<compile_context>
chip_gen: v7x
topology: tpu7x:2x2x1
jax: 0.10.0
libtpu: 0.0.40
codegen_flags: <defaults>
</compile_context>

<pallas_src>
import functools
from math import ceil

import jax
import jax.numpy as jnp
from jax import lax
from jax.experimental import pallas as pl
from jax.experimental.pallas import tpu as pltpu

_MXU_DTYPE = jnp.bfloat16      # MXU operand dtype (accumulation is always f32)
_BN_EPS = 1e-5
_DIFFPOOL_EPS = 1e-15
_VMEM_LIMIT = 64 * 1024 * 1024


# ---------------------------------------------------------------------------
# In-kernel building blocks
# ---------------------------------------------------------------------------
def _aggregate(adj_mxu, deg_inv, h_flat, B, N):
    """Mean neighbour aggregation (adj @ h) / clamp(deg, 1), on flattened activations."""
    C = h_flat.shape[-1]
    h3 = h_flat.reshape(B, N, C).astype(_MXU_DTYPE)
    agg = jnp.einsum('bij,bjc->bic', adj_mxu, h3,
                     preferred_element_type=jnp.float32) * deg_inv
    return agg.reshape(B * N, C)


def _sage_relu_bn(h_flat, agg_flat, w_ref, b_ref, g_ref, be_ref, mask_flat, inv_cnt):
    """DenseSAGEConv (merged [rel; root] weight) -> mask -> ReLU -> BatchNorm1d (train)."""
    cat = jnp.concatenate([agg_flat, h_flat], axis=-1).astype(_MXU_DTYPE)
    out = jnp.dot(cat, w_ref[...], preferred_element_type=jnp.float32) + b_ref[...]
    if mask_flat is not None:
        out = out * mask_flat
    out = jnp.maximum(out, 0.0)
    # Two-pass batch statistics over all B*N rows (biased variance, eps=1e-5).
    mean = jnp.sum(out, axis=0, keepdims=True) * inv_cnt
    cen = out - mean
    var = jnp.sum(cen * cen, axis=0, keepdims=True) * inv_cnt
    return cen * lax.rsqrt(var + _BN_EPS) * g_ref[...] + be_ref[...]


# ---------------------------------------------------------------------------
# Stage kernel: gnn{k}_pool + gnn{k}_embed + dense_diff_pool, whole batch in VMEM
# ---------------------------------------------------------------------------
def _diffpool_stage_kernel(*refs, has_mask):
    it = iter(refs)
    x_ref, adj_ref = next(it), next(it)
    mask_ref = next(it) if has_mask else None
    p_par = [next(it) for _ in range(12)]                 # pool GNN: (w, b, gamma, beta) x 3
    wl1, wl2, wl3, bl = [next(it) for _ in range(4)]      # pool GNN final Linear (pre-sliced)
    e_par = [next(it) for _ in range(12)]                 # embed GNN: (w, b, gamma, beta) x 3
    ox_ref, oadj_ref, link_ref, ent_ref = [next(it) for _ in range(4)]

    B, N, _ = adj_ref.shape
    x = x_ref[...].reshape(B * N, x_ref.shape[-1])        # (B*N, F)
    adj = adj_ref[...]                                    # (B, N, N), f32
    adj_mxu = adj.astype(_MXU_DTYPE)
    mask3 = mask_ref[...] if has_mask else None           # (B, N, 1)
    mask_flat = mask3.reshape(B * N, 1) if has_mask else None
    inv_cnt = 1.0 / (B * N)

    # Degree / mean-aggregation denominator, computed once and shared by all 6 convs.
    deg_inv = 1.0 / jnp.maximum(jnp.sum(adj, axis=-1, keepdims=True), 1.0)

    def conv(h, agg, par, layer):
        w, b, g, be = par[4 * layer: 4 * layer + 4]
        return _sage_relu_bn(h, agg, w, b, g, be, mask_flat, inv_cnt)

    # ---- layer 1: adj @ x is identical for pool & embed GNNs -> computed once ----
    agg0 = _aggregate(adj_mxu, deg_inv, x, B, N)
    p1 = conv(x, agg0, p_par, 0)                          # (B*N, H) pool GNN x1
    e1 = conv(x, agg0, e_par, 0)                          # (B*N, H) embed GNN x1
    lin_acc = bl[...] + jnp.dot(p1.astype(_MXU_DTYPE), wl1[...],
                                preferred_element_type=jnp.float32)

    # ---- layer 2: one joint aggregation of the concatenated [pool | embed] channels ----
    Hp = p1.shape[-1]
    agg = _aggregate(adj_mxu, deg_inv, jnp.concatenate([p1, e1], axis=-1), B, N)
    p2 = conv(p1, agg[:, :Hp], p_par, 1)
    e2 = conv(e1, agg[:, Hp:], e_par, 1)
    lin_acc = lin_acc + jnp.dot(p2.astype(_MXU_DTYPE), wl2[...],
                                preferred_element_type=jnp.float32)

    # ---- layer 3 ----
    Hp = p2.shape[-1]
    agg = _aggregate(adj_mxu, deg_inv, jnp.concatenate([p2, e2], axis=-1), B, N)
    p3 = conv(p2, agg[:, :Hp], p_par, 2)                  # (B*N, K) cluster channel
    e3 = conv(e2, agg[:, Hp:], e_par, 2)                  # (B*N, H)
    lin_acc = lin_acc + jnp.dot(p3.astype(_MXU_DTYPE), wl3[...],
                                preferred_element_type=jnp.float32)

    s_logits = jnp.maximum(lin_acc, 0.0)                  # pool GNN: relu(lin(cat(x1,x2,x3)))
    xemb = jnp.concatenate([e1, e2, e3], axis=-1)         # embed GNN output, (B*N, 3H)

    # ---- dense_diff_pool (whole batch) ----
    K = s_logits.shape[-1]
    Fe = xemb.shape[-1]
    sl = s_logits.reshape(B, N, K)
    sl = sl - jnp.max(sl, axis=-1, keepdims=True)
    es = jnp.exp(sl)
    s = es / jnp.sum(es, axis=-1, keepdims=True)          # softmax (exact divide)
    xe = xemb.reshape(B, N, Fe)
    if has_mask:
        s = s * mask3
        xe = xe * mask3

    st = jnp.swapaxes(s, 1, 2).astype(_MXU_DTYPE)         # (B, K, N)
    s_mxu = s.astype(_MXU_DTYPE)
    ox = jnp.einsum('bkn,bnf->bkf', st, xe.astype(_MXU_DTYPE),
                    preferred_element_type=jnp.float32)                        # s^T x
    sadj = jnp.einsum('bkn,bnm->bkm', st, adj_mxu,
                      preferred_element_type=jnp.float32)                      # s^T adj
    oadj = jnp.einsum('bkm,bmj->bkj', sadj.astype(_MXU_DTYPE), s_mxu,
                      preferred_element_type=jnp.float32)                      # s^T adj s
    sts = jnp.einsum('bkn,bnj->bkj', st, s_mxu,
                     preferred_element_type=jnp.float32)                       # s^T s

    # ||adj - s s^T||_F^2 = ||adj||^2 - 2 tr(s^T adj s) + ||s^T s||^2   (no (N, N) temp)
    eye = (lax.broadcasted_iota(jnp.int32, (K, K), 0)
           == lax.broadcasted_iota(jnp.int32, (K, K), 1)).astype(jnp.float32)
    link_sq = jnp.sum(adj * adj) - 2.0 * jnp.sum(oadj * eye) + jnp.sum(sts * sts)
    link = jnp.sqrt(jnp.maximum(link_sq, 0.0)) * (1.0 / (B * N * N))           # ||.|| / numel
    ent = jnp.sum(-s * jnp.log(s + _DIFFPOOL_EPS)) * (1.0 / (B * N))           # mean over (B,N)

    ox_ref[...] = ox
    oadj_ref[...] = oadj
    link_ref[...] = jnp.broadcast_to(link, (1, 1))
    ent_ref[...] = jnp.broadcast_to(ent, (1, 1))


# ---------------------------------------------------------------------------
# Final kernel: gnn3_embed + global mean pool + lin1 -> ReLU -> lin2 -> log_softmax
# ---------------------------------------------------------------------------
def _embed_head_kernel(*refs):
    # Kept 3-D with (tiny) batch-broadcast weights: the node count here is the stage-2
    # cluster count (not sublane aligned), so a (B*N, C) flatten would force an unaligned
    # relayout; at (B, K2, 192) sizes the broadcast/matmul cost is negligible.
    it = iter(refs)
    x_ref, adj_ref = next(it), next(it)
    e_par = [next(it) for _ in range(12)]
    w1_ref, b1_ref, w2_ref, b2_ref = [next(it) for _ in range(4)]
    out_ref = next(it)

    B, N, _ = adj_ref.shape
    x = x_ref[...]                                        # (B, N, F)
    adj = adj_ref[...]
    adj_mxu = adj.astype(_MXU_DTYPE)
    inv_cnt = 1.0 / (B * N)
    deg_inv = 1.0 / jnp.maximum(jnp.sum(adj, axis=-1, keepdims=True), 1.0)

    def conv(h, layer):
        w, b, g, be = e_par[4 * layer: 4 * layer + 4]
        agg = jnp.einsum('bij,bjc->bic', adj_mxu, h.astype(_MXU_DTYPE),
                         preferred_element_type=jnp.float32) * deg_inv
        cat = jnp.concatenate([agg, h], axis=-1).astype(_MXU_DTYPE)
        wb = jnp.broadcast_to(w[...], (B,) + w.shape)
        out = jnp.einsum('bnc,bcd->bnd', cat, wb,
                         preferred_element_type=jnp.float32) + b[...]
        out = jnp.maximum(out, 0.0)
        mean = jnp.sum(jnp.sum(out, axis=1, keepdims=True), axis=0, keepdims=True) * inv_cnt
        cen = out - mean
        var = jnp.sum(jnp.sum(cen * cen, axis=1, keepdims=True),
                      axis=0, keepdims=True) * inv_cnt
        return cen * lax.rsqrt(var + _BN_EPS) * g[...] + be[...]

    e1 = conv(x, 0)
    e2 = conv(e1, 1)
    e3 = conv(e2, 2)
    xemb = jnp.concatenate([e1, e2, e3], axis=-1)         # (B, N, 3H)

    xm = jnp.sum(xemb, axis=1) * (1.0 / N)                # global mean pooling -> (B, 3H)
    h = jnp.maximum(jnp.dot(xm, w1_ref[...], preferred_element_type=jnp.float32)
                    + b1_ref[...], 0.0)
    logits = jnp.dot(h, w2_ref[...], preferred_element_type=jnp.float32) + b2_ref[...]
    shifted = logits - jnp.max(logits, axis=-1, keepdims=True)
    out_ref[...] = shifted - jnp.log(jnp.sum(jnp.exp(shifted), axis=-1, keepdims=True))


# ---------------------------------------------------------------------------
# Wrappers
# ---------------------------------------------------------------------------
def _gnn_flat_args(p):
    args = []
    for (w, b), (g, be) in zip(p["convs"], p["bns"]):
        args += [w, b, g, be]
    return args


def diffpool_stage(pool_p, embed_p, x, adj, mask=None):
    """One DiffPool stage: fused [pool GNN + embed GNN + dense_diff_pool] pallas_call."""
    B, N, _ = x.shape
    hidden = embed_p["bns"][0][0].shape[-1]
    emb_out = 2 * hidden + embed_p["bns"][2][0].shape[-1]
    K = pool_p["bns"][2][0].shape[-1]
    has_mask = mask is not None

    args = [x, adj] + ([mask] if has_mask else [])
    args += _gnn_flat_args(pool_p) + list(pool_p["lin"]) + _gnn_flat_args(embed_p)

    return pl.pallas_call(
        functools.partial(_diffpool_stage_kernel, has_mask=has_mask),
        out_shape=(
            jax.ShapeDtypeStruct((B, K, emb_out), jnp.float32),   # pooled node features
            jax.ShapeDtypeStruct((B, K, K), jnp.float32),         # pooled adjacency
            jax.ShapeDtypeStruct((1, 1), jnp.float32),            # link loss (normalized)
            jax.ShapeDtypeStruct((1, 1), jnp.float32),            # entropy loss (normalized)
        ),
        compiler_params=pltpu.CompilerParams(vmem_limit_bytes=_VMEM_LIMIT),
    )(*args)


def embed_head_stage(embed_p, lin1, lin2, x, adj):
    """gnn3_embed + mean pool + classifier head, one pallas_call."""
    B = x.shape[0]
    T = lin2[0].shape[-1]
    args = [x, adj] + _gnn_flat_args(embed_p) + [lin1[0], lin1[1], lin2[0], lin2[1]]
    return pl.pallas_call(
        _embed_head_kernel,
        out_shape=jax.ShapeDtypeStruct((B, T), jnp.float32),
        compiler_params=pltpu.CompilerParams(vmem_limit_bytes=_VMEM_LIMIT),
    )(*args)


def graphsage_diffpool_forward(params, x, adj, mask):
    x1, adj1, link1, ent1 = diffpool_stage(params["gnn1_pool"], params["gnn1_embed"],
                                           x, adj, mask)
    x2, adj2, link2, ent2 = diffpool_stage(params["gnn2_pool"], params["gnn2_embed"],
                                           x1, adj1, None)
    log_probs = embed_head_stage(params["gnn3_embed"], params["lin1"], params["lin2"],
                                 x2, adj2)
    return log_probs, (link1 + link2)[0, 0], (ent1 + ent2)[0, 0]


# ---------------------------------------------------------------------------
# Parameter init (deterministic, synthetic, kernel-ready layout)
# ---------------------------------------------------------------------------
def _uniform(key, shape, fan_in):
    bound = 1.0 / (fan_in ** 0.5)
    return jax.random.uniform(key, shape, jnp.float32, -bound, bound)


def _init_gnn(key, cin, hidden, cout, lin):
    """Kernel-ready GNN params: merged [rel; root] conv weights (bf16), BN affine, sliced lin."""
    ks = jax.random.split(key, 11)
    dims = [(cin, hidden), (hidden, hidden), (hidden, cout)]
    convs, bns = [], []
    for i, (ci, co) in enumerate(dims):
        wrel = _uniform(ks[3 * i + 0], (ci, co), ci)
        wroot = _uniform(ks[3 * i + 1], (ci, co), ci)
        bias = _uniform(ks[3 * i + 2], (1, co), ci)
        convs.append((jnp.concatenate([wrel, wroot], axis=0).astype(_MXU_DTYPE), bias))
        bns.append((jnp.ones((1, co), jnp.float32), jnp.zeros((1, co), jnp.float32)))
    p = {"convs": convs, "bns": bns}
    if lin:
        ci = 2 * hidden + cout
        wl = _uniform(ks[9], (ci, cout), ci).astype(_MXU_DTYPE)
        bl = _uniform(ks[10], (1, cout), ci)
        # lin(cat(x1,x2,x3)) == x1 @ W[:h] + x2 @ W[h:2h] + x3 @ W[2h:]  (incremental accum)
        p["lin"] = (wl[:hidden], wl[hidden:2 * hidden], wl[2 * hidden:], bl)
    return p


def init_model(key, dim_features, dim_target, coarse_scale=0.25, max_nodes=150):
    n1 = ceil(coarse_scale * max_nodes)
    n2 = ceil(coarse_scale * n1)
    ks = jax.random.split(key, 9)
    return {
        "gnn1_pool": _init_gnn(ks[0], dim_features, 64, n1, lin=True),
        "gnn1_embed": _init_gnn(ks[1], dim_features, 64, 64, lin=False),
        "gnn2_pool": _init_gnn(ks[2], 3 * 64, 64, n2, lin=True),
        "gnn2_embed": _init_gnn(ks[3], 3 * 64, 64, 64, lin=False),
        "gnn3_embed": _init_gnn(ks[4], 3 * 64, 64, 64, lin=False),
        "lin1": (_uniform(ks[5], (3 * 64, 64), 3 * 64), _uniform(ks[6], (1, 64), 3 * 64)),
        "lin2": (_uniform(ks[7], (64, dim_target), 64), _uniform(ks[8], (1, dim_target), 64)),
    }


# ---------------------------------------------------------------------------
# Demo
# ---------------------------------------------------------------------------
if __name__ == "__main__":
    key = jax.random.PRNGKey(0)
    B, N = 2, 32                       # 32 padded nodes -> 8 -> 2 clusters (coarse_scale=0.25)
    dim_features, dim_target = 16, 6

    kp, kx, ka = jax.random.split(key, 3)
    params = init_model(kp, dim_features, dim_target, coarse_scale=0.25, max_nodes=N)

    x = jax.random.normal(kx, (B, N, dim_features), jnp.float32)
    a = jax.random.uniform(ka, (B, N, N))
    adj = (a + jnp.swapaxes(a, 1, 2) > 1.0).astype(jnp.float32)   # symmetric 0/1 adjacency
    n_valid = jnp.array([N, N - 8])
    mask = (jnp.arange(N)[None, :] < n_valid[:, None]).astype(jnp.float32)[..., None]

    fwd = jax.jit(graphsage_diffpool_forward)
    log_probs, link_loss, ent_loss = fwd(params, x, adj, mask)
    jax.block_until_ready((log_probs, link_loss, ent_loss))

    assert log_probs.shape == (B, dim_target)
    assert bool(jnp.all(jnp.isfinite(log_probs)))
    assert bool(jnp.isfinite(link_loss)) and bool(jnp.isfinite(ent_loss))
    print("KERNEL_OK")
</pallas_src>

<mosaic_0001>
module attributes {stable_mosaic.version = 11 : i64} {
  func.func @_diffpool_stage_kernel(%arg0: memref<2x32x16xf32, #tpu.memory_space<vmem>>, %arg1: memref<2x32x32xf32, #tpu.memory_space<vmem>>, %arg2: memref<2x32x1xf32, #tpu.memory_space<vmem>>, %arg3: memref<32x64xbf16, #tpu.memory_space<vmem>>, %arg4: memref<1x64xf32, #tpu.memory_space<vmem>>, %arg5: memref<1x64xf32, #tpu.memory_space<vmem>>, %arg6: memref<1x64xf32, #tpu.memory_space<vmem>>, %arg7: memref<128x64xbf16, #tpu.memory_space<vmem>>, %arg8: memref<1x64xf32, #tpu.memory_space<vmem>>, %arg9: memref<1x64xf32, #tpu.memory_space<vmem>>, %arg10: memref<1x64xf32, #tpu.memory_space<vmem>>, %arg11: memref<128x8xbf16, #tpu.memory_space<vmem>>, %arg12: memref<1x8xf32, #tpu.memory_space<vmem>>, %arg13: memref<1x8xf32, #tpu.memory_space<vmem>>, %arg14: memref<1x8xf32, #tpu.memory_space<vmem>>, %arg15: memref<64x8xbf16, #tpu.memory_space<vmem>>, %arg16: memref<64x8xbf16, #tpu.memory_space<vmem>>, %arg17: memref<8x8xbf16, #tpu.memory_space<vmem>>, %arg18: memref<1x8xf32, #tpu.memory_space<vmem>>, %arg19: memref<32x64xbf16, #tpu.memory_space<vmem>>, %arg20: memref<1x64xf32, #tpu.memory_space<vmem>>, %arg21: memref<1x64xf32, #tpu.memory_space<vmem>>, %arg22: memref<1x64xf32, #tpu.memory_space<vmem>>, %arg23: memref<128x64xbf16, #tpu.memory_space<vmem>>, %arg24: memref<1x64xf32, #tpu.memory_space<vmem>>, %arg25: memref<1x64xf32, #tpu.memory_space<vmem>>, %arg26: memref<1x64xf32, #tpu.memory_space<vmem>>, %arg27: memref<128x64xbf16, #tpu.memory_space<vmem>>, %arg28: memref<1x64xf32, #tpu.memory_space<vmem>>, %arg29: memref<1x64xf32, #tpu.memory_space<vmem>>, %arg30: memref<1x64xf32, #tpu.memory_space<vmem>>, %arg31: memref<2x8x192xf32, #tpu.memory_space<vmem>>, %arg32: memref<2x8x8xf32, #tpu.memory_space<vmem>>, %arg33: memref<1x1xf32, #tpu.memory_space<vmem>>, %arg34: memref<1x1xf32, #tpu.memory_space<vmem>>) attributes {dimension_semantics = [], scalar_prefetch = 0 : i64, scratch_operands = 0 : i64, tpu.core_type = #tpu.core_type<tc>} {
    %c0 = arith.constant 0 : index
    %c0_0 = arith.constant 0 : index
    %c0_1 = arith.constant 0 : index
    %0 = vector.load %arg0[%c0, %c0_0, %c0_1] : memref<2x32x16xf32, #tpu.memory_space<vmem>>, vector<2x32x16xf32>
    %1 = vector.shape_cast %0 : vector<2x32x16xf32> to vector<64x16xf32>
    %c0_2 = arith.constant 0 : index
    %c0_3 = arith.constant 0 : index
    %c0_4 = arith.constant 0 : index
    %2 = vector.load %arg1[%c0_2, %c0_3, %c0_4] : memref<2x32x32xf32, #tpu.memory_space<vmem>>, vector<2x32x32xf32>
    %3 = arith.truncf %2 : vector<2x32x32xf32> to vector<2x32x32xbf16>
    %c0_5 = arith.constant 0 : index
    %c0_6 = arith.constant 0 : index
    %c0_7 = arith.constant 0 : index
    %4 = vector.load %arg2[%c0_5, %c0_6, %c0_7] : memref<2x32x1xf32, #tpu.memory_space<vmem>>, vector<2x32x1xf32>
    %5 = vector.shape_cast %4 : vector<2x32x1xf32> to vector<64x1xf32>
    %cst = arith.constant dense<0.000000e+00> : vector<2x32xf32>
    %6 = vector.multi_reduction <add>, %2, %cst [2] : vector<2x32x32xf32> to vector<2x32xf32>
    %7 = vector.shape_cast %6 : vector<2x32xf32> to vector<2x32x1xf32>
    %cst_8 = arith.constant 1.000000e+00 : f32
    %8 = vector.broadcast %cst_8 : f32 to vector<2x32x1xf32>
    %9 = arith.maximumf %7, %8 : vector<2x32x1xf32>
    %cst_9 = arith.constant 1.000000e+00 : f32
    %10 = vector.broadcast %cst_9 : f32 to vector<2x32x1xf32>
    %11 = arith.divf %10, %9 : vector<2x32x1xf32>
    %12 = vector.shape_cast %1 : vector<64x16xf32> to vector<2x32x16xf32>
    %13 = arith.truncf %12 : vector<2x32x16xf32> to vector<2x32x16xbf16>
    "tpu.trace_start"() <{level = 10 : i32, message = "bij,bjc->bic"}> : () -> ()
    %cst_10 = arith.constant dense<0.000000e+00> : vector<2x32x16xf32>
    %14 = tpu.matmul %3, %13, %cst_10 {dimension_numbers = #tpu.dot_dimension_numbers<[2], [1], [1], [2], [0, 0, 0, 1, 1, 2], [0], [0]>} : vector<2x32x32xbf16>, vector<2x32x16xbf16>, vector<2x32x16xf32> -> vector<2x32x16xf32>
    "tpu.trace_stop"() : () -> ()
    %15 = vector.broadcast %11 : vector<2x32x1xf32> to vector<2x32x16xf32>
    %16 = arith.mulf %14, %15 : vector<2x32x16xf32>
    %17 = vector.shape_cast %16 : vector<2x32x16xf32> to vector<64x16xf32>
    %18 = tpu.concatenate %17, %1 in 1 : vector<64x16xf32>, vector<64x16xf32> -> vector<64x32xf32>
    %19 = arith.truncf %18 : vector<64x32xf32> to vector<64x32xbf16>
    %c0_11 = arith.constant 0 : index
    %c0_12 = arith.constant 0 : index
    %20 = vector.load %arg3[%c0_11, %c0_12] : memref<32x64xbf16, #tpu.memory_space<vmem>>, vector<32x64xbf16>
    %cst_13 = arith.constant dense<0.000000e+00> : vector<64x64xf32>
    %21 = tpu.matmul %19, %20, %cst_13 {dimension_numbers = #tpu.dot_dimension_numbers<[1], [0], [0], [1], [0, 0, 1, 1], [], []>} : vector<64x32xbf16>, vector<32x64xbf16>, vector<64x64xf32> -> vector<64x64xf32>
    %c0_14 = arith.constant 0 : index
    %c0_15 = arith.constant 0 : index
    %22 = vector.load %arg4[%c0_14, %c0_15] : memref<1x64xf32, #tpu.memory_space<vmem>>, vector<1x64xf32>
    %23 = vector.broadcast %22 : vector<1x64xf32> to vector<64x64xf32>
    %24 = arith.addf %21, %23 : vector<64x64xf32>
    %25 = vector.broadcast %5 : vector<64x1xf32> to vector<64x64xf32>
    %26 = arith.mulf %24, %25 : vector<64x64xf32>
    %cst_16 = arith.constant 0.000000e+00 : f32
    %27 = vector.broadcast %cst_16 : f32 to vector<64x64xf32>
    %28 = arith.maximumf %26, %27 : vector<64x64xf32>
    %cst_17 = arith.constant dense<0.000000e+00> : vector<64xf32>
    %29 = vector.multi_reduction <add>, %28, %cst_17 [0] : vector<64x64xf32> to vector<64xf32>
    %30 = vector.shape_cast %29 : vector<64xf32> to vector<1x64xf32>
    %cst_18 = arith.constant 1.562500e-02 : f32
    %31 = vector.broadcast %cst_18 : f32 to vector<1x64xf32>
    %32 = arith.mulf %30, %31 : vector<1x64xf32>
    %33 = vector.broadcast %32 : vector<1x64xf32> to vector<64x64xf32>
    %34 = arith.subf %28, %33 : vector<64x64xf32>
    %35 = arith.mulf %34, %34 : vector<64x64xf32>
    %cst_19 = arith.constant dense<0.000000e+00> : vector<64xf32>
    %36 = vector.multi_reduction <add>, %35, %cst_19 [0] : vector<64x64xf32> to vector<64xf32>
    %37 = vector.shape_cast %36 : vector<64xf32> to vector<1x64xf32>
    %cst_20 = arith.constant 1.562500e-02 : f32
    %38 = vector.broadcast %cst_20 : f32 to vector<1x64xf32>
    %39 = arith.mulf %37, %38 : vector<1x64xf32>
    %cst_21 = arith.constant 9.99999974E-6 : f32
    %40 = vector.broadcast %cst_21 : f32 to vector<1x64xf32>
    %41 = arith.addf %39, %40 : vector<1x64xf32>
    %42 = math.rsqrt %41 : vector<1x64xf32>
    %43 = vector.broadcast %42 : vector<1x64xf32> to vector<64x64xf32>
    %44 = arith.mulf %34, %43 : vector<64x64xf32>
    %c0_22 = arith.constant 0 : index
    %c0_23 = arith.constant 0 : index
    %45 = vector.load %arg5[%c0_22, %c0_23] : memref<1x64xf32, #tpu.memory_space<vmem>>, vector<1x64xf32>
    %46 = vector.broadcast %45 : vector<1x64xf32> to vector<64x64xf32>
    %47 = arith.mulf %44, %46 : vector<64x64xf32>
    %c0_24 = arith.constant 0 : index
    %c0_25 = arith.constant 0 : index
    %48 = vector.load %arg6[%c0_24, %c0_25] : memref<1x64xf32, #tpu.memory_space<vmem>>, vector<1x64xf32>
    %49 = vector.broadcast %48 : vector<1x64xf32> to vector<64x64xf32>
    %50 = arith.addf %47, %49 : vector<64x64xf32>
    %51 = tpu.concatenate %17, %1 in 1 : vector<64x16xf32>, vector<64x16xf32> -> vector<64x32xf32>
    %52 = arith.truncf %51 : vector<64x32xf32> to vector<64x32xbf16>
    %c0_26 = arith.constant 0 : index
    %c0_27 = arith.constant 0 : index
    %53 = vector.load %arg19[%c0_26, %c0_27] : memref<32x64xbf16, #tpu.memory_space<vmem>>, vector<32x64xbf16>
    %cst_28 = arith.constant dense<0.000000e+00> : vector<64x64xf32>
    %54 = tpu.matmul %52, %53, %cst_28 {dimension_numbers = #tpu.dot_dimension_numbers<[1], [0], [0], [1], [0, 0, 1, 1], [], []>} : vector<64x32xbf16>, vector<32x64xbf16>, vector<64x64xf32> -> vector<64x64xf32>
    %c0_29 = arith.constant 0 : index
    %c0_30 = arith.constant 0 : index
    %55 = vector.load %arg20[%c0_29, %c0_30] : memref<1x64xf32, #tpu.memory_space<vmem>>, vector<1x64xf32>
    %56 = vector.broadcast %55 : vector<1x64xf32> to vector<64x64xf32>
    %57 = arith.addf %54, %56 : vector<64x64xf32>
    %58 = vector.broadcast %5 : vector<64x1xf32> to vector<64x64xf32>
    %59 = arith.mulf %57, %58 : vector<64x64xf32>
    %cst_31 = arith.constant 0.000000e+00 : f32
    %60 = vector.broadcast %cst_31 : f32 to vector<64x64xf32>
    %61 = arith.maximumf %59, %60 : vector<64x64xf32>
    %cst_32 = arith.constant dense<0.000000e+00> : vector<64xf32>
    %62 = vector.multi_reduction <add>, %61, %cst_32 [0] : vector<64x64xf32> to vector<64xf32>
    %63 = vector.shape_cast %62 : vector<64xf32> to vector<1x64xf32>
    %cst_33 = arith.constant 1.562500e-02 : f32
    %64 = vector.broadcast %cst_33 : f32 to vector<1x64xf32>
    %65 = arith.mulf %63, %64 : vector<1x64xf32>
    %66 = vector.broadcast %65 : vector<1x64xf32> to vector<64x64xf32>
    %67 = arith.subf %61, %66 : vector<64x64xf32>
    %68 = arith.mulf %67, %67 : vector<64x64xf32>
    %cst_34 = arith.constant dense<0.000000e+00> : vector<64xf32>
    %69 = vector.multi_reduction <add>, %68, %cst_34 [0] : vector<64x64xf32> to vector<64xf32>
    %70 = vector.shape_cast %69 : vector<64xf32> to vector<1x64xf32>
    %cst_35 = arith.constant 1.562500e-02 : f32
    %71 = vector.broadcast %cst_35 : f32 to vector<1x64xf32>
    %72 = arith.mulf %70, %71 : vector<1x64xf32>
    %cst_36 = arith.constant 9.99999974E-6 : f32
    %73 = vector.broadcast %cst_36 : f32 to vector<1x64xf32>
    %74 = arith.addf %72, %73 : vector<1x64xf32>
    %75 = math.rsqrt %74 : vector<1x64xf32>
    %76 = vector.broadcast %75 : vector<1x64xf32> to vector<64x64xf32>
    %77 = arith.mulf %67, %76 : vector<64x64xf32>
    %c0_37 = arith.constant 0 : index
    %c0_38 = arith.constant 0 : index
    %78 = vector.load %arg21[%c0_37, %c0_38] : memref<1x64xf32, #tpu.memory_space<vmem>>, vector<1x64xf32>
    %79 = vector.broadcast %78 : vector<1x64xf32> to vector<64x64xf32>
    %80 = arith.mulf %77, %79 : vector<64x64xf32>
    %c0_39 = arith.constant 0 : index
    %c0_40 = arith.constant 0 : index
    %81 = vector.load %arg22[%c0_39, %c0_40] : memref<1x64xf32, #tpu.memory_space<vmem>>, vector<1x64xf32>
    %82 = vector.broadcast %81 : vector<1x64xf32> to vector<64x64xf32>
    %83 = arith.addf %80, %82 : vector<64x64xf32>
    %c0_41 = arith.constant 0 : index
    %c0_42 = arith.constant 0 : index
    %84 = vector.load %arg18[%c0_41, %c0_42] : memref<1x8xf32, #tpu.memory_space<vmem>>, vector<1x8xf32>
    %85 = arith.truncf %50 : vector<64x64xf32> to vector<64x64xbf16>
    %c0_43 = arith.constant 0 : index
    %c0_44 = arith.constant 0 : index
    %86 = vector.load %arg15[%c0_43, %c0_44] : memref<64x8xbf16, #tpu.memory_space<vmem>>, vector<64x8xbf16>
    %cst_45 = arith.constant dense<0.000000e+00> : vector<64x8xf32>
    %87 = tpu.matmul %85, %86, %cst_45 {dimension_numbers = #tpu.dot_dimension_numbers<[1], [0], [0], [1], [0, 0, 1, 1], [], []>} : vector<64x64xbf16>, vector<64x8xbf16>, vector<64x8xf32> -> vector<64x8xf32>
    %88 = vector.broadcast %84 : vector<1x8xf32> to vector<64x8xf32>
    %89 = arith.addf %88, %87 : vector<64x8xf32>
    %90 = tpu.concatenate %50, %83 in 1 : vector<64x64xf32>, vector<64x64xf32> -> vector<64x128xf32>
    %91 = vector.shape_cast %90 : vector<64x128xf32> to vector<2x32x128xf32>
    %92 = arith.truncf %91 : vector<2x32x128xf32> to vector<2x32x128xbf16>
    "tpu.trace_start"() <{level = 10 : i32, message = "bij,bjc->bic"}> : () -> ()
    %cst_46 = arith.constant dense<0.000000e+00> : vector<2x32x128xf32>
    %93 = tpu.matmul %3, %92, %cst_46 {dimension_numbers = #tpu.dot_dimension_numbers<[2], [1], [1], [2], [0, 0, 0, 1, 1, 2], [0], [0]>} : vector<2x32x32xbf16>, vector<2x32x128xbf16>, vector<2x32x128xf32> -> vector<2x32x128xf32>
    "tpu.trace_stop"() : () -> ()
    %94 = vector.broadcast %11 : vector<2x32x1xf32> to vector<2x32x128xf32>
    %95 = arith.mulf %93, %94 : vector<2x32x128xf32>
    %96 = vector.shape_cast %95 : vector<2x32x128xf32> to vector<64x128xf32>
    %97 = vector.extract_strided_slice %96 {offsets = [0, 0], sizes = [64, 64], strides = [1, 1]} : vector<64x128xf32> to vector<64x64xf32>
    %98 = tpu.concatenate %97, %50 in 1 : vector<64x64xf32>, vector<64x64xf32> -> vector<64x128xf32>
    %99 = arith.truncf %98 : vector<64x128xf32> to vector<64x128xbf16>
    %c0_47 = arith.constant 0 : index
    %c0_48 = arith.constant 0 : index
    %100 = vector.load %arg7[%c0_47, %c0_48] : memref<128x64xbf16, #tpu.memory_space<vmem>>, vector<128x64xbf16>
    %cst_49 = arith.constant dense<0.000000e+00> : vector<64x64xf32>
    %101 = tpu.matmul %99, %100, %cst_49 {dimension_numbers = #tpu.dot_dimension_numbers<[1], [0], [0], [1], [0, 0, 1, 1], [], []>} : vector<64x128xbf16>, vector<128x64xbf16>, vector<64x64xf32> -> vector<64x64xf32>
    %c0_50 = arith.constant 0 : index
    %c0_51 = arith.constant 0 : index
    %102 = vector.load %arg8[%c0_50, %c0_51] : memref<1x64xf32, #tpu.memory_space<vmem>>, vector<1x64xf32>
    %103 = vector.broadcast %102 : vector<1x64xf32> to vector<64x64xf32>
    %104 = arith.addf %101, %103 : vector<64x64xf32>
    %105 = vector.broadcast %5 : vector<64x1xf32> to vector<64x64xf32>
    %106 = arith.mulf %104, %105 : vector<64x64xf32>
    %cst_52 = arith.constant 0.000000e+00 : f32
    %107 = vector.broadcast %cst_52 : f32 to vector<64x64xf32>
    %108 = arith.maximumf %106, %107 : vector<64x64xf32>
    %cst_53 = arith.constant dense<0.000000e+00> : vector<64xf32>
    %109 = vector.multi_reduction <add>, %108, %cst_53 [0] : vector<64x64xf32> to vector<64xf32>
    %110 = vector.shape_cast %109 : vector<64xf32> to vector<1x64xf32>
    %cst_54 = arith.constant 1.562500e-02 : f32
    %111 = vector.broadcast %cst_54 : f32 to vector<1x64xf32>
    %112 = arith.mulf %110, %111 : vector<1x64xf32>
    %113 = vector.broadcast %112 : vector<1x64xf32> to vector<64x64xf32>
    %114 = arith.subf %108, %113 : vector<64x64xf32>
    %115 = arith.mulf %114, %114 : vector<64x64xf32>
    %cst_55 = arith.constant dense<0.000000e+00> : vector<64xf32>
    %116 = vector.multi_reduction <add>, %115, %cst_55 [0] : vector<64x64xf32> to vector<64xf32>
    %117 = vector.shape_cast %116 : vector<64xf32> to vector<1x64xf32>
    %cst_56 = arith.constant 1.562500e-02 : f32
    %118 = vector.broadcast %cst_56 : f32 to vector<1x64xf32>
    %119 = arith.mulf %117, %118 : vector<1x64xf32>
    %cst_57 = arith.constant 9.99999974E-6 : f32
    %120 = vector.broadcast %cst_57 : f32 to vector<1x64xf32>
    %121 = arith.addf %119, %120 : vector<1x64xf32>
    %122 = math.rsqrt %121 : vector<1x64xf32>
    %123 = vector.broadcast %122 : vector<1x64xf32> to vector<64x64xf32>
    %124 = arith.mulf %114, %123 : vector<64x64xf32>
    %c0_58 = arith.constant 0 : index
    %c0_59 = arith.constant 0 : index
    %125 = vector.load %arg9[%c0_58, %c0_59] : memref<1x64xf32, #tpu.memory_space<vmem>>, vector<1x64xf32>
    %126 = vector.broadcast %125 : vector<1x64xf32> to vector<64x64xf32>
    %127 = arith.mulf %124, %126 : vector<64x64xf32>
    %c0_60 = arith.constant 0 : index
    %c0_61 = arith.constant 0 : index
    %128 = vector.load %arg10[%c0_60, %c0_61] : memref<1x64xf32, #tpu.memory_space<vmem>>, vector<1x64xf32>
    %129 = vector.broadcast %128 : vector<1x64xf32> to vector<64x64xf32>
    %130 = arith.addf %127, %129 : vector<64x64xf32>
    %131 = vector.extract_strided_slice %96 {offsets = [0, 64], sizes = [64, 64], strides = [1, 1]} : vector<64x128xf32> to vector<64x64xf32>
    %132 = tpu.concatenate %131, %83 in 1 : vector<64x64xf32>, vector<64x64xf32> -> vector<64x128xf32>
    %133 = arith.truncf %132 : vector<64x128xf32> to vector<64x128xbf16>
    %c0_62 = arith.constant 0 : index
    %c0_63 = arith.constant 0 : index
    %134 = vector.load %arg23[%c0_62, %c0_63] : memref<128x64xbf16, #tpu.memory_space<vmem>>, vector<128x64xbf16>
    %cst_64 = arith.constant dense<0.000000e+00> : vector<64x64xf32>
    %135 = tpu.matmul %133, %134, %cst_64 {dimension_numbers = #tpu.dot_dimension_numbers<[1], [0], [0], [1], [0, 0, 1, 1], [], []>} : vector<64x128xbf16>, vector<128x64xbf16>, vector<64x64xf32> -> vector<64x64xf32>
    %c0_65 = arith.constant 0 : index
    %c0_66 = arith.constant 0 : index
    %136 = vector.load %arg24[%c0_65, %c0_66] : memref<1x64xf32, #tpu.memory_space<vmem>>, vector<1x64xf32>
    %137 = vector.broadcast %136 : vector<1x64xf32> to vector<64x64xf32>
    %138 = arith.addf %135, %137 : vector<64x64xf32>
    %139 = vector.broadcast %5 : vector<64x1xf32> to vector<64x64xf32>
    %140 = arith.mulf %138, %139 : vector<64x64xf32>
    %cst_67 = arith.constant 0.000000e+00 : f32
    %141 = vector.broadcast %cst_67 : f32 to vector<64x64xf32>
    %142 = arith.maximumf %140, %141 : vector<64x64xf32>
    %cst_68 = arith.constant dense<0.000000e+00> : vector<64xf32>
    %143 = vector.multi_reduction <add>, %142, %cst_68 [0] : vector<64x64xf32> to vector<64xf32>
    %144 = vector.shape_cast %143 : vector<64xf32> to vector<1x64xf32>
    %cst_69 = arith.constant 1.562500e-02 : f32
    %145 = vector.broadcast %cst_69 : f32 to vector<1x64xf32>
    %146 = arith.mulf %144, %145 : vector<1x64xf32>
    %147 = vector.broadcast %146 : vector<1x64xf32> to vector<64x64xf32>
    %148 = arith.subf %142, %147 : vector<64x64xf32>
    %149 = arith.mulf %148, %148 : vector<64x64xf32>
    %cst_70 = arith.constant dense<0.000000e+00> : vector<64xf32>
    %150 = vector.multi_reduction <add>, %149, %cst_70 [0] : vector<64x64xf32> to vector<64xf32>
    %151 = vector.shape_cast %150 : vector<64xf32> to vector<1x64xf32>
    %cst_71 = arith.constant 1.562500e-02 : f32
    %152 = vector.broadcast %cst_71 : f32 to vector<1x64xf32>
    %153 = arith.mulf %151, %152 : vector<1x64xf32>
    %cst_72 = arith.constant 9.99999974E-6 : f32
    %154 = vector.broadcast %cst_72 : f32 to vector<1x64xf32>
    %155 = arith.addf %153, %154 : vector<1x64xf32>
    %156 = math.rsqrt %155 : vector<1x64xf32>
    %157 = vector.broadcast %156 : vector<1x64xf32> to vector<64x64xf32>
    %158 = arith.mulf %148, %157 : vector<64x64xf32>
    %c0_73 = arith.constant 0 : index
    %c0_74 = arith.constant 0 : index
    %159 = vector.load %arg25[%c0_73, %c0_74] : memref<1x64xf32, #tpu.memory_space<vmem>>, vector<1x64xf32>
    %160 = vector.broadcast %159 : vector<1x64xf32> to vector<64x64xf32>
    %161 = arith.mulf %158, %160 : vector<64x64xf32>
    %c0_75 = arith.constant 0 : index
    %c0_76 = arith.constant 0 : index
    %162 = vector.load %arg26[%c0_75, %c0_76] : memref<1x64xf32, #tpu.memory_space<vmem>>, vector<1x64xf32>
    %163 = vector.broadcast %162 : vector<1x64xf32> to vector<64x64xf32>
    %164 = arith.addf %161, %163 : vector<64x64xf32>
    %165 = arith.truncf %130 : vector<64x64xf32> to vector<64x64xbf16>
    %c0_77 = arith.constant 0 : index
    %c0_78 = arith.constant 0 : index
    %166 = vector.load %arg16[%c0_77, %c0_78] : memref<64x8xbf16, #tpu.memory_space<vmem>>, vector<64x8xbf16>
    %cst_79 = arith.constant dense<0.000000e+00> : vector<64x8xf32>
    %167 = tpu.matmul %165, %166, %cst_79 {dimension_numbers = #tpu.dot_dimension_numbers<[1], [0], [0], [1], [0, 0, 1, 1], [], []>} : vector<64x64xbf16>, vector<64x8xbf16>, vector<64x8xf32> -> vector<64x8xf32>
    %168 = arith.addf %89, %167 : vector<64x8xf32>
    %169 = tpu.concatenate %130, %164 in 1 : vector<64x64xf32>, vector<64x64xf32> -> vector<64x128xf32>
    %170 = vector.shape_cast %169 : vector<64x128xf32> to vector<2x32x128xf32>
    %171 = arith.truncf %170 : vector<2x32x128xf32> to vector<2x32x128xbf16>
    "tpu.trace_start"() <{level = 10 : i32, message = "bij,bjc->bic"}> : () -> ()
    %cst_80 = arith.constant dense<0.000000e+00> : vector<2x32x128xf32>
    %172 = tpu.matmul %3, %171, %cst_80 {dimension_numbers = #tpu.dot_dimension_numbers<[2], [1], [1], [2], [0, 0, 0, 1, 1, 2], [0], [0]>} : vector<2x32x32xbf16>, vector<2x32x128xbf16>, vector<2x32x128xf32> -> vector<2x32x128xf32>
    "tpu.trace_stop"() : () -> ()
    %173 = vector.broadcast %11 : vector<2x32x1xf32> to vector<2x32x128xf32>
    %174 = arith.mulf %172, %173 : vector<2x32x128xf32>
    %175 = vector.shape_cast %174 : vector<2x32x128xf32> to vector<64x128xf32>
    %176 = vector.extract_strided_slice %175 {offsets = [0, 0], sizes = [64, 64], strides = [1, 1]} : vector<64x128xf32> to vector<64x64xf32>
    %177 = tpu.concatenate %176, %130 in 1 : vector<64x64xf32>, vector<64x64xf32> -> vector<64x128xf32>
    %178 = arith.truncf %177 : vector<64x128xf32> to vector<64x128xbf16>
    %c0_81 = arith.constant 0 : index
    %c0_82 = arith.constant 0 : index
    %179 = vector.load %arg11[%c0_81, %c0_82] : memref<128x8xbf16, #tpu.memory_space<vmem>>, vector<128x8xbf16>
    %cst_83 = arith.constant dense<0.000000e+00> : vector<64x8xf32>
    %180 = tpu.matmul %178, %179, %cst_83 {dimension_numbers = #tpu.dot_dimension_numbers<[1], [0], [0], [1], [0, 0, 1, 1], [], []>} : vector<64x128xbf16>, vector<128x8xbf16>, vector<64x8xf32> -> vector<64x8xf32>
    %c0_84 = arith.constant 0 : index
    %c0_85 = arith.constant 0 : index
    %181 = vector.load %arg12[%c0_84, %c0_85] : memref<1x8xf32, #tpu.memory_space<vmem>>, vector<1x8xf32>
    %182 = vector.broadcast %181 : vector<1x8xf32> to vector<64x8xf32>
    %183 = arith.addf %180, %182 : vector<64x8xf32>
    %184 = vector.broadcast %5 : vector<64x1xf32> to vector<64x8xf32>
    %185 = arith.mulf %183, %184 : vector<64x8xf32>
    %cst_86 = arith.constant 0.000000e+00 : f32
    %186 = vector.broadcast %cst_86 : f32 to vector<64x8xf32>
    %187 = arith.maximumf %185, %186 : vector<64x8xf32>
    %cst_87 = arith.constant dense<0.000000e+00> : vector<8xf32>
    %188 = vector.multi_reduction <add>, %187, %cst_87 [0] : vector<64x8xf32> to vector<8xf32>
    %189 = vector.shape_cast %188 : vector<8xf32> to vector<1x8xf32>
    %cst_88 = arith.constant 1.562500e-02 : f32
    %190 = vector.broadcast %cst_88 : f32 to vector<1x8xf32>
    %191 = arith.mulf %189, %190 : vector<1x8xf32>
    %192 = vector.broadcast %191 : vector<1x8xf32> to vector<64x8xf32>
    %193 = arith.subf %187, %192 : vector<64x8xf32>
    %194 = arith.mulf %193, %193 : vector<64x8xf32>
    %cst_89 = arith.constant dense<0.000000e+00> : vector<8xf32>
    %195 = vector.multi_reduction <add>, %194, %cst_89 [0] : vector<64x8xf32> to vector<8xf32>
    %196 = vector.shape_cast %195 : vector<8xf32> to vector<1x8xf32>
    %cst_90 = arith.constant 1.562500e-02 : f32
    %197 = vector.broadcast %cst_90 : f32 to vector<1x8xf32>
    %198 = arith.mulf %196, %197 : vector<1x8xf32>
    %cst_91 = arith.constant 9.99999974E-6 : f32
    %199 = vector.broadcast %cst_91 : f32 to vector<1x8xf32>
    %200 = arith.addf %198, %199 : vector<1x8xf32>
    %201 = math.rsqrt %200 : vector<1x8xf32>
    %202 = vector.broadcast %201 : vector<1x8xf32> to vector<64x8xf32>
    %203 = arith.mulf %193, %202 : vector<64x8xf32>
    %c0_92 = arith.constant 0 : index
    %c0_93 = arith.constant 0 : index
    %204 = vector.load %arg13[%c0_92, %c0_93] : memref<1x8xf32, #tpu.memory_space<vmem>>, vector<1x8xf32>
    %205 = vector.broadcast %204 : vector<1x8xf32> to vector<64x8xf32>
    %206 = arith.mulf %203, %205 : vector<64x8xf32>
    %c0_94 = arith.constant 0 : index
    %c0_95 = arith.constant 0 : index
    %207 = vector.load %arg14[%c0_94, %c0_95] : memref<1x8xf32, #tpu.memory_space<vmem>>, vector<1x8xf32>
    %208 = vector.broadcast %207 : vector<1x8xf32> to vector<64x8xf32>
    %209 = arith.addf %206, %208 : vector<64x8xf32>
    %210 = vector.extract_strided_slice %175 {offsets = [0, 64], sizes = [64, 64], strides = [1, 1]} : vector<64x128xf32> to vector<64x64xf32>
    %211 = tpu.concatenate %210, %164 in 1 : vector<64x64xf32>, vector<64x64xf32> -> vector<64x128xf32>
    %212 = arith.truncf %211 : vector<64x128xf32> to vector<64x128xbf16>
    %c0_96 = arith.constant 0 : index
    %c0_97 = arith.constant 0 : index
    %213 = vector.load %arg27[%c0_96, %c0_97] : memref<128x64xbf16, #tpu.memory_space<vmem>>, vector<128x64xbf16>
    %cst_98 = arith.constant dense<0.000000e+00> : vector<64x64xf32>
    %214 = tpu.matmul %212, %213, %cst_98 {dimension_numbers = #tpu.dot_dimension_numbers<[1], [0], [0], [1], [0, 0, 1, 1], [], []>} : vector<64x128xbf16>, vector<128x64xbf16>, vector<64x64xf32> -> vector<64x64xf32>
    %c0_99 = arith.constant 0 : index
    %c0_100 = arith.constant 0 : index
    %215 = vector.load %arg28[%c0_99, %c0_100] : memref<1x64xf32, #tpu.memory_space<vmem>>, vector<1x64xf32>
    %216 = vector.broadcast %215 : vector<1x64xf32> to vector<64x64xf32>
    %217 = arith.addf %214, %216 : vector<64x64xf32>
    %218 = vector.broadcast %5 : vector<64x1xf32> to vector<64x64xf32>
    %219 = arith.mulf %217, %218 : vector<64x64xf32>
    %cst_101 = arith.constant 0.000000e+00 : f32
    %220 = vector.broadcast %cst_101 : f32 to vector<64x64xf32>
    %221 = arith.maximumf %219, %220 : vector<64x64xf32>
    %cst_102 = arith.constant dense<0.000000e+00> : vector<64xf32>
    %222 = vector.multi_reduction <add>, %221, %cst_102 [0] : vector<64x64xf32> to vector<64xf32>
    %223 = vector.shape_cast %222 : vector<64xf32> to vector<1x64xf32>
    %cst_103 = arith.constant 1.562500e-02 : f32
    %224 = vector.broadcast %cst_103 : f32 to vector<1x64xf32>
    %225 = arith.mulf %223, %224 : vector<1x64xf32>
    %226 = vector.broadcast %225 : vector<1x64xf32> to vector<64x64xf32>
    %227 = arith.subf %221, %226 : vector<64x64xf32>
    %228 = arith.mulf %227, %227 : vector<64x64xf32>
    %cst_104 = arith.constant dense<0.000000e+00> : vector<64xf32>
    %229 = vector.multi_reduction <add>, %228, %cst_104 [0] : vector<64x64xf32> to vector<64xf32>
    %230 = vector.shape_cast %229 : vector<64xf32> to vector<1x64xf32>
    %cst_105 = arith.constant 1.562500e-02 : f32
    %231 = vector.broadcast %cst_105 : f32 to vector<1x64xf32>
    %232 = arith.mulf %230, %231 : vector<1x64xf32>
    %cst_106 = arith.constant 9.99999974E-6 : f32
    %233 = vector.broadcast %cst_106 : f32 to vector<1x64xf32>
    %234 = arith.addf %232, %233 : vector<1x64xf32>
    %235 = math.rsqrt %234 : vector<1x64xf32>
    %236 = vector.broadcast %235 : vector<1x64xf32> to vector<64x64xf32>
    %237 = arith.mulf %227, %236 : vector<64x64xf32>
    %c0_107 = arith.constant 0 : index
    %c0_108 = arith.constant 0 : index
    %238 = vector.load %arg29[%c0_107, %c0_108] : memref<1x64xf32, #tpu.memory_space<vmem>>, vector<1x64xf32>
    %239 = vector.broadcast %238 : vector<1x64xf32> to vector<64x64xf32>
    %240 = arith.mulf %237, %239 : vector<64x64xf32>
    %c0_109 = arith.constant 0 : index
    %c0_110 = arith.constant 0 : index
    %241 = vector.load %arg30[%c0_109, %c0_110] : memref<1x64xf32, #tpu.memory_space<vmem>>, vector<1x64xf32>
    %242 = vector.broadcast %241 : vector<1x64xf32> to vector<64x64xf32>
    %243 = arith.addf %240, %242 : vector<64x64xf32>
    %244 = arith.truncf %209 : vector<64x8xf32> to vector<64x8xbf16>
    %c0_111 = arith.constant 0 : index
    %c0_112 = arith.constant 0 : index
    %245 = vector.load %arg17[%c0_111, %c0_112] : memref<8x8xbf16, #tpu.memory_space<vmem>>, vector<8x8xbf16>
    %cst_113 = arith.constant dense<0.000000e+00> : vector<64x8xf32>
    %246 = tpu.matmul %244, %245, %cst_113 {dimension_numbers = #tpu.dot_dimension_numbers<[1], [0], [0], [1], [0, 0, 1, 1], [], []>} : vector<64x8xbf16>, vector<8x8xbf16>, vector<64x8xf32> -> vector<64x8xf32>
    %247 = arith.addf %168, %246 : vector<64x8xf32>
    %cst_114 = arith.constant 0.000000e+00 : f32
    %248 = vector.broadcast %cst_114 : f32 to vector<64x8xf32>
    %249 = arith.maximumf %247, %248 : vector<64x8xf32>
    %250 = tpu.concatenate %83, %164, %243 in 1 : vector<64x64xf32>, vector<64x64xf32>, vector<64x64xf32> -> vector<64x192xf32>
    %251 = vector.shape_cast %249 : vector<64x8xf32> to vector<2x32x8xf32>
    %cst_115 = arith.constant dense<0xFF800000> : vector<2x32xf32>
    %252 = vector.multi_reduction <maximumf>, %251, %cst_115 [2] : vector<2x32x8xf32> to vector<2x32xf32>
    %253 = vector.shape_cast %252 : vector<2x32xf32> to vector<2x32x1xf32>
    %254 = vector.broadcast %253 : vector<2x32x1xf32> to vector<2x32x8xf32>
    %255 = arith.subf %251, %254 : vector<2x32x8xf32>
    %256 = math.exp %255 : vector<2x32x8xf32>
    %cst_116 = arith.constant dense<0.000000e+00> : vector<2x32xf32>
    %257 = vector.multi_reduction <add>, %256, %cst_116 [2] : vector<2x32x8xf32> to vector<2x32xf32>
    %258 = vector.shape_cast %257 : vector<2x32xf32> to vector<2x32x1xf32>
    %259 = vector.broadcast %258 : vector<2x32x1xf32> to vector<2x32x8xf32>
    %260 = arith.divf %256, %259 : vector<2x32x8xf32>
    %261 = vector.shape_cast %250 : vector<64x192xf32> to vector<2x32x192xf32>
    %262 = vector.broadcast %4 : vector<2x32x1xf32> to vector<2x32x8xf32>
    %263 = arith.mulf %260, %262 : vector<2x32x8xf32>
    %264 = vector.broadcast %4 : vector<2x32x1xf32> to vector<2x32x192xf32>
    %265 = arith.mulf %261, %264 : vector<2x32x192xf32>
    %266 = tpu.transpose %263, [0, 2, 1] : vector<2x32x8xf32> -> vector<2x8x32xf32>
    %267 = arith.truncf %266 : vector<2x8x32xf32> to vector<2x8x32xbf16>
    %268 = arith.truncf %263 : vector<2x32x8xf32> to vector<2x32x8xbf16>
    %269 = arith.truncf %265 : vector<2x32x192xf32> to vector<2x32x192xbf16>
    "tpu.trace_start"() <{level = 10 : i32, message = "bkn,bnf->bkf"}> : () -> ()
    %cst_117 = arith.constant dense<0.000000e+00> : vector<2x8x192xf32>
    %270 = tpu.matmul %267, %269, %cst_117 {dimension_numbers = #tpu.dot_dimension_numbers<[2], [1], [1], [2], [0, 0, 0, 1, 1, 2], [0], [0]>} : vector<2x8x32xbf16>, vector<2x32x192xbf16>, vector<2x8x192xf32> -> vector<2x8x192xf32>
    "tpu.trace_stop"() : () -> ()
    "tpu.trace_start"() <{level = 10 : i32, message = "bkn,bnm->bkm"}> : () -> ()
    %cst_118 = arith.constant dense<0.000000e+00> : vector<2x8x32xf32>
    %271 = tpu.matmul %267, %3, %cst_118 {dimension_numbers = #tpu.dot_dimension_numbers<[2], [1], [1], [2], [0, 0, 0, 1, 1, 2], [0], [0]>} : vector<2x8x32xbf16>, vector<2x32x32xbf16>, vector<2x8x32xf32> -> vector<2x8x32xf32>
    "tpu.trace_stop"() : () -> ()
    %272 = arith.truncf %271 : vector<2x8x32xf32> to vector<2x8x32xbf16>
    "tpu.trace_start"() <{level = 10 : i32, message = "bkm,bmj->bkj"}> : () -> ()
    %cst_119 = arith.constant dense<0.000000e+00> : vector<2x8x8xf32>
    %273 = tpu.matmul %272, %268, %cst_119 {dimension_numbers = #tpu.dot_dimension_numbers<[2], [1], [1], [2], [0, 0, 0, 1, 1, 2], [0], [0]>} : vector<2x8x32xbf16>, vector<2x32x8xbf16>, vector<2x8x8xf32> -> vector<2x8x8xf32>
    "tpu.trace_stop"() : () -> ()
    "tpu.trace_start"() <{level = 10 : i32, message = "bkn,bnj->bkj"}> : () -> ()
    %cst_120 = arith.constant dense<0.000000e+00> : vector<2x8x8xf32>
    %274 = tpu.matmul %267, %268, %cst_120 {dimension_numbers = #tpu.dot_dimension_numbers<[2], [1], [1], [2], [0, 0, 0, 1, 1, 2], [0], [0]>} : vector<2x8x32xbf16>, vector<2x32x8xbf16>, vector<2x8x8xf32> -> vector<2x8x8xf32>
    "tpu.trace_stop"() : () -> ()
    %275 = tpu.iota {dimensions = array<i32: 0>} : vector<8x8xi32>
    %276 = tpu.iota {dimensions = array<i32: 1>} : vector<8x8xi32>
    %277 = arith.cmpi eq, %275, %276 : vector<8x8xi32>
    %278 = arith.extui %277 : vector<8x8xi1> to vector<8x8xi32>
    %279 = arith.sitofp %278 : vector<8x8xi32> to vector<8x8xf32>
    %280 = arith.mulf %2, %2 : vector<2x32x32xf32>
    %281 = vector.shape_cast %280 : vector<2x32x32xf32> to vector<1x2x32x32xf32>
    %cst_121 = arith.constant dense<0.000000e+00> : vector<1xf32>
    %282 = vector.multi_reduction <add>, %281, %cst_121 [1, 2, 3] : vector<1x2x32x32xf32> to vector<1xf32>
    %283 = vector.shape_cast %282 : vector<1xf32> to vector<1x1x1x1xf32>
    %284 = vector.extract %283[0, 0, 0, 0] : f32 from vector<1x1x1x1xf32>
    %285 = vector.shape_cast %279 : vector<8x8xf32> to vector<1x8x8xf32>
    %286 = vector.broadcast %285 : vector<1x8x8xf32> to vector<2x8x8xf32>
    %287 = arith.mulf %273, %286 : vector<2x8x8xf32>
    %288 = vector.shape_cast %287 : vector<2x8x8xf32> to vector<1x2x8x8xf32>
    %cst_122 = arith.constant dense<0.000000e+00> : vector<1xf32>
    %289 = vector.multi_reduction <add>, %288, %cst_122 [1, 2, 3] : vector<1x2x8x8xf32> to vector<1xf32>
    %290 = vector.shape_cast %289 : vector<1xf32> to vector<1x1x1x1xf32>
    %291 = vector.extract %290[0, 0, 0, 0] : f32 from vector<1x1x1x1xf32>
    %cst_123 = arith.constant 2.000000e+00 : f32
    %292 = arith.mulf %cst_123, %291 : f32
    %293 = arith.subf %284, %292 : f32
    %294 = arith.mulf %274, %274 : vector<2x8x8xf32>
    %295 = vector.shape_cast %294 : vector<2x8x8xf32> to vector<1x2x8x8xf32>
    %cst_124 = arith.constant dense<0.000000e+00> : vector<1xf32>
    %296 = vector.multi_reduction <add>, %295, %cst_124 [1, 2, 3] : vector<1x2x8x8xf32> to vector<1xf32>
    %297 = vector.shape_cast %296 : vector<1xf32> to vector<1x1x1x1xf32>
    %298 = vector.extract %297[0, 0, 0, 0] : f32 from vector<1x1x1x1xf32>
    %299 = arith.addf %293, %298 : f32
    %cst_125 = arith.constant 0.000000e+00 : f32
    %300 = arith.maximumf %299, %cst_125 : f32
    %301 = math.sqrt %300 : f32
    %cst_126 = arith.constant 4.8828125E-4 : f32
    %302 = arith.mulf %301, %cst_126 : f32
    %cst_127 = arith.constant 0.000000e+00 : f32
    %303 = vector.broadcast %cst_127 : f32 to vector<2x32x8xf32>
    %304 = arith.subf %303, %263 : vector<2x32x8xf32>
    %cst_128 = arith.constant 1.000000e-15 : f32
    %305 = vector.broadcast %cst_128 : f32 to vector<2x32x8xf32>
    %306 = arith.addf %263, %305 : vector<2x32x8xf32>
    %307 = math.log %306 : vector<2x32x8xf32>
    %308 = arith.mulf %304, %307 : vector<2x32x8xf32>
    %309 = vector.shape_cast %308 : vector<2x32x8xf32> to vector<1x2x32x8xf32>
    %cst_129 = arith.constant dense<0.000000e+00> : vector<1xf32>
    %310 = vector.multi_reduction <add>, %309, %cst_129 [1, 2, 3] : vector<1x2x32x8xf32> to vector<1xf32>
    %311 = vector.shape_cast %310 : vector<1xf32> to vector<1x1x1x1xf32>
    %312 = vector.extract %311[0, 0, 0, 0] : f32 from vector<1x1x1x1xf32>
    %cst_130 = arith.constant 1.562500e-02 : f32
    %313 = arith.mulf %312, %cst_130 : f32
    %c0_131 = arith.constant 0 : index
    %c0_132 = arith.constant 0 : index
    %c0_133 = arith.constant 0 : index
    %314 = vector.load %arg31[%c0_131, %c0_132, %c0_133] : memref<2x8x192xf32, #tpu.memory_space<vmem>>, vector<2x8x192xf32>
    tpu.vector_store %arg31[%c0_131, %c0_132, %c0_133], %270 {strides = array<i32>} : memref<2x8x192xf32, #tpu.memory_space<vmem>>, vector<2x8x192xf32>,
    %c0_134 = arith.constant 0 : index
    %c0_135 = arith.constant 0 : index
    %c0_136 = arith.constant 0 : index
    %315 = vector.load %arg32[%c0_134, %c0_135, %c0_136] : memref<2x8x8xf32, #tpu.memory_space<vmem>>, vector<2x8x8xf32>
    tpu.vector_store %arg32[%c0_134, %c0_135, %c0_136], %273 {strides = array<i32>} : memref<2x8x8xf32, #tpu.memory_space<vmem>>, vector<2x8x8xf32>,
    %316 = vector.broadcast %302 : f32 to vector<1x1xf32>
    %c0_137 = arith.constant 0 : index
    %c0_138 = arith.constant 0 : index
    %317 = vector.load %arg33[%c0_137, %c0_138] : memref<1x1xf32, #tpu.memory_space<vmem>>, vector<1x1xf32>
    tpu.vector_store %arg33[%c0_137, %c0_138], %316 {strides = array<i32>} : memref<1x1xf32, #tpu.memory_space<vmem>>, vector<1x1xf32>,
    %318 = vector.broadcast %313 : f32 to vector<1x1xf32>
    %c0_139 = arith.constant 0 : index
    %c0_140 = arith.constant 0 : index
    %319 = vector.load %arg34[%c0_139, %c0_140] : memref<1x1xf32, #tpu.memory_space<vmem>>, vector<1x1xf32>
    tpu.vector_store %arg34[%c0_139, %c0_140], %318 {strides = array<i32>} : memref<1x1xf32, #tpu.memory_space<vmem>>, vector<1x1xf32>,
    return
  }
}

module attributes {stable_mosaic.version = 11 : i64} {
  func.func @_diffpool_stage_kernel(%arg0: memref<2x8x192xf32, #tpu.memory_space<vmem>>, %arg1: memref<2x8x8xf32, #tpu.memory_space<vmem>>, %arg2: memref<384x64xbf16, #tpu.memory_space<vmem>>, %arg3: memref<1x64xf32, #tpu.memory_space<vmem>>, %arg4: memref<1x64xf32, #tpu.memory_space<vmem>>, %arg5: memref<1x64xf32, #tpu.memory_space<vmem>>, %arg6: memref<128x64xbf16, #tpu.memory_space<vmem>>, %arg7: memref<1x64xf32, #tpu.memory_space<vmem>>, %arg8: memref<1x64xf32, #tpu.memory_space<vmem>>, %arg9: memref<1x64xf32, #tpu.memory_space<vmem>>, %arg10: memref<128x2xbf16, #tpu.memory_space<vmem>>, %arg11: memref<1x2xf32, #tpu.memory_space<vmem>>, %arg12: memref<1x2xf32, #tpu.memory_space<vmem>>, %arg13: memref<1x2xf32, #tpu.memory_space<vmem>>, %arg14: memref<64x2xbf16, #tpu.memory_space<vmem>>, %arg15: memref<64x2xbf16, #tpu.memory_space<vmem>>, %arg16: memref<2x2xbf16, #tpu.memory_space<vmem>>, %arg17: memref<1x2xf32, #tpu.memory_space<vmem>>, %arg18: memref<384x64xbf16, #tpu.memory_space<vmem>>, %arg19: memref<1x64xf32, #tpu.memory_space<vmem>>, %arg20: memref<1x64xf32, #tpu.memory_space<vmem>>, %arg21: memref<1x64xf32, #tpu.memory_space<vmem>>, %arg22: memref<128x64xbf16, #tpu.memory_space<vmem>>, %arg23: memref<1x64xf32, #tpu.memory_space<vmem>>, %arg24: memref<1x64xf32, #tpu.memory_space<vmem>>, %arg25: memref<1x64xf32, #tpu.memory_space<vmem>>, %arg26: memref<128x64xbf16, #tpu.memory_space<vmem>>, %arg27: memref<1x64xf32, #tpu.memory_space<vmem>>, %arg28: memref<1x64xf32, #tpu.memory_space<vmem>>, %arg29: memref<1x64xf32, #tpu.memory_space<vmem>>, %arg30: memref<2x2x192xf32, #tpu.memory_space<vmem>>, %arg31: memref<2x2x2xf32, #tpu.memory_space<vmem>>, %arg32: memref<1x1xf32, #tpu.memory_space<vmem>>, %arg33: memref<1x1xf32, #tpu.memory_space<vmem>>) attributes {dimension_semantics = [], scalar_prefetch = 0 : i64, scratch_operands = 0 : i64, tpu.core_type = #tpu.core_type<tc>} {
    %c0 = arith.constant 0 : index
    %c0_0 = arith.constant 0 : index
    %c0_1 = arith.constant 0 : index
    %0 = vector.load %arg0[%c0, %c0_0, %c0_1] : memref<2x8x192xf32, #tpu.memory_space<vmem>>, vector<2x8x192xf32>
    %1 = vector.shape_cast %0 : vector<2x8x192xf32> to vector<16x192xf32>
    %c0_2 = arith.constant 0 : index
    %c0_3 = arith.constant 0 : index
    %c0_4 = arith.constant 0 : index
    %2 = vector.load %arg1[%c0_2, %c0_3, %c0_4] : memref<2x8x8xf32, #tpu.memory_space<vmem>>, vector<2x8x8xf32>
    %3 = arith.truncf %2 : vector<2x8x8xf32> to vector<2x8x8xbf16>
    %cst = arith.constant dense<0.000000e+00> : vector<2x8xf32>
    %4 = vector.multi_reduction <add>, %2, %cst [2] : vector<2x8x8xf32> to vector<2x8xf32>
    %5 = vector.shape_cast %4 : vector<2x8xf32> to vector<2x8x1xf32>
    %cst_5 = arith.constant 1.000000e+00 : f32
    %6 = vector.broadcast %cst_5 : f32 to vector<2x8x1xf32>
    %7 = arith.maximumf %5, %6 : vector<2x8x1xf32>
    %cst_6 = arith.constant 1.000000e+00 : f32
    %8 = vector.broadcast %cst_6 : f32 to vector<2x8x1xf32>
    %9 = arith.divf %8, %7 : vector<2x8x1xf32>
    %10 = vector.shape_cast %1 : vector<16x192xf32> to vector<2x8x192xf32>
    %11 = arith.truncf %10 : vector<2x8x192xf32> to vector<2x8x192xbf16>
    "tpu.trace_start"() <{level = 10 : i32, message = "bij,bjc->bic"}> : () -> ()
    %cst_7 = arith.constant dense<0.000000e+00> : vector<2x8x192xf32>
    %12 = tpu.matmul %3, %11, %cst_7 {dimension_numbers = #tpu.dot_dimension_numbers<[2], [1], [1], [2], [0, 0, 0, 1, 1, 2], [0], [0]>} : vector<2x8x8xbf16>, vector<2x8x192xbf16>, vector<2x8x192xf32> -> vector<2x8x192xf32>
    "tpu.trace_stop"() : () -> ()
    %13 = vector.broadcast %9 : vector<2x8x1xf32> to vector<2x8x192xf32>
    %14 = arith.mulf %12, %13 : vector<2x8x192xf32>
    %15 = vector.shape_cast %14 : vector<2x8x192xf32> to vector<16x192xf32>
    %16 = tpu.concatenate %15, %1 in 1 : vector<16x192xf32>, vector<16x192xf32> -> vector<16x384xf32>
    %17 = arith.truncf %16 : vector<16x384xf32> to vector<16x384xbf16>
    %c0_8 = arith.constant 0 : index
    %c0_9 = arith.constant 0 : index
    %18 = vector.load %arg2[%c0_8, %c0_9] : memref<384x64xbf16, #tpu.memory_space<vmem>>, vector<384x64xbf16>
    %cst_10 = arith.constant dense<0.000000e+00> : vector<16x64xf32>
    %19 = tpu.matmul %17, %18, %cst_10 {dimension_numbers = #tpu.dot_dimension_numbers<[1], [0], [0], [1], [0, 0, 1, 1], [], []>} : vector<16x384xbf16>, vector<384x64xbf16>, vector<16x64xf32> -> vector<16x64xf32>
    %c0_11 = arith.constant 0 : index
    %c0_12 = arith.constant 0 : index
    %20 = vector.load %arg3[%c0_11, %c0_12] : memref<1x64xf32, #tpu.memory_space<vmem>>, vector<1x64xf32>
    %21 = vector.broadcast %20 : vector<1x64xf32> to vector<16x64xf32>
    %22 = arith.addf %19, %21 : vector<16x64xf32>
    %cst_13 = arith.constant 0.000000e+00 : f32
    %23 = vector.broadcast %cst_13 : f32 to vector<16x64xf32>
    %24 = arith.maximumf %22, %23 : vector<16x64xf32>
    %cst_14 = arith.constant dense<0.000000e+00> : vector<64xf32>
    %25 = vector.multi_reduction <add>, %24, %cst_14 [0] : vector<16x64xf32> to vector<64xf32>
    %26 = vector.shape_cast %25 : vector<64xf32> to vector<1x64xf32>
    %cst_15 = arith.constant 6.250000e-02 : f32
    %27 = vector.broadcast %cst_15 : f32 to vector<1x64xf32>
    %28 = arith.mulf %26, %27 : vector<1x64xf32>
    %29 = vector.broadcast %28 : vector<1x64xf32> to vector<16x64xf32>
    %30 = arith.subf %24, %29 : vector<16x64xf32>
    %31 = arith.mulf %30, %30 : vector<16x64xf32>
    %cst_16 = arith.constant dense<0.000000e+00> : vector<64xf32>
    %32 = vector.multi_reduction <add>, %31, %cst_16 [0] : vector<16x64xf32> to vector<64xf32>
    %33 = vector.shape_cast %32 : vector<64xf32> to vector<1x64xf32>
    %cst_17 = arith.constant 6.250000e-02 : f32
    %34 = vector.broadcast %cst_17 : f32 to vector<1x64xf32>
    %35 = arith.mulf %33, %34 : vector<1x64xf32>
    %cst_18 = arith.constant 9.99999974E-6 : f32
    %36 = vector.broadcast %cst_18 : f32 to vector<1x64xf32>
    %37 = arith.addf %35, %36 : vector<1x64xf32>
    %38 = math.rsqrt %37 : vector<1x64xf32>
    %39 = vector.broadcast %38 : vector<1x64xf32> to vector<16x64xf32>
    %40 = arith.mulf %30, %39 : vector<16x64xf32>
    %c0_19 = arith.constant 0 : index
    %c0_20 = arith.constant 0 : index
    %41 = vector.load %arg4[%c0_19, %c0_20] : memref<1x64xf32, #tpu.memory_space<vmem>>, vector<1x64xf32>
    %42 = vector.broadcast %41 : vector<1x64xf32> to vector<16x64xf32>
    %43 = arith.mulf %40, %42 : vector<16x64xf32>
    %c0_21 = arith.constant 0 : index
    %c0_22 = arith.constant 0 : index
    %44 = vector.load %arg5[%c0_21, %c0_22] : memref<1x64xf32, #tpu.memory_space<vmem>>, vector<1x64xf32>
    %45 = vector.broadcast %44 : vector<1x64xf32> to vector<16x64xf32>
    %46 = arith.addf %43, %45 : vector<16x64xf32>
    %47 = tpu.concatenate %15, %1 in 1 : vector<16x192xf32>, vector<16x192xf32> -> vector<16x384xf32>
    %48 = arith.truncf %47 : vector<16x384xf32> to vector<16x384xbf16>
    %c0_23 = arith.constant 0 : index
    %c0_24 = arith.constant 0 : index
    %49 = vector.load %arg18[%c0_23, %c0_24] : memref<384x64xbf16, #tpu.memory_space<vmem>>, vector<384x64xbf16>
    %cst_25 = arith.constant dense<0.000000e+00> : vector<16x64xf32>
    %50 = tpu.matmul %48, %49, %cst_25 {dimension_numbers = #tpu.dot_dimension_numbers<[1], [0], [0], [1], [0, 0, 1, 1], [], []>} : vector<16x384xbf16>, vector<384x64xbf16>, vector<16x64xf32> -> vector<16x64xf32>
    %c0_26 = arith.constant 0 : index
    %c0_27 = arith.constant 0 : index
    %51 = vector.load %arg19[%c0_26, %c0_27] : memref<1x64xf32, #tpu.memory_space<vmem>>, vector<1x64xf32>
    %52 = vector.broadcast %51 : vector<1x64xf32> to vector<16x64xf32>
    %53 = arith.addf %50, %52 : vector<16x64xf32>
    %cst_28 = arith.constant 0.000000e+00 : f32
    %54 = vector.broadcast %cst_28 : f32 to vector<16x64xf32>
    %55 = arith.maximumf %53, %54 : vector<16x64xf32>
    %cst_29 = arith.constant dense<0.000000e+00> : vector<64xf32>
    %56 = vector.multi_reduction <add>, %55, %cst_29 [0] : vector<16x64xf32> to vector<64xf32>
    %57 = vector.shape_cast %56 : vector<64xf32> to vector<1x64xf32>
    %cst_30 = arith.constant 6.250000e-02 : f32
    %58 = vector.broadcast %cst_30 : f32 to vector<1x64xf32>
    %59 = arith.mulf %57, %58 : vector<1x64xf32>
    %60 = vector.broadcast %59 : vector<1x64xf32> to vector<16x64xf32>
    %61 = arith.subf %55, %60 : vector<16x64xf32>
    %62 = arith.mulf %61, %61 : vector<16x64xf32>
    %cst_31 = arith.constant dense<0.000000e+00> : vector<64xf32>
    %63 = vector.multi_reduction <add>, %62, %cst_31 [0] : vector<16x64xf32> to vector<64xf32>
    %64 = vector.shape_cast %63 : vector<64xf32> to vector<1x64xf32>
    %cst_32 = arith.constant 6.250000e-02 : f32
    %65 = vector.broadcast %cst_32 : f32 to vector<1x64xf32>
    %66 = arith.mulf %64, %65 : vector<1x64xf32>
    %cst_33 = arith.constant 9.99999974E-6 : f32
    %67 = vector.broadcast %cst_33 : f32 to vector<1x64xf32>
    %68 = arith.addf %66, %67 : vector<1x64xf32>
    %69 = math.rsqrt %68 : vector<1x64xf32>
    %70 = vector.broadcast %69 : vector<1x64xf32> to vector<16x64xf32>
    %71 = arith.mulf %61, %70 : vector<16x64xf32>
    %c0_34 = arith.constant 0 : index
    %c0_35 = arith.constant 0 : index
    %72 = vector.load %arg20[%c0_34, %c0_35] : memref<1x64xf32, #tpu.memory_space<vmem>>, vector<1x64xf32>
    %73 = vector.broadcast %72 : vector<1x64xf32> to vector<16x64xf32>
    %74 = arith.mulf %71, %73 : vector<16x64xf32>
    %c0_36 = arith.constant 0 : index
    %c0_37 = arith.constant 0 : index
    %75 = vector.load %arg21[%c0_36, %c0_37] : memref<1x64xf32, #tpu.memory_space<vmem>>, vector<1x64xf32>
    %76 = vector.broadcast %75 : vector<1x64xf32> to vector<16x64xf32>
    %77 = arith.addf %74, %76 : vector<16x64xf32>
    %c0_38 = arith.constant 0 : index
    %c0_39 = arith.constant 0 : index
    %78 = vector.load %arg17[%c0_38, %c0_39] : memref<1x2xf32, #tpu.memory_space<vmem>>, vector<1x2xf32>
    %79 = arith.truncf %46 : vector<16x64xf32> to vector<16x64xbf16>
    %c0_40 = arith.constant 0 : index
    %c0_41 = arith.constant 0 : index
    %80 = vector.load %arg14[%c0_40, %c0_41] : memref<64x2xbf16, #tpu.memory_space<vmem>>, vector<64x2xbf16>
    %cst_42 = arith.constant dense<0.000000e+00> : vector<16x2xf32>
    %81 = tpu.matmul %79, %80, %cst_42 {dimension_numbers = #tpu.dot_dimension_numbers<[1], [0], [0], [1], [0, 0, 1, 1], [], []>} : vector<16x64xbf16>, vector<64x2xbf16>, vector<16x2xf32> -> vector<16x2xf32>
    %82 = vector.broadcast %78 : vector<1x2xf32> to vector<16x2xf32>
    %83 = arith.addf %82, %81 : vector<16x2xf32>
    %84 = tpu.concatenate %46, %77 in 1 : vector<16x64xf32>, vector<16x64xf32> -> vector<16x128xf32>
    %85 = vector.shape_cast %84 : vector<16x128xf32> to vector<2x8x128xf32>
    %86 = arith.truncf %85 : vector<2x8x128xf32> to vector<2x8x128xbf16>
    "tpu.trace_start"() <{level = 10 : i32, message = "bij,bjc->bic"}> : () -> ()
    %cst_43 = arith.constant dense<0.000000e+00> : vector<2x8x128xf32>
    %87 = tpu.matmul %3, %86, %cst_43 {dimension_numbers = #tpu.dot_dimension_numbers<[2], [1], [1], [2], [0, 0, 0, 1, 1, 2], [0], [0]>} : vector<2x8x8xbf16>, vector<2x8x128xbf16>, vector<2x8x128xf32> -> vector<2x8x128xf32>
    "tpu.trace_stop"() : () -> ()
    %88 = vector.broadcast %9 : vector<2x8x1xf32> to vector<2x8x128xf32>
    %89 = arith.mulf %87, %88 : vector<2x8x128xf32>
    %90 = vector.shape_cast %89 : vector<2x8x128xf32> to vector<16x128xf32>
    %91 = vector.extract_strided_slice %90 {offsets = [0, 0], sizes = [16, 64], strides = [1, 1]} : vector<16x128xf32> to vector<16x64xf32>
    %92 = tpu.concatenate %91, %46 in 1 : vector<16x64xf32>, vector<16x64xf32> -> vector<16x128xf32>
    %93 = arith.truncf %92 : vector<16x128xf32> to vector<16x128xbf16>
    %c0_44 = arith.constant 0 : index
    %c0_45 = arith.constant 0 : index
    %94 = vector.load %arg6[%c0_44, %c0_45] : memref<128x64xbf16, #tpu.memory_space<vmem>>, vector<128x64xbf16>
    %cst_46 = arith.constant dense<0.000000e+00> : vector<16x64xf32>
    %95 = tpu.matmul %93, %94, %cst_46 {dimension_numbers = #tpu.dot_dimension_numbers<[1], [0], [0], [1], [0, 0, 1, 1], [], []>} : vector<16x128xbf16>, vector<128x64xbf16>, vector<16x64xf32> -> vector<16x64xf32>
    %c0_47 = arith.constant 0 : index
    %c0_48 = arith.constant 0 : index
    %96 = vector.load %arg7[%c0_47, %c0_48] : memref<1x64xf32, #tpu.memory_space<vmem>>, vector<1x64xf32>
    %97 = vector.broadcast %96 : vector<1x64xf32> to vector<16x64xf32>
    %98 = arith.addf %95, %97 : vector<16x64xf32>
    %cst_49 = arith.constant 0.000000e+00 : f32
    %99 = vector.broadcast %cst_49 : f32 to vector<16x64xf32>
    %100 = arith.maximumf %98, %99 : vector<16x64xf32>
    %cst_50 = arith.constant dense<0.000000e+00> : vector<64xf32>
    %101 = vector.multi_reduction <add>, %100, %cst_50 [0] : vector<16x64xf32> to vector<64xf32>
    %102 = vector.shape_cast %101 : vector<64xf32> to vector<1x64xf32>
    %cst_51 = arith.constant 6.250000e-02 : f32
    %103 = vector.broadcast %cst_51 : f32 to vector<1x64xf32>
    %104 = arith.mulf %102, %103 : vector<1x64xf32>
    %105 = vector.broadcast %104 : vector<1x64xf32> to vector<16x64xf32>
    %106 = arith.subf %100, %105 : vector<16x64xf32>
    %107 = arith.mulf %106, %106 : vector<16x64xf32>
    %cst_52 = arith.constant dense<0.000000e+00> : vector<64xf32>
    %108 = vector.multi_reduction <add>, %107, %cst_52 [0] : vector<16x64xf32> to vector<64xf32>
    %109 = vector.shape_cast %108 : vector<64xf32> to vector<1x64xf32>
    %cst_53 = arith.constant 6.250000e-02 : f32
    %110 = vector.broadcast %cst_53 : f32 to vector<1x64xf32>
    %111 = arith.mulf %109, %110 : vector<1x64xf32>
    %cst_54 = arith.constant 9.99999974E-6 : f32
    %112 = vector.broadcast %cst_54 : f32 to vector<1x64xf32>
    %113 = arith.addf %111, %112 : vector<1x64xf32>
    %114 = math.rsqrt %113 : vector<1x64xf32>
    %115 = vector.broadcast %114 : vector<1x64xf32> to vector<16x64xf32>
    %116 = arith.mulf %106, %115 : vector<16x64xf32>
    %c0_55 = arith.constant 0 : index
    %c0_56 = arith.constant 0 : index
    %117 = vector.load %arg8[%c0_55, %c0_56] : memref<1x64xf32, #tpu.memory_space<vmem>>, vector<1x64xf32>
    %118 = vector.broadcast %117 : vector<1x64xf32> to vector<16x64xf32>
    %119 = arith.mulf %116, %118 : vector<16x64xf32>
    %c0_57 = arith.constant 0 : index
    %c0_58 = arith.constant 0 : index
    %120 = vector.load %arg9[%c0_57, %c0_58] : memref<1x64xf32, #tpu.memory_space<vmem>>, vector<1x64xf32>
    %121 = vector.broadcast %120 : vector<1x64xf32> to vector<16x64xf32>
    %122 = arith.addf %119, %121 : vector<16x64xf32>
    %123 = vector.extract_strided_slice %90 {offsets = [0, 64], sizes = [16, 64], strides = [1, 1]} : vector<16x128xf32> to vector<16x64xf32>
    %124 = tpu.concatenate %123, %77 in 1 : vector<16x64xf32>, vector<16x64xf32> -> vector<16x128xf32>
    %125 = arith.truncf %124 : vector<16x128xf32> to vector<16x128xbf16>
    %c0_59 = arith.constant 0 : index
    %c0_60 = arith.constant 0 : index
    %126 = vector.load %arg22[%c0_59, %c0_60] : memref<128x64xbf16, #tpu.memory_space<vmem>>, vector<128x64xbf16>
    %cst_61 = arith.constant dense<0.000000e+00> : vector<16x64xf32>
    %127 = tpu.matmul %125, %126, %cst_61 {dimension_numbers = #tpu.dot_dimension_numbers<[1], [0], [0], [1], [0, 0, 1, 1], [], []>} : vector<16x128xbf16>, vector<128x64xbf16>, vector<16x64xf32> -> vector<16x64xf32>
    %c0_62 = arith.constant 0 : index
    %c0_63 = arith.constant 0 : index
    %128 = vector.load %arg23[%c0_62, %c0_63] : memref<1x64xf32, #tpu.memory_space<vmem>>, vector<1x64xf32>
    %129 = vector.broadcast %128 : vector<1x64xf32> to vector<16x64xf32>
    %130 = arith.addf %127, %129 : vector<16x64xf32>
    %cst_64 = arith.constant 0.000000e+00 : f32
    %131 = vector.broadcast %cst_64 : f32 to vector<16x64xf32>
    %132 = arith.maximumf %130, %131 : vector<16x64xf32>
    %cst_65 = arith.constant dense<0.000000e+00> : vector<64xf32>
    %133 = vector.multi_reduction <add>, %132, %cst_65 [0] : vector<16x64xf32> to vector<64xf32>
    %134 = vector.shape_cast %133 : vector<64xf32> to vector<1x64xf32>
    %cst_66 = arith.constant 6.250000e-02 : f32
    %135 = vector.broadcast %cst_66 : f32 to vector<1x64xf32>
    %136 = arith.mulf %134, %135 : vector<1x64xf32>
    %137 = vector.broadcast %136 : vector<1x64xf32> to vector<16x64xf32>
    %138 = arith.subf %132, %137 : vector<16x64xf32>
    %139 = arith.mulf %138, %138 : vector<16x64xf32>
    %cst_67 = arith.constant dense<0.000000e+00> : vector<64xf32>
    %140 = vector.multi_reduction <add>, %139, %cst_67 [0] : vector<16x64xf32> to vector<64xf32>
    %141 = vector.shape_cast %140 : vector<64xf32> to vector<1x64xf32>
    %cst_68 = arith.constant 6.250000e-02 : f32
    %142 = vector.broadcast %cst_68 : f32 to vector<1x64xf32>
    %143 = arith.mulf %141, %142 : vector<1x64xf32>
    %cst_69 = arith.constant 9.99999974E-6 : f32
    %144 = vector.broadcast %cst_69 : f32 to vector<1x64xf32>
    %145 = arith.addf %143, %144 : vector<1x64xf32>
    %146 = math.rsqrt %145 : vector<1x64xf32>
    %147 = vector.broadcast %146 : vector<1x64xf32> to vector<16x64xf32>
    %148 = arith.mulf %138, %147 : vector<16x64xf32>
    %c0_70 = arith.constant 0 : index
    %c0_71 = arith.constant 0 : index
    %149 = vector.load %arg24[%c0_70, %c0_71] : memref<1x64xf32, #tpu.memory_space<vmem>>, vector<1x64xf32>
    %150 = vector.broadcast %149 : vector<1x64xf32> to vector<16x64xf32>
    %151 = arith.mulf %148, %150 : vector<16x64xf32>
    %c0_72 = arith.constant 0 : index
    %c0_73 = arith.constant 0 : index
    %152 = vector.load %arg25[%c0_72, %c0_73] : memref<1x64xf32, #tpu.memory_space<vmem>>, vector<1x64xf32>
    %153 = vector.broadcast %152 : vector<1x64xf32> to vector<16x64xf32>
    %154 = arith.addf %151, %153 : vector<16x64xf32>
    %155 = arith.truncf %122 : vector<16x64xf32> to vector<16x64xbf16>
    %c0_74 = arith.constant 0 : index
    %c0_75 = arith.constant 0 : index
    %156 = vector.load %arg15[%c0_74, %c0_75] : memref<64x2xbf16, #tpu.memory_space<vmem>>, vector<64x2xbf16>
    %cst_76 = arith.constant dense<0.000000e+00> : vector<16x2xf32>
    %157 = tpu.matmul %155, %156, %cst_76 {dimension_numbers = #tpu.dot_dimension_numbers<[1], [0], [0], [1], [0, 0, 1, 1], [], []>} : vector<16x64xbf16>, vector<64x2xbf16>, vector<16x2xf32> -> vector<16x2xf32>
    %158 = arith.addf %83, %157 : vector<16x2xf32>
    %159 = tpu.concatenate %122, %154 in 1 : vector<16x64xf32>, vector<16x64xf32> -> vector<16x128xf32>
    %160 = vector.shape_cast %159 : vector<16x128xf32> to vector<2x8x128xf32>
    %161 = arith.truncf %160 : vector<2x8x128xf32> to vector<2x8x128xbf16>
    "tpu.trace_start"() <{level = 10 : i32, message = "bij,bjc->bic"}> : () -> ()
    %cst_77 = arith.constant dense<0.000000e+00> : vector<2x8x128xf32>
    %162 = tpu.matmul %3, %161, %cst_77 {dimension_numbers = #tpu.dot_dimension_numbers<[2], [1], [1], [2], [0, 0, 0, 1, 1, 2], [0], [0]>} : vector<2x8x8xbf16>, vector<2x8x128xbf16>, vector<2x8x128xf32> -> vector<2x8x128xf32>
    "tpu.trace_stop"() : () -> ()
    %163 = vector.broadcast %9 : vector<2x8x1xf32> to vector<2x8x128xf32>
    %164 = arith.mulf %162, %163 : vector<2x8x128xf32>
    %165 = vector.shape_cast %164 : vector<2x8x128xf32> to vector<16x128xf32>
    %166 = vector.extract_strided_slice %165 {offsets = [0, 0], sizes = [16, 64], strides = [1, 1]} : vector<16x128xf32> to vector<16x64xf32>
    %167 = tpu.concatenate %166, %122 in 1 : vector<16x64xf32>, vector<16x64xf32> -> vector<16x128xf32>
    %168 = arith.truncf %167 : vector<16x128xf32> to vector<16x128xbf16>
    %c0_78 = arith.constant 0 : index
    %c0_79 = arith.constant 0 : index
    %169 = vector.load %arg10[%c0_78, %c0_79] : memref<128x2xbf16, #tpu.memory_space<vmem>>, vector<128x2xbf16>
    %cst_80 = arith.constant dense<0.000000e+00> : vector<16x2xf32>
    %170 = tpu.matmul %168, %169, %cst_80 {dimension_numbers = #tpu.dot_dimension_numbers<[1], [0], [0], [1], [0, 0, 1, 1], [], []>} : vector<16x128xbf16>, vector<128x2xbf16>, vector<16x2xf32> -> vector<16x2xf32>
    %c0_81 = arith.constant 0 : index
    %c0_82 = arith.constant 0 : index
    %171 = vector.load %arg11[%c0_81, %c0_82] : memref<1x2xf32, #tpu.memory_space<vmem>>, vector<1x2xf32>
    %172 = vector.broadcast %171 : vector<1x2xf32> to vector<16x2xf32>
    %173 = arith.addf %170, %172 : vector<16x2xf32>
    %cst_83 = arith.constant 0.000000e+00 : f32
    %174 = vector.broadcast %cst_83 : f32 to vector<16x2xf32>
    %175 = arith.maximumf %173, %174 : vector<16x2xf32>
    %cst_84 = arith.constant dense<0.000000e+00> : vector<2xf32>
    %176 = vector.multi_reduction <add>, %175, %cst_84 [0] : vector<16x2xf32> to vector<2xf32>
    %177 = vector.shape_cast %176 : vector<2xf32> to vector<1x2xf32>
    %cst_85 = arith.constant 6.250000e-02 : f32
    %178 = vector.broadcast %cst_85 : f32 to vector<1x2xf32>
    %179 = arith.mulf %177, %178 : vector<1x2xf32>
    %180 = vector.broadcast %179 : vector<1x2xf32> to vector<16x2xf32>
    %181 = arith.subf %175, %180 : vector<16x2xf32>
    %182 = arith.mulf %181, %181 : vector<16x2xf32>
    %cst_86 = arith.constant dense<0.000000e+00> : vector<2xf32>
    %183 = vector.multi_reduction <add>, %182, %cst_86 [0] : vector<16x2xf32> to vector<2xf32>
    %184 = vector.shape_cast %183 : vector<2xf32> to vector<1x2xf32>
    %cst_87 = arith.constant 6.250000e-02 : f32
    %185 = vector.broadcast %cst_87 : f32 to vector<1x2xf32>
    %186 = arith.mulf %184, %185 : vector<1x2xf32>
    %cst_88 = arith.constant 9.99999974E-6 : f32
    %187 = vector.broadcast %cst_88 : f32 to vector<1x2xf32>
    %188 = arith.addf %186, %187 : vector<1x2xf32>
    %189 = math.rsqrt %188 : vector<1x2xf32>
    %190 = vector.broadcast %189 : vector<1x2xf32> to vector<16x2xf32>
    %191 = arith.mulf %181, %190 : vector<16x2xf32>
    %c0_89 = arith.constant 0 : index
    %c0_90 = arith.constant 0 : index
    %192 = vector.load %arg12[%c0_89, %c0_90] : memref<1x2xf32, #tpu.memory_space<vmem>>, vector<1x2xf32>
    %193 = vector.broadcast %192 : vector<1x2xf32> to vector<16x2xf32>
    %194 = arith.mulf %191, %193 : vector<16x2xf32>
    %c0_91 = arith.constant 0 : index
    %c0_92 = arith.constant 0 : index
    %195 = vector.load %arg13[%c0_91, %c0_92] : memref<1x2xf32, #tpu.memory_space<vmem>>, vector<1x2xf32>
    %196 = vector.broadcast %195 : vector<1x2xf32> to vector<16x2xf32>
    %197 = arith.addf %194, %196 : vector<16x2xf32>
    %198 = vector.extract_strided_slice %165 {offsets = [0, 64], sizes = [16, 64], strides = [1, 1]} : vector<16x128xf32> to vector<16x64xf32>
    %199 = tpu.concatenate %198, %154 in 1 : vector<16x64xf32>, vector<16x64xf32> -> vector<16x128xf32>
    %200 = arith.truncf %199 : vector<16x128xf32> to vector<16x128xbf16>
    %c0_93 = arith.constant 0 : index
    %c0_94 = arith.constant 0 : index
    %201 = vector.load %arg26[%c0_93, %c0_94] : memref<128x64xbf16, #tpu.memory_space<vmem>>, vector<128x64xbf16>
    %cst_95 = arith.constant dense<0.000000e+00> : vector<16x64xf32>
    %202 = tpu.matmul %200, %201, %cst_95 {dimension_numbers = #tpu.dot_dimension_numbers<[1], [0], [0], [1], [0, 0, 1, 1], [], []>} : vector<16x128xbf16>, vector<128x64xbf16>, vector<16x64xf32> -> vector<16x64xf32>
    %c0_96 = arith.constant 0 : index
    %c0_97 = arith.constant 0 : index
    %203 = vector.load %arg27[%c0_96, %c0_97] : memref<1x64xf32, #tpu.memory_space<vmem>>, vector<1x64xf32>
    %204 = vector.broadcast %203 : vector<1x64xf32> to vector<16x64xf32>
    %205 = arith.addf %202, %204 : vector<16x64xf32>
    %cst_98 = arith.constant 0.000000e+00 : f32
    %206 = vector.broadcast %cst_98 : f32 to vector<16x64xf32>
    %207 = arith.maximumf %205, %206 : vector<16x64xf32>
    %cst_99 = arith.constant dense<0.000000e+00> : vector<64xf32>
    %208 = vector.multi_reduction <add>, %207, %cst_99 [0] : vector<16x64xf32> to vector<64xf32>
    %209 = vector.shape_cast %208 : vector<64xf32> to vector<1x64xf32>
    %cst_100 = arith.constant 6.250000e-02 : f32
    %210 = vector.broadcast %cst_100 : f32 to vector<1x64xf32>
    %211 = arith.mulf %209, %210 : vector<1x64xf32>
    %212 = vector.broadcast %211 : vector<1x64xf32> to vector<16x64xf32>
    %213 = arith.subf %207, %212 : vector<16x64xf32>
    %214 = arith.mulf %213, %213 : vector<16x64xf32>
    %cst_101 = arith.constant dense<0.000000e+00> : vector<64xf32>
    %215 = vector.multi_reduction <add>, %214, %cst_101 [0] : vector<16x64xf32> to vector<64xf32>
    %216 = vector.shape_cast %215 : vector<64xf32> to vector<1x64xf32>
    %cst_102 = arith.constant 6.250000e-02 : f32
    %217 = vector.broadcast %cst_102 : f32 to vector<1x64xf32>
    %218 = arith.mulf %216, %217 : vector<1x64xf32>
    %cst_103 = arith.constant 9.99999974E-6 : f32
    %219 = vector.broadcast %cst_103 : f32 to vector<1x64xf32>
    %220 = arith.addf %218, %219 : vector<1x64xf32>
    %221 = math.rsqrt %220 : vector<1x64xf32>
    %222 = vector.broadcast %221 : vector<1x64xf32> to vector<16x64xf32>
    %223 = arith.mulf %213, %222 : vector<16x64xf32>
    %c0_104 = arith.constant 0 : index
    %c0_105 = arith.constant 0 : index
    %224 = vector.load %arg28[%c0_104, %c0_105] : memref<1x64xf32, #tpu.memory_space<vmem>>, vector<1x64xf32>
    %225 = vector.broadcast %224 : vector<1x64xf32> to vector<16x64xf32>
    %226 = arith.mulf %223, %225 : vector<16x64xf32>
    %c0_106 = arith.constant 0 : index
    %c0_107 = arith.constant 0 : index
    %227 = vector.load %arg29[%c0_106, %c0_107] : memref<1x64xf32, #tpu.memory_space<vmem>>, vector<1x64xf32>
    %228 = vector.broadcast %227 : vector<1x64xf32> to vector<16x64xf32>
    %229 = arith.addf %226, %228 : vector<16x64xf32>
    %230 = arith.truncf %197 : vector<16x2xf32> to vector<16x2xbf16>
    %c0_108 = arith.constant 0 : index
    %c0_109 = arith.constant 0 : index
    %231 = vector.load %arg16[%c0_108, %c0_109] : memref<2x2xbf16, #tpu.memory_space<vmem>>, vector<2x2xbf16>
    %cst_110 = arith.constant dense<0.000000e+00> : vector<16x2xf32>
    %232 = tpu.matmul %230, %231, %cst_110 {dimension_numbers = #tpu.dot_dimension_numbers<[1], [0], [0], [1], [0, 0, 1, 1], [], []>} : vector<16x2xbf16>, vector<2x2xbf16>, vector<16x2xf32> -> vector<16x2xf32>
    %233 = arith.addf %158, %232 : vector<16x2xf32>
    %cst_111 = arith.constant 0.000000e+00 : f32
    %234 = vector.broadcast %cst_111 : f32 to vector<16x2xf32>
    %235 = arith.maximumf %233, %234 : vector<16x2xf32>
    %236 = tpu.concatenate %77, %154, %229 in 1 : vector<16x64xf32>, vector<16x64xf32>, vector<16x64xf32> -> vector<16x192xf32>
    %237 = vector.shape_cast %235 : vector<16x2xf32> to vector<2x8x2xf32>
    %cst_112 = arith.constant dense<0xFF800000> : vector<2x8xf32>
    %238 = vector.multi_reduction <maximumf>, %237, %cst_112 [2] : vector<2x8x2xf32> to vector<2x8xf32>
    %239 = vector.shape_cast %238 : vector<2x8xf32> to vector<2x8x1xf32>
    %240 = vector.broadcast %239 : vector<2x8x1xf32> to vector<2x8x2xf32>
    %241 = arith.subf %237, %240 : vector<2x8x2xf32>
    %242 = math.exp %241 : vector<2x8x2xf32>
    %cst_113 = arith.constant dense<0.000000e+00> : vector<2x8xf32>
    %243 = vector.multi_reduction <add>, %242, %cst_113 [2] : vector<2x8x2xf32> to vector<2x8xf32>
    %244 = vector.shape_cast %243 : vector<2x8xf32> to vector<2x8x1xf32>
    %245 = vector.broadcast %244 : vector<2x8x1xf32> to vector<2x8x2xf32>
    %246 = arith.divf %242, %245 : vector<2x8x2xf32>
    %247 = vector.shape_cast %236 : vector<16x192xf32> to vector<2x8x192xf32>
    %248 = tpu.transpose %246, [0, 2, 1] : vector<2x8x2xf32> -> vector<2x2x8xf32>
    %249 = arith.truncf %248 : vector<2x2x8xf32> to vector<2x2x8xbf16>
    %250 = arith.truncf %246 : vector<2x8x2xf32> to vector<2x8x2xbf16>
    %251 = arith.truncf %247 : vector<2x8x192xf32> to vector<2x8x192xbf16>
    "tpu.trace_start"() <{level = 10 : i32, message = "bkn,bnf->bkf"}> : () -> ()
    %cst_114 = arith.constant dense<0.000000e+00> : vector<2x2x192xf32>
    %252 = tpu.matmul %249, %251, %cst_114 {dimension_numbers = #tpu.dot_dimension_numbers<[2], [1], [1], [2], [0, 0, 0, 1, 1, 2], [0], [0]>} : vector<2x2x8xbf16>, vector<2x8x192xbf16>, vector<2x2x192xf32> -> vector<2x2x192xf32>
    "tpu.trace_stop"() : () -> ()
    "tpu.trace_start"() <{level = 10 : i32, message = "bkn,bnm->bkm"}> : () -> ()
    %cst_115 = arith.constant dense<0.000000e+00> : vector<2x2x8xf32>
    %253 = tpu.matmul %249, %3, %cst_115 {dimension_numbers = #tpu.dot_dimension_numbers<[2], [1], [1], [2], [0, 0, 0, 1, 1, 2], [0], [0]>} : vector<2x2x8xbf16>, vector<2x8x8xbf16>, vector<2x2x8xf32> -> vector<2x2x8xf32>
    "tpu.trace_stop"() : () -> ()
    %254 = arith.truncf %253 : vector<2x2x8xf32> to vector<2x2x8xbf16>
    "tpu.trace_start"() <{level = 10 : i32, message = "bkm,bmj->bkj"}> : () -> ()
    %cst_116 = arith.constant dense<0.000000e+00> : vector<2x2x2xf32>
    %255 = tpu.matmul %254, %250, %cst_116 {dimension_numbers = #tpu.dot_dimension_numbers<[2], [1], [1], [2], [0, 0, 0, 1, 1, 2], [0], [0]>} : vector<2x2x8xbf16>, vector<2x8x2xbf16>, vector<2x2x2xf32> -> vector<2x2x2xf32>
    "tpu.trace_stop"() : () -> ()
    "tpu.trace_start"() <{level = 10 : i32, message = "bkn,bnj->bkj"}> : () -> ()
    %cst_117 = arith.constant dense<0.000000e+00> : vector<2x2x2xf32>
    %256 = tpu.matmul %249, %250, %cst_117 {dimension_numbers = #tpu.dot_dimension_numbers<[2], [1], [1], [2], [0, 0, 0, 1, 1, 2], [0], [0]>} : vector<2x2x8xbf16>, vector<2x8x2xbf16>, vector<2x2x2xf32> -> vector<2x2x2xf32>
    "tpu.trace_stop"() : () -> ()
    %257 = tpu.iota {dimensions = array<i32: 0>} : vector<2x2xi32>
    %258 = tpu.iota {dimensions = array<i32: 1>} : vector<2x2xi32>
    %259 = arith.cmpi eq, %257, %258 : vector<2x2xi32>
    %260 = arith.extui %259 : vector<2x2xi1> to vector<2x2xi32>
    %261 = arith.sitofp %260 : vector<2x2xi32> to vector<2x2xf32>
    %262 = arith.mulf %2, %2 : vector<2x8x8xf32>
    %263 = vector.shape_cast %262 : vector<2x8x8xf32> to vector<1x2x8x8xf32>
    %cst_118 = arith.constant dense<0.000000e+00> : vector<1xf32>
    %264 = vector.multi_reduction <add>, %263, %cst_118 [1, 2, 3] : vector<1x2x8x8xf32> to vector<1xf32>
    %265 = vector.shape_cast %264 : vector<1xf32> to vector<1x1x1x1xf32>
    %266 = vector.extract %265[0, 0, 0, 0] : f32 from vector<1x1x1x1xf32>
    %267 = vector.shape_cast %261 : vector<2x2xf32> to vector<1x2x2xf32>
    %268 = vector.broadcast %267 : vector<1x2x2xf32> to vector<2x2x2xf32>
    %269 = arith.mulf %255, %268 : vector<2x2x2xf32>
    %270 = vector.shape_cast %269 : vector<2x2x2xf32> to vector<1x2x2x2xf32>
    %cst_119 = arith.constant dense<0.000000e+00> : vector<1xf32>
    %271 = vector.multi_reduction <add>, %270, %cst_119 [1, 2, 3] : vector<1x2x2x2xf32> to vector<1xf32>
    %272 = vector.shape_cast %271 : vector<1xf32> to vector<1x1x1x1xf32>
    %273 = vector.extract %272[0, 0, 0, 0] : f32 from vector<1x1x1x1xf32>
    %cst_120 = arith.constant 2.000000e+00 : f32
    %274 = arith.mulf %cst_120, %273 : f32
    %275 = arith.subf %266, %274 : f32
    %276 = arith.mulf %256, %256 : vector<2x2x2xf32>
    %277 = vector.shape_cast %276 : vector<2x2x2xf32> to vector<1x2x2x2xf32>
    %cst_121 = arith.constant dense<0.000000e+00> : vector<1xf32>
    %278 = vector.multi_reduction <add>, %277, %cst_121 [1, 2, 3] : vector<1x2x2x2xf32> to vector<1xf32>
    %279 = vector.shape_cast %278 : vector<1xf32> to vector<1x1x1x1xf32>
    %280 = vector.extract %279[0, 0, 0, 0] : f32 from vector<1x1x1x1xf32>
    %281 = arith.addf %275, %280 : f32
    %cst_122 = arith.constant 0.000000e+00 : f32
    %282 = arith.maximumf %281, %cst_122 : f32
    %283 = math.sqrt %282 : f32
    %cst_123 = arith.constant 7.812500e-03 : f32
    %284 = arith.mulf %283, %cst_123 : f32
    %cst_124 = arith.constant 0.000000e+00 : f32
    %285 = vector.broadcast %cst_124 : f32 to vector<2x8x2xf32>
    %286 = arith.subf %285, %246 : vector<2x8x2xf32>
    %cst_125 = arith.constant 1.000000e-15 : f32
    %287 = vector.broadcast %cst_125 : f32 to vector<2x8x2xf32>
    %288 = arith.addf %246, %287 : vector<2x8x2xf32>
    %289 = math.log %288 : vector<2x8x2xf32>
    %290 = arith.mulf %286, %289 : vector<2x8x2xf32>
    %291 = vector.shape_cast %290 : vector<2x8x2xf32> to vector<1x2x8x2xf32>
    %cst_126 = arith.constant dense<0.000000e+00> : vector<1xf32>
    %292 = vector.multi_reduction <add>, %291, %cst_126 [1, 2, 3] : vector<1x2x8x2xf32> to vector<1xf32>
    %293 = vector.shape_cast %292 : vector<1xf32> to vector<1x1x1x1xf32>
    %294 = vector.extract %293[0, 0, 0, 0] : f32 from vector<1x1x1x1xf32>
    %cst_127 = arith.constant 6.250000e-02 : f32
    %295 = arith.mulf %294, %cst_127 : f32
    %c0_128 = arith.constant 0 : index
    %c0_129 = arith.constant 0 : index
    %c0_130 = arith.constant 0 : index
    %296 = vector.load %arg30[%c0_128, %c0_129, %c0_130] : memref<2x2x192xf32, #tpu.memory_space<vmem>>, vector<2x2x192xf32>
    tpu.vector_store %arg30[%c0_128, %c0_129, %c0_130], %252 {strides = array<i32>} : memref<2x2x192xf32, #tpu.memory_space<vmem>>, vector<2x2x192xf32>,
    %c0_131 = arith.constant 0 : index
    %c0_132 = arith.constant 0 : index
    %c0_133 = arith.constant 0 : index
    %297 = vector.load %arg31[%c0_131, %c0_132, %c0_133] : memref<2x2x2xf32, #tpu.memory_space<vmem>>, vector<2x2x2xf32>
    tpu.vector_store %arg31[%c0_131, %c0_132, %c0_133], %255 {strides = array<i32>} : memref<2x2x2xf32, #tpu.memory_space<vmem>>, vector<2x2x2xf32>,
    %298 = vector.broadcast %284 : f32 to vector<1x1xf32>
    %c0_134 = arith.constant 0 : index
    %c0_135 = arith.constant 0 : index
    %299 = vector.load %arg32[%c0_134, %c0_135] : memref<1x1xf32, #tpu.memory_space<vmem>>, vector<1x1xf32>
    tpu.vector_store %arg32[%c0_134, %c0_135], %298 {strides = array<i32>} : memref<1x1xf32, #tpu.memory_space<vmem>>, vector<1x1xf32>,
    %300 = vector.broadcast %295 : f32 to vector<1x1xf32>
    %c0_136 = arith.constant 0 : index
    %c0_137 = arith.constant 0 : index
    %301 = vector.load %arg33[%c0_136, %c0_137] : memref<1x1xf32, #tpu.memory_space<vmem>>, vector<1x1xf32>
    tpu.vector_store %arg33[%c0_136, %c0_137], %300 {strides = array<i32>} : memref<1x1xf32, #tpu.memory_space<vmem>>, vector<1x1xf32>,
    return
  }
}

module attributes {stable_mosaic.version = 11 : i64} {
  func.func @_embed_head_kernel(%arg0: memref<2x2x192xf32, #tpu.memory_space<vmem>>, %arg1: memref<2x2x2xf32, #tpu.memory_space<vmem>>, %arg2: memref<384x64xbf16, #tpu.memory_space<vmem>>, %arg3: memref<1x64xf32, #tpu.memory_space<vmem>>, %arg4: memref<1x64xf32, #tpu.memory_space<vmem>>, %arg5: memref<1x64xf32, #tpu.memory_space<vmem>>, %arg6: memref<128x64xbf16, #tpu.memory_space<vmem>>, %arg7: memref<1x64xf32, #tpu.memory_space<vmem>>, %arg8: memref<1x64xf32, #tpu.memory_space<vmem>>, %arg9: memref<1x64xf32, #tpu.memory_space<vmem>>, %arg10: memref<128x64xbf16, #tpu.memory_space<vmem>>, %arg11: memref<1x64xf32, #tpu.memory_space<vmem>>, %arg12: memref<1x64xf32, #tpu.memory_space<vmem>>, %arg13: memref<1x64xf32, #tpu.memory_space<vmem>>, %arg14: memref<192x64xf32, #tpu.memory_space<vmem>>, %arg15: memref<1x64xf32, #tpu.memory_space<vmem>>, %arg16: memref<64x6xf32, #tpu.memory_space<vmem>>, %arg17: memref<1x6xf32, #tpu.memory_space<vmem>>, %arg18: memref<2x6xf32, #tpu.memory_space<vmem>>) attributes {dimension_semantics = [], scalar_prefetch = 0 : i64, scratch_operands = 0 : i64, tpu.core_type = #tpu.core_type<tc>} {
    %c0 = arith.constant 0 : index
    %c0_0 = arith.constant 0 : index
    %c0_1 = arith.constant 0 : index
    %0 = vector.load %arg0[%c0, %c0_0, %c0_1] : memref<2x2x192xf32, #tpu.memory_space<vmem>>, vector<2x2x192xf32>
    %c0_2 = arith.constant 0 : index
    %c0_3 = arith.constant 0 : index
    %c0_4 = arith.constant 0 : index
    %1 = vector.load %arg1[%c0_2, %c0_3, %c0_4] : memref<2x2x2xf32, #tpu.memory_space<vmem>>, vector<2x2x2xf32>
    %2 = arith.truncf %1 : vector<2x2x2xf32> to vector<2x2x2xbf16>
    %cst = arith.constant dense<0.000000e+00> : vector<2x2xf32>
    %3 = vector.multi_reduction <add>, %1, %cst [2] : vector<2x2x2xf32> to vector<2x2xf32>
    %4 = vector.shape_cast %3 : vector<2x2xf32> to vector<2x2x1xf32>
    %cst_5 = arith.constant 1.000000e+00 : f32
    %5 = vector.broadcast %cst_5 : f32 to vector<2x2x1xf32>
    %6 = arith.maximumf %4, %5 : vector<2x2x1xf32>
    %cst_6 = arith.constant 1.000000e+00 : f32
    %7 = vector.broadcast %cst_6 : f32 to vector<2x2x1xf32>
    %8 = arith.divf %7, %6 : vector<2x2x1xf32>
    %9 = arith.truncf %0 : vector<2x2x192xf32> to vector<2x2x192xbf16>
    "tpu.trace_start"() <{level = 10 : i32, message = "bij,bjc->bic"}> : () -> ()
    %cst_7 = arith.constant dense<0.000000e+00> : vector<2x2x192xf32>
    %10 = tpu.matmul %2, %9, %cst_7 {dimension_numbers = #tpu.dot_dimension_numbers<[2], [1], [1], [2], [0, 0, 0, 1, 1, 2], [0], [0]>} : vector<2x2x2xbf16>, vector<2x2x192xbf16>, vector<2x2x192xf32> -> vector<2x2x192xf32>
    "tpu.trace_stop"() : () -> ()
    %11 = vector.broadcast %8 : vector<2x2x1xf32> to vector<2x2x192xf32>
    %12 = arith.mulf %10, %11 : vector<2x2x192xf32>
    %13 = tpu.concatenate %12, %0 in 2 : vector<2x2x192xf32>, vector<2x2x192xf32> -> vector<2x2x384xf32>
    %14 = arith.truncf %13 : vector<2x2x384xf32> to vector<2x2x384xbf16>
    %c0_8 = arith.constant 0 : index
    %c0_9 = arith.constant 0 : index
    %15 = vector.load %arg2[%c0_8, %c0_9] : memref<384x64xbf16, #tpu.memory_space<vmem>>, vector<384x64xbf16>
    %16 = vector.shape_cast %15 : vector<384x64xbf16> to vector<1x384x64xbf16>
    %17 = vector.broadcast %16 : vector<1x384x64xbf16> to vector<2x384x64xbf16>
    "tpu.trace_start"() <{level = 10 : i32, message = "bnc,bcd->bnd"}> : () -> ()
    %cst_10 = arith.constant dense<0.000000e+00> : vector<2x2x64xf32>
    %18 = tpu.matmul %14, %17, %cst_10 {dimension_numbers = #tpu.dot_dimension_numbers<[2], [1], [1], [2], [0, 0, 0, 1, 1, 2], [0], [0]>} : vector<2x2x384xbf16>, vector<2x384x64xbf16>, vector<2x2x64xf32> -> vector<2x2x64xf32>
    "tpu.trace_stop"() : () -> ()
    %c0_11 = arith.constant 0 : index
    %c0_12 = arith.constant 0 : index
    %19 = vector.load %arg3[%c0_11, %c0_12] : memref<1x64xf32, #tpu.memory_space<vmem>>, vector<1x64xf32>
    %20 = vector.shape_cast %19 : vector<1x64xf32> to vector<1x1x64xf32>
    %21 = vector.broadcast %20 : vector<1x1x64xf32> to vector<2x2x64xf32>
    %22 = arith.addf %18, %21 : vector<2x2x64xf32>
    %cst_13 = arith.constant 0.000000e+00 : f32
    %23 = vector.broadcast %cst_13 : f32 to vector<2x2x64xf32>
    %24 = arith.maximumf %22, %23 : vector<2x2x64xf32>
    %cst_14 = arith.constant dense<0.000000e+00> : vector<2x64xf32>
    %25 = vector.multi_reduction <add>, %24, %cst_14 [1] : vector<2x2x64xf32> to vector<2x64xf32>
    %26 = vector.shape_cast %25 : vector<2x64xf32> to vector<2x1x64xf32>
    %cst_15 = arith.constant dense<0.000000e+00> : vector<1x64xf32>
    %27 = vector.multi_reduction <add>, %26, %cst_15 [0] : vector<2x1x64xf32> to vector<1x64xf32>
    %28 = vector.shape_cast %27 : vector<1x64xf32> to vector<1x1x64xf32>
    %cst_16 = arith.constant 2.500000e-01 : f32
    %29 = vector.broadcast %cst_16 : f32 to vector<1x1x64xf32>
    %30 = arith.mulf %28, %29 : vector<1x1x64xf32>
    %31 = vector.broadcast %30 : vector<1x1x64xf32> to vector<2x2x64xf32>
    %32 = arith.subf %24, %31 : vector<2x2x64xf32>
    %33 = arith.mulf %32, %32 : vector<2x2x64xf32>
    %cst_17 = arith.constant dense<0.000000e+00> : vector<2x64xf32>
    %34 = vector.multi_reduction <add>, %33, %cst_17 [1] : vector<2x2x64xf32> to vector<2x64xf32>
    %35 = vector.shape_cast %34 : vector<2x64xf32> to vector<2x1x64xf32>
    %cst_18 = arith.constant dense<0.000000e+00> : vector<1x64xf32>
    %36 = vector.multi_reduction <add>, %35, %cst_18 [0] : vector<2x1x64xf32> to vector<1x64xf32>
    %37 = vector.shape_cast %36 : vector<1x64xf32> to vector<1x1x64xf32>
    %cst_19 = arith.constant 2.500000e-01 : f32
    %38 = vector.broadcast %cst_19 : f32 to vector<1x1x64xf32>
    %39 = arith.mulf %37, %38 : vector<1x1x64xf32>
    %cst_20 = arith.constant 9.99999974E-6 : f32
    %40 = vector.broadcast %cst_20 : f32 to vector<1x1x64xf32>
    %41 = arith.addf %39, %40 : vector<1x1x64xf32>
    %42 = math.rsqrt %41 : vector<1x1x64xf32>
    %43 = vector.broadcast %42 : vector<1x1x64xf32> to vector<2x2x64xf32>
    %44 = arith.mulf %32, %43 : vector<2x2x64xf32>
    %c0_21 = arith.constant 0 : index
    %c0_22 = arith.constant 0 : index
    %45 = vector.load %arg4[%c0_21, %c0_22] : memref<1x64xf32, #tpu.memory_space<vmem>>, vector<1x64xf32>
    %46 = vector.shape_cast %45 : vector<1x64xf32> to vector<1x1x64xf32>
    %47 = vector.broadcast %46 : vector<1x1x64xf32> to vector<2x2x64xf32>
    %48 = arith.mulf %44, %47 : vector<2x2x64xf32>
    %c0_23 = arith.constant 0 : index
    %c0_24 = arith.constant 0 : index
    %49 = vector.load %arg5[%c0_23, %c0_24] : memref<1x64xf32, #tpu.memory_space<vmem>>, vector<1x64xf32>
    %50 = vector.shape_cast %49 : vector<1x64xf32> to vector<1x1x64xf32>
    %51 = vector.broadcast %50 : vector<1x1x64xf32> to vector<2x2x64xf32>
    %52 = arith.addf %48, %51 : vector<2x2x64xf32>
    %53 = arith.truncf %52 : vector<2x2x64xf32> to vector<2x2x64xbf16>
    "tpu.trace_start"() <{level = 10 : i32, message = "bij,bjc->bic"}> : () -> ()
    %cst_25 = arith.constant dense<0.000000e+00> : vector<2x2x64xf32>
    %54 = tpu.matmul %2, %53, %cst_25 {dimension_numbers = #tpu.dot_dimension_numbers<[2], [1], [1], [2], [0, 0, 0, 1, 1, 2], [0], [0]>} : vector<2x2x2xbf16>, vector<2x2x64xbf16>, vector<2x2x64xf32> -> vector<2x2x64xf32>
    "tpu.trace_stop"() : () -> ()
    %55 = vector.broadcast %8 : vector<2x2x1xf32> to vector<2x2x64xf32>
    %56 = arith.mulf %54, %55 : vector<2x2x64xf32>
    %57 = tpu.concatenate %56, %52 in 2 : vector<2x2x64xf32>, vector<2x2x64xf32> -> vector<2x2x128xf32>
    %58 = arith.truncf %57 : vector<2x2x128xf32> to vector<2x2x128xbf16>
    %c0_26 = arith.constant 0 : index
    %c0_27 = arith.constant 0 : index
    %59 = vector.load %arg6[%c0_26, %c0_27] : memref<128x64xbf16, #tpu.memory_space<vmem>>, vector<128x64xbf16>
    %60 = vector.shape_cast %59 : vector<128x64xbf16> to vector<1x128x64xbf16>
    %61 = vector.broadcast %60 : vector<1x128x64xbf16> to vector<2x128x64xbf16>
    "tpu.trace_start"() <{level = 10 : i32, message = "bnc,bcd->bnd"}> : () -> ()
    %cst_28 = arith.constant dense<0.000000e+00> : vector<2x2x64xf32>
    %62 = tpu.matmul %58, %61, %cst_28 {dimension_numbers = #tpu.dot_dimension_numbers<[2], [1], [1], [2], [0, 0, 0, 1, 1, 2], [0], [0]>} : vector<2x2x128xbf16>, vector<2x128x64xbf16>, vector<2x2x64xf32> -> vector<2x2x64xf32>
    "tpu.trace_stop"() : () -> ()
    %c0_29 = arith.constant 0 : index
    %c0_30 = arith.constant 0 : index
    %63 = vector.load %arg7[%c0_29, %c0_30] : memref<1x64xf32, #tpu.memory_space<vmem>>, vector<1x64xf32>
    %64 = vector.shape_cast %63 : vector<1x64xf32> to vector<1x1x64xf32>
    %65 = vector.broadcast %64 : vector<1x1x64xf32> to vector<2x2x64xf32>
    %66 = arith.addf %62, %65 : vector<2x2x64xf32>
    %cst_31 = arith.constant 0.000000e+00 : f32
    %67 = vector.broadcast %cst_31 : f32 to vector<2x2x64xf32>
    %68 = arith.maximumf %66, %67 : vector<2x2x64xf32>
    %cst_32 = arith.constant dense<0.000000e+00> : vector<2x64xf32>
    %69 = vector.multi_reduction <add>, %68, %cst_32 [1] : vector<2x2x64xf32> to vector<2x64xf32>
    %70 = vector.shape_cast %69 : vector<2x64xf32> to vector<2x1x64xf32>
    %cst_33 = arith.constant dense<0.000000e+00> : vector<1x64xf32>
    %71 = vector.multi_reduction <add>, %70, %cst_33 [0] : vector<2x1x64xf32> to vector<1x64xf32>
    %72 = vector.shape_cast %71 : vector<1x64xf32> to vector<1x1x64xf32>
    %cst_34 = arith.constant 2.500000e-01 : f32
    %73 = vector.broadcast %cst_34 : f32 to vector<1x1x64xf32>
    %74 = arith.mulf %72, %73 : vector<1x1x64xf32>
    %75 = vector.broadcast %74 : vector<1x1x64xf32> to vector<2x2x64xf32>
    %76 = arith.subf %68, %75 : vector<2x2x64xf32>
    %77 = arith.mulf %76, %76 : vector<2x2x64xf32>
    %cst_35 = arith.constant dense<0.000000e+00> : vector<2x64xf32>
    %78 = vector.multi_reduction <add>, %77, %cst_35 [1] : vector<2x2x64xf32> to vector<2x64xf32>
    %79 = vector.shape_cast %78 : vector<2x64xf32> to vector<2x1x64xf32>
    %cst_36 = arith.constant dense<0.000000e+00> : vector<1x64xf32>
    %80 = vector.multi_reduction <add>, %79, %cst_36 [0] : vector<2x1x64xf32> to vector<1x64xf32>
    %81 = vector.shape_cast %80 : vector<1x64xf32> to vector<1x1x64xf32>
    %cst_37 = arith.constant 2.500000e-01 : f32
    %82 = vector.broadcast %cst_37 : f32 to vector<1x1x64xf32>
    %83 = arith.mulf %81, %82 : vector<1x1x64xf32>
    %cst_38 = arith.constant 9.99999974E-6 : f32
    %84 = vector.broadcast %cst_38 : f32 to vector<1x1x64xf32>
    %85 = arith.addf %83, %84 : vector<1x1x64xf32>
    %86 = math.rsqrt %85 : vector<1x1x64xf32>
    %87 = vector.broadcast %86 : vector<1x1x64xf32> to vector<2x2x64xf32>
    %88 = arith.mulf %76, %87 : vector<2x2x64xf32>
    %c0_39 = arith.constant 0 : index
    %c0_40 = arith.constant 0 : index
    %89 = vector.load %arg8[%c0_39, %c0_40] : memref<1x64xf32, #tpu.memory_space<vmem>>, vector<1x64xf32>
    %90 = vector.shape_cast %89 : vector<1x64xf32> to vector<1x1x64xf32>
    %91 = vector.broadcast %90 : vector<1x1x64xf32> to vector<2x2x64xf32>
    %92 = arith.mulf %88, %91 : vector<2x2x64xf32>
    %c0_41 = arith.constant 0 : index
    %c0_42 = arith.constant 0 : index
    %93 = vector.load %arg9[%c0_41, %c0_42] : memref<1x64xf32, #tpu.memory_space<vmem>>, vector<1x64xf32>
    %94 = vector.shape_cast %93 : vector<1x64xf32> to vector<1x1x64xf32>
    %95 = vector.broadcast %94 : vector<1x1x64xf32> to vector<2x2x64xf32>
    %96 = arith.addf %92, %95 : vector<2x2x64xf32>
    %97 = arith.truncf %96 : vector<2x2x64xf32> to vector<2x2x64xbf16>
    "tpu.trace_start"() <{level = 10 : i32, message = "bij,bjc->bic"}> : () -> ()
    %cst_43 = arith.constant dense<0.000000e+00> : vector<2x2x64xf32>
    %98 = tpu.matmul %2, %97, %cst_43 {dimension_numbers = #tpu.dot_dimension_numbers<[2], [1], [1], [2], [0, 0, 0, 1, 1, 2], [0], [0]>} : vector<2x2x2xbf16>, vector<2x2x64xbf16>, vector<2x2x64xf32> -> vector<2x2x64xf32>
    "tpu.trace_stop"() : () -> ()
    %99 = vector.broadcast %8 : vector<2x2x1xf32> to vector<2x2x64xf32>
    %100 = arith.mulf %98, %99 : vector<2x2x64xf32>
    %101 = tpu.concatenate %100, %96 in 2 : vector<2x2x64xf32>, vector<2x2x64xf32> -> vector<2x2x128xf32>
    %102 = arith.truncf %101 : vector<2x2x128xf32> to vector<2x2x128xbf16>
    %c0_44 = arith.constant 0 : index
    %c0_45 = arith.constant 0 : index
    %103 = vector.load %arg10[%c0_44, %c0_45] : memref<128x64xbf16, #tpu.memory_space<vmem>>, vector<128x64xbf16>
    %104 = vector.shape_cast %103 : vector<128x64xbf16> to vector<1x128x64xbf16>
    %105 = vector.broadcast %104 : vector<1x128x64xbf16> to vector<2x128x64xbf16>
    "tpu.trace_start"() <{level = 10 : i32, message = "bnc,bcd->bnd"}> : () -> ()
    %cst_46 = arith.constant dense<0.000000e+00> : vector<2x2x64xf32>
    %106 = tpu.matmul %102, %105, %cst_46 {dimension_numbers = #tpu.dot_dimension_numbers<[2], [1], [1], [2], [0, 0, 0, 1, 1, 2], [0], [0]>} : vector<2x2x128xbf16>, vector<2x128x64xbf16>, vector<2x2x64xf32> -> vector<2x2x64xf32>
    "tpu.trace_stop"() : () -> ()
    %c0_47 = arith.constant 0 : index
    %c0_48 = arith.constant 0 : index
    %107 = vector.load %arg11[%c0_47, %c0_48] : memref<1x64xf32, #tpu.memory_space<vmem>>, vector<1x64xf32>
    %108 = vector.shape_cast %107 : vector<1x64xf32> to vector<1x1x64xf32>
    %109 = vector.broadcast %108 : vector<1x1x64xf32> to vector<2x2x64xf32>
    %110 = arith.addf %106, %109 : vector<2x2x64xf32>
    %cst_49 = arith.constant 0.000000e+00 : f32
    %111 = vector.broadcast %cst_49 : f32 to vector<2x2x64xf32>
    %112 = arith.maximumf %110, %111 : vector<2x2x64xf32>
    %cst_50 = arith.constant dense<0.000000e+00> : vector<2x64xf32>
    %113 = vector.multi_reduction <add>, %112, %cst_50 [1] : vector<2x2x64xf32> to vector<2x64xf32>
    %114 = vector.shape_cast %113 : vector<2x64xf32> to vector<2x1x64xf32>
    %cst_51 = arith.constant dense<0.000000e+00> : vector<1x64xf32>
    %115 = vector.multi_reduction <add>, %114, %cst_51 [0] : vector<2x1x64xf32> to vector<1x64xf32>
    %116 = vector.shape_cast %115 : vector<1x64xf32> to vector<1x1x64xf32>
    %cst_52 = arith.constant 2.500000e-01 : f32
    %117 = vector.broadcast %cst_52 : f32 to vector<1x1x64xf32>
    %118 = arith.mulf %116, %117 : vector<1x1x64xf32>
    %119 = vector.broadcast %118 : vector<1x1x64xf32> to vector<2x2x64xf32>
    %120 = arith.subf %112, %119 : vector<2x2x64xf32>
    %121 = arith.mulf %120, %120 : vector<2x2x64xf32>
    %cst_53 = arith.constant dense<0.000000e+00> : vector<2x64xf32>
    %122 = vector.multi_reduction <add>, %121, %cst_53 [1] : vector<2x2x64xf32> to vector<2x64xf32>
    %123 = vector.shape_cast %122 : vector<2x64xf32> to vector<2x1x64xf32>
    %cst_54 = arith.constant dense<0.000000e+00> : vector<1x64xf32>
    %124 = vector.multi_reduction <add>, %123, %cst_54 [0] : vector<2x1x64xf32> to vector<1x64xf32>
    %125 = vector.shape_cast %124 : vector<1x64xf32> to vector<1x1x64xf32>
    %cst_55 = arith.constant 2.500000e-01 : f32
    %126 = vector.broadcast %cst_55 : f32 to vector<1x1x64xf32>
    %127 = arith.mulf %125, %126 : vector<1x1x64xf32>
    %cst_56 = arith.constant 9.99999974E-6 : f32
    %128 = vector.broadcast %cst_56 : f32 to vector<1x1x64xf32>
    %129 = arith.addf %127, %128 : vector<1x1x64xf32>
    %130 = math.rsqrt %129 : vector<1x1x64xf32>
    %131 = vector.broadcast %130 : vector<1x1x64xf32> to vector<2x2x64xf32>
    %132 = arith.mulf %120, %131 : vector<2x2x64xf32>
    %c0_57 = arith.constant 0 : index
    %c0_58 = arith.constant 0 : index
    %133 = vector.load %arg12[%c0_57, %c0_58] : memref<1x64xf32, #tpu.memory_space<vmem>>, vector<1x64xf32>
    %134 = vector.shape_cast %133 : vector<1x64xf32> to vector<1x1x64xf32>
    %135 = vector.broadcast %134 : vector<1x1x64xf32> to vector<2x2x64xf32>
    %136 = arith.mulf %132, %135 : vector<2x2x64xf32>
    %c0_59 = arith.constant 0 : index
    %c0_60 = arith.constant 0 : index
    %137 = vector.load %arg13[%c0_59, %c0_60] : memref<1x64xf32, #tpu.memory_space<vmem>>, vector<1x64xf32>
    %138 = vector.shape_cast %137 : vector<1x64xf32> to vector<1x1x64xf32>
    %139 = vector.broadcast %138 : vector<1x1x64xf32> to vector<2x2x64xf32>
    %140 = arith.addf %136, %139 : vector<2x2x64xf32>
    %141 = tpu.concatenate %52, %96, %140 in 2 : vector<2x2x64xf32>, vector<2x2x64xf32>, vector<2x2x64xf32> -> vector<2x2x192xf32>
    %cst_61 = arith.constant dense<0.000000e+00> : vector<2x192xf32>
    %142 = vector.multi_reduction <add>, %141, %cst_61 [1] : vector<2x2x192xf32> to vector<2x192xf32>
    %cst_62 = arith.constant 5.000000e-01 : f32
    %143 = vector.broadcast %cst_62 : f32 to vector<2x192xf32>
    %144 = arith.mulf %142, %143 : vector<2x192xf32>
    %c0_63 = arith.constant 0 : index
    %c0_64 = arith.constant 0 : index
    %145 = vector.load %arg14[%c0_63, %c0_64] : memref<192x64xf32, #tpu.memory_space<vmem>>, vector<192x64xf32>
    %cst_65 = arith.constant dense<0.000000e+00> : vector<2x64xf32>
    %146 = tpu.matmul %144, %145, %cst_65 {dimension_numbers = #tpu.dot_dimension_numbers<[1], [0], [0], [1], [0, 0, 1, 1], [], []>} : vector<2x192xf32>, vector<192x64xf32>, vector<2x64xf32> -> vector<2x64xf32>
    %c0_66 = arith.constant 0 : index
    %c0_67 = arith.constant 0 : index
    %147 = vector.load %arg15[%c0_66, %c0_67] : memref<1x64xf32, #tpu.memory_space<vmem>>, vector<1x64xf32>
    %148 = vector.broadcast %147 : vector<1x64xf32> to vector<2x64xf32>
    %149 = arith.addf %146, %148 : vector<2x64xf32>
    %cst_68 = arith.constant 0.000000e+00 : f32
    %150 = vector.broadcast %cst_68 : f32 to vector<2x64xf32>
    %151 = arith.maximumf %149, %150 : vector<2x64xf32>
    %c0_69 = arith.constant 0 : index
    %c0_70 = arith.constant 0 : index
    %152 = vector.load %arg16[%c0_69, %c0_70] : memref<64x6xf32, #tpu.memory_space<vmem>>, vector<64x6xf32>
    %cst_71 = arith.constant dense<0.000000e+00> : vector<2x6xf32>
    %153 = tpu.matmul %151, %152, %cst_71 {dimension_numbers = #tpu.dot_dimension_numbers<[1], [0], [0], [1], [0, 0, 1, 1], [], []>} : vector<2x64xf32>, vector<64x6xf32>, vector<2x6xf32> -> vector<2x6xf32>
    %c0_72 = arith.constant 0 : index
    %c0_73 = arith.constant 0 : index
    %154 = vector.load %arg17[%c0_72, %c0_73] : memref<1x6xf32, #tpu.memory_space<vmem>>, vector<1x6xf32>
    %155 = vector.broadcast %154 : vector<1x6xf32> to vector<2x6xf32>
    %156 = arith.addf %153, %155 : vector<2x6xf32>
    %cst_74 = arith.constant dense<0xFF800000> : vector<2xf32>
    %157 = vector.multi_reduction <maximumf>, %156, %cst_74 [1] : vector<2x6xf32> to vector<2xf32>
    %158 = vector.shape_cast %157 : vector<2xf32> to vector<2x1xf32>
    %159 = vector.broadcast %158 : vector<2x1xf32> to vector<2x6xf32>
    %160 = arith.subf %156, %159 : vector<2x6xf32>
    %161 = math.exp %160 : vector<2x6xf32>
    %cst_75 = arith.constant dense<0.000000e+00> : vector<2xf32>
    %162 = vector.multi_reduction <add>, %161, %cst_75 [1] : vector<2x6xf32> to vector<2xf32>
    %163 = vector.shape_cast %162 : vector<2xf32> to vector<2x1xf32>
    %164 = math.log %163 : vector<2x1xf32>
    %165 = vector.broadcast %164 : vector<2x1xf32> to vector<2x6xf32>
    %166 = arith.subf %160, %165 : vector<2x6xf32>
    %c0_76 = arith.constant 0 : index
    %c0_77 = arith.constant 0 : index
    %167 = vector.load %arg18[%c0_76, %c0_77] : memref<2x6xf32, #tpu.memory_space<vmem>>, vector<2x6xf32>
    tpu.vector_store %arg18[%c0_76, %c0_77], %166 {strides = array<i32>} : memref<2x6xf32, #tpu.memory_space<vmem>>, vector<2x6xf32>,
    return
  }
}

</mosaic_0001>

<bundles_post_ra>
// kernel: graphsage_diffpool_forward.5
= control target key start
LH: loop header
LB: loop body
LE: loop exit
PB: predicated region body
PF: predicated region fallthrough
CT: control target
= control target key end

     0   :  { %s3346_s0 = inlined_call_operand.hbm [shape: f32[2,2,192], index: 0, kind: input, shape index: {}]   ;;  %s3347_s1 = inlined_call_operand.hbm [shape: f32[2,2,2], index: 1, kind: input, shape index: {}]   ;;  %s3348_s2 = inlined_call_operand.hbm [shape: bf16[384,64], index: 2, kind: input, shape index: {}]   ;;  %s3349_s3 = inlined_call_operand.hbm [shape: f32[1,64], index: 3, kind: input, shape index: {}]   ;;  %s3350_s4 = inlined_call_operand.hbm [shape: f32[1,64], index: 4, kind: input, shape index: {}]   ;;  %s3351_s5 = inlined_call_operand.hbm [shape: f32[1,64], index: 5, kind: input, shape index: {}]   ;;  %s3352_s6 = inlined_call_operand.hbm [shape: bf16[128,64], index: 6, kind: input, shape index: {}]   ;;  %s3353_s7 = inlined_call_operand.hbm [shape: f32[1,64], index: 7, kind: input, shape index: {}]   ;;  %s3354_s8 = inlined_call_operand.hbm [shape: f32[1,64], index: 8, kind: input, shape index: {}]   ;;  %s3355_s9 = inlined_call_operand.hbm [shape: f32[1,64], index: 9, kind: input, shape index: {}]   ;;  %s3356_s10 = inlined_call_operand.hbm [shape: bf16[128,64], index: 10, kind: input, shape index: {}]   ;;  %s3357_s11 = inlined_call_operand.hbm [shape: f32[1,64], index: 11, kind: input, shape index: {}]   ;;  %s3358_s12 = inlined_call_operand.hbm [shape: f32[1,64], index: 12, kind: input, shape index: {}]   ;;  %s3359_s13 = inlined_call_operand.hbm [shape: f32[1,64], index: 13, kind: input, shape index: {}]   ;;  %s3360_s14 = inlined_call_operand.hbm [shape: f32[192,64], index: 14, kind: input, shape index: {}]   ;;  %s3361_s15 = inlined_call_operand.hbm [shape: f32[1,64], index: 15, kind: input, shape index: {}]   ;;  %s3362_s16 = inlined_call_operand.hbm [shape: f32[64,6], index: 16, kind: input, shape index: {}]   ;;  %s3363_s17 = inlined_call_operand.hbm [shape: f32[1,6], index: 17, kind: input, shape index: {}]   ;;  %s3364_s18 = inlined_call_operand.hbm [shape: f32[2,6], index: 18, kind: output, shape index: {}]  }
   0x1   :  { %3370 = sst [smem:[#allocation43_spill]] %s3346_s0 }
   0x2   :  { %3371 = sst [smem:[#allocation44_spill]] %s3347_s1 }
   0x3   :  { %3372 = sst [smem:[#allocation45_spill]] %s3348_s2 }
   0x4   :  { %3373 = sst [smem:[#allocation46_spill]] %s3363_s17 }
   0x5   :  { %3374 = sst [smem:[#allocation47_spill]] %s3364_s18 }
   0x6   :  { %23 = vsyncpa [#allocation3], 0 }
   0x7   :  { %24 = vsyncpa [#allocation6], 0 }
   0x8   :  { %25 = vsyncpa [#allocation9], 0 }
   0x9   :  { %26 = vsyncpa [#allocation12], 0 }
   0xa   :  { %27 = vsyncpa [#allocation15], 0 }
   0xb   :  { %28 = vsyncpa [#allocation18], 0 }
   0xc   :  { %29 = vsyncpa [#allocation21], 0 }
   0xd   :  { %30 = vsyncpa [#allocation24], 0 }
   0xe   :  { %31 = vsyncpa [#allocation27], 0 }
   0xf   :  { %32 = vsyncpa [#allocation30], 0 }
  0x10   :  { %33 = vsyncpa [#allocation4], 0  ;;  %s2710_s27 = smov [#allocation5]   ;;  %s3375_s0 = sld [smem:[#allocation44_spill]] }
  0x11   :  { %s51_s28 = sshll.u32 %s2710_s27, 4  ;;  %s52_s28 = int_to_ptr.vmem [resolvable:$true] %s51_s28 }
  0x16   :  { %s2270_s19 = scalar_lea.hbm %s3375_s0, 64 }
  0x17   :  { %p2271_p0 = scmp.ne.s32.totalorder %s3375_s0, %s2270_s19  ;;  %p2274_p1 = scmp.lt.u32.totalorder %s2270_s19, %s3375_s0 }
  0x19   :  { %p2276_p2 = pnand %p2274_p1, %p2271_p0 }
  0x1b   :  { %2279 = shalt.err (!%p2276_p2)
}
  0x1c   :  { %s2280_s2 = scalar_lea.vmem %s52_s28, 64  ;;  %p2285_p4 = scmp.lt.s32.totalorder %s52_s28, %s52_s28 }
  0x1d   :  { %p2281_p3 = scmp.ne.s32.totalorder %s52_s28, %s2280_s2  ;;  %p2286_p5 = scmp.lt.s32.totalorder %s2280_s2, %s2280_s2 }
  0x1f   :  { %p2287_p6 = por %p2286_p5, %p2285_p4 }
  0x21   :  { %p2288_p7 = pnand %p2287_p6, %p2281_p3 }
  0x23   :  { %2291 = shalt.err (!%p2288_p7)
}
  0x24   :  { %s2711_s23 = smov 32   ;;  %s2712_s24 = smov 2  }
  0x25   :  { %57 = dma.hbm_to_vmem [thread:$0]  %s3375_s0, 64, %s52_s28, [#allocation6], %s2711_s23, %s2711_s23, %s2712_s24  }
  0x26   :  { %s2713_s27 = smov [#allocation8]   ;;  %s2714_s30 = smov [#allocation11]  }
  0x27   :  { %s76_s29 = sshll.u32 %s2713_s27, 4  ;;  %s96_s19 = sshll.u32 %s2714_s30, 4  ;;  %s77_s29 = int_to_ptr.vmem [resolvable:$true] %s76_s29  ;;  %s97_s19 = int_to_ptr.vmem [resolvable:$true] %s96_s19 }
  0x28   :  { %s2292_s21 = scalar_lea.hbm %s3349_s3, 16 }
  0x29   :  { %p2293_p8 = scmp.ne.s32.totalorder %s3349_s3, %s2292_s21  ;;  %p2296_p9 = scmp.lt.u32.totalorder %s2292_s21, %s3349_s3 }
  0x2b   :  { %p2298_p10 = pnand %p2296_p9, %p2293_p8 }
  0x2d   :  { %2301 = shalt.err (!%p2298_p10)
}
  0x2e   :  { %s2302_s28 = scalar_lea.vmem %s77_s29, 16  ;;  %s2306_s0 = scalar_lea.vmem %s77_s29, 32 }
  0x2f   :  { %p2303_p11 = scmp.ne.s32.totalorder %s77_s29, %s2302_s28  ;;  %p2307_p12 = scmp.lt.s32.totalorder %s77_s29, %s77_s29 }
  0x30   :  { %p2308_p13 = scmp.lt.s32.totalorder %s2306_s0, %s2302_s28 }
  0x32   :  { %p2309_p0 = por %p2308_p13, %p2307_p12 }
  0x34   :  { %p2310_p1 = pnand %p2309_p0, %p2303_p11 }
  0x36   :  { %2313 = shalt.err (!%p2310_p1)
}
  0x37   :  { %79 = dma.hbm_to_vmem [thread:$0]  %s3349_s3, 16, %s77_s29, [#allocation9]  }
  0x38   :  { %s2314_s17 = scalar_lea.hbm %s3351_s5, 16 }
  0x39   :  { %p2315_p2 = scmp.ne.s32.totalorder %s3351_s5, %s2314_s17  ;;  %p2318_p3 = scmp.lt.u32.totalorder %s2314_s17, %s3351_s5 }
  0x3b   :  { %p2320_p4 = pnand %p2318_p3, %p2315_p2 }
  0x3d   :  { %2323 = shalt.err (!%p2320_p4)
}
  0x3e   :  { %s2324_s20 = scalar_lea.vmem %s97_s19, 16  ;;  %s2328_s21 = scalar_lea.vmem %s97_s19, 32 }
  0x3f   :  { %p2325_p5 = scmp.ne.s32.totalorder %s97_s19, %s2324_s20  ;;  %p2329_p6 = scmp.lt.s32.totalorder %s97_s19, %s97_s19 }
  0x40   :  { %p2330_p7 = scmp.lt.s32.totalorder %s2328_s21, %s2324_s20 }
  0x42   :  { %p2331_p8 = por %p2330_p7, %p2329_p6 }
  0x44   :  { %p2332_p9 = pnand %p2331_p8, %p2325_p5 }
  0x46   :  { %2335 = shalt.err (!%p2332_p9)
}
  0x47   :  { %99 = dma.hbm_to_vmem [thread:$0]  %s3351_s5, 16, %s97_s19, [#allocation12]  }
  0x48   :  { %s2715_s22 = smov [#allocation14]   ;;  %s2716_s28 = smov [#allocation17]  }
  0x49   :  { %s118_s2 = sshll.u32 %s2715_s22, 4  ;;  %s138_s0 = sshll.u32 %s2716_s28, 4  ;;  %s119_s2 = int_to_ptr.vmem [resolvable:$true] %s118_s2  ;;  %s139_s0 = int_to_ptr.vmem [resolvable:$true] %s138_s0 }
  0x4a   :  { %s2336_s25 = scalar_lea.hbm %s3353_s7, 16 }
  0x4b   :  { %p2337_p10 = scmp.ne.s32.totalorder %s3353_s7, %s2336_s25  ;;  %p2340_p11 = scmp.lt.u32.totalorder %s2336_s25, %s3353_s7 }
  0x4d   :  { %p2342_p12 = pnand %p2340_p11, %p2337_p10 }
  0x4f   :  { %2345 = shalt.err (!%p2342_p12)
}
  0x50   :  { %s2346_s5 = scalar_lea.vmem %s119_s2, 16  ;;  %s2350_s19 = scalar_lea.vmem %s119_s2, 32 }
  0x51   :  { %p2347_p13 = scmp.ne.s32.totalorder %s119_s2, %s2346_s5  ;;  %p2351_p0 = scmp.lt.s32.totalorder %s119_s2, %s119_s2 }
  0x52   :  { %p2352_p1 = scmp.lt.s32.totalorder %s2350_s19, %s2346_s5 }
  0x54   :  { %p2353_p2 = por %p2352_p1, %p2351_p0 }
  0x56   :  { %p2354_p3 = pnand %p2353_p2, %p2347_p13 }
  0x58   :  { %2357 = shalt.err (!%p2354_p3)
}
  0x59   :  { %121 = dma.hbm_to_vmem [thread:$0]  %s3353_s7, 16, %s119_s2, [#allocation15]  }
  0x5a   :  { %s2358_s3 = scalar_lea.hbm %s3355_s9, 16 }
  0x5b   :  { %p2359_p4 = scmp.ne.s32.totalorder %s3355_s9, %s2358_s3  ;;  %p2362_p5 = scmp.lt.u32.totalorder %s2358_s3, %s3355_s9 }
  0x5d   :  { %p2364_p6 = pnand %p2362_p5, %p2359_p4 }
  0x5f   :  { %2367 = shalt.err (!%p2364_p6)
}
  0x60   :  { %s2368_s24 = scalar_lea.vmem %s139_s0, 16  ;;  %s2372_s25 = scalar_lea.vmem %s139_s0, 32 }
  0x61   :  { %p2369_p7 = scmp.ne.s32.totalorder %s139_s0, %s2368_s24  ;;  %p2373_p8 = scmp.lt.s32.totalorder %s139_s0, %s139_s0 }
  0x62   :  { %p2374_p9 = scmp.lt.s32.totalorder %s2372_s25, %s2368_s24 }
  0x64   :  { %p2375_p10 = por %p2374_p9, %p2373_p8 }
  0x66   :  { %p2376_p11 = pnand %p2375_p10, %p2369_p7 }
  0x68   :  { %2379 = shalt.err (!%p2376_p11)
}
  0x69   :  { %141 = dma.hbm_to_vmem [thread:$0]  %s3355_s9, 16, %s139_s0, [#allocation18]  }
  0x6a   :  { %s2717_s26 = smov [#allocation20]   ;;  %s2718_s18 = smov [#allocation23]  }
  0x6b   :  { %s160_s17 = sshll.u32 %s2717_s26, 4  ;;  %s180_s27 = sshll.u32 %s2718_s18, 4  ;;  %s161_s17 = int_to_ptr.vmem [resolvable:$true] %s160_s17  ;;  %s181_s27 = int_to_ptr.vmem [resolvable:$true] %s180_s27 }
  0x6c   :  { %s2380_s30 = scalar_lea.hbm %s3357_s11, 16 }
  0x6d   :  { %p2381_p12 = scmp.ne.s32.totalorder %s3357_s11, %s2380_s30  ;;  %p2384_p13 = scmp.lt.u32.totalorder %s2380_s30, %s3357_s11 }
  0x6f   :  { %p2386_p0 = pnand %p2384_p13, %p2381_p12 }
  0x71   :  { %2389 = shalt.err (!%p2386_p0)
}
  0x72   :  { %s2390_s9 = scalar_lea.vmem %s161_s17, 16  ;;  %s2394_s0 = scalar_lea.vmem %s161_s17, 32 }
  0x73   :  { %p2391_p1 = scmp.ne.s32.totalorder %s161_s17, %s2390_s9  ;;  %p2395_p2 = scmp.lt.s32.totalorder %s161_s17, %s161_s17 }
  0x74   :  { %p2396_p3 = scmp.lt.s32.totalorder %s2394_s0, %s2390_s9 }
  0x76   :  { %p2397_p4 = por %p2396_p3, %p2395_p2 }
  0x78   :  { %p2398_p5 = pnand %p2397_p4, %p2391_p1 }
  0x7a   :  { %2401 = shalt.err (!%p2398_p5)
}
  0x7b   :  { %163 = dma.hbm_to_vmem [thread:$0]  %s3357_s11, 16, %s161_s17, [#allocation21]  }
  0x7c   :  { %s2402_s24 = scalar_lea.hbm %s3359_s13, 16 }
  0x7d   :  { %p2403_p6 = scmp.ne.s32.totalorder %s3359_s13, %s2402_s24  ;;  %p2406_p7 = scmp.lt.u32.totalorder %s2402_s24, %s3359_s13 }
  0x7f   :  { %p2408_p8 = pnand %p2406_p7, %p2403_p6 }
  0x81   :  { %2411 = shalt.err (!%p2408_p8)
}
  0x82   :  { %s2412_s18 = scalar_lea.vmem %s181_s27, 16  ;;  %s2416_s5 = scalar_lea.vmem %s181_s27, 32 }
  0x83   :  { %p2413_p9 = scmp.ne.s32.totalorder %s181_s27, %s2412_s18  ;;  %p2417_p10 = scmp.lt.s32.totalorder %s181_s27, %s181_s27 }
  0x84   :  { %p2418_p11 = scmp.lt.s32.totalorder %s2416_s5, %s2412_s18 }
  0x86   :  { %p2419_p12 = por %p2418_p11, %p2417_p10 }
  0x88   :  { %p2420_p13 = pnand %p2419_p12, %p2413_p9 }
  0x8a   :  { %2423 = shalt.err (!%p2420_p13)
}
  0x8b   :  { %183 = dma.hbm_to_vmem [thread:$0]  %s3359_s13, 16, %s181_s27, [#allocation24]  }
  0x8c   :  { %s2719_s19 = smov [#allocation26]   ;;  %s2720_s1 = smov [#allocation2]  }
  0x8d   :  { %s202_s30 = sshll.u32 %s2719_s19, 4  ;;  %s39_s20 = sshll.u32 %s2720_s1, 4  ;;  %s203_s30 = int_to_ptr.vmem [resolvable:$true] %s202_s30  ;;  %s40_s20 = int_to_ptr.vmem [resolvable:$true] %s39_s20 }
  0x8e   :  { %s2424_s9 = scalar_lea.hbm %s3361_s15, 16 }
  0x8f   :  { %p2425_p0 = scmp.ne.s32.totalorder %s3361_s15, %s2424_s9  ;;  %p2428_p1 = scmp.lt.u32.totalorder %s2424_s9, %s3361_s15 }
  0x91   :  { %p2430_p2 = pnand %p2428_p1, %p2425_p0 }
  0x93   :  { %2433 = shalt.err (!%p2430_p2)
}
  0x94   :  { %s2434_s13 = scalar_lea.vmem %s203_s30, 16  ;;  %s2438_s27 = scalar_lea.vmem %s203_s30, 32 }
  0x95   :  { %p2435_p3 = scmp.ne.s32.totalorder %s203_s30, %s2434_s13  ;;  %p2439_p4 = scmp.lt.s32.totalorder %s203_s30, %s203_s30 }
  0x96   :  { %p2440_p5 = scmp.lt.s32.totalorder %s2438_s27, %s2434_s13 }
  0x98   :  { %p2441_p6 = por %p2440_p5, %p2439_p4 }
  0x9a   :  { %p2442_p7 = pnand %p2441_p6, %p2435_p3 }
  0x9c   :  { %2445 = shalt.err (!%p2442_p7)
}
  0x9d   :  { %205 = dma.hbm_to_vmem [thread:$0]  %s3361_s15, 16, %s203_s30, [#allocation27]  }
  0x9e   :  { %s3376_s2 = sld [smem:[#allocation43_spill]] }
  0xa4   :  { %s2446_s26 = scalar_lea.hbm %s3376_s2, 128 }
  0xa5   :  { %p2447_p8 = scmp.ne.s32.totalorder %s3376_s2, %s2446_s26  ;;  %p2450_p9 = scmp.lt.u32.totalorder %s2446_s26, %s3376_s2 }
  0xa7   :  { %p2452_p10 = pnand %p2450_p9, %p2447_p8 }
  0xa9   :  { %2455 = shalt.err (!%p2452_p10)
}
  0xaa   :  { %s2456_s19 = scalar_lea.vmem %s40_s20, 128  ;;  %p2461_p12 = scmp.lt.s32.totalorder %s40_s20, %s40_s20 }
  0xab   :  { %p2457_p11 = scmp.ne.s32.totalorder %s40_s20, %s2456_s19  ;;  %p2462_p13 = scmp.lt.s32.totalorder %s2456_s19, %s2456_s19 }
  0xad   :  { %p2463_p0 = por %p2462_p13, %p2461_p12 }
  0xaf   :  { %p2464_p1 = pnand %p2463_p0, %p2457_p11 }
  0xb1   :  { %2467 = shalt.err (!%p2464_p1)
}
  0xb2   :  { %s2721_s15 = smov 64   ;;  %s2722_s30 = smov 4  }
  0xb3   :  { %45 = dma.hbm_to_vmem [thread:$0]  %s3376_s2, 128, %s40_s20, [#allocation3], %s2721_s15, %s2721_s15, %s2722_s30  }
  0xb4   :  { %s2723_s3 = smov [#allocation7]   ;;  %s2724_s0 = smov [#allocation10]  }
  0xb5   :  { %s63_s9 = sshll.u32 %s2723_s3, 4  ;;  %s86_s29 = sshll.u32 %s2724_s0, 4  ;;  %s64_s9 = int_to_ptr.vmem [resolvable:$true] %s63_s9  ;;  %s87_s29 = int_to_ptr.vmem [resolvable:$true] %s86_s29 }
  0xb6   :  { %s3377_s13 = sld [smem:[#allocation45_spill]] }
  0xbc   :  { %s2468_s27 = scalar_lea.hbm %s3377_s13, 3072 }
  0xbd   :  { %p2469_p2 = scmp.ne.s32.totalorder %s3377_s13, %s2468_s27  ;;  %p2472_p3 = scmp.lt.u32.totalorder %s2468_s27, %s3377_s13 }
  0xbf   :  { %p2474_p4 = pnand %p2472_p3, %p2469_p2 }
  0xc1   :  { %2477 = shalt.err (!%p2474_p4)
}
  0xc2   :  { %s2478_s20 = scalar_lea.vmem %s64_s9, 3072  ;;  %p2483_p6 = scmp.lt.s32.totalorder %s64_s9, %s64_s9 }
  0xc3   :  { %p2479_p5 = scmp.ne.s32.totalorder %s64_s9, %s2478_s20  ;;  %p2484_p7 = scmp.lt.s32.totalorder %s2478_s20, %s2478_s20 }
  0xc5   :  { %p2485_p8 = por %p2484_p7, %p2483_p6 }
  0xc7   :  { %p2486_p9 = pnand %p2485_p8, %p2479_p5 }
  0xc9   :  { %2489 = shalt.err (!%p2486_p9)
}
  0xca   :  { %69 = dma.hbm_to_vmem [thread:$0]  %s3377_s13, 3072, %s64_s9, [#allocation6], %s2721_s15, %s2721_s15, %s2722_s30  }
  0xcb   :  { %s2490_s11 = scalar_lea.hbm %s3350_s4, 16 }
  0xcc   :  { %p2491_p10 = scmp.ne.s32.totalorder %s3350_s4, %s2490_s11  ;;  %p2494_p11 = scmp.lt.u32.totalorder %s2490_s11, %s3350_s4 }
  0xce   :  { %p2496_p12 = pnand %p2494_p11, %p2491_p10 }
  0xd0   :  { %2499 = shalt.err (!%p2496_p12)
}
  0xd1   :  { %s2500_s3 = scalar_lea.vmem %s87_s29, 16  ;;  %s2504_s0 = scalar_lea.vmem %s87_s29, 32 }
  0xd2   :  { %p2501_p13 = scmp.ne.s32.totalorder %s87_s29, %s2500_s3  ;;  %p2505_p0 = scmp.lt.s32.totalorder %s87_s29, %s87_s29 }
  0xd3   :  { %p2506_p1 = scmp.lt.s32.totalorder %s2504_s0, %s2500_s3 }
  0xd5   :  { %p2507_p2 = por %p2506_p1, %p2505_p0 }
  0xd7   :  { %p2508_p3 = pnand %p2507_p2, %p2501_p13 }
  0xd9   :  { %2511 = shalt.err (!%p2508_p3)
}
  0xda   :  { %89 = dma.hbm_to_vmem [thread:$0]  %s3350_s4, 16, %s87_s29, [#allocation9]  }
  0xdb   :  { %s2725_s28 = smov [#allocation13]   ;;  %s2726_s27 = smov [#allocation16]  }
  0xdc   :  { %s105_s13 = sshll.u32 %s2725_s28, 4  ;;  %s128_s23 = sshll.u32 %s2726_s27, 4  ;;  %s106_s13 = int_to_ptr.vmem [resolvable:$true] %s105_s13  ;;  %s129_s23 = int_to_ptr.vmem [resolvable:$true] %s128_s23 }
  0xdd   :  { %s2512_s7 = scalar_lea.hbm %s3352_s6, 1024 }
  0xde   :  { %p2513_p4 = scmp.ne.s32.totalorder %s3352_s6, %s2512_s7  ;;  %p2516_p5 = scmp.lt.u32.totalorder %s2512_s7, %s3352_s6 }
  0xe0   :  { %p2518_p6 = pnand %p2516_p5, %p2513_p4 }
  0xe2   :  { %2521 = shalt.err (!%p2518_p6)
}
  0xe3   :  { %s2522_s4 = scalar_lea.vmem %s106_s13, 1024  ;;  %p2527_p8 = scmp.lt.s32.totalorder %s106_s13, %s106_s13 }
  0xe4   :  { %p2523_p7 = scmp.ne.s32.totalorder %s106_s13, %s2522_s4  ;;  %p2528_p9 = scmp.lt.s32.totalorder %s2522_s4, %s2522_s4 }
  0xe6   :  { %p2529_p10 = por %p2528_p9, %p2527_p8 }
  0xe8   :  { %p2530_p11 = pnand %p2529_p10, %p2523_p7 }
  0xea   :  { %2533 = shalt.err (!%p2530_p11)
}
  0xeb   :  { %111 = dma.hbm_to_vmem [thread:$0]  %s3352_s6, 1024, %s106_s13, [#allocation12], %s2721_s15, %s2721_s15, %s2722_s30  }
  0xec   :  { %s2534_s19 = scalar_lea.hbm %s3354_s8, 16 }
  0xed   :  { %p2535_p12 = scmp.ne.s32.totalorder %s3354_s8, %s2534_s19  ;;  %p2538_p13 = scmp.lt.u32.totalorder %s2534_s19, %s3354_s8 }
  0xef   :  { %p2540_p0 = pnand %p2538_p13, %p2535_p12 }
  0xf1   :  { %2543 = shalt.err (!%p2540_p0)
}
  0xf2   :  { %s2544_s9 = scalar_lea.vmem %s129_s23, 16  ;;  %s2548_s22 = scalar_lea.vmem %s129_s23, 32 }
  0xf3   :  { %p2545_p1 = scmp.ne.s32.totalorder %s129_s23, %s2544_s9  ;;  %p2549_p2 = scmp.lt.s32.totalorder %s129_s23, %s129_s23 }
  0xf4   :  { %p2550_p3 = scmp.lt.s32.totalorder %s2548_s22, %s2544_s9 }
  0xf6   :  { %p2551_p4 = por %p2550_p3, %p2549_p2 }
  0xf8   :  { %p2552_p5 = pnand %p2551_p4, %p2545_p1 }
  0xfa   :  { %2555 = shalt.err (!%p2552_p5)
}
  0xfb   :  { %131 = dma.hbm_to_vmem [thread:$0]  %s3354_s8, 16, %s129_s23, [#allocation15]  }
  0xfc   :  { %s2727_s13 = smov [#allocation19]   ;;  %s2728_s24 = smov [#allocation22]  }
  0xfd   :  { %s147_s27 = sshll.u32 %s2727_s13, 4  ;;  %s170_s25 = sshll.u32 %s2728_s24, 4  ;;  %s148_s27 = int_to_ptr.vmem [resolvable:$true] %s147_s27  ;;  %s171_s25 = int_to_ptr.vmem [resolvable:$true] %s170_s25 }
  0xfe   :  { %s2556_s2 = scalar_lea.hbm %s3356_s10, 1024 }
  0xff   :  { %p2557_p6 = scmp.ne.s32.totalorder %s3356_s10, %s2556_s2  ;;  %p2560_p7 = scmp.lt.u32.totalorder %s2556_s2, %s3356_s10 }
 0x101   :  { %p2562_p8 = pnand %p2560_p7, %p2557_p6 }
 0x103   :  { %2565 = shalt.err (!%p2562_p8)
}
 0x104   :  { %s2566_s8 = scalar_lea.vmem %s148_s27, 1024  ;;  %p2571_p10 = scmp.lt.s32.totalorder %s148_s27, %s148_s27 }
 0x105   :  { %p2567_p9 = scmp.ne.s32.totalorder %s148_s27, %s2566_s8  ;;  %p2572_p11 = scmp.lt.s32.totalorder %s2566_s8, %s2566_s8 }
 0x107   :  { %p2573_p12 = por %p2572_p11, %p2571_p10 }
 0x109   :  { %p2574_p13 = pnand %p2573_p12, %p2567_p9 }
 0x10b   :  { %2577 = shalt.err (!%p2574_p13)
}
 0x10c   :  { %153 = dma.hbm_to_vmem [thread:$0]  %s3356_s10, 1024, %s148_s27, [#allocation18], %s2721_s15, %s2721_s15, %s2722_s30  }
 0x10d   :  { %s2578_s19 = scalar_lea.hbm %s3358_s12, 16 }
 0x10e   :  { %p2579_p0 = scmp.ne.s32.totalorder %s3358_s12, %s2578_s19  ;;  %p2582_p1 = scmp.lt.u32.totalorder %s2578_s19, %s3358_s12 }
 0x110   :  { %p2584_p2 = pnand %p2582_p1, %p2579_p0 }
 0x112   :  { %2587 = shalt.err (!%p2584_p2)
}
 0x113   :  { %s2588_s9 = scalar_lea.vmem %s171_s25, 16  ;;  %s2592_s22 = scalar_lea.vmem %s171_s25, 32 }
 0x114   :  { %p2589_p3 = scmp.ne.s32.totalorder %s171_s25, %s2588_s9  ;;  %p2593_p4 = scmp.lt.s32.totalorder %s171_s25, %s171_s25 }
 0x115   :  { %p2594_p5 = scmp.lt.s32.totalorder %s2592_s22, %s2588_s9 }
 0x117   :  { %p2595_p6 = por %p2594_p5, %p2593_p4 }
 0x119   :  { %p2596_p7 = pnand %p2595_p6, %p2589_p3 }
 0x11b   :  { %2599 = shalt.err (!%p2596_p7)
}
 0x11c   :  { %173 = dma.hbm_to_vmem [thread:$0]  %s3358_s12, 16, %s171_s25, [#allocation21]  }
 0x11d   :  { %s2729_s6 = smov [#allocation25]   ;;  %s2600_s24 = scalar_lea.hbm %s3360_s14, 3072 }
 0x11e   :  { %s189_s28 = sshll.u32 %s2729_s6, 4  ;;  %p2601_p8 = scmp.ne.s32.totalorder %s3360_s14, %s2600_s24  ;;  %s190_s28 = int_to_ptr.vmem [resolvable:$true] %s189_s28 }
 0x11f   :  { %p2604_p9 = scmp.lt.u32.totalorder %s2600_s24, %s3360_s14 }
 0x121   :  { %p2606_p10 = pnand %p2604_p9, %p2601_p8 }
 0x123   :  { %2609 = shalt.err (!%p2606_p10)
}
 0x124   :  { %s2610_s18 = scalar_lea.vmem %s190_s28, 3072  ;;  %p2615_p12 = scmp.lt.s32.totalorder %s190_s28, %s190_s28 }
 0x125   :  { %p2611_p11 = scmp.ne.s32.totalorder %s190_s28, %s2610_s18  ;;  %p2616_p13 = scmp.lt.s32.totalorder %s2610_s18, %s2610_s18 }
 0x127   :  { %p2617_p0 = por %p2616_p13, %p2615_p12 }
 0x129   :  { %p2618_p1 = pnand %p2617_p0, %p2611_p11 }
 0x12b   :  { %2621 = shalt.err (!%p2618_p1)
}
 0x12c   :  { %s2730_s12 = smov 128   ;;  %s2731_s25 = smov 8  }
 0x12d   :  { %195 = dma.hbm_to_vmem [thread:$0]  %s3360_s14, 3072, %s190_s28, [#allocation24], %s2730_s12, %s2730_s12, %s2731_s25  }
 0x12e   :  { %s2732_s8 = smov [#allocation28]   ;;  %s2733_s5 = smov [#allocation29]  }
 0x12f   :  { %s211_s23 = sshll.u32 %s2732_s8, 4  ;;  %s224_s11 = sshll.u32 %s2733_s5, 4  ;;  %s212_s23 = int_to_ptr.vmem [resolvable:$true] %s211_s23  ;;  %s225_s11 = int_to_ptr.vmem [resolvable:$true] %s224_s11 }
 0x130   :  { %s2622_s1 = scalar_lea.hbm %s3362_s16, 1024 }
 0x131   :  { %p2623_p2 = scmp.ne.s32.totalorder %s3362_s16, %s2622_s1  ;;  %p2626_p3 = scmp.lt.u32.totalorder %s2622_s1, %s3362_s16 }
 0x133   :  { %p2628_p4 = pnand %p2626_p3, %p2623_p2 }
 0x135   :  { %2631 = shalt.err (!%p2628_p4)
}
 0x136   :  { %s2632_s14 = scalar_lea.vmem %s212_s23, 1024  ;;  %p2637_p6 = scmp.lt.s32.totalorder %s212_s23, %s212_s23 }
 0x137   :  { %p2633_p5 = scmp.ne.s32.totalorder %s212_s23, %s2632_s14  ;;  %p2638_p7 = scmp.lt.s32.totalorder %s2632_s14, %s2632_s14 }
 0x139   :  { %p2639_p8 = por %p2638_p7, %p2637_p6 }
 0x13b   :  { %p2640_p9 = pnand %p2639_p8, %p2633_p5 }
 0x13d   :  { %2643 = shalt.err (!%p2640_p9)
}
 0x13e   :  { %217 = dma.hbm_to_vmem [thread:$0]  %s3362_s16, 1024, %s212_s23, [#allocation27], %s2730_s12, %s2730_s12, %s2731_s25  }
 0x13f   :  { %s3378_s28 = sld [smem:[#allocation46_spill]] }
 0x145   :  { %s2644_s13 = scalar_lea.hbm %s3378_s28, 16 }
 0x146   :  { %p2645_p10 = scmp.ne.s32.totalorder %s3378_s28, %s2644_s13  ;;  %p2648_p11 = scmp.lt.u32.totalorder %s2644_s13, %s3378_s28 }
 0x148   :  { %p2650_p12 = pnand %p2648_p11, %p2645_p10 }
 0x14a   :  { %2653 = shalt.err (!%p2650_p12)
}
 0x14b   :  { %s2654_s2 = scalar_lea.vmem %s225_s11, 16  ;;  %s2658_s26 = scalar_lea.vmem %s225_s11, 32 }
 0x14c   :  { %p2655_p13 = scmp.ne.s32.totalorder %s225_s11, %s2654_s2  ;;  %p2659_p0 = scmp.lt.s32.totalorder %s225_s11, %s225_s11 }
 0x14d   :  { %p2660_p1 = scmp.lt.s32.totalorder %s2658_s26, %s2654_s2 }
 0x14f   :  { %p2661_p2 = por %p2660_p1, %p2659_p0 }
 0x151   :  { %p2662_p3 = pnand %p2661_p2, %p2655_p13 }
 0x153   :  { %2665 = shalt.err (!%p2662_p3)
}
 0x154   :  { %227 = dma.hbm_to_vmem [thread:$0]  %s3378_s28, 16, %s225_s11, [#allocation30]  }
 0x155   :  { %2688 = dma.done.wait [#allocation3], 128  }
 0x156   :  { %2689 = vsyncadd [#allocation3], 4294967168 }
 0x157   :  { %2690 = dma.done.wait [#allocation6], 3136  }
 0x158   :  { %2691 = vsyncadd [#allocation6], 4294964160 }
 0x159   :  { %2692 = dma.done.wait [#allocation9], 32  }
 0x15a   :  { %2693 = vsyncadd [#allocation9], 4294967264 }
 0x15b   :  { %2694 = dma.done.wait [#allocation12], 1040  }
 0x15c   :  { %2695 = vsyncadd [#allocation12], 4294966256 }
 0x15d   :  { %2696 = dma.done.wait [#allocation15], 32  }
 0x15e   :  { %2697 = vsyncadd [#allocation15], 4294967264 }
 0x15f   :  { %2698 = dma.done.wait [#allocation18], 1040  }
 0x160   :  { %2699 = vsyncadd [#allocation18], 4294966256 }
 0x161   :  { %2700 = dma.done.wait [#allocation21], 32  }
 0x162   :  { %2701 = vsyncadd [#allocation21], 4294967264 }
 0x163   :  { %2702 = dma.done.wait [#allocation24], 3088  }
 0x164   :  { %2703 = vsyncadd [#allocation24], 4294964208 }
 0x165   :  { %2704 = dma.done.wait [#allocation27], 1040  }
 0x166   :  { %2705 = vsyncadd [#allocation27], 4294966256 }
 0x167   :  { %2706 = dma.done.wait [#allocation30], 16  }
 0x168   :  { %2707 = vsyncadd [#allocation30], 4294967280  ;;  %v2734_v0 = vmov 0   ;;  %vm332_vm0 = vcmask 1040384   ;;  %vm289_vm1 = vcmask 9216   ;;  %v3070_v15 = vld [vmem:[#allocation7 + $0x40] sm:$0xff]  }
 0x169   :  { %371 = vmatprep.mubr.bf16.mxu0 %v2734_v0  ;;  %421 = vmatprep.mubr.bf16.mxu1 %v2734_v0  ;;  %v3062_v1 = vld.sshfl [vmem:[#allocation2] sm:$0x33 pattern:$0x76325410]  ;;  %v285_v2 = vld [vmem:[#allocation5] sm:$0x3] }
 0x16a   :  { %v311_v3 = vcombine.high %v3062_v1, %v3062_v1  ;;  %v324_v4 = vpack.c.bf16 %v3062_v1, %v3062_v1  ;;  %v1789_v5 = vld.sshfl [vmem:[#allocation2 + $0x4] sm:$0x33 pattern:$0x76325410]  ;;  %v286_v6 = vld [vmem:[#allocation5 + $0x2] sm:$0x3]  ;;  %v3073_v16 = vpack.c.bf16 %v285_v2, %v285_v2 }
 0x16b   :  { %v319_v7 = vcombine.high %v1789_v5, %v1789_v5  ;;  %v326_v8 = vpack.c.bf16 %v1789_v5, %v1789_v5  ;;  %v290_v9 = vsel %vm289_vm1, %v285_v2, 0.0  ;;  %v293_v12 = vsel %vm289_vm1, %v286_v6, 0.0  ;;  %v3075_v17 = vld [vmem:[#allocation7 + $0x80] sm:$0xff]   ;;  %v3083_v20 = vld [vmem:[#allocation7 + $0x48] sm:$0xff]   ;;  %v3097_v24 = vld [vmem:[#allocation7 + $0x50] sm:$0xff]  }
 0x16c   :  { %v325_v10 = vpack.c.bf16 %v311_v3, %v311_v3  ;;  %v334_v11 = vsel %vm332_vm0, %v324_v4, 0  ;;  %291 = vadd.xlane.f32.xlu0 %v290_v9  ;;  %294 = vadd.xlane.f32.xlu1 %v293_v12  ;;  %vm328_vm2 = vcmask 15360   ;;  %v3078_v18 = vpack.c.bf16 %v286_v6, %v286_v6  ;;  %v3080_v19 = vld [vmem:[#allocation7] sm:$0xff]   ;;  %v3088_v22 = vld [vmem:[#allocation7 + $0x88] sm:$0xff]   ;;  %v3100_v25 = vld [vmem:[#allocation7 + $0x10] sm:$0xff]  }
 0x16d   :  { %v327_v13 = vpack.c.bf16 %v319_v7, %v319_v7  ;;  %v384_v14 = vsel %vm332_vm0, %v326_v8, 0  ;;  %v2735_v21 = vmov 0.0   ;;  %v3093_v23 = vld [vmem:[#allocation7 + $0x8] sm:$0xff]   ;;  %v2222_v26 = vld [vmem:[#allocation7 + $0x90] sm:$0xff]   ;;  %v2225_v27 = vld [vmem:[#allocation7 + $0x98] sm:$0xff]   ;;  %v2206_v31 = vpack.i.bf16 %v311_v3, %v3062_v1 }
 0x16e   :  { %1790 = vmatprep.subr.msk.bf16.mxu0 %vm332_vm0, %v325_v10  ;;  %v3107_v28 = vld [vmem:[#allocation7 + $0x58] sm:$0xff]   ;;  %v3112_v30 = vld [vmem:[#allocation7 + $0x60] sm:$0xff]   ;;  %v3119_v34 = vld [vmem:[#allocation7 + $0x68] sm:$0xff]   ;;  %vm2736_vm3 = vmmov 0   ;;  %vm442_vm4 = vcmask 523264   ;;  %vm818_vm5 = vcmask 517120  }
 0x16f   :  { %340 = vmatpush1.bf16.msra.mxu0 %v334_v11  ;;  %1792 = vmatprep.subr.msk.bf16.mxu1 %vm332_vm0, %v327_v13  ;;  %v3109_v29 = vld [vmem:[#allocation7 + $0x18] sm:$0xff]   ;;  %v2228_v32 = vld [vmem:[#allocation7 + $0xa0] sm:$0xff]   ;;  %v3124_v35 = vld [vmem:[#allocation7 + $0x28] sm:$0xff]   ;;  %vm1517_vm6 = vcmask 1041408   ;;  %vm1585_vm7 = vcmask 1041409   ;;  %vm1750_vm8 = vcmask 41984  }
 0x170   :  { %390 = vmatpush1.bf16.msra.mxu1 %v384_v14  ;;  %1851 = vmatprep.subr.bf16.mxu0 %v3070_v15  ;;  %v3117_v33 = vld [vmem:[#allocation7 + $0x20] sm:$0xff]   ;;  %v2231_v36 = vld [vmem:[#allocation7 + $0xa8] sm:$0xff]   ;;  %v3128_v37 = vld [vmem:[#allocation7 + $0x70] sm:$0xff]  }
 0x171   :  { %1966 = vmatprep.subr.bf16.mxu1 %v2735_v21  ;;  %v2234_v38 = vld [vmem:[#allocation7 + $0xb0] sm:$0xff]   ;;  %v2237_v40 = vld [vmem:[#allocation7 + $0xb8] sm:$0xff]  }
 0x172   :  { %1791 = vmatmul.mubr.msk.bf16.vlgmr.msra.gmra.mrb[0].mxu0 %vm328_vm2, %v3073_v16  ;;  %v3137_v39 = vld [vmem:[#allocation7 + $0x30] sm:$0xff]   ;;  %v3140_v41 = vld [vmem:[#allocation7 + $0x78] sm:$0xff]  }
 0x173   :  { %1793 = vmatmul.mubr.msk.bf16.vlgmr.msra.gmra.mrb[0].mxu1 %vm328_vm2, %v3078_v18  ;;  %1852 = vmatpush3.bf16.msra.mxu0 %v3080_v19  ;;  %v3143_v42 = vld [vmem:[#allocation7 + $0x38] sm:$0xff]  }
 0x174   :  { %1967 = vmatpush3.bf16.msra.mxu1 %v3075_v17  ;;  %1853 = vmatprep.subr.bf16.mxu0 %v3083_v20 }
 0x175   :  { %1968 = vmatprep.subr.bf16.mxu1 %v2735_v21  ;;  %1982 = vmatprep.mubr.msk.bf16.mxu1 %vm2736_vm3, %v2735_v21 }
 0x177   :  { %1854 = vmatpush3.bf16.msra.mxu0 %v3093_v23 }
 0x178   :  { %1969 = vmatpush3.bf16.msra.mxu1 %v3088_v22  ;;  %1855 = vmatprep.subr.bf16.mxu0 %v3097_v24 }
 0x179   :  { %1970 = vmatprep.subr.bf16.mxu1 %v2735_v21 }
 0x17b   :  { %1856 = vmatpush3.bf16.msra.mxu0 %v3100_v25 }
 0x17c   :  { %1971 = vmatpush3.bf16.msra.mxu1 %v2222_v26  ;;  %1857 = vmatprep.subr.bf16.mxu0 %v3107_v28 }
 0x17d   :  { %1972 = vmatprep.subr.bf16.mxu1 %v2735_v21  ;;  %438 = vrot.lane.b32.xlu1 %v1789_v5, %s2721_s15 }
 0x17f   :  { %1858 = vmatpush3.bf16.msra.mxu0 %v3109_v29 }
 0x180   :  { %1973 = vmatpush3.bf16.msra.mxu1 %v2225_v27  ;;  %1859 = vmatprep.subr.bf16.mxu0 %v3112_v30 }
 0x181   :  { %1974 = vmatprep.subr.bf16.mxu1 %v2735_v21  ;;  %440 = vrot.lane.b32.xlu1 %v319_v7, %s2721_s15 }
 0x182   :  { %2207 = vrot.lane.b32.xlu0 %v2206_v31, %s2721_s15 }
 0x183   :  { %1860 = vmatpush3.bf16.msra.mxu0 %v3117_v33 }
 0x184   :  { %1975 = vmatpush3.bf16.msra.mxu1 %v2228_v32  ;;  %1861 = vmatprep.subr.bf16.mxu0 %v3119_v34 }
 0x185   :  { %1976 = vmatprep.subr.bf16.mxu1 %v2735_v21 }
 0x187   :  { %1862 = vmatpush3.bf16.msra.mxu0 %v3124_v35 }
 0x188   :  { %1977 = vmatpush3.bf16.msra.mxu1 %v2231_v36  ;;  %1863 = vmatprep.subr.bf16.mxu0 %v3128_v37 }
 0x189   :  { %1978 = vmatprep.subr.bf16.mxu1 %v2735_v21 }
 0x18b   :  { %1864 = vmatpush3.bf16.msra.mxu0 %v3137_v39 }
 0x18c   :  { %1979 = vmatpush3.bf16.msra.mxu1 %v2234_v38  ;;  %1865 = vmatprep.subr.bf16.mxu0 %v3140_v41 }
 0x18d   :  { %1980 = vmatprep.subr.bf16.mxu1 %v2735_v21 }
 0x18f   :  { %1866 = vmatpush3.bf16.msra.mxu0 %v3143_v42 }
 0x190   :  { %1981 = vmatpush3.bf16.msra.mxu1 %v2237_v40  ;;  %1882 = vmatprep.subr.bf16.mxu0 %v3070_v15 }
 0x191   :  { %1986 = vmatprep.subr.bf16.mxu1 %v2735_v21 }
 0x1f9   :  { %v292_v43 = vpop.xlane.xlu0 %291  ;;  %v295_v49 = vpop.xlane.xlu1 %294 }
 0x1fa   :  { %v296_v54 = vmax.f32 %v292_v43, 1.0  ;;  %v297_v55 = vmax.f32 %v295_v49, 1.0 }
 0x1fc   :  { %2256 = vrcp.f32 %v296_v54 }
 0x1fd   :  { %v2208_v44 = vpop.permute.xlu0 %2207  ;;  %v439_v50 = vpop.permute.xlu1 %438  ;;  %2258 = vrcp.f32 %v297_v55 }
 0x1fe   :  { %v2210_v45 = vunpack.i.h.bf16 %v2208_v44  ;;  %v2209_v46 = vunpack.i.l.bf16 %v2208_v44 }
 0x200   :  { %v443_v47 = vsel %vm442_vm4, %v2209_v46, %v2210_v45 }
 0x201   :  { %v453_v48 = vpack.c.bf16 %v443_v47, %v443_v47  ;;  %v441_v51 = vpop.permute.xlu1 %440 }
 0x202   :  { %v444_v52 = vsel %vm442_vm4, %v439_v50, %v441_v51 }
 0x203   :  { %1983 = vmatmul.mubr.bf16.vlgmr.msra.gmra.mrb[4].mxu1 %v453_v48  ;;  %v456_v53 = vpack.c.bf16 %v444_v52, %v444_v52 }
 0x204   :  { %1987 = vmatpush3.bf16.msra.mxu1 %v3075_v17  ;;  %2002 = vmatprep.mubr.msk.bf16.mxu1 %vm2736_vm3, %v2735_v21 }
 0x205   :  { %1988 = vmatprep.subr.bf16.mxu1 %v2735_v21 }
 0x206   :  { %v3166_v56 = vpop.eup %2256 }
 0x207   :  { %v3168_v57 = vpop.eup %2258 }
 0x208   :  { %1989 = vmatpush3.bf16.msra.mxu1 %v3088_v22 }
 0x209   :  { %1990 = vmatprep.subr.bf16.mxu1 %v2735_v21 }
 0x20c   :  { %1991 = vmatpush3.bf16.msra.mxu1 %v2222_v26 }
 0x20d   :  { %1992 = vmatprep.subr.bf16.mxu1 %v2735_v21 }
 0x210   :  { %1993 = vmatpush3.bf16.msra.mxu1 %v2225_v27 }
 0x211   :  { %1994 = vmatprep.subr.bf16.mxu1 %v2735_v21 }
 0x214   :  { %1995 = vmatpush3.bf16.msra.mxu1 %v2228_v32 }
 0x215   :  { %1996 = vmatprep.subr.bf16.mxu1 %v2735_v21 }
 0x218   :  { %1997 = vmatpush3.bf16.msra.mxu1 %v2231_v36 }
 0x219   :  { %1998 = vmatprep.subr.bf16.mxu1 %v2735_v21 }
 0x21c   :  { %1999 = vmatpush3.bf16.msra.mxu1 %v2234_v38 }
 0x21d   :  { %2000 = vmatprep.subr.bf16.mxu1 %v2735_v21 }
 0x220   :  { %2001 = vmatpush3.bf16.msra.mxu1 %v2237_v40 }
 0x221   :  { %2006 = vmatprep.subr.bf16.mxu1 %v2735_v21 }
 0x223   :  { %2003 = vmatmul.mubr.bf16.vlgmr.msra.gmra.mrb[8].mxu1 %v456_v53 }
 0x224   :  { %2008 = vmatprep.mubr.msk.bf16.mxu1 %vm2736_vm3, %v2735_v21 }
 0x245   :  { %v373_v58 = vpop.f32.mrb[0].mxu0 }
 0x246   :  { %v375_v59 = vpop.f32.mrb[1].mxu0  ;;  %v423_v60 = vpop.f32.mrb[0].mxu1  ;;  %v430_v61 = vmul.f32 %v3166_v56, %v373_v58 }
 0x247   :  { %v431_v62 = vmul.f32 %v3166_v56, %v375_v59  ;;  %v377_v63 = vpop.f32.mrb[2].mxu0  ;;  %v425_v0 = vpop.f32.mrb[1].mxu1  ;;  %v432_v10 = vmul.f32 %v3168_v57, %v423_v60 }
 0x248   :  { %v378_v1 = vpop.f32.mrb[3].mxu0  ;;  %v433_v2 = vmul.f32 %v3168_v57, %v425_v0  ;;  %v427_v3 = vpop.f32.mrb[2].mxu1  ;;  %v451_v8 = vpack.c.bf16 %v430_v61, %v430_v61 }
 0x249   :  { %v449_v4 = vsel %vm442_vm4, %v431_v62, %v2209_v46  ;;  %v428_v5 = vpop.f32.mrb[3].mxu1  ;;  %v454_v11 = vpack.c.bf16 %v432_v10, %v432_v10 }
 0x24a   :  { %v452_v6 = vpack.c.bf16 %v449_v4, %v449_v4  ;;  %v450_v7 = vsel %vm442_vm4, %v433_v2, %v439_v50 }
 0x24b   :  { %v455_v9 = vpack.c.bf16 %v450_v7, %v450_v7 }
 0x24c   :  { %688 = vmatprep.mubr.bf16.mxu0 %v452_v6 }
 0x24d   :  { %689 = vmatmul.mubr.bf16.vlgmr.msra.gmra.mrb[4].mxu0 %v451_v8 }
 0x24e   :  { %1883 = vmatpush3.bf16.msra.mxu0 %v3080_v19  ;;  %768 = vmatprep.mubr.bf16.mxu0 %v455_v9 }
 0x24f   :  { %1884 = vmatprep.subr.bf16.mxu0 %v3083_v20 }
 0x252   :  { %1885 = vmatpush3.bf16.msra.mxu0 %v3093_v23 }
 0x253   :  { %1886 = vmatprep.subr.bf16.mxu0 %v3097_v24  ;;  %v1794_v24 = vld [vmem:[#allocation8] ss:$0 sm:$0xff] }
 0x256   :  { %1887 = vmatpush3.bf16.msra.mxu0 %v3100_v25 }
 0x257   :  { %1888 = vmatprep.subr.bf16.mxu0 %v3107_v28 }
 0x25a   :  { %1889 = vmatpush3.bf16.msra.mxu0 %v3109_v29 }
 0x25b   :  { %1890 = vmatprep.subr.bf16.mxu0 %v3112_v30 }
 0x25e   :  { %1891 = vmatpush3.bf16.msra.mxu0 %v3117_v33 }
 0x25f   :  { %1892 = vmatprep.subr.bf16.mxu0 %v3119_v34 }
 0x262   :  { %1893 = vmatpush3.bf16.msra.mxu0 %v3124_v35 }
 0x263   :  { %1894 = vmatprep.subr.bf16.mxu0 %v3128_v37 }
 0x266   :  { %1895 = vmatpush3.bf16.msra.mxu0 %v3137_v39 }
 0x267   :  { %1896 = vmatprep.subr.bf16.mxu0 %v3140_v41 }
 0x26a   :  { %1897 = vmatpush3.bf16.msra.mxu0 %v3143_v42 }
 0x26b   :  { %2018 = vmatprep.subr.bf16.mxu0 %v2735_v21 }
 0x26d   :  { %769 = vmatmul.mubr.bf16.vlgmr.msra.gmra.mrb[8].mxu0 %v454_v11 }
 0x26e   :  { %2034 = vmatprep.mubr.msk.bf16.mxu0 %vm2736_vm3, %v2735_v21 }
 0x2d6   :  { %v730_v12 = vpop.f32.mrb[4].mxu1 }
 0x2d7   :  { %v1984_v13 = vpop.f32.mrb[5].mxu1 }
 0x2d8   :  { %v733_v14 = vpop.f32.mrb[6].mxu1 }
 0x2d9   :  { %v1985_v15 = vpop.f32.mrb[7].mxu1 }
 0x2f6   :  { %v810_v17 = vpop.f32.mrb[8].mxu1 }
 0x2f7   :  { %v2004_v19 = vpop.f32.mrb[9].mxu1 }
 0x2f8   :  { %v813_v20 = vpop.f32.mrb[10].mxu1 }
 0x2f9   :  { %v2005_v22 = vpop.f32.mrb[11].mxu1 }
 0x2fa   :  { %v2240_v22 = vld [vmem:[#allocation13] sm:$0xff]  }
 0x2fb   :  { %2019 = vmatpush3.bf16.msra.mxu0 %v2240_v22 }
 0x2fc   :  { %2020 = vmatprep.subr.bf16.mxu0 %v2735_v21 }
 0x320   :  { %v1867_v23 = vpop.f32.mrb[4].mxu0 }
 0x321   :  { %v1868_v25 = vpop.f32.mrb[5].mxu0 }
 0x322   :  { %v1869_v26 = vadd.f32 %v1868_v25, %v1867_v23  ;;  %v1870_v27 = vpop.f32.mrb[6].mxu0  ;;  %v2241_v23 = vld [vmem:[#allocation13 + $0x8] sm:$0xff]   ;;  %v1819_v25 = vld [vmem:[#allocation10] ss:$0 sm:$0xff] }
 0x323   :  { %v1871_v28 = vpop.f32.mrb[7].mxu0  ;;  %2021 = vmatpush3.bf16.msra.mxu0 %v2241_v23 }
 0x324   :  { %v691_v29 = vadd.f32 %v1869_v26, %v1794_v24  ;;  %v1820_v28 = vld [vmem:[#allocation11] ss:$0 sm:$0xff]  ;;  %2022 = vmatprep.subr.bf16.mxu0 %v2735_v21 }
 0x326   :  { %v731_v30 = vadd.f32 %v730_v12, %v691_v29  ;;  %v2242_v29 = vld [vmem:[#allocation13 + $0x10] sm:$0xff]  }
 0x327   :  { %2023 = vmatpush3.bf16.msra.mxu0 %v2242_v29 }
 0x328   :  { %v816_v31 = vmax.f32 %v731_v30, 0.0  ;;  %2024 = vmatprep.subr.bf16.mxu0 %v2735_v21 }
 0x32a   :  { %v819_v32 = vsel %vm818_vm5, %v816_v31, 0.0 }
 0x32b   :  { %v820_v33 = vrot.slane %v819_v32, 4 }
 0x32d   :  { %v821_v38 = vadd.f32 %v820_v33, %v819_v32 }
 0x32f   :  { %v822_v42 = vrot.slane %v821_v38, 2 }
 0x331   :  { %v823_v45 = vadd.f32 %v822_v42, %v821_v38  ;;  %v2246_v42 = vld [vmem:[#allocation13 + $0x30] sm:$0xff]  }
 0x333   :  { %v824_v48 = vrot.slane %v823_v45, 1 }
 0x335   :  { %v825_v51 = vadd.f32 %v824_v48, %v823_v45 }
 0x337   :  { %v833_v54 = vsel %vm442_vm4, %v825_v51, 0.0 }
 0x340   :  { %v1898_v34 = vpop.f32.mrb[8].mxu0 }
 0x341   :  { %v1899_v35 = vpop.f32.mrb[9].mxu0 }
 0x342   :  { %v1900_v36 = vadd.f32 %v1899_v35, %v1898_v34  ;;  %v1901_v37 = vpop.f32.mrb[10].mxu0  ;;  %v2243_v34 = vld [vmem:[#allocation13 + $0x18] sm:$0xff]  }
 0x343   :  { %v1902_v39 = vpop.f32.mrb[11].mxu0  ;;  %2025 = vmatpush3.bf16.msra.mxu0 %v2243_v34 }
 0x344   :  { %v771_v40 = vadd.f32 %v1900_v36, %v1794_v24  ;;  %2026 = vmatprep.subr.bf16.mxu0 %v2735_v21  ;;  %v2244_v39 = vld [vmem:[#allocation13 + $0x20] sm:$0xff]  }
 0x346   :  { %v811_v41 = vadd.f32 %v810_v17, %v771_v40 }
 0x347   :  { %2027 = vmatpush3.bf16.msra.mxu0 %v2244_v39 }
 0x348   :  { %v817_v43 = vmax.f32 %v811_v41, 0.0  ;;  %v2245_v41 = vld [vmem:[#allocation13 + $0x28] sm:$0xff]   ;;  %2028 = vmatprep.subr.bf16.mxu0 %v2735_v21 }
 0x34a   :  { %v826_v44 = vsel %vm818_vm5, %v817_v43, 0.0 }
 0x34b   :  { %v827_v46 = vrot.slane %v826_v44, 4  ;;  %2029 = vmatpush3.bf16.msra.mxu0 %v2245_v41 }
 0x34c   :  { %2030 = vmatprep.subr.bf16.mxu0 %v2735_v21 }
 0x34d   :  { %v828_v47 = vadd.f32 %v827_v46, %v826_v44 }
 0x34f   :  { %v829_v49 = vrot.slane %v828_v47, 2  ;;  %2031 = vmatpush3.bf16.msra.mxu0 %v2246_v42 }
 0x350   :  { %2032 = vmatprep.subr.bf16.mxu0 %v2735_v21 }
 0x351   :  { %v830_v50 = vadd.f32 %v829_v49, %v828_v47 }
 0x353   :  { %v831_v52 = vrot.slane %v830_v50, 1 }
 0x355   :  { %v832_v53 = vadd.f32 %v831_v52, %v830_v50 }
 0x357   :  { %v834_v55 = vsel %vm442_vm4, %v832_v53, 0.0 }
 0x358   :  { %v835_v58 = vadd.f32 %v834_v55, %v833_v54 }
 0x35a   :  { %v836_v59 = vmul.f32 0.25, %v835_v58 }
 0x35c   :  { %v837_v60 = vsub.f32 %v816_v31, %v836_v59  ;;  %v838_v61 = vsub.f32 %v817_v43, %v836_v59  ;;  %v2247_v43 = vld [vmem:[#allocation13 + $0x38] sm:$0xff]  }
 0x35d   :  { %2033 = vmatpush3.bf16.msra.mxu0 %v2247_v43 }
 0x35e   :  { %v839_v62 = vmul.f32 %v837_v60, %v837_v60  ;;  %v840_v63 = vmul.f32 %v838_v61, %v838_v61  ;;  %2070 = vmatprep.subr.bf16.mxu0 %v2735_v21 }
 0x360   :  { %v841_v0 = vsel %vm818_vm5, %v839_v62, 0.0  ;;  %v848_v1 = vsel %vm818_vm5, %v840_v63, 0.0  ;;  %v1823_v63 = vld [vmem:[#allocation14] ss:$0 sm:$0xff] }
 0x361   :  { %v842_v2 = vrot.slane %v841_v0, 4  ;;  %v849_v3 = vrot.slane %v848_v1, 4 }
 0x363   :  { %v843_v4 = vadd.f32 %v842_v2, %v841_v0  ;;  %v850_v5 = vadd.f32 %v849_v3, %v848_v1 }
 0x365   :  { %v844_v6 = vrot.slane %v843_v4, 2  ;;  %v851_v7 = vrot.slane %v850_v5, 2 }
 0x367   :  { %v845_v8 = vadd.f32 %v844_v6, %v843_v4  ;;  %v852_v9 = vadd.f32 %v851_v7, %v850_v5 }
 0x369   :  { %v846_v10 = vrot.slane %v845_v8, 1  ;;  %v853_v11 = vrot.slane %v852_v9, 1 }
 0x36b   :  { %v847_v12 = vadd.f32 %v846_v10, %v845_v8  ;;  %v854_v13 = vadd.f32 %v853_v11, %v852_v9 }
 0x36d   :  { %v855_v14 = vsel %vm442_vm4, %v847_v12, 0.0  ;;  %v856_v15 = vsel %vm442_vm4, %v854_v13, 0.0 }
 0x36e   :  { %v857_v17 = vadd.f32 %v856_v15, %v855_v14 }
 0x370   :  { %v858_v19 = vmul.f32 0.25, %v857_v17 }
 0x372   :  { %v859_v20 = vadd.f32 1e-05, %v858_v19 }
 0x374   :  { %2260 = vrsqrt.f32 %v859_v20 }
 0x37e   :  { %v2261_v24 = vpop.eup %2260 }
 0x37f   :  { %v862_v26 = vmul.f32 %v2261_v24, %v838_v61  ;;  %v861_v27 = vmul.f32 %v2261_v24, %v837_v60 }
 0x381   :  { %v870_v30 = vmul.f32 %v1819_v25, %v861_v27  ;;  %v871_v31 = vmul.f32 %v1819_v25, %v862_v26 }
 0x383   :  { %v3204_v32 = vadd.f32 %v1820_v28, %v870_v30  ;;  %v3206_v33 = vadd.f32 %v1820_v28, %v871_v31 }
 0x385   :  { %v2211_v35 = vpack.i.bf16 %v3206_v33, %v3204_v32  ;;  %v881_v36 = vpack.c.bf16 %v3204_v32, %v3204_v32  ;;  %v882_v38 = vpack.c.bf16 %v3206_v33, %v3206_v33 }
 0x387   :  { %2212 = vrot.lane.b32.xlu1 %v2211_v35, %s2721_s15  ;;  %v884_v37 = vsel %vm332_vm0, %v881_v36, 0  ;;  %v927_v40 = vsel %vm332_vm0, %v882_v38, 0 }
 0x388   :  { %2007 = vmatpush3.bf16.msra.mxu1 %v884_v37 }
 0x389   :  { %2012 = vmatprep.subr.bf16.mxu1 %v2735_v21 }
 0x38b   :  { %2009 = vmatmul.mubr.msk.bf16.vlgmr.msra.gmra.mrb[12].mxu1 %vm328_vm2, %v3073_v16 }
 0x38c   :  { %2013 = vmatpush3.bf16.msra.mxu1 %v927_v40  ;;  %2014 = vmatprep.mubr.msk.bf16.mxu1 %vm2736_vm3, %v2735_v21 }
 0x38d   :  { %2038 = vmatprep.subr.bf16.mxu1 %v2735_v21 }
 0x393   :  { %2015 = vmatmul.mubr.msk.bf16.vlgmr.msra.gmra.mrb[16].mxu1 %vm328_vm2, %v3078_v18 }
 0x394   :  { %2039 = vmatpush3.bf16.msra.mxu1 %v2240_v22  ;;  %2054 = vmatprep.mubr.msk.bf16.mxu1 %vm2736_vm3, %v2735_v21 }
 0x395   :  { %2040 = vmatprep.subr.bf16.mxu1 %v2735_v21 }
 0x398   :  { %2041 = vmatpush3.bf16.msra.mxu1 %v2241_v23 }
 0x399   :  { %2042 = vmatprep.subr.bf16.mxu1 %v2735_v21 }
 0x39c   :  { %2043 = vmatpush3.bf16.msra.mxu1 %v2242_v29 }
 0x39d   :  { %2044 = vmatprep.subr.bf16.mxu1 %v2735_v21 }
 0x3a0   :  { %2045 = vmatpush3.bf16.msra.mxu1 %v2243_v34 }
 0x3a1   :  { %2046 = vmatprep.subr.bf16.mxu1 %v2735_v21 }
 0x3a4   :  { %2047 = vmatpush3.bf16.msra.mxu1 %v2244_v39 }
 0x3a5   :  { %2048 = vmatprep.subr.bf16.mxu1 %v2735_v21 }
 0x3a8   :  { %2049 = vmatpush3.bf16.msra.mxu1 %v2245_v41 }
 0x3a9   :  { %2050 = vmatprep.subr.bf16.mxu1 %v2735_v21 }
 0x3ac   :  { %2051 = vmatpush3.bf16.msra.mxu1 %v2246_v42 }
 0x3ad   :  { %2052 = vmatprep.subr.bf16.mxu1 %v2735_v21 }
 0x3b0   :  { %2053 = vmatpush3.bf16.msra.mxu1 %v2247_v43 }
 0x3b1   :  { %2058 = vmatprep.subr.bf16.mxu1 %v2735_v21 }
 0x3f9   :  { %v2213_v44 = vpop.permute.xlu1 %2212 }
 0x3fa   :  { %v2214_v46 = vunpack.i.l.bf16 %v2213_v44  ;;  %v2215_v54 = vunpack.i.h.bf16 %v2213_v44 }
 0x45e   :  { %v920_v45 = vpop.f32.mrb[12].mxu1 }
 0x45f   :  { %v969_v47 = vmul.f32 %v3166_v56, %v920_v45  ;;  %v2010_v48 = vpop.f32.mrb[13].mxu1 }
 0x460   :  { %v923_v49 = vpop.f32.mrb[14].mxu1 }
 0x461   :  { %v979_v50 = vsel %vm442_vm4, %v969_v47, %v2214_v46  ;;  %v2011_v51 = vpop.f32.mrb[15].mxu1 }
 0x462   :  { %v981_v52 = vpack.c.bf16 %v979_v50, %v979_v50 }
 0x464   :  { %2035 = vmatmul.mubr.bf16.vlgmr.msra.gmra.mrb[12].mxu0 %v981_v52 }
 0x465   :  { %2086 = vmatprep.mubr.msk.bf16.mxu0 %vm2736_vm3, %v2735_v21 }
 0x466   :  { %v963_v53 = vpop.f32.mrb[16].mxu1 }
 0x467   :  { %v970_v55 = vmul.f32 %v3168_v57, %v963_v53  ;;  %v2016_v58 = vpop.f32.mrb[17].mxu1 }
 0x468   :  { %v966_v59 = vpop.f32.mrb[18].mxu1 }
 0x469   :  { %v980_v60 = vsel %vm442_vm4, %v970_v55, %v2215_v54  ;;  %v2017_v61 = vpop.f32.mrb[19].mxu1 }
 0x46a   :  { %v982_v62 = vpack.c.bf16 %v980_v60, %v980_v60  ;;  %v1832_v61 = vld [vmem:[#allocation16] ss:$0 sm:$0xff] }
 0x46c   :  { %2055 = vmatmul.mubr.bf16.vlgmr.msra.gmra.mrb[20].mxu1 %v982_v62 }
 0x46d   :  { %2060 = vmatprep.mubr.msk.bf16.mxu1 %vm2736_vm3, %v2735_v21 }
 0x537   :  { %v1088_v0 = vpop.f32.mrb[12].mxu0 }
 0x538   :  { %v1089_v1 = vadd.f32 %v1823_v63, %v1088_v0  ;;  %v2036_v2 = vpop.f32.mrb[13].mxu0  ;;  %v1833_v0 = vld [vmem:[#allocation17] ss:$0 sm:$0xff] }
 0x539   :  { %v1091_v3 = vpop.f32.mrb[14].mxu0 }
 0x53a   :  { %v1134_v4 = vmax.f32 %v1089_v1, 0.0  ;;  %v2037_v5 = vpop.f32.mrb[15].mxu0 }
 0x53b   :  { %v2248_v5 = vld [vmem:[#allocation19] sm:$0xff]  }
 0x53c   :  { %v1136_v6 = vsel %vm818_vm5, %v1134_v4, 0.0  ;;  %2071 = vmatpush3.bf16.msra.mxu0 %v2248_v5 }
 0x53d   :  { %v1137_v7 = vrot.slane %v1136_v6, 4  ;;  %2072 = vmatprep.subr.bf16.mxu0 %v2735_v21 }
 0x53f   :  { %v1138_v8 = vadd.f32 %v1137_v7, %v1136_v6  ;;  %v1128_v9 = vpop.f32.mrb[20].mxu1  ;;  %v2249_v7 = vld [vmem:[#allocation19 + $0x8] sm:$0xff]  }
 0x540   :  { %v1129_v10 = vadd.f32 %v1823_v63, %v1128_v9  ;;  %v2056_v11 = vpop.f32.mrb[21].mxu1  ;;  %2073 = vmatpush3.bf16.msra.mxu0 %v2249_v7 }
 0x541   :  { %v1139_v12 = vrot.slane %v1138_v8, 2  ;;  %v1131_v13 = vpop.f32.mrb[22].mxu1  ;;  %2074 = vmatprep.subr.bf16.mxu0 %v2735_v21 }
 0x542   :  { %v1135_v14 = vmax.f32 %v1129_v10, 0.0  ;;  %v2057_v15 = vpop.f32.mrb[23].mxu1  ;;  %v2250_v10 = vld [vmem:[#allocation19 + $0x10] sm:$0xff]   ;;  %v2252_v13 = vld [vmem:[#allocation19 + $0x20] sm:$0xff]  }
 0x543   :  { %v1140_v19 = vadd.f32 %v1139_v12, %v1138_v8  ;;  %v2251_v12 = vld [vmem:[#allocation19 + $0x18] sm:$0xff]  }
 0x544   :  { %v1143_v17 = vsel %vm818_vm5, %v1135_v14, 0.0  ;;  %2075 = vmatpush3.bf16.msra.mxu0 %v2250_v10 }
 0x545   :  { %v1144_v20 = vrot.slane %v1143_v17, 4  ;;  %v1141_v23 = vrot.slane %v1140_v19, 1  ;;  %2076 = vmatprep.subr.bf16.mxu0 %v2735_v21 }
 0x547   :  { %v1145_v22 = vadd.f32 %v1144_v20, %v1143_v17  ;;  %v1142_v26 = vadd.f32 %v1141_v23, %v1140_v19 }
 0x548   :  { %2077 = vmatpush3.bf16.msra.mxu0 %v2251_v12 }
 0x549   :  { %v1146_v24 = vrot.slane %v1145_v22, 2  ;;  %v1150_v29 = vsel %vm442_vm4, %v1142_v26, 0.0  ;;  %2078 = vmatprep.subr.bf16.mxu0 %v2735_v21 }
 0x54b   :  { %v1147_v25 = vadd.f32 %v1146_v24, %v1145_v22 }
 0x54c   :  { %2079 = vmatpush3.bf16.msra.mxu0 %v2252_v13 }
 0x54d   :  { %v1148_v27 = vrot.slane %v1147_v25, 1  ;;  %2080 = vmatprep.subr.bf16.mxu0 %v2735_v21 }
 0x54f   :  { %v1149_v28 = vadd.f32 %v1148_v27, %v1147_v25 }
 0x551   :  { %v1151_v30 = vsel %vm442_vm4, %v1149_v28, 0.0 }
 0x552   :  { %v1152_v31 = vadd.f32 %v1151_v30, %v1150_v29 }
 0x554   :  { %v1153_v34 = vmul.f32 0.25, %v1152_v31 }
 0x556   :  { %v1154_v35 = vsub.f32 %v1134_v4, %v1153_v34  ;;  %v1155_v36 = vsub.f32 %v1135_v14, %v1153_v34  ;;  %v2254_v14 = vld [vmem:[#allocation19 + $0x30] sm:$0xff]  }
 0x558   :  { %v1156_v37 = vmul.f32 %v1154_v35, %v1154_v35  ;;  %v1157_v38 = vmul.f32 %v1155_v36, %v1155_v36 }
 0x55a   :  { %v1158_v39 = vsel %vm818_vm5, %v1156_v37, 0.0  ;;  %v1165_v40 = vsel %vm818_vm5, %v1157_v38, 0.0  ;;  %v2737_v38 = vmov 0.0|0.0  }
 0x55b   :  { %v1159_v41 = vrot.slane %v1158_v39, 4  ;;  %v1166_v42 = vrot.slane %v1165_v40, 4 }
 0x55d   :  { %v1160_v43 = vadd.f32 %v1159_v41, %v1158_v39  ;;  %v1167_v44 = vadd.f32 %v1166_v42, %v1165_v40  ;;  %v1553_v39 = vld [vmem:[#allocation25 + $0x18] sm:$0xff]  ;;  %v1554_v41 = vld [vmem:[#allocation25 + $0x20] sm:$0xff]  ;;  %v1555_v42 = vld [vmem:[#allocation25 + $0x28] sm:$0xff] }
 0x55f   :  { %v1161_v45 = vrot.slane %v1160_v43, 2  ;;  %v1168_v46 = vrot.slane %v1167_v44, 2 }
 0x561   :  { %v1162_v47 = vadd.f32 %v1161_v45, %v1160_v43  ;;  %v1169_v48 = vadd.f32 %v1168_v46, %v1167_v44  ;;  %v1556_v43 = vld [vmem:[#allocation25 + $0x30] sm:$0xff]  ;;  %v1557_v44 = vld [vmem:[#allocation25 + $0x38] sm:$0xff]  ;;  %v1558_v46 = vld [vmem:[#allocation25 + $0x40] sm:$0xff] }
 0x562   :  { %v2139_v45 = vpack.c.bf16 %v1557_v44, %v1556_v43 }
 0x563   :  { %v1163_v49 = vrot.slane %v1162_v47, 1  ;;  %v1170_v50 = vrot.slane %v1169_v48, 1 }
 0x565   :  { %v1164_v51 = vadd.f32 %v1163_v49, %v1162_v47  ;;  %v1171_v52 = vadd.f32 %v1170_v50, %v1169_v48  ;;  %v1559_v47 = vld [vmem:[#allocation25 + $0x48] sm:$0xff]  ;;  %v1560_v49 = vld [vmem:[#allocation25 + $0x50] sm:$0xff]  ;;  %v1561_v50 = vld [vmem:[#allocation25 + $0x58] sm:$0xff] }
 0x566   :  { %v2142_v48 = vpack.c.bf16 %v1559_v47, %v1558_v46 }
 0x567   :  { %v1172_v53 = vsel %vm442_vm4, %v1164_v51, 0.0  ;;  %v1173_v54 = vsel %vm442_vm4, %v1171_v52, 0.0  ;;  %v2145_v51 = vpack.c.bf16 %v1561_v50, %v1560_v49  ;;  %v1562_v52 = vld [vmem:[#allocation25 + $0x60] sm:$0xff] }
 0x568   :  { %v1174_v55 = vadd.f32 %v1173_v54, %v1172_v53  ;;  %v1563_v53 = vld [vmem:[#allocation25 + $0x68] sm:$0xff] }
 0x569   :  { %v2148_v54 = vpack.c.bf16 %v1563_v53, %v1562_v52 }
 0x56a   :  { %v1175_v58 = vmul.f32 0.25, %v1174_v55  ;;  %v1564_v55 = vld [vmem:[#allocation25 + $0x70] sm:$0xff] }
 0x56c   :  { %v1176_v59 = vadd.f32 1e-05, %v1175_v58  ;;  %v1565_v58 = vld [vmem:[#allocation25 + $0x78] sm:$0xff] }
 0x56e   :  { %2262 = vrsqrt.f32 %v1176_v59  ;;  %v2151_v59 = vpack.c.bf16 %v1565_v58, %v1564_v55 }
 0x578   :  { %v2263_v60 = vpop.eup %2262 }
 0x579   :  { %v1179_v62 = vmul.f32 %v2263_v60, %v1155_v36  ;;  %v1178_v63 = vmul.f32 %v2263_v60, %v1154_v35  ;;  %v1550_v35 = vld [vmem:[#allocation25] sm:$0xff]  ;;  %v1551_v36 = vld [vmem:[#allocation25 + $0x8] sm:$0xff] }
 0x57a   :  { %v2130_v37 = vpack.c.bf16 %v1551_v36, %v1550_v35  ;;  %v1566_v60 = vld [vmem:[#allocation25 + $0x80] sm:$0xff] }
 0x57b   :  { %v1188_v1 = vmul.f32 %v1832_v61, %v1179_v62  ;;  %v1187_v2 = vmul.f32 %v1832_v61, %v1178_v63  ;;  %v1567_v61 = vld [vmem:[#allocation25 + $0x88] sm:$0xff]  ;;  %v1568_v63 = vld [vmem:[#allocation25 + $0x90] sm:$0xff] }
 0x57c   :  { %v2154_v62 = vpack.c.bf16 %v1567_v61, %v1566_v60 }
 0x57d   :  { %v1197_v3 = vadd.f32 %v1833_v0, %v1188_v1  ;;  %v1196_v4 = vadd.f32 %v1833_v0, %v1187_v2  ;;  %v1569_v0 = vld [vmem:[#allocation25 + $0x98] sm:$0xff]  ;;  %v1570_v1 = vld [vmem:[#allocation25 + $0xa0] sm:$0xff] }
 0x57e   :  { %v2157_v2 = vpack.c.bf16 %v1569_v0, %v1568_v63 }
 0x57f   :  { %1292 = vrot.lane.b32.xlu1 %v1197_v3, %s2721_s15  ;;  %1290 = vrot.lane.b32.xlu0 %v1196_v4, %s2721_s15  ;;  %v1198_v6 = vpack.c.bf16 %v1196_v4, %v1196_v4  ;;  %v1199_v8 = vpack.c.bf16 %v1197_v3, %v1197_v3  ;;  %v1571_v3 = vld [vmem:[#allocation25 + $0xa8] sm:$0xff]  ;;  %s2738_s15 = smov [#allocation31]  }
 0x580   :  { %v2160_v4 = vpack.c.bf16 %v1571_v3, %v1570_v1  ;;  %s1770_s12 = sshll.u32 %s2738_s15, 4  ;;  %s1771_s12 = int_to_ptr.vmem [resolvable:$true] %s1770_s12 }
 0x581   :  { %v1201_v9 = vsel %vm332_vm0, %v1198_v6, 0  ;;  %v1244_v11 = vsel %vm332_vm0, %v1199_v8, 0  ;;  %v1573_v6 = vld [vmem:[#allocation25 + $0xb8] sm:$0xff]  ;;  %v1662_v8 = vld [vmem:[#allocation28] sm:$0xff]  ;;  %s2666_s25 = scalar_lea.vmem %s1771_s12, 32  ;;  %p2671_p5 = scmp.lt.s32.totalorder %s1771_s12, %s1771_s12 }
 0x582   :  { %2059 = vmatpush3.bf16.msra.mxu1 %v1201_v9  ;;  %v1663_v9 = vld [vmem:[#allocation28 + $0x8] sm:$0xff]  ;;  %p2667_p4 = scmp.ne.s32.totalorder %s1771_s12, %s2666_s25  ;;  %p2672_p6 = scmp.lt.s32.totalorder %s2666_s25, %s2666_s25 }
 0x583   :  { %2064 = vmatprep.subr.bf16.mxu1 %v2735_v21 }
 0x584   :  { %p2673_p7 = por %p2672_p6, %p2671_p5 }
 0x585   :  { %2061 = vmatmul.mubr.msk.bf16.vlgmr.msra.gmra.mrb[24].mxu1 %vm328_vm2, %v3073_v16  ;;  %v2253_v16 = vld [vmem:[#allocation19 + $0x28] sm:$0xff]  }
 0x586   :  { %2065 = vmatpush3.bf16.msra.mxu1 %v1244_v11  ;;  %2066 = vmatprep.mubr.msk.bf16.mxu1 %vm2736_vm3, %v2735_v21  ;;  %v2166_v11 = vpack.c.bf16 %v1663_v9, %v1662_v8  ;;  %p2674_p8 = pnand %p2673_p7, %p2667_p4 }
 0x587   :  { %2090 = vmatprep.subr.bf16.mxu1 %v2735_v21  ;;  %2081 = vmatpush3.bf16.msra.mxu0 %v2253_v16 }
 0x588   :  { %2082 = vmatprep.subr.bf16.mxu0 %v2735_v21 }
 0x58b   :  { %2083 = vmatpush3.bf16.msra.mxu0 %v2254_v14 }
 0x58c   :  { %2084 = vmatprep.subr.bf16.mxu0 %v2735_v21 }
 0x58d   :  { %2067 = vmatmul.mubr.msk.bf16.vlgmr.msra.gmra.mrb[28].mxu1 %vm328_vm2, %v3078_v18  ;;  %v2255_v18 = vld [vmem:[#allocation19 + $0x38] sm:$0xff]  }
 0x58e   :  { %2091 = vmatpush3.bf16.msra.mxu1 %v2248_v5  ;;  %2106 = vmatprep.mubr.msk.bf16.mxu1 %vm2736_vm3, %v2735_v21  ;;  %v1572_v5 = vld [vmem:[#allocation25 + $0xb0] sm:$0xff] }
 0x58f   :  { %2092 = vmatprep.subr.bf16.mxu1 %v2735_v21  ;;  %2085 = vmatpush3.bf16.msra.mxu0 %v2255_v18 }
 0x590   :  { %2129 = vmatprep.subr.bf16.mxu0 %v2737_v38 }
 0x592   :  { %2093 = vmatpush3.bf16.msra.mxu1 %v2249_v7  ;;  %v2163_v7 = vpack.c.bf16 %v1573_v6, %v1572_v5 }
 0x593   :  { %2094 = vmatprep.subr.bf16.mxu1 %v2735_v21 }
 0x596   :  { %2095 = vmatpush3.bf16.msra.mxu1 %v2250_v10  ;;  %v1664_v10 = vld [vmem:[#allocation28 + $0x10] sm:$0xff] }
 0x597   :  { %2096 = vmatprep.subr.bf16.mxu1 %v2735_v21 }
 0x59a   :  { %2097 = vmatpush3.bf16.msra.mxu1 %v2251_v12  ;;  %v1665_v12 = vld [vmem:[#allocation28 + $0x18] sm:$0xff] }
 0x59b   :  { %2098 = vmatprep.subr.bf16.mxu1 %v2735_v21 }
 0x59e   :  { %2099 = vmatpush3.bf16.msra.mxu1 %v2252_v13  ;;  %v2169_v13 = vpack.c.bf16 %v1665_v12, %v1664_v10 }
 0x59f   :  { %2100 = vmatprep.subr.bf16.mxu1 %v2735_v21 }
 0x5a2   :  { %2101 = vmatpush3.bf16.msra.mxu1 %v2253_v16  ;;  %v1666_v16 = vld [vmem:[#allocation28 + $0x20] sm:$0xff] }
 0x5a3   :  { %2102 = vmatprep.subr.bf16.mxu1 %v2735_v21 }
 0x5a6   :  { %2103 = vmatpush3.bf16.msra.mxu1 %v2254_v14  ;;  %v1667_v14 = vld [vmem:[#allocation28 + $0x28] sm:$0xff] }
 0x5a7   :  { %2104 = vmatprep.subr.bf16.mxu1 %v2735_v21 }
 0x5aa   :  { %2105 = vmatpush3.bf16.msra.mxu1 %v2255_v18  ;;  %v2172_v18 = vpack.c.bf16 %v1667_v14, %v1666_v16 }
 0x5ab   :  { %2165 = vmatprep.subr.bf16.mxu1 %v2737_v38 }
 0x5f1   :  { %v3286_v20 = vpop.permute.xlu0 %1290  ;;  %v3291_v29 = vpop.permute.xlu1 %1292 }
 0x5f2   :  { %v1515_v12 = vsel %vm442_vm4, %v3204_v32, %v3286_v20 }
 0x5f3   :  { %v1518_v16 = vsel %vm1517_vm6, %v1515_v12, 0.0 }
 0x658   :  { %v1237_v15 = vpop.f32.mrb[24].mxu1 }
 0x659   :  { %v1286_v17 = vmul.f32 %v3166_v56, %v1237_v15  ;;  %v2062_v19 = vpop.f32.mrb[25].mxu1  ;;  %v1836_v15 = vld [vmem:[#allocation20] ss:$0 sm:$0xff] }
 0x65a   :  { %v1240_v22 = vpop.f32.mrb[26].mxu1 }
 0x65b   :  { %v1296_v23 = vsel %vm442_vm4, %v1286_v17, %v3286_v20  ;;  %v2063_v24 = vpop.f32.mrb[27].mxu1 }
 0x65c   :  { %v1298_v25 = vpack.c.bf16 %v1296_v23, %v1296_v23 }
 0x65e   :  { %2087 = vmatmul.mubr.bf16.vlgmr.msra.gmra.mrb[16].mxu0 %v1298_v25 }
 0x65f   :  { %2131 = vmatpush1.bf16.msra.mxu0 %v2130_v37 }
 0x660   :  { %v1280_v26 = vpop.f32.mrb[28].mxu1  ;;  %2132 = vmatprep.subr.bf16.mxu0 %v2737_v38 }
 0x661   :  { %v1287_v27 = vmul.f32 %v3168_v57, %v1280_v26  ;;  %v2068_v28 = vpop.f32.mrb[29].mxu1  ;;  %v1552_v57 = vld [vmem:[#allocation25 + $0x10] sm:$0xff] }
 0x662   :  { %v1283_v30 = vpop.f32.mrb[30].mxu1  ;;  %v2133_v40 = vpack.c.bf16 %v1553_v39, %v1552_v57 }
 0x663   :  { %v1297_v56 = vsel %vm442_vm4, %v1287_v27, %v3291_v29  ;;  %v2069_v31 = vpop.f32.mrb[31].mxu1 }
 0x664   :  { %v1299_v34 = vpack.c.bf16 %v1297_v56, %v1297_v56  ;;  %2134 = vmatpush1.bf16.msra.mxu0 %v2133_v40 }
 0x665   :  { %2135 = vmatprep.subr.bf16.mxu0 %v2737_v38 }
 0x666   :  { %2107 = vmatmul.mubr.bf16.vlgmr.msra.gmra.mrb[32].mxu1 %v1299_v34 }
 0x667   :  { %2126 = vmatprep.mubr.msk.f32.mxu1 %vm2736_vm3, %v2735_v21  ;;  %v2136_v21 = vpack.c.bf16 %v1555_v42, %v1554_v41  ;;  %2167 = vmatpush3.bf16.msra.mxu1 %v2166_v11  ;;  %v1516_v11 = vsel %vm442_vm4, %v3206_v33, %v3291_v29 }
 0x668   :  { %2168 = vmatprep.subr.bf16.mxu1 %v2737_v38 }
 0x669   :  { %2137 = vmatpush1.bf16.msra.mxu0 %v2136_v21 }
 0x66a   :  { %2138 = vmatprep.subr.bf16.mxu0 %v2737_v38 }
 0x66b   :  { %2170 = vmatpush3.bf16.msra.mxu1 %v2169_v13  ;;  %v1532_v13 = vsel %vm1517_vm6, %v1516_v11, 0.0 }
 0x66c   :  { %2171 = vmatprep.subr.bf16.mxu1 %v2737_v38  ;;  %v1533_v14 = vrot.slane %v1532_v13, 4 }
 0x66d   :  { %2140 = vmatpush1.bf16.msra.mxu0 %v2139_v45 }
 0x66e   :  { %2141 = vmatprep.subr.bf16.mxu0 %v2737_v38 }
 0x66f   :  { %2173 = vmatpush3.bf16.msra.mxu1 %v2172_v18  ;;  %v1519_v18 = vrot.slane %v1518_v16, 4 }
 0x670   :  { %2174 = vmatprep.subr.bf16.mxu1 %v2737_v38 }
 0x671   :  { %2143 = vmatpush1.bf16.msra.mxu0 %v2142_v48 }
 0x672   :  { %2144 = vmatprep.subr.bf16.mxu0 %v2737_v38 }
 0x675   :  { %2146 = vmatpush1.bf16.msra.mxu0 %v2145_v51 }
 0x676   :  { %2147 = vmatprep.subr.bf16.mxu0 %v2737_v38 }
 0x679   :  { %2149 = vmatpush1.bf16.msra.mxu0 %v2148_v54 }
 0x67a   :  { %2150 = vmatprep.subr.bf16.mxu0 %v2737_v38 }
 0x67d   :  { %2152 = vmatpush1.bf16.msra.mxu0 %v2151_v59 }
 0x67e   :  { %2153 = vmatprep.subr.bf16.mxu0 %v2737_v38 }
 0x681   :  { %2155 = vmatpush1.bf16.msra.mxu0 %v2154_v62 }
 0x682   :  { %2156 = vmatprep.subr.bf16.mxu0 %v2737_v38 }
 0x685   :  { %2158 = vmatpush1.bf16.msra.mxu0 %v2157_v2 }
 0x686   :  { %2159 = vmatprep.subr.bf16.mxu0 %v2737_v38 }
 0x689   :  { %2161 = vmatpush1.bf16.msra.mxu0 %v2160_v4 }
 0x68a   :  { %2162 = vmatprep.subr.bf16.mxu0 %v2737_v38 }
 0x68d   :  { %2164 = vmatpush1.bf16.msra.mxu0 %v2163_v7 }
 0x731   :  { %v1405_v17 = vpop.f32.mrb[16].mxu0 }
 0x732   :  { %v1406_v19 = vadd.f32 %v1836_v15, %v1405_v17  ;;  %v2088_v22 = vpop.f32.mrb[17].mxu0  ;;  %v1520_v17 = vadd.f32 %v1519_v18, %v1518_v16 }
 0x733   :  { %v1408_v23 = vpop.f32.mrb[18].mxu0  ;;  %v1845_v22 = vld [vmem:[#allocation22] ss:$0 sm:$0xff] }
 0x734   :  { %v1451_v24 = vmax.f32 %v1406_v19, 0.0  ;;  %v2089_v25 = vpop.f32.mrb[19].mxu0 }
 0x735   :  { %v1846_v25 = vld [vmem:[#allocation23] ss:$0 sm:$0xff] }
 0x736   :  { %v1453_v26 = vsel %vm818_vm5, %v1451_v24, 0.0 }
 0x737   :  { %v1454_v27 = vrot.slane %v1453_v26, 4 }
 0x739   :  { %v1455_v28 = vadd.f32 %v1454_v27, %v1453_v26  ;;  %v1445_v30 = vpop.f32.mrb[32].mxu1  ;;  %v1521_v27 = vrot.slane %v1520_v17, 2 }
 0x73a   :  { %v1446_v56 = vadd.f32 %v1836_v15, %v1445_v30  ;;  %v2108_v31 = vpop.f32.mrb[33].mxu1  ;;  %v1534_v15 = vadd.f32 %v1533_v14, %v1532_v13 }
 0x73b   :  { %v1456_v34 = vrot.slane %v1455_v28, 2  ;;  %v1448_v35 = vpop.f32.mrb[34].mxu1  ;;  %v1522_v32 = vadd.f32 %v1521_v27, %v1520_v17 }
 0x73c   :  { %v1452_v36 = vmax.f32 %v1446_v56, 0.0  ;;  %v2109_v37 = vpop.f32.mrb[35].mxu1  ;;  %v1535_v26 = vrot.slane %v1534_v15, 2 }
 0x73d   :  { %v1457_v57 = vadd.f32 %v1456_v34, %v1455_v28 }
 0x73e   :  { %v1460_v38 = vsel %vm818_vm5, %v1452_v36, 0.0  ;;  %v1536_v56 = vadd.f32 %v1535_v26, %v1534_v15 }
 0x73f   :  { %v1461_v39 = vrot.slane %v1460_v38, 4  ;;  %v1458_v41 = vrot.slane %v1457_v57, 1 }
 0x741   :  { %v1462_v40 = vadd.f32 %v1461_v39, %v1460_v38  ;;  %v1459_v43 = vadd.f32 %v1458_v41, %v1457_v57  ;;  %v1537_v38 = vrot.slane %v1536_v56, 1  ;;  %v1523_v57 = vrot.slane %v1522_v32, 1 }
 0x743   :  { %v1463_v42 = vrot.slane %v1462_v40, 2  ;;  %v1467_v46 = vsel %vm442_vm4, %v1459_v43, 0.0  ;;  %v1524_v43 = vadd.f32 %v1523_v57, %v1522_v32 }
 0x745   :  { %v1464_v21 = vadd.f32 %v1463_v42, %v1462_v40 }
 0x747   :  { %v1465_v44 = vrot.slane %v1464_v21, 1 }
 0x749   :  { %v1466_v45 = vadd.f32 %v1465_v44, %v1464_v21  ;;  %v1538_v21 = vadd.f32 %v1537_v38, %v1536_v56 }
 0x74b   :  { %v1468_v47 = vsel %vm442_vm4, %v1466_v45, 0.0 }
 0x74c   :  { %v1469_v48 = vadd.f32 %v1468_v47, %v1467_v46 }
 0x74e   :  { %v1470_v49 = vmul.f32 0.25, %v1469_v48  ;;  %v1546_v48 = vmul.f32 0.5, %v1524_v43 }
 0x750   :  { %v1471_v50 = vsub.f32 %v1451_v24, %v1470_v49  ;;  %v1472_v51 = vsub.f32 %v1452_v36, %v1470_v49  ;;  %v1548_v49 = vmul.f32 0.5, %v1538_v21 }
 0x752   :  { %v1473_v52 = vmul.f32 %v1471_v50, %v1471_v50  ;;  %v1474_v53 = vmul.f32 %v1472_v51, %v1472_v51 }
 0x754   :  { %v1475_v54 = vsel %vm818_vm5, %v1473_v52, 0.0  ;;  %v1482_v55 = vsel %vm818_vm5, %v1474_v53, 0.0  ;;  %v1586_v53 = vsel %vm1585_vm7, %v1548_v49, %v1546_v48 }
 0x755   :  { %v1476_v58 = vrot.slane %v1475_v54, 4  ;;  %v1483_v59 = vrot.slane %v1482_v55, 4 }
 0x757   :  { %v1477_v60 = vadd.f32 %v1476_v58, %v1475_v54  ;;  %v1484_v61 = vadd.f32 %v1483_v59, %v1482_v55  ;;  %v1668_v54 = vld [vmem:[#allocation28 + $0x30] sm:$0xff]  ;;  %v1669_v55 = vld [vmem:[#allocation28 + $0x38] sm:$0xff] }
 0x758   :  { %v2175_v58 = vpack.c.bf16 %v1669_v55, %v1668_v54  ;;  %v1847_v59 = vld [vmem:[#allocation26] ss:$0 sm:$0xff] }
 0x759   :  { %v1478_v62 = vrot.slane %v1477_v60, 2  ;;  %v1485_v63 = vrot.slane %v1484_v61, 2 }
 0x75a   :  { %2176 = vmatpush3.bf16.msra.mxu1 %v2175_v58 }
 0x75b   :  { %v1479_v0 = vadd.f32 %v1478_v62, %v1477_v60  ;;  %v1486_v1 = vadd.f32 %v1485_v63, %v1484_v61 }
 0x75d   :  { %v1480_v2 = vrot.slane %v1479_v0, 1  ;;  %v1487_v3 = vrot.slane %v1486_v1, 1 }
 0x75f   :  { %v1481_v4 = vadd.f32 %v1480_v2, %v1479_v0  ;;  %v1488_v5 = vadd.f32 %v1487_v3, %v1486_v1  ;;  %v1849_v0 = vld [vmem:[#allocation29] ss:$0 sm:$0xff] }
 0x761   :  { %v1489_v6 = vsel %vm442_vm4, %v1481_v4, 0.0  ;;  %v1490_v7 = vsel %vm442_vm4, %v1488_v5, 0.0 }
 0x762   :  { %v1491_v8 = vadd.f32 %v1490_v7, %v1489_v6 }
 0x764   :  { %v1492_v9 = vmul.f32 0.25, %v1491_v8 }
 0x766   :  { %v1493_v10 = vadd.f32 1e-05, %v1492_v9 }
 0x768   :  { %2264 = vrsqrt.f32 %v1493_v10 }
 0x772   :  { %v2265_v19 = vpop.eup %2264 }
 0x773   :  { %v1495_v23 = vmul.f32 %v2265_v19, %v1471_v50  ;;  %v1496_v24 = vmul.f32 %v2265_v19, %v1472_v51 }
 0x775   :  { %v1504_v28 = vmul.f32 %v1845_v22, %v1495_v23  ;;  %v1505_v33 = vmul.f32 %v1845_v22, %v1496_v24 }
 0x777   :  { %v1513_v29 = vadd.f32 %v1846_v25, %v1504_v28  ;;  %v1514_v30 = vadd.f32 %v1846_v25, %v1505_v33 }
 0x779   :  { %v1525_v20 = vsel %vm818_vm5, %v1513_v29, 0.0  ;;  %v1539_v31 = vsel %vm818_vm5, %v1514_v30, 0.0 }
 0x77a   :  { %v1526_v34 = vrot.slane %v1525_v20, 4  ;;  %v1540_v35 = vrot.slane %v1539_v31, 4 }
 0x77c   :  { %v1541_v36 = vadd.f32 %v1540_v35, %v1539_v31  ;;  %v1527_v37 = vadd.f32 %v1526_v34, %v1525_v20 }
 0x77e   :  { %v1528_v39 = vrot.slane %v1527_v37, 2  ;;  %v1542_v40 = vrot.slane %v1541_v36, 2 }
 0x780   :  { %v1529_v41 = vadd.f32 %v1528_v39, %v1527_v37  ;;  %v1543_v42 = vadd.f32 %v1542_v40, %v1541_v36 }
 0x782   :  { %v1530_v44 = vrot.slane %v1529_v41, 1  ;;  %v1544_v45 = vrot.slane %v1543_v42, 1 }
 0x784   :  { %v1531_v46 = vadd.f32 %v1530_v44, %v1529_v41  ;;  %v1545_v47 = vadd.f32 %v1544_v45, %v1543_v42 }
 0x786   :  { %v1547_v50 = vmul.f32 0.5, %v1531_v46  ;;  %v1549_v51 = vmul.f32 0.5, %v1545_v47 }
 0x788   :  { %v1587_v52 = vsel %vm1585_vm7, %v1549_v51, %v1547_v50 }
 0x789   :  { %1848 = vmatprep.mubr.msk.f32.mxu0 %vm442_vm4, %v1587_v52 }
 0x78a   :  { %1656 = vmatmul.mubr.f32.vlgmr.msra.gmra.mrb[20].mxu0 %v1586_v53 }
 0x85d   :  { %v1657_v60 = vpop.f32.mrb[20].mxu0 }
 0x85e   :  { %v1658_v61 = vadd.f32 %v1847_v59, %v1657_v60  ;;  %v1659_v62 = vpop.f32.mrb[21].mxu0 }
 0x860   :  { %v1661_v63 = vmax.f32 %v1658_v61, 0.0 }
 0x862   :  { %2127 = vmatmul.mubr.msk.f32.vlgmr.msra.gmra.mrb[36].mxu1 %vm442_vm4, %v1661_v63 }
 0x935   :  { %v1746_v1 = vpop.f32.mrb[36].mxu1 }
 0x936   :  { %v1747_v2 = vadd.f32 %v1849_v0, %v1746_v1  ;;  %v2128_v3 = vpop.f32.mrb[37].mxu1 }
 0x938   :  { %v1751_v4 = vsel %vm1750_vm8, %v1747_v2, -inf }
 0x939   :  { %1752 = vmax.xlane.f32.xlu0 %v1751_v4 }
 0x9c6   :  { %v1753_v5 = vpop.xlane.xlu0 %1752 }
 0x9c7   :  { %v1754_v6 = vsub.f32 %v1747_v2, %v1753_v5 }
 0x9c9   :  { %v1755_v7 = vmul.f32 1.442695, %v1754_v6 }
 0x9cb   :  { %2266 = vpow2.f32 %v1755_v7 }
 0x9d5   :  { %v2267_v8 = vpop.eup %2266 }
 0x9d6   :  { %v1757_v9 = vsel %vm1750_vm8, %v2267_v8, 0.0 }
 0x9d7   :  { %1758 = vadd.xlane.f32.xlu1 %v1757_v9 }
 0xa64   :  { %v1759_v10 = vpop.xlane.xlu1 %1758 }
 0xa65   :  { %2268 = vlog2.f32 %v1759_v10 }
 0xa6f   :  { %v2269_v11 = vpop.eup %2268 }
 0xa70   :  { %v1761_v12 = vmul.f32 0.6931472, %v2269_v11 }
 0xa72   :  { %v1762_v13 = vsub.f32 %v1754_v6, %v1761_v12 }
 0xa74   :  { %1763 = vst.msk [vmem:[#allocation31] sm:$0x3] %vm1750_vm8, %v1762_v13 }
 0xa75   :  { %2677 = shalt.err (!%p2674_p8)
}
 0xa76   :  { %s3379_s8 = sld [smem:[#allocation47_spill]] }
 0xa7c   :  { %s2678_s23 = scalar_lea.hbm %s3379_s8, 32 }
 0xa7d   :  { %p2679_p9 = scmp.ne.s32.totalorder %s3379_s8, %s2678_s23  ;;  %p2682_p10 = scmp.lt.u32.totalorder %s2678_s23, %s3379_s8 }
 0xa7f   :  { %p2684_p11 = pnand %p2682_p10, %p2679_p9 }
 0xa81   :  { %2687 = shalt.err (!%p2684_p11)
}
 0xa82   :  { %1773 = dma.vmem_to_hbm [thread:$0]  %s1771_s12, 32, %s3379_s8, [#allocation4]  }
 0xa83   :  { %2708 = dma.done.wait [#allocation4], 32  }
 0xa84   :  { %2709 = vsyncadd [#allocation4], 4294967264 }
 0xa85   :  { %1777 = vsyncpa [#allocation3], 1 }
 0xa86   :  { %1778 = vsyncpa [#allocation6], 1 }
 0xa87   :  { %1779 = vsyncpa [#allocation9], 1 }
 0xa88   :  { %1780 = vsyncpa [#allocation12], 1 }
 0xa89   :  { %1781 = vsyncpa [#allocation15], 1 }
 0xa8a   :  { %1782 = vsyncpa [#allocation18], 1 }
 0xa8b   :  { %1783 = vsyncpa [#allocation21], 1 }
 0xa8c   :  { %1784 = vsyncpa [#allocation24], 1 }
 0xa8d   :  { %1785 = vsyncpa [#allocation27], 1 }
 0xa8e   :  { %1786 = vsyncpa [#allocation30], 1 }
 0xa8f   :  { %1787 = vsyncpa [#allocation4], 1 }

// kernel: graphsage_diffpool_forward.4
= control target key start
LH: loop header
LB: loop body
LE: loop exit
PB: predicated region body
PF: predicated region fallthrough
CT: control target
= control target key end

     0   :  { %s4614_s6 = smov 1   ;;  %s4615_s10 = smov 2   ;;  %s5319_s0 = inlined_call_operand.smem [shape: u32[34], index: -1, kind: input, shape index: {}] }
   0x1   :  { %s4702_s5 = sld [smem:[%s5319_s0]]   ;;  %s4616_s14 = smov 3  }
   0x2   :  { %s4707_s9 = sld [smem:[%s5319_s0 + %s4614_s6]]   ;;  %s4617_s18 = smov 4  }
   0x3   :  { %s4712_s13 = sld [smem:[%s5319_s0 + %s4615_s10]]   ;;  %s4618_s22 = smov 5  }
   0x4   :  { %s4717_s17 = sld [smem:[%s5319_s0 + %s4616_s14]]   ;;  %s4619_s26 = smov 6  }
   0x5   :  { %s4722_s21 = sld [smem:[%s5319_s0 + %s4617_s18]]   ;;  %s4620_s30 = smov 7  }
   0x6   :  { %s4727_s25 = sld [smem:[%s5319_s0 + %s4618_s22]]   ;;  %s4621_s4 = smov 8  }
   0x7   :  { %5336 = sst [smem:[#allocation74_spill]] %s4702_s5  ;;  %s4622_s10 = smov 9  }
   0x8   :  { %s4732_s29 = sld [smem:[%s5319_s0 + %s4619_s26]]   ;;  %s4623_s15 = smov 10  }
   0x9   :  { %5337 = sst [smem:[#allocation75_spill]] %s4712_s13  ;;  %s4624_s20 = smov 11  }
   0xa   :  { %s4737_s3 = sld [smem:[%s5319_s0 + %s4620_s30]]   ;;  %s4625_s26 = smov 12  }
   0xb   :  { %5338 = sst [smem:[#allocation76_spill]] %s4722_s21  ;;  %s4626_s1 = smov 13  }
   0xc   :  { %s4742_s8 = sld [smem:[%s5319_s0 + %s4621_s4]]   ;;  %s4627_s7 = smov 14  }
   0xd   :  { %s4747_s14 = sld [smem:[%s5319_s0 + %s4622_s10]]   ;;  %s4629_s22 = smov 16  }
   0xe   :  { %5339 = sst [smem:[#allocation77_spill]] %s4732_s29  ;;  %s4630_s28 = smov 17  }
   0xf   :  { %s4752_s19 = sld [smem:[%s5319_s0 + %s4623_s15]]   ;;  %s4628_s15 = smov 15  }
  0x10   :  { %s4757_s24 = sld [smem:[%s5319_s0 + %s4624_s20]]  }
  0x11   :  { %s4762_s30 = sld [smem:[%s5319_s0 + %s4625_s26]]  }
  0x12   :  { %5340 = sst [smem:[#allocation78_spill]] %s4742_s8 }
  0x13   :  { %s4767_s6 = sld [smem:[%s5319_s0 + %s4626_s1]]  }
  0x14   :  { %s4772_s12 = sld [smem:[%s5319_s0 + %s4627_s7]]   ;;  %s4631_s7 = smov 18  }
  0x15   :  { %5341 = sst [smem:[#allocation79_spill]] %s4752_s19 }
  0x16   :  { %s4777_s20 = sld [smem:[%s5319_s0 + %s4628_s15]]   ;;  %s4632_s15 = smov 19  }
  0x17   :  { %5342 = sst [smem:[#allocation80_spill]] %s4762_s30 }
  0x18   :  { %s4782_s27 = sld [smem:[%s5319_s0 + %s4629_s22]]   ;;  %s4633_s22 = smov 20  }
  0x19   :  { %s4787_s4 = sld [smem:[%s5319_s0 + %s4630_s28]]   ;;  %s4634_s28 = smov 21  }
  0x1a   :  { %5343 = sst [smem:[#allocation81_spill]] %s4772_s12 }
  0x1b   :  { %s4792_s12 = sld [smem:[%s5319_s0 + %s4631_s7]]   ;;  %s4635_s7 = smov 22  }
  0x1c   :  { %s4797_s30 = sld [smem:[%s5319_s0 + %s4632_s15]]   ;;  %s4636_s15 = smov 23  }
  0x1d   :  { %s4807_s19 = sld [smem:[%s5319_s0 + %s4634_s28]]   ;;  %s4638_s28 = smov 25  }
  0x1e   :  { %5344 = sst [smem:[#allocation82_spill]] %s4782_s27 }
  0x1f   :  { %s4802_s27 = sld [smem:[%s5319_s0 + %s4633_s22]]   ;;  %s4637_s22 = smov 24  }
  0x20   :  { %s4817_s8 = sld [smem:[%s5319_s0 + %s4636_s15]]   ;;  %s4640_s15 = smov 27  }
  0x21   :  { %5345 = sst [smem:[#allocation83_spill]] %s4792_s12 }
  0x22   :  { %s4812_s12 = sld [smem:[%s5319_s0 + %s4635_s7]]   ;;  %s4639_s7 = smov 26  }
  0x23   :  { %s4827_s29 = sld [smem:[%s5319_s0 + %s4638_s28]]   ;;  %s4642_s28 = smov 29  }
  0x24   :  { %s4837_s21 = sld [smem:[%s5319_s0 + %s4640_s15]]   ;;  %s4644_s15 = smov 31  }
  0x25   :  { %5346 = sst [smem:[#allocation84_spill]] %s4802_s27 }
  0x26   :  { %s4822_s27 = sld [smem:[%s5319_s0 + %s4637_s22]]   ;;  %s4641_s22 = smov 28  }
  0x27   :  { %s4847_s13 = sld [smem:[%s5319_s0 + %s4642_s28]]   ;;  %s4646_s28 = smov 33  }
  0x28   :  { %5347 = sst [smem:[#allocation85_spill]] %s4812_s12 }
  0x29   :  { %s4832_s12 = sld [smem:[%s5319_s0 + %s4639_s7]]   ;;  %s4643_s7 = smov 30  }
  0x2a   :  { %s4857_s5 = sld [smem:[%s5319_s0 + %s4644_s15]]  }
  0x2c   :  { %5348 = sst [smem:[#allocation86_spill]] %s4822_s27 }
  0x2d   :  { %s4842_s27 = sld [smem:[%s5319_s0 + %s4641_s22]]   ;;  %s4645_s22 = smov 32  }
  0x2e   :  { %5351 = sst [smem:[#allocation89_spill]] %s4847_s13 }
  0x2f   :  { %5349 = sst [smem:[#allocation87_spill]] %s4832_s12 }
  0x30   :  { %s4852_s12 = sld [smem:[%s5319_s0 + %s4643_s7]]  }
  0x31   :  { %s4867_s13 = sld [smem:[%s5319_s0 + %s4646_s28]]  }
  0x33   :  { %5350 = sst [smem:[#allocation88_spill]] %s4842_s27 }
  0x34   :  { %s4862_s27 = sld [smem:[%s5319_s0 + %s4645_s22]]  }
  0x35   :  { %73 = vsyncpa [#allocation3], 0 }
  0x36   :  { %74 = vsyncpa [#allocation6], 0 }
  0x37   :  { %75 = vsyncpa [#allocation9], 0 }
  0x38   :  { %76 = vsyncpa [#allocation12], 0 }
  0x39   :  { %77 = vsyncpa [#allocation15], 0 }
  0x3a   :  { %78 = vsyncpa [#allocation18], 0 }
  0x3b   :  { %79 = vsyncpa [#allocation21], 0 }
  0x3c   :  { %80 = vsyncpa [#allocation24], 0 }
  0x3d   :  { %81 = vsyncpa [#allocation27], 0 }
  0x3e   :  { %82 = vsyncpa [#allocation30], 0 }
  0x3f   :  { %83 = vsyncpa [#allocation33], 0 }
  0x40   :  { %84 = vsyncpa [#allocation36], 0 }
  0x41   :  { %85 = vsyncpa [#allocation39], 0 }
  0x42   :  { %86 = vsyncpa [#allocation42], 0 }
  0x43   :  { %87 = vsyncpa [#allocation45], 0 }
  0x44   :  { %88 = vsyncpa [#allocation48], 0 }
  0x45   :  { %89 = vsyncpa [#allocation4], 0 }
  0x46   :  { %90 = vsyncpa [#allocation51], 0 }
  0x47   :  { %91 = vsyncpa [#allocation54], 0  ;;  %s4647_s0 = smov [#allocation5]   ;;  %s3828_s10 = scalar_lea.hbm %s4707_s9, 256 }
  0x48   :  { %s109_s7 = sshll.u32 %s4647_s0, 4  ;;  %p3829_p0 = scmp.ne.s32.totalorder %s4707_s9, %s3828_s10  ;;  %s110_s7 = int_to_ptr.vmem [resolvable:$true] %s109_s7 }
  0x49   :  { %p3832_p1 = scmp.lt.u32.totalorder %s3828_s10, %s4707_s9 }
  0x4b   :  { %p3834_p2 = pnand %p3832_p1, %p3829_p0 }
  0x4d   :  { %3837 = shalt.err (!%p3834_p2)
}
  0x4e   :  { %s3838_s11 = scalar_lea.vmem %s110_s7, 256  ;;  %p3843_p4 = scmp.lt.s32.totalorder %s110_s7, %s110_s7 }
  0x4f   :  { %p3839_p3 = scmp.ne.s32.totalorder %s110_s7, %s3838_s11  ;;  %p3844_p5 = scmp.lt.s32.totalorder %s3838_s11, %s3838_s11 }
  0x51   :  { %p3845_p6 = por %p3844_p5, %p3843_p4 }
  0x53   :  { %p3846_p7 = pnand %p3845_p6, %p3839_p3 }
  0x55   :  { %3849 = shalt.err (!%p3846_p7)
}
  0x56   :  { %s4648_s15 = smov 128   ;;  %s4649_s16 = smov 8  }
  0x57   :  { %115 = dma.hbm_to_vmem [thread:$0]  %s4707_s9, 256, %s110_s7, [#allocation6], %s4648_s15, %s4648_s15, %s4649_s16  }
  0x58   :  { %s4650_s18 = smov [#allocation8]   ;;  %s4651_s23 = smov [#allocation11]  }
  0x59   :  { %s134_s22 = sshll.u32 %s4650_s18, 4  ;;  %s154_s26 = sshll.u32 %s4651_s23, 4  ;;  %s135_s22 = int_to_ptr.vmem [resolvable:$true] %s134_s22  ;;  %s155_s26 = int_to_ptr.vmem [resolvable:$true] %s154_s26 }
  0x5a   :  { %s3850_s28 = scalar_lea.hbm %s4717_s17, 16 }
  0x5b   :  { %p3851_p8 = scmp.ne.s32.totalorder %s4717_s17, %s3850_s28  ;;  %p3854_p9 = scmp.lt.u32.totalorder %s3850_s28, %s4717_s17 }
  0x5d   :  { %p3856_p10 = pnand %p3854_p9, %p3851_p8 }
  0x5f   :  { %3859 = shalt.err (!%p3856_p10)
}
  0x60   :  { %s3860_s1 = scalar_lea.vmem %s135_s22, 16  ;;  %s3864_s2 = scalar_lea.vmem %s135_s22, 32 }
  0x61   :  { %p3861_p11 = scmp.ne.s32.totalorder %s135_s22, %s3860_s1  ;;  %p3865_p12 = scmp.lt.s32.totalorder %s135_s22, %s135_s22 }
  0x62   :  { %p3866_p13 = scmp.lt.s32.totalorder %s3864_s2, %s3860_s1 }
  0x64   :  { %p3867_p0 = por %p3866_p13, %p3865_p12 }
  0x66   :  { %p3868_p1 = pnand %p3867_p0, %p3861_p11 }
  0x68   :  { %3871 = shalt.err (!%p3868_p1)
}
  0x69   :  { %137 = dma.hbm_to_vmem [thread:$0]  %s4717_s17, 16, %s135_s22, [#allocation9]  }
  0x6a   :  { %s3872_s9 = scalar_lea.hbm %s4727_s25, 16 }
  0x6b   :  { %p3873_p2 = scmp.ne.s32.totalorder %s4727_s25, %s3872_s9  ;;  %p3876_p3 = scmp.lt.u32.totalorder %s3872_s9, %s4727_s25 }
  0x6d   :  { %p3878_p4 = pnand %p3876_p3, %p3873_p2 }
  0x6f   :  { %3881 = shalt.err (!%p3878_p4)
}
  0x70   :  { %s3882_s0 = scalar_lea.vmem %s155_s26, 16  ;;  %s3886_s7 = scalar_lea.vmem %s155_s26, 32 }
  0x71   :  { %p3883_p5 = scmp.ne.s32.totalorder %s155_s26, %s3882_s0  ;;  %p3887_p6 = scmp.lt.s32.totalorder %s155_s26, %s155_s26 }
  0x72   :  { %p3888_p7 = scmp.lt.s32.totalorder %s3886_s7, %s3882_s0 }
  0x74   :  { %p3889_p8 = por %p3888_p7, %p3887_p6 }
  0x76   :  { %p3890_p9 = pnand %p3889_p8, %p3883_p5 }
  0x78   :  { %3893 = shalt.err (!%p3890_p9)
}
  0x79   :  { %157 = dma.hbm_to_vmem [thread:$0]  %s4727_s25, 16, %s155_s26, [#allocation12]  }
  0x7a   :  { %s4652_s17 = smov [#allocation14]   ;;  %s4653_s11 = smov [#allocation17]  }
  0x7b   :  { %s176_s10 = sshll.u32 %s4652_s17, 4  ;;  %s196_s15 = sshll.u32 %s4653_s11, 4  ;;  %s177_s10 = int_to_ptr.vmem [resolvable:$true] %s176_s10  ;;  %s197_s15 = int_to_ptr.vmem [resolvable:$true] %s196_s15 }
  0x7c   :  { %s3894_s16 = scalar_lea.hbm %s4737_s3, 16 }
  0x7d   :  { %p3895_p10 = scmp.ne.s32.totalorder %s4737_s3, %s3894_s16  ;;  %p3898_p11 = scmp.lt.u32.totalorder %s3894_s16, %s4737_s3 }
  0x7f   :  { %p3900_p12 = pnand %p3898_p11, %p3895_p10 }
  0x81   :  { %3903 = shalt.err (!%p3900_p12)
}
  0x82   :  { %s3904_s18 = scalar_lea.vmem %s177_s10, 16  ;;  %s3908_s22 = scalar_lea.vmem %s177_s10, 32 }
  0x83   :  { %p3905_p13 = scmp.ne.s32.totalorder %s177_s10, %s3904_s18  ;;  %p3909_p0 = scmp.lt.s32.totalorder %s177_s10, %s177_s10 }
  0x84   :  { %p3910_p1 = scmp.lt.s32.totalorder %s3908_s22, %s3904_s18 }
  0x86   :  { %p3911_p2 = por %p3910_p1, %p3909_p0 }
  0x88   :  { %p3912_p3 = pnand %p3911_p2, %p3905_p13 }
  0x8a   :  { %3915 = shalt.err (!%p3912_p3)
}
  0x8b   :  { %179 = dma.hbm_to_vmem [thread:$0]  %s4737_s3, 16, %s177_s10, [#allocation15]  }
  0x8c   :  { %s3916_s25 = scalar_lea.hbm %s4747_s14, 16 }
  0x8d   :  { %p3917_p4 = scmp.ne.s32.totalorder %s4747_s14, %s3916_s25  ;;  %p3920_p5 = scmp.lt.u32.totalorder %s3916_s25, %s4747_s14 }
  0x8f   :  { %p3922_p6 = pnand %p3920_p5, %p3917_p4 }
  0x91   :  { %3925 = shalt.err (!%p3922_p6)
}
  0x92   :  { %s3926_s23 = scalar_lea.vmem %s197_s15, 16  ;;  %s3930_s26 = scalar_lea.vmem %s197_s15, 32 }
  0x93   :  { %p3927_p7 = scmp.ne.s32.totalorder %s197_s15, %s3926_s23  ;;  %p3931_p8 = scmp.lt.s32.totalorder %s197_s15, %s197_s15 }
  0x94   :  { %p3932_p9 = scmp.lt.s32.totalorder %s3930_s26, %s3926_s23 }
  0x96   :  { %p3933_p10 = por %p3932_p9, %p3931_p8 }
  0x98   :  { %p3934_p11 = pnand %p3933_p10, %p3927_p7 }
  0x9a   :  { %3937 = shalt.err (!%p3934_p11)
}
  0x9b   :  { %199 = dma.hbm_to_vmem [thread:$0]  %s4747_s14, 16, %s197_s15, [#allocation18]  }
  0x9c   :  { %s4654_s3 = smov [#allocation20]   ;;  %s4655_s1 = smov [#allocation23]  }
  0x9d   :  { %s218_s28 = sshll.u32 %s4654_s3, 4  ;;  %s238_s2 = sshll.u32 %s4655_s1, 4  ;;  %s219_s28 = int_to_ptr.vmem [resolvable:$true] %s218_s28  ;;  %s239_s2 = int_to_ptr.vmem [resolvable:$true] %s238_s2 }
  0x9e   :  { %s3938_s9 = scalar_lea.hbm %s4757_s24, 16 }
  0x9f   :  { %p3939_p12 = scmp.ne.s32.totalorder %s4757_s24, %s3938_s9  ;;  %p3942_p13 = scmp.lt.u32.totalorder %s3938_s9, %s4757_s24 }
  0xa1   :  { %p3944_p0 = pnand %p3942_p13, %p3939_p12 }
  0xa3   :  { %3947 = shalt.err (!%p3944_p0)
}
  0xa4   :  { %s3948_s0 = scalar_lea.vmem %s219_s28, 16  ;;  %s3952_s7 = scalar_lea.vmem %s219_s28, 32 }
  0xa5   :  { %p3949_p1 = scmp.ne.s32.totalorder %s219_s28, %s3948_s0  ;;  %p3953_p2 = scmp.lt.s32.totalorder %s219_s28, %s219_s28 }
  0xa6   :  { %p3954_p3 = scmp.lt.s32.totalorder %s3952_s7, %s3948_s0 }
  0xa8   :  { %p3955_p4 = por %p3954_p3, %p3953_p2 }
  0xaa   :  { %p3956_p5 = pnand %p3955_p4, %p3949_p1 }
  0xac   :  { %3959 = shalt.err (!%p3956_p5)
}
  0xad   :  { %221 = dma.hbm_to_vmem [thread:$0]  %s4757_s24, 16, %s219_s28, [#allocation21]  }
  0xae   :  { %s3960_s14 = scalar_lea.hbm %s4767_s6, 16 }
  0xaf   :  { %p3961_p6 = scmp.ne.s32.totalorder %s4767_s6, %s3960_s14  ;;  %p3964_p7 = scmp.lt.u32.totalorder %s3960_s14, %s4767_s6 }
  0xb1   :  { %p3966_p8 = pnand %p3964_p7, %p3961_p6 }
  0xb3   :  { %3969 = shalt.err (!%p3966_p8)
}
  0xb4   :  { %s3970_s17 = scalar_lea.vmem %s239_s2, 16  ;;  %s3974_s10 = scalar_lea.vmem %s239_s2, 32 }
  0xb5   :  { %p3971_p9 = scmp.ne.s32.totalorder %s239_s2, %s3970_s17  ;;  %p3975_p10 = scmp.lt.s32.totalorder %s239_s2, %s239_s2 }
  0xb6   :  { %p3976_p11 = scmp.lt.s32.totalorder %s3974_s10, %s3970_s17 }
  0xb8   :  { %p3977_p12 = por %p3976_p11, %p3975_p10 }
  0xba   :  { %p3978_p13 = pnand %p3977_p12, %p3971_p9 }
  0xbc   :  { %3981 = shalt.err (!%p3978_p13)
}
  0xbd   :  { %241 = dma.hbm_to_vmem [thread:$0]  %s4767_s6, 16, %s239_s2, [#allocation24]  }
  0xbe   :  { %s4656_s24 = smov [#allocation26]   ;;  %s4657_s15 = smov [#allocation29]  }
  0xbf   :  { %s259_s11 = sshll.u32 %s4656_s24, 4  ;;  %s282_s16 = sshll.u32 %s4657_s15, 4  ;;  %s260_s11 = int_to_ptr.vmem [resolvable:$true] %s259_s11  ;;  %s283_s16 = int_to_ptr.vmem [resolvable:$true] %s282_s16 }
  0xc0   :  { %s3982_s18 = scalar_lea.hbm %s4777_s20, 512 }
  0xc1   :  { %p3983_p0 = scmp.ne.s32.totalorder %s4777_s20, %s3982_s18  ;;  %p3986_p1 = scmp.lt.u32.totalorder %s3982_s18, %s4777_s20 }
  0xc3   :  { %p3988_p2 = pnand %p3986_p1, %p3983_p0 }
  0xc5   :  { %3991 = shalt.err (!%p3988_p2)
}
  0xc6   :  { %s3992_s22 = scalar_lea.vmem %s260_s11, 512  ;;  %p3997_p4 = scmp.lt.s32.totalorder %s260_s11, %s260_s11 }
  0xc7   :  { %p3993_p3 = scmp.ne.s32.totalorder %s260_s11, %s3992_s22  ;;  %p3998_p5 = scmp.lt.s32.totalorder %s3992_s22, %s3992_s22 }
  0xc9   :  { %p3999_p6 = por %p3998_p5, %p3997_p4 }
  0xcb   :  { %p4000_p7 = pnand %p3999_p6, %p3993_p3 }
  0xcd   :  { %4003 = shalt.err (!%p4000_p7)
}
  0xce   :  { %s4658_s25 = smov 64   ;;  %s4659_s6 = smov 4  }
  0xcf   :  { %265 = dma.hbm_to_vmem [thread:$0]  %s4777_s20, 512, %s260_s11, [#allocation27], %s4658_s25, %s4658_s25, %s4659_s6  }
  0xd0   :  { %s4004_s23 = scalar_lea.hbm %s4787_s4, 16 }
  0xd1   :  { %p4005_p8 = scmp.ne.s32.totalorder %s4787_s4, %s4004_s23  ;;  %p4008_p9 = scmp.lt.u32.totalorder %s4004_s23, %s4787_s4 }
  0xd3   :  { %p4010_p10 = pnand %p4008_p9, %p4005_p8 }
  0xd5   :  { %4013 = shalt.err (!%p4010_p10)
}
  0xd6   :  { %s4014_s26 = scalar_lea.vmem %s283_s16, 16  ;;  %s4018_s3 = scalar_lea.vmem %s283_s16, 32 }
  0xd7   :  { %p4015_p11 = scmp.ne.s32.totalorder %s283_s16, %s4014_s26  ;;  %p4019_p12 = scmp.lt.s32.totalorder %s283_s16, %s283_s16 }
  0xd8   :  { %p4020_p13 = scmp.lt.s32.totalorder %s4018_s3, %s4014_s26 }
  0xda   :  { %p4021_p0 = por %p4020_p13, %p4019_p12 }
  0xdc   :  { %p4022_p1 = pnand %p4021_p0, %p4015_p11 }
  0xde   :  { %4025 = shalt.err (!%p4022_p1)
}
  0xdf   :  { %285 = dma.hbm_to_vmem [thread:$0]  %s4787_s4, 16, %s283_s16, [#allocation30]  }
  0xe0   :  { %s4660_s20 = smov [#allocation32]   ;;  %s4661_s1 = smov [#allocation35]  }
  0xe1   :  { %s304_s28 = sshll.u32 %s4660_s20, 4  ;;  %s324_s2 = sshll.u32 %s4661_s1, 4  ;;  %s305_s28 = int_to_ptr.vmem [resolvable:$true] %s304_s28  ;;  %s325_s2 = int_to_ptr.vmem [resolvable:$true] %s324_s2 }
  0xe2   :  { %s4026_s9 = scalar_lea.hbm %s4797_s30, 16 }
  0xe3   :  { %p4027_p2 = scmp.ne.s32.totalorder %s4797_s30, %s4026_s9  ;;  %p4030_p3 = scmp.lt.u32.totalorder %s4026_s9, %s4797_s30 }
  0xe5   :  { %p4032_p4 = pnand %p4030_p3, %p4027_p2 }
  0xe7   :  { %4035 = shalt.err (!%p4032_p4)
}
  0xe8   :  { %s4036_s0 = scalar_lea.vmem %s305_s28, 16  ;;  %s4040_s7 = scalar_lea.vmem %s305_s28, 32 }
  0xe9   :  { %p4037_p5 = scmp.ne.s32.totalorder %s305_s28, %s4036_s0  ;;  %p4041_p6 = scmp.lt.s32.totalorder %s305_s28, %s305_s28 }
  0xea   :  { %p4042_p7 = scmp.lt.s32.totalorder %s4040_s7, %s4036_s0 }
  0xec   :  { %p4043_p8 = por %p4042_p7, %p4041_p6 }
  0xee   :  { %p4044_p9 = pnand %p4043_p8, %p4037_p5 }
  0xf0   :  { %4047 = shalt.err (!%p4044_p9)
}
  0xf1   :  { %307 = dma.hbm_to_vmem [thread:$0]  %s4797_s30, 16, %s305_s28, [#allocation33]  }
  0xf2   :  { %s4048_s4 = scalar_lea.hbm %s4807_s19, 16 }
  0xf3   :  { %p4049_p10 = scmp.ne.s32.totalorder %s4807_s19, %s4048_s4  ;;  %p4052_p11 = scmp.lt.u32.totalorder %s4048_s4, %s4807_s19 }
  0xf5   :  { %p4054_p12 = pnand %p4052_p11, %p4049_p10 }
  0xf7   :  { %4057 = shalt.err (!%p4054_p12)
}
  0xf8   :  { %s4058_s14 = scalar_lea.vmem %s325_s2, 16  ;;  %s4062_s17 = scalar_lea.vmem %s325_s2, 32 }
  0xf9   :  { %p4059_p13 = scmp.ne.s32.totalorder %s325_s2, %s4058_s14  ;;  %p4063_p0 = scmp.lt.s32.totalorder %s325_s2, %s325_s2 }
  0xfa   :  { %p4064_p1 = scmp.lt.s32.totalorder %s4062_s17, %s4058_s14 }
  0xfc   :  { %p4065_p2 = por %p4064_p1, %p4063_p0 }
  0xfe   :  { %p4066_p3 = pnand %p4065_p2, %p4059_p13 }
 0x100   :  { %4069 = shalt.err (!%p4066_p3)
}
 0x101   :  { %327 = dma.hbm_to_vmem [thread:$0]  %s4807_s19, 16, %s325_s2, [#allocation36]  }
 0x102   :  { %s4662_s30 = smov [#allocation38]   ;;  %s4663_s24 = smov [#allocation41]  }
 0x103   :  { %s346_s10 = sshll.u32 %s4662_s30, 4  ;;  %s366_s11 = sshll.u32 %s4663_s24, 4  ;;  %s347_s10 = int_to_ptr.vmem [resolvable:$true] %s346_s10  ;;  %s367_s11 = int_to_ptr.vmem [resolvable:$true] %s366_s11 }
 0x104   :  { %s4070_s15 = scalar_lea.hbm %s4817_s8, 16 }
 0x105   :  { %p4071_p4 = scmp.ne.s32.totalorder %s4817_s8, %s4070_s15  ;;  %p4074_p5 = scmp.lt.u32.totalorder %s4070_s15, %s4817_s8 }
 0x107   :  { %p4076_p6 = pnand %p4074_p5, %p4071_p4 }
 0x109   :  { %4079 = shalt.err (!%p4076_p6)
}
 0x10a   :  { %s4080_s16 = scalar_lea.vmem %s347_s10, 16  ;;  %s4084_s18 = scalar_lea.vmem %s347_s10, 32 }
 0x10b   :  { %p4081_p7 = scmp.ne.s32.totalorder %s347_s10, %s4080_s16  ;;  %p4085_p8 = scmp.lt.s32.totalorder %s347_s10, %s347_s10 }
 0x10c   :  { %p4086_p9 = scmp.lt.s32.totalorder %s4084_s18, %s4080_s16 }
 0x10e   :  { %p4087_p10 = por %p4086_p9, %p4085_p8 }
 0x110   :  { %p4088_p11 = pnand %p4087_p10, %p4081_p7 }
 0x112   :  { %4091 = shalt.err (!%p4088_p11)
}
 0x113   :  { %349 = dma.hbm_to_vmem [thread:$0]  %s4817_s8, 16, %s347_s10, [#allocation39]  }
 0x114   :  { %s4092_s19 = scalar_lea.hbm %s4827_s29, 16 }
 0x115   :  { %p4093_p12 = scmp.ne.s32.totalorder %s4827_s29, %s4092_s19  ;;  %p4096_p13 = scmp.lt.u32.totalorder %s4092_s19, %s4827_s29 }
 0x117   :  { %p4098_p0 = pnand %p4096_p13, %p4093_p12 }
 0x119   :  { %4101 = shalt.err (!%p4098_p0)
}
 0x11a   :  { %s4102_s22 = scalar_lea.vmem %s367_s11, 16  ;;  %s4106_s23 = scalar_lea.vmem %s367_s11, 32 }
 0x11b   :  { %p4103_p1 = scmp.ne.s32.totalorder %s367_s11, %s4102_s22  ;;  %p4107_p2 = scmp.lt.s32.totalorder %s367_s11, %s367_s11 }
 0x11c   :  { %p4108_p3 = scmp.lt.s32.totalorder %s4106_s23, %s4102_s22 }
 0x11e   :  { %p4109_p4 = por %p4108_p3, %p4107_p2 }
 0x120   :  { %p4110_p5 = pnand %p4109_p4, %p4103_p1 }
 0x122   :  { %4113 = shalt.err (!%p4110_p5)
}
 0x123   :  { %369 = dma.hbm_to_vmem [thread:$0]  %s4827_s29, 16, %s367_s11, [#allocation42]  }
 0x124   :  { %s4664_s8 = smov [#allocation44]   ;;  %s4665_s3 = smov [#allocation2]  }
 0x125   :  { %s388_s26 = sshll.u32 %s4664_s8, 4  ;;  %s97_s20 = sshll.u32 %s4665_s3, 4  ;;  %s389_s26 = int_to_ptr.vmem [resolvable:$true] %s388_s26  ;;  %s98_s20 = int_to_ptr.vmem [resolvable:$true] %s97_s20 }
 0x126   :  { %s4114_s28 = scalar_lea.hbm %s4837_s21, 16 }
 0x127   :  { %p4115_p6 = scmp.ne.s32.totalorder %s4837_s21, %s4114_s28  ;;  %p4118_p7 = scmp.lt.u32.totalorder %s4114_s28, %s4837_s21 }
 0x129   :  { %p4120_p8 = pnand %p4118_p7, %p4115_p6 }
 0x12b   :  { %4123 = shalt.err (!%p4120_p8)
}
 0x12c   :  { %s4124_s1 = scalar_lea.vmem %s389_s26, 16  ;;  %s4128_s2 = scalar_lea.vmem %s389_s26, 32 }
 0x12d   :  { %p4125_p9 = scmp.ne.s32.totalorder %s389_s26, %s4124_s1  ;;  %p4129_p10 = scmp.lt.s32.totalorder %s389_s26, %s389_s26 }
 0x12e   :  { %p4130_p11 = scmp.lt.s32.totalorder %s4128_s2, %s4124_s1 }
 0x130   :  { %p4131_p12 = por %p4130_p11, %p4129_p10 }
 0x132   :  { %p4132_p13 = pnand %p4131_p12, %p4125_p9 }
 0x134   :  { %4135 = shalt.err (!%p4132_p13)
}
 0x135   :  { %s5352_s29 = sld [smem:[#allocation74_spill]] }
 0x136   :  { %391 = dma.hbm_to_vmem [thread:$0]  %s4837_s21, 16, %s389_s26, [#allocation45]  }
 0x13b   :  { %s4136_s9 = scalar_lea.hbm %s5352_s29, 512 }
 0x13c   :  { %p4137_p0 = scmp.ne.s32.totalorder %s5352_s29, %s4136_s9  ;;  %p4140_p1 = scmp.lt.u32.totalorder %s4136_s9, %s5352_s29 }
 0x13e   :  { %p4142_p2 = pnand %p4140_p1, %p4137_p0 }
 0x140   :  { %4145 = shalt.err (!%p4142_p2)
}
 0x141   :  { %s4146_s0 = scalar_lea.vmem %s98_s20, 512  ;;  %p4151_p4 = scmp.lt.s32.totalorder %s98_s20, %s98_s20 }
 0x142   :  { %p4147_p3 = scmp.ne.s32.totalorder %s98_s20, %s4146_s0  ;;  %p4152_p5 = scmp.lt.s32.totalorder %s4146_s0, %s4146_s0 }
 0x144   :  { %p4153_p6 = por %p4152_p5, %p4151_p4 }
 0x146   :  { %p4154_p7 = pnand %p4153_p6, %p4147_p3 }
 0x148   :  { %4157 = shalt.err (!%p4154_p7)
}
 0x149   :  { %s4666_s7 = smov 256   ;;  %s5353_s4 = sld [smem:[#allocation75_spill]] }
 0x14a   :  { %s4667_s14 = smov 16   ;;  %s4668_s21 = smov [#allocation7]  }
 0x14b   :  { %103 = dma.hbm_to_vmem [thread:$0]  %s5352_s29, 512, %s98_s20, [#allocation3], %s4666_s7, %s4666_s7, %s4667_s14  }
 0x14c   :  { %s121_s17 = sshll.u32 %s4668_s21, 4  ;;  %s4669_s30 = smov [#allocation10]   ;;  %s122_s17 = int_to_ptr.vmem [resolvable:$true] %s121_s17 }
 0x14d   :  { %s144_s10 = sshll.u32 %s4669_s30, 4  ;;  %s145_s10 = int_to_ptr.vmem [resolvable:$true] %s144_s10 }
 0x14f   :  { %s4158_s24 = scalar_lea.hbm %s5353_s4, 3072 }
 0x150   :  { %p4159_p8 = scmp.ne.s32.totalorder %s5353_s4, %s4158_s24  ;;  %p4162_p9 = scmp.lt.u32.totalorder %s4158_s24, %s5353_s4 }
 0x152   :  { %p4164_p10 = pnand %p4162_p9, %p4159_p8 }
 0x154   :  { %4167 = shalt.err (!%p4164_p10)
}
 0x155   :  { %s4168_s11 = scalar_lea.vmem %s122_s17, 3072  ;;  %p4173_p12 = scmp.lt.s32.totalorder %s122_s17, %s122_s17 }
 0x156   :  { %p4169_p11 = scmp.ne.s32.totalorder %s122_s17, %s4168_s11  ;;  %p4174_p13 = scmp.lt.s32.totalorder %s4168_s11, %s4168_s11 }
 0x158   :  { %p4175_p0 = por %p4174_p13, %p4173_p12 }
 0x15a   :  { %p4176_p1 = pnand %p4175_p0, %p4169_p11 }
 0x15c   :  { %4179 = shalt.err (!%p4176_p1)
}
 0x15d   :  { %s5354_s15 = sld [smem:[#allocation76_spill]] }
 0x15e   :  { %127 = dma.hbm_to_vmem [thread:$0]  %s5353_s4, 3072, %s122_s17, [#allocation6], %s4658_s25, %s4658_s25, %s4659_s6  }
 0x163   :  { %s4180_s16 = scalar_lea.hbm %s5354_s15, 16 }
 0x164   :  { %p4181_p2 = scmp.ne.s32.totalorder %s5354_s15, %s4180_s16  ;;  %p4184_p3 = scmp.lt.u32.totalorder %s4180_s16, %s5354_s15 }
 0x166   :  { %p4186_p4 = pnand %p4184_p3, %p4181_p2 }
 0x168   :  { %4189 = shalt.err (!%p4186_p4)
}
 0x169   :  { %s4190_s18 = scalar_lea.vmem %s145_s10, 16  ;;  %s4194_s19 = scalar_lea.vmem %s145_s10, 32 }
 0x16a   :  { %p4191_p5 = scmp.ne.s32.totalorder %s145_s10, %s4190_s18  ;;  %p4195_p6 = scmp.lt.s32.totalorder %s145_s10, %s145_s10 }
 0x16b   :  { %p4196_p7 = scmp.lt.s32.totalorder %s4194_s19, %s4190_s18 }
 0x16d   :  { %p4197_p8 = por %p4196_p7, %p4195_p6 }
 0x16f   :  { %p4198_p9 = pnand %p4197_p8, %p4191_p5 }
 0x171   :  { %4201 = shalt.err (!%p4198_p9)
}
 0x172   :  { %s5355_s22 = sld [smem:[#allocation77_spill]]  ;;  %s4670_s23 = smov [#allocation13]  }
 0x173   :  { %147 = dma.hbm_to_vmem [thread:$0]  %s5354_s15, 16, %s145_s10, [#allocation9]  }
 0x174   :  { %s163_s8 = sshll.u32 %s4670_s23, 4  ;;  %s4671_s26 = smov [#allocation16]   ;;  %s164_s8 = int_to_ptr.vmem [resolvable:$true] %s163_s8 }
 0x175   :  { %s186_s3 = sshll.u32 %s4671_s26, 4  ;;  %s187_s3 = int_to_ptr.vmem [resolvable:$true] %s186_s3 }
 0x178   :  { %s4202_s20 = scalar_lea.hbm %s5355_s22, 1024 }
 0x179   :  { %p4203_p10 = scmp.ne.s32.totalorder %s5355_s22, %s4202_s20  ;;  %p4206_p11 = scmp.lt.u32.totalorder %s4202_s20, %s5355_s22 }
 0x17b   :  { %p4208_p12 = pnand %p4206_p11, %p4203_p10 }
 0x17d   :  { %4211 = shalt.err (!%p4208_p12)
}
 0x17e   :  { %s4212_s28 = scalar_lea.vmem %s164_s8, 1024  ;;  %p4217_p0 = scmp.lt.s32.totalorder %s164_s8, %s164_s8 }
 0x17f   :  { %p4213_p13 = scmp.ne.s32.totalorder %s164_s8, %s4212_s28  ;;  %p4218_p1 = scmp.lt.s32.totalorder %s4212_s28, %s4212_s28 }
 0x181   :  { %p4219_p2 = por %p4218_p1, %p4217_p0 }
 0x183   :  { %p4220_p3 = pnand %p4219_p2, %p4213_p13 }
 0x185   :  { %4223 = shalt.err (!%p4220_p3)
}
 0x186   :  { %s5356_s1 = sld [smem:[#allocation78_spill]] }
 0x187   :  { %169 = dma.hbm_to_vmem [thread:$0]  %s5355_s22, 1024, %s164_s8, [#allocation12], %s4658_s25, %s4658_s25, %s4659_s6  }
 0x18c   :  { %s4224_s2 = scalar_lea.hbm %s5356_s1, 16 }
 0x18d   :  { %p4225_p4 = scmp.ne.s32.totalorder %s5356_s1, %s4224_s2  ;;  %p4228_p5 = scmp.lt.u32.totalorder %s4224_s2, %s5356_s1 }
 0x18f   :  { %p4230_p6 = pnand %p4228_p5, %p4225_p4 }
 0x191   :  { %4233 = shalt.err (!%p4230_p6)
}
 0x192   :  { %s4234_s29 = scalar_lea.vmem %s187_s3, 16  ;;  %s4238_s9 = scalar_lea.vmem %s187_s3, 32 }
 0x193   :  { %p4235_p7 = scmp.ne.s32.totalorder %s187_s3, %s4234_s29  ;;  %p4239_p8 = scmp.lt.s32.totalorder %s187_s3, %s187_s3 }
 0x194   :  { %p4240_p9 = scmp.lt.s32.totalorder %s4238_s9, %s4234_s29 }
 0x196   :  { %p4241_p10 = por %p4240_p9, %p4239_p8 }
 0x198   :  { %p4242_p11 = pnand %p4241_p10, %p4235_p7 }
 0x19a   :  { %4245 = shalt.err (!%p4242_p11)
}
 0x19b   :  { %s5357_s0 = sld [smem:[#allocation79_spill]]  ;;  %s4672_s7 = smov [#allocation19]  }
 0x19c   :  { %189 = dma.hbm_to_vmem [thread:$0]  %s5356_s1, 16, %s187_s3, [#allocation15]  }
 0x19d   :  { %s205_s4 = sshll.u32 %s4672_s7, 4  ;;  %s4673_s14 = smov [#allocation22]   ;;  %s206_s4 = int_to_ptr.vmem [resolvable:$true] %s205_s4 }
 0x19e   :  { %s228_s21 = sshll.u32 %s4673_s14, 4  ;;  %s229_s21 = int_to_ptr.vmem [resolvable:$true] %s228_s21 }
 0x1a1   :  { %s4246_s17 = scalar_lea.hbm %s5357_s0, 1024 }
 0x1a2   :  { %p4247_p12 = scmp.ne.s32.totalorder %s5357_s0, %s4246_s17  ;;  %p4250_p13 = scmp.lt.u32.totalorder %s4246_s17, %s5357_s0 }
 0x1a4   :  { %p4252_p0 = pnand %p4250_p13, %p4247_p12 }
 0x1a6   :  { %4255 = shalt.err (!%p4252_p0)
}
 0x1a7   :  { %s4256_s30 = scalar_lea.vmem %s206_s4, 1024  ;;  %p4261_p2 = scmp.lt.s32.totalorder %s206_s4, %s206_s4 }
 0x1a8   :  { %p4257_p1 = scmp.ne.s32.totalorder %s206_s4, %s4256_s30  ;;  %p4262_p3 = scmp.lt.s32.totalorder %s4256_s30, %s4256_s30 }
 0x1aa   :  { %p4263_p4 = por %p4262_p3, %p4261_p2 }
 0x1ac   :  { %p4264_p5 = pnand %p4263_p4, %p4257_p1 }
 0x1ae   :  { %4267 = shalt.err (!%p4264_p5)
}
 0x1af   :  { %s5358_s10 = sld [smem:[#allocation80_spill]] }
 0x1b0   :  { %211 = dma.hbm_to_vmem [thread:$0]  %s5357_s0, 1024, %s206_s4, [#allocation18], %s4658_s25, %s4658_s25, %s4659_s6  }
 0x1b5   :  { %s4268_s24 = scalar_lea.hbm %s5358_s10, 16 }
 0x1b6   :  { %p4269_p6 = scmp.ne.s32.totalorder %s5358_s10, %s4268_s24  ;;  %p4272_p7 = scmp.lt.u32.totalorder %s4268_s24, %s5358_s10 }
 0x1b8   :  { %p4274_p8 = pnand %p4272_p7, %p4269_p6 }
 0x1ba   :  { %4277 = shalt.err (!%p4274_p8)
}
 0x1bb   :  { %s4278_s11 = scalar_lea.vmem %s229_s21, 16  ;;  %s4282_s15 = scalar_lea.vmem %s229_s21, 32 }
 0x1bc   :  { %p4279_p9 = scmp.ne.s32.totalorder %s229_s21, %s4278_s11  ;;  %p4283_p10 = scmp.lt.s32.totalorder %s229_s21, %s229_s21 }
 0x1bd   :  { %p4284_p11 = scmp.lt.s32.totalorder %s4282_s15, %s4278_s11 }
 0x1bf   :  { %p4285_p12 = por %p4284_p11, %p4283_p10 }
 0x1c1   :  { %p4286_p13 = pnand %p4285_p12, %p4279_p9 }
 0x1c3   :  { %4289 = shalt.err (!%p4286_p13)
}
 0x1c4   :  { %s5359_s16 = sld [smem:[#allocation81_spill]]  ;;  %s4674_s18 = smov [#allocation25]  }
 0x1c5   :  { %231 = dma.hbm_to_vmem [thread:$0]  %s5358_s10, 16, %s229_s21, [#allocation21]  }
 0x1c6   :  { %s247_s19 = sshll.u32 %s4674_s18, 4  ;;  %s4675_s22 = smov [#allocation28]   ;;  %s248_s19 = int_to_ptr.vmem [resolvable:$true] %s247_s19 }
 0x1c7   :  { %s272_s23 = sshll.u32 %s4675_s22, 4  ;;  %s273_s23 = int_to_ptr.vmem [resolvable:$true] %s272_s23 }
 0x1ca   :  { %s4290_s8 = scalar_lea.hbm %s5359_s16, 512 }
 0x1cb   :  { %p4291_p0 = scmp.ne.s32.totalorder %s5359_s16, %s4290_s8  ;;  %p4294_p1 = scmp.lt.u32.totalorder %s4290_s8, %s5359_s16 }
 0x1cd   :  { %p4296_p2 = pnand %p4294_p1, %p4291_p0 }
 0x1cf   :  { %4299 = shalt.err (!%p4296_p2)
}
 0x1d0   :  { %s4300_s26 = scalar_lea.vmem %s248_s19, 512  ;;  %p4305_p4 = scmp.lt.s32.totalorder %s248_s19, %s248_s19 }
 0x1d1   :  { %p4301_p3 = scmp.ne.s32.totalorder %s248_s19, %s4300_s26  ;;  %p4306_p5 = scmp.lt.s32.totalorder %s4300_s26, %s4300_s26 }
 0x1d3   :  { %p4307_p6 = por %p4306_p5, %p4305_p4 }
 0x1d5   :  { %p4308_p7 = pnand %p4307_p6, %p4301_p3 }
 0x1d7   :  { %4311 = shalt.err (!%p4308_p7)
}
 0x1d8   :  { %s5360_s3 = sld [smem:[#allocation82_spill]] }
 0x1d9   :  { %253 = dma.hbm_to_vmem [thread:$0]  %s5359_s16, 512, %s248_s19, [#allocation24], %s4658_s25, %s4658_s25, %s4659_s6  }
 0x1de   :  { %s4312_s20 = scalar_lea.hbm %s5360_s3, 16 }
 0x1df   :  { %p4313_p8 = scmp.ne.s32.totalorder %s5360_s3, %s4312_s20  ;;  %p4316_p9 = scmp.lt.u32.totalorder %s4312_s20, %s5360_s3 }
 0x1e1   :  { %p4318_p10 = pnand %p4316_p9, %p4313_p8 }
 0x1e3   :  { %4321 = shalt.err (!%p4318_p10)
}
 0x1e4   :  { %s4322_s28 = scalar_lea.vmem %s273_s23, 16  ;;  %s4326_s1 = scalar_lea.vmem %s273_s23, 32 }
 0x1e5   :  { %p4323_p11 = scmp.ne.s32.totalorder %s273_s23, %s4322_s28  ;;  %p4327_p12 = scmp.lt.s32.totalorder %s273_s23, %s273_s23 }
 0x1e6   :  { %p4328_p13 = scmp.lt.s32.totalorder %s4326_s1, %s4322_s28 }
 0x1e8   :  { %p4329_p0 = por %p4328_p13, %p4327_p12 }
 0x1ea   :  { %p4330_p1 = pnand %p4329_p0, %p4323_p11 }
 0x1ec   :  { %4333 = shalt.err (!%p4330_p1)
}
 0x1ed   :  { %s5361_s2 = sld [smem:[#allocation83_spill]]  ;;  %s4676_s29 = smov [#allocation31]  }
 0x1ee   :  { %275 = dma.hbm_to_vmem [thread:$0]  %s5360_s3, 16, %s273_s23, [#allocation27]  }
 0x1ef   :  { %s291_s9 = sshll.u32 %s4676_s29, 4  ;;  %s4677_s0 = smov [#allocation34]   ;;  %s292_s9 = int_to_ptr.vmem [resolvable:$true] %s291_s9 }
 0x1f0   :  { %s314_s7 = sshll.u32 %s4677_s0, 4  ;;  %s315_s7 = int_to_ptr.vmem [resolvable:$true] %s314_s7 }
 0x1f3   :  { %s4334_s4 = scalar_lea.hbm %s5361_s2, 3072 }
 0x1f4   :  { %p4335_p2 = scmp.ne.s32.totalorder %s5361_s2, %s4334_s4  ;;  %p4338_p3 = scmp.lt.u32.totalorder %s4334_s4, %s5361_s2 }
 0x1f6   :  { %p4340_p4 = pnand %p4338_p3, %p4335_p2 }
 0x1f8   :  { %4343 = shalt.err (!%p4340_p4)
}
 0x1f9   :  { %s4344_s14 = scalar_lea.vmem %s292_s9, 3072  ;;  %p4349_p6 = scmp.lt.s32.totalorder %s292_s9, %s292_s9 }
 0x1fa   :  { %p4345_p5 = scmp.ne.s32.totalorder %s292_s9, %s4344_s14  ;;  %p4350_p7 = scmp.lt.s32.totalorder %s4344_s14, %s4344_s14 }
 0x1fc   :  { %p4351_p8 = por %p4350_p7, %p4349_p6 }
 0x1fe   :  { %p4352_p9 = pnand %p4351_p8, %p4345_p5 }
 0x200   :  { %4355 = shalt.err (!%p4352_p9)
}
 0x201   :  { %s5362_s21 = sld [smem:[#allocation84_spill]] }
 0x202   :  { %297 = dma.hbm_to_vmem [thread:$0]  %s5361_s2, 3072, %s292_s9, [#allocation30], %s4658_s25, %s4658_s25, %s4659_s6  }
 0x207   :  { %s4356_s17 = scalar_lea.hbm %s5362_s21, 16 }
 0x208   :  { %p4357_p10 = scmp.ne.s32.totalorder %s5362_s21, %s4356_s17  ;;  %p4360_p11 = scmp.lt.u32.totalorder %s4356_s17, %s5362_s21 }
 0x20a   :  { %p4362_p12 = pnand %p4360_p11, %p4357_p10 }
 0x20c   :  { %4365 = shalt.err (!%p4362_p12)
}
 0x20d   :  { %s4366_s30 = scalar_lea.vmem %s315_s7, 16  ;;  %s4370_s10 = scalar_lea.vmem %s315_s7, 32 }
 0x20e   :  { %p4367_p13 = scmp.ne.s32.totalorder %s315_s7, %s4366_s30  ;;  %p4371_p0 = scmp.lt.s32.totalorder %s315_s7, %s315_s7 }
 0x20f   :  { %p4372_p1 = scmp.lt.s32.totalorder %s4370_s10, %s4366_s30 }
 0x211   :  { %p4373_p2 = por %p4372_p1, %p4371_p0 }
 0x213   :  { %p4374_p3 = pnand %p4373_p2, %p4367_p13 }
 0x215   :  { %4377 = shalt.err (!%p4374_p3)
}
 0x216   :  { %s5363_s24 = sld [smem:[#allocation85_spill]]  ;;  %s4678_s11 = smov [#allocation37]  }
 0x217   :  { %317 = dma.hbm_to_vmem [thread:$0]  %s5362_s21, 16, %s315_s7, [#allocation33]  }
 0x218   :  { %s333_s15 = sshll.u32 %s4678_s11, 4  ;;  %s4679_s16 = smov [#allocation40]   ;;  %s334_s15 = int_to_ptr.vmem [resolvable:$true] %s333_s15 }
 0x219   :  { %s356_s18 = sshll.u32 %s4679_s16, 4  ;;  %s357_s18 = int_to_ptr.vmem [resolvable:$true] %s356_s18 }
 0x21c   :  { %s4378_s19 = scalar_lea.hbm %s5363_s24, 1024 }
 0x21d   :  { %p4379_p4 = scmp.ne.s32.totalorder %s5363_s24, %s4378_s19  ;;  %p4382_p5 = scmp.lt.u32.totalorder %s4378_s19, %s5363_s24 }
 0x21f   :  { %p4384_p6 = pnand %p4382_p5, %p4379_p4 }
 0x221   :  { %4387 = shalt.err (!%p4384_p6)
}
 0x222   :  { %s4388_s22 = scalar_lea.vmem %s334_s15, 1024  ;;  %p4393_p8 = scmp.lt.s32.totalorder %s334_s15, %s334_s15 }
 0x223   :  { %p4389_p7 = scmp.ne.s32.totalorder %s334_s15, %s4388_s22  ;;  %p4394_p9 = scmp.lt.s32.totalorder %s4388_s22, %s4388_s22 }
 0x225   :  { %p4395_p10 = por %p4394_p9, %p4393_p8 }
 0x227   :  { %p4396_p11 = pnand %p4395_p10, %p4389_p7 }
 0x229   :  { %4399 = shalt.err (!%p4396_p11)
}
 0x22a   :  { %s5364_s23 = sld [smem:[#allocation86_spill]] }
 0x22b   :  { %339 = dma.hbm_to_vmem [thread:$0]  %s5363_s24, 1024, %s334_s15, [#allocation36], %s4658_s25, %s4658_s25, %s4659_s6  }
 0x230   :  { %s4400_s8 = scalar_lea.hbm %s5364_s23, 16 }
 0x231   :  { %p4401_p12 = scmp.ne.s32.totalorder %s5364_s23, %s4400_s8  ;;  %p4404_p13 = scmp.lt.u32.totalorder %s4400_s8, %s5364_s23 }
 0x233   :  { %p4406_p0 = pnand %p4404_p13, %p4401_p12 }
 0x235   :  { %4409 = shalt.err (!%p4406_p0)
}
 0x236   :  { %s4410_s26 = scalar_lea.vmem %s357_s18, 16  ;;  %s4414_s3 = scalar_lea.vmem %s357_s18, 32 }
 0x237   :  { %p4411_p1 = scmp.ne.s32.totalorder %s357_s18, %s4410_s26  ;;  %p4415_p2 = scmp.lt.s32.totalorder %s357_s18, %s357_s18 }
 0x238   :  { %p4416_p3 = scmp.lt.s32.totalorder %s4414_s3, %s4410_s26 }
 0x23a   :  { %p4417_p4 = por %p4416_p3, %p4415_p2 }
 0x23c   :  { %p4418_p5 = pnand %p4417_p4, %p4411_p1 }
 0x23e   :  { %4421 = shalt.err (!%p4418_p5)
}
 0x23f   :  { %s5365_s20 = sld [smem:[#allocation87_spill]]  ;;  %s4680_s28 = smov [#allocation43]  }
 0x240   :  { %359 = dma.hbm_to_vmem [thread:$0]  %s5364_s23, 16, %s357_s18, [#allocation39]  }
 0x241   :  { %s375_s1 = sshll.u32 %s4680_s28, 4  ;;  %s4681_s2 = smov [#allocation46]   ;;  %s376_s1 = int_to_ptr.vmem [resolvable:$true] %s375_s1 }
 0x242   :  { %s398_s29 = sshll.u32 %s4681_s2, 4  ;;  %s399_s29 = int_to_ptr.vmem [resolvable:$true] %s398_s29 }
 0x245   :  { %s4422_s9 = scalar_lea.hbm %s5365_s20, 1024 }
 0x246   :  { %p4423_p6 = scmp.ne.s32.totalorder %s5365_s20, %s4422_s9  ;;  %p4426_p7 = scmp.lt.u32.totalorder %s4422_s9, %s5365_s20 }
 0x248   :  { %p4428_p8 = pnand %p4426_p7, %p4423_p6 }
 0x24a   :  { %4431 = shalt.err (!%p4428_p8)
}
 0x24b   :  { %s4432_s0 = scalar_lea.vmem %s376_s1, 1024  ;;  %p4437_p10 = scmp.lt.s32.totalorder %s376_s1, %s376_s1 }
 0x24c   :  { %p4433_p9 = scmp.ne.s32.totalorder %s376_s1, %s4432_s0  ;;  %p4438_p11 = scmp.lt.s32.totalorder %s4432_s0, %s4432_s0 }
 0x24e   :  { %p4439_p12 = por %p4438_p11, %p4437_p10 }
 0x250   :  { %p4440_p13 = pnand %p4439_p12, %p4433_p9 }
 0x252   :  { %4443 = shalt.err (!%p4440_p13)
}
 0x253   :  { %s5366_s7 = sld [smem:[#allocation88_spill]] }
 0x254   :  { %381 = dma.hbm_to_vmem [thread:$0]  %s5365_s20, 1024, %s376_s1, [#allocation42], %s4658_s25, %s4658_s25, %s4659_s6  }
 0x259   :  { %s4444_s4 = scalar_lea.hbm %s5366_s7, 16 }
 0x25a   :  { %p4445_p0 = scmp.ne.s32.totalorder %s5366_s7, %s4444_s4  ;;  %p4448_p1 = scmp.lt.u32.totalorder %s4444_s4, %s5366_s7 }
 0x25c   :  { %p4450_p2 = pnand %p4448_p1, %p4445_p0 }
 0x25e   :  { %4453 = shalt.err (!%p4450_p2)
}
 0x25f   :  { %s4454_s14 = scalar_lea.vmem %s399_s29, 16  ;;  %s4458_s21 = scalar_lea.vmem %s399_s29, 32 }
 0x260   :  { %p4455_p3 = scmp.ne.s32.totalorder %s399_s29, %s4454_s14  ;;  %p4459_p4 = scmp.lt.s32.totalorder %s399_s29, %s399_s29 }
 0x261   :  { %p4460_p5 = scmp.lt.s32.totalorder %s4458_s21, %s4454_s14 }
 0x263   :  { %p4461_p6 = por %p4460_p5, %p4459_p4 }
 0x265   :  { %p4462_p7 = pnand %p4461_p6, %p4455_p3 }
 0x267   :  { %4465 = shalt.err (!%p4462_p7)
}
 0x268   :  { %s5367_s17 = sld [smem:[#allocation89_spill]]  ;;  %s4682_s30 = smov [#allocation47]  }
 0x269   :  { %401 = dma.hbm_to_vmem [thread:$0]  %s5366_s7, 16, %s399_s29, [#allocation45]  }
 0x26a   :  { %s408_s10 = sshll.u32 %s4682_s30, 4  ;;  %s409_s10 = int_to_ptr.vmem [resolvable:$true] %s408_s10 }
 0x26e   :  { %s4466_s24 = scalar_lea.hbm %s5367_s17, 16 }
 0x26f   :  { %p4467_p8 = scmp.ne.s32.totalorder %s5367_s17, %s4466_s24  ;;  %p4470_p9 = scmp.lt.u32.totalorder %s4466_s24, %s5367_s17 }
 0x271   :  { %p4472_p10 = pnand %p4470_p9, %p4467_p8 }
 0x273   :  { %4475 = shalt.err (!%p4472_p10)
}
 0x274   :  { %s4476_s11 = scalar_lea.vmem %s409_s10, 16  ;;  %s4480_s15 = scalar_lea.vmem %s409_s10, 32 }
 0x275   :  { %p4477_p11 = scmp.ne.s32.totalorder %s409_s10, %s4476_s11  ;;  %p4481_p12 = scmp.lt.s32.totalorder %s409_s10, %s409_s10 }
 0x276   :  { %p4482_p13 = scmp.lt.s32.totalorder %s4480_s15, %s4476_s11 }
 0x278   :  { %p4483_p0 = por %p4482_p13, %p4481_p12 }
 0x27a   :  { %p4484_p1 = pnand %p4483_p0, %p4477_p11 }
 0x27c   :  { %4487 = shalt.err (!%p4484_p1)
}
 0x27d   :  { %411 = dma.hbm_to_vmem [thread:$0]  %s5367_s17, 16, %s409_s10, [#allocation48]  }
 0x27e   :  { %4576 = dma.done.wait [#allocation3], 512  }
 0x27f   :  { %4577 = vsyncadd [#allocation3], 4294966784 }
 0x280   :  { %4578 = dma.done.wait [#allocation6], 3328  }
 0x281   :  { %4579 = vsyncadd [#allocation6], 4294963968 }
 0x282   :  { %4580 = dma.done.wait [#allocation9], 32  }
 0x283   :  { %4581 = vsyncadd [#allocation9], 4294967264 }
 0x284   :  { %4582 = dma.done.wait [#allocation12], 1040  }
 0x285   :  { %4583 = vsyncadd [#allocation12], 4294966256 }
 0x286   :  { %4584 = dma.done.wait [#allocation15], 32  }
 0x287   :  { %4585 = vsyncadd [#allocation15], 4294967264 }
 0x288   :  { %4586 = dma.done.wait [#allocation18], 1040  }
 0x289   :  { %4587 = vsyncadd [#allocation18], 4294966256 }
 0x28a   :  { %4588 = dma.done.wait [#allocation21], 32  }
 0x28b   :  { %4589 = vsyncadd [#allocation21], 4294967264 }
 0x28c   :  { %4590 = dma.done.wait [#allocation24], 528  }
 0x28d   :  { %4591 = vsyncadd [#allocation24], 4294966768 }
 0x28e   :  { %4592 = dma.done.wait [#allocation27], 528  }
 0x28f   :  { %4593 = vsyncadd [#allocation27], 4294966768 }
 0x290   :  { %4594 = dma.done.wait [#allocation30], 3088  }
 0x291   :  { %4595 = vsyncadd [#allocation30], 4294964208 }
 0x292   :  { %4596 = dma.done.wait [#allocation33], 32  }
 0x293   :  { %4597 = vsyncadd [#allocation33], 4294967264 }
 0x294   :  { %4598 = dma.done.wait [#allocation36], 1040  }
 0x295   :  { %4599 = vsyncadd [#allocation36], 4294966256 }
 0x296   :  { %4600 = dma.done.wait [#allocation39], 32  }
 0x297   :  { %4601 = vsyncadd [#allocation39], 4294967264 }
 0x298   :  { %4602 = dma.done.wait [#allocation42], 1040  }
 0x299   :  { %4603 = vsyncadd [#allocation42], 4294966256 }
 0x29a   :  { %4604 = dma.done.wait [#allocation45], 32  }
 0x29b   :  { %4605 = vsyncadd [#allocation45], 4294967264 }
 0x29c   :  { %4606 = dma.done.wait [#allocation48], 16  }
 0x29d   :  { %4607 = vsyncadd [#allocation48], 4294967280  ;;  %v4683_v0 = vmov 0   ;;  %v504_v1 = vld [vmem:[#allocation2 + $0x8] sm:$0xff]  ;;  %vm531_vm0 = vcmask 1043456   ;;  %v506_v2 = vld [vmem:[#allocation2 + $0x18] sm:$0xff] }
 0x29e   :  { %570 = vmatprep.mubr.bf16.mxu0 %v4683_v0  ;;  %620 = vmatprep.mubr.bf16.mxu1 %v4683_v0  ;;  %v503_v3 = vld [vmem:[#allocation2] sm:$0xff]  ;;  %v525_v4 = vpack.c.bf16 %v504_v1, %v504_v1  ;;  %v527_v5 = vpack.c.bf16 %v506_v2, %v506_v2  ;;  %v505_v7 = vld [vmem:[#allocation2 + $0x10] sm:$0xff]  ;;  %vm511_vm1 = vcmask 64512   ;;  %v508_v9 = vld [vmem:[#allocation5 + $0x8] sm:$0xff]  ;;  %v3676_v18 = vpack.i.bf16 %v506_v2, %v504_v1  ;;  %s4687_s16 = smov [#allocation50]   ;;  %s4688_s19 = smov [#allocation49]  }
 0x29f   :  { %v524_v6 = vpack.c.bf16 %v503_v3, %v503_v3  ;;  %v507_v8 = vld [vmem:[#allocation5] sm:$0xff]  ;;  %v526_v10 = vpack.c.bf16 %v505_v7, %v505_v7  ;;  %v3671_v14 = vpack.i.bf16 %v505_v7, %v503_v3  ;;  %v5022_v16 = vpack.c.bf16 %v508_v9, %v508_v9  ;;  %v3708_v19 = vld [vmem:[#allocation7 + $0x80] sm:$0xff]   ;;  %v3709_v21 = vld [vmem:[#allocation7 + $0x88] sm:$0xff]   ;;  %s3011_s18 = sshll.u32 %s4687_s16, 4  ;;  %s2999_s22 = sshll.u32 %s4688_s19, 4  ;;  %s3012_s18 = int_to_ptr.vmem [resolvable:$true] %s3011_s18  ;;  %s3000_s22 = int_to_ptr.vmem [resolvable:$true] %s2999_s22 }
 0x2a0   :  { %v512_v11 = vsel %vm511_vm1, %v507_v8, 0.0  ;;  %3102 = vmatprep.subr.msk.bf16.mxu0 %vm531_vm0, %v525_v4  ;;  %3104 = vmatprep.subr.msk.bf16.mxu1 %vm531_vm0, %v527_v5  ;;  %v5019_v13 = vpack.c.bf16 %v507_v8, %v507_v8  ;;  %v515_v17 = vsel %vm511_vm1, %v508_v9, 0.0  ;;  %v4684_v20 = vmov 0.0   ;;  %v3710_v22 = vld [vmem:[#allocation7 + $0x90] sm:$0xff]   ;;  %v3717_v23 = vld [vmem:[#allocation7 + $0x40] sm:$0xff]   ;;  %v3720_v25 = vld [vmem:[#allocation7 + $0x48] sm:$0xff]   ;;  %p4493_p3 = scmp.lt.s32.totalorder %s3012_s18, %s3012_s18 }
 0x2a1   :  { %v533_v12 = vsel %vm531_vm0, %v524_v6, 0  ;;  %v583_v15 = vsel %vm531_vm0, %v526_v10, 0  ;;  %513 = vadd.xlane.f32.xlu0 %v512_v11  ;;  %3672 = vrot.lane.b32.xlu1 %v3671_v14, %s4658_s25  ;;  %vm4685_vm2 = vmmov 0   ;;  %v3718_v24 = vld [vmem:[#allocation7] sm:$0xff]   ;;  %v3721_v26 = vld [vmem:[#allocation7 + $0x8] sm:$0xff]   ;;  %v3711_v27 = vld [vmem:[#allocation7 + $0x98] sm:$0xff]  }
 0x2a2   :  { %539 = vmatpush1.bf16.msra.mxu0 %v533_v12  ;;  %589 = vmatpush1.bf16.msra.mxu1 %v583_v15  ;;  %v3712_v28 = vld [vmem:[#allocation7 + $0xa0] sm:$0xff]   ;;  %v3723_v29 = vld [vmem:[#allocation7 + $0x50] sm:$0xff]   ;;  %v3726_v31 = vld [vmem:[#allocation7 + $0x58] sm:$0xff]   ;;  %vm645_vm3 = vcmask 523264   ;;  %vm2370_vm4 = vcmask 1040384   ;;  %vm2147_vm5 = vcmask 15360  }
 0x2a3   :  { %3361 = vmatprep.subr.bf16.mxu1 %v4684_v20  ;;  %3231 = vmatprep.subr.bf16.mxu0 %v3717_v23  ;;  %v3724_v30 = vld [vmem:[#allocation7 + $0x10] sm:$0xff]   ;;  %v3727_v32 = vld [vmem:[#allocation7 + $0x18] sm:$0xff]   ;;  %v3713_v33 = vld [vmem:[#allocation7 + $0xa8] sm:$0xff]   ;;  %vm2982_vm6 = vcmask 1041408   ;;  %vm2983_vm7 = vcmask 519170   ;;  %vm2896_vm10 = vcmask 9216  }
 0x2a4   :  { %v3729_v34 = vld [vmem:[#allocation7 + $0x60] sm:$0xff]   ;;  %v3714_v35 = vld [vmem:[#allocation7 + $0xb0] sm:$0xff]   ;;  %v3732_v37 = vld [vmem:[#allocation7 + $0x68] sm:$0xff]   ;;  %s4488_s23 = scalar_lea.vmem %s3012_s18, 64 }
 0x2a5   :  { %3103 = vmatmul.mubr.msk.bf16.vlgmr.msra.gmra.mrb[0].mxu0 %vm511_vm1, %v5019_v13  ;;  %3105 = vmatmul.mubr.msk.bf16.vlgmr.msra.gmra.mrb[0].mxu1 %vm511_vm1, %v5022_v16  ;;  %v3730_v36 = vld [vmem:[#allocation7 + $0x20] sm:$0xff]   ;;  %v3733_v38 = vld [vmem:[#allocation7 + $0x28] sm:$0xff]   ;;  %v3735_v39 = vld [vmem:[#allocation7 + $0x70] sm:$0xff]   ;;  %p4489_p2 = scmp.ne.s32.totalorder %s3012_s18, %s4488_s23  ;;  %p4494_p4 = scmp.lt.s32.totalorder %s4488_s23, %s4488_s23 }
 0x2a6   :  { %516 = vadd.xlane.f32.xlu0 %v515_v17  ;;  %3677 = vrot.lane.b32.xlu1 %v3676_v18, %s4658_s25  ;;  %v3715_v40 = vld [vmem:[#allocation7 + $0xb8] sm:$0xff]   ;;  %v3736_v41 = vld [vmem:[#allocation7 + $0x30] sm:$0xff]   ;;  %v3722_v56 = vld [vmem:[#allocation31 + $0x90] sm:$0xff]  }
 0x2a7   :  { %3362 = vmatpush3.bf16.msra.mxu1 %v3708_v19  ;;  %3377 = vmatprep.mubr.msk.bf16.mxu1 %vm4685_vm2, %v4684_v20  ;;  %v3738_v42 = vld [vmem:[#allocation7 + $0x78] sm:$0xff]   ;;  %v3725_v57 = vld [vmem:[#allocation31 + $0x98] sm:$0xff]   ;;  %v3734_v60 = vld [vmem:[#allocation31 + $0xb0] sm:$0xff]   ;;  %p4495_p5 = por %p4494_p4, %p4493_p3 }
 0x2a8   :  { %3363 = vmatprep.subr.bf16.mxu1 %v4684_v20  ;;  %3232 = vmatpush3.bf16.msra.mxu0 %v3718_v24  ;;  %v3739_v43 = vld [vmem:[#allocation7 + $0x38] sm:$0xff]   ;;  %v3737_v61 = vld [vmem:[#allocation31 + $0xb8] sm:$0xff]   ;;  %vm2984_vm8 = vmor %vm2983_vm7, %vm2982_vm6 }
 0x2a9   :  { %3233 = vmatprep.subr.bf16.mxu0 %v3720_v25  ;;  %v3740_v44 = vld [vmem:[#allocation31 + $0x40] sm:$0xff]   ;;  %v3719_v55 = vld [vmem:[#allocation31 + $0x88] sm:$0xff]   ;;  %p4496_p6 = pnand %p4495_p5, %p4489_p2 }
 0x2aa   :  { %v3716_v53 = vld [vmem:[#allocation31 + $0x80] sm:$0xff]   ;;  %v3731_v59 = vld [vmem:[#allocation31 + $0xa8] sm:$0xff]  }
 0x2ab   :  { %3364 = vmatpush3.bf16.msra.mxu1 %v3709_v21  ;;  %v3728_v58 = vld [vmem:[#allocation31 + $0xa0] sm:$0xff]   ;;  %v3742_v25 = vld [vmem:[#allocation31 + $0x48] sm:$0xff]  }
 0x2ac   :  { %3365 = vmatprep.subr.bf16.mxu1 %v4684_v20  ;;  %3234 = vmatpush3.bf16.msra.mxu0 %v3721_v26  ;;  %v3741_v24 = vld [vmem:[#allocation31] sm:$0xff]   ;;  %v3743_v26 = vld [vmem:[#allocation31 + $0x8] sm:$0xff]  }
 0x2ad   :  { %3235 = vmatprep.subr.bf16.mxu0 %v3723_v29  ;;  %v3746_v29 = vld [vmem:[#allocation31 + $0x58] sm:$0xff]  }
 0x2af   :  { %3366 = vmatpush3.bf16.msra.mxu1 %v3710_v22 }
 0x2b0   :  { %3367 = vmatprep.subr.bf16.mxu1 %v4684_v20  ;;  %3236 = vmatpush3.bf16.msra.mxu0 %v3724_v30  ;;  %v3747_v30 = vld [vmem:[#allocation31 + $0x18] sm:$0xff]  }
 0x2b1   :  { %3237 = vmatprep.subr.bf16.mxu0 %v3726_v31  ;;  %v3748_v31 = vld [vmem:[#allocation31 + $0x60] sm:$0xff]  }
 0x2b3   :  { %3368 = vmatpush3.bf16.msra.mxu1 %v3711_v27  ;;  %v3744_v27 = vld [vmem:[#allocation31 + $0x50] sm:$0xff]  }
 0x2b4   :  { %3369 = vmatprep.subr.bf16.mxu1 %v4684_v20  ;;  %3238 = vmatpush3.bf16.msra.mxu0 %v3727_v32  ;;  %v3749_v32 = vld [vmem:[#allocation31 + $0x20] sm:$0xff]  }
 0x2b5   :  { %3239 = vmatprep.subr.bf16.mxu0 %v3729_v34  ;;  %v3751_v34 = vld [vmem:[#allocation31 + $0x28] sm:$0xff]  }
 0x2b7   :  { %3370 = vmatpush3.bf16.msra.mxu1 %v3712_v28  ;;  %v3745_v28 = vld [vmem:[#allocation31 + $0x10] sm:$0xff]  }
 0x2b8   :  { %3371 = vmatprep.subr.bf16.mxu1 %v4684_v20  ;;  %3240 = vmatpush3.bf16.msra.mxu0 %v3730_v36  ;;  %v3753_v36 = vld [vmem:[#allocation31 + $0x30] sm:$0xff]  }
 0x2b9   :  { %3241 = vmatprep.subr.bf16.mxu0 %v3732_v37  ;;  %v3754_v37 = vld [vmem:[#allocation31 + $0x78] sm:$0xff]  }
 0x2bb   :  { %3372 = vmatpush3.bf16.msra.mxu1 %v3713_v33  ;;  %v3750_v33 = vld [vmem:[#allocation31 + $0x68] sm:$0xff]  }
 0x2bc   :  { %3373 = vmatprep.subr.bf16.mxu1 %v4684_v20  ;;  %3242 = vmatpush3.bf16.msra.mxu0 %v3733_v38  ;;  %v3755_v38 = vld [vmem:[#allocation31 + $0x38] sm:$0xff]  }
 0x2bd   :  { %3243 = vmatprep.subr.bf16.mxu0 %v3735_v39 }
 0x2bf   :  { %3374 = vmatpush3.bf16.msra.mxu1 %v3714_v35  ;;  %v3752_v35 = vld [vmem:[#allocation31 + $0x70] sm:$0xff]  }
 0x2c0   :  { %3375 = vmatprep.subr.bf16.mxu1 %v4684_v20  ;;  %3244 = vmatpush3.bf16.msra.mxu0 %v3736_v41 }
 0x2c1   :  { %3245 = vmatprep.subr.bf16.mxu0 %v3738_v42 }
 0x2c3   :  { %3376 = vmatpush3.bf16.msra.mxu1 %v3715_v40 }
 0x2c4   :  { %3381 = vmatprep.subr.bf16.mxu1 %v4684_v20  ;;  %3246 = vmatpush3.bf16.msra.mxu0 %v3739_v43  ;;  %v3756_v43 = vld [vmem:[#allocation25] sm:$0xff]  }
 0x2c5   :  { %3262 = vmatprep.subr.bf16.mxu0 %v3740_v44  ;;  %v3757_v44 = vld [vmem:[#allocation25 + $0x8] sm:$0xff]  }
 0x313   :  { %v3673_v45 = vpop.permute.xlu1 %3672 }
 0x314   :  { %v3675_v46 = vunpack.i.h.bf16 %v3673_v45  ;;  %v3674_v47 = vunpack.i.l.bf16 %v3673_v45 }
 0x318   :  { %v3678_v48 = vpop.permute.xlu1 %3677 }
 0x319   :  { %v3680_v49 = vunpack.i.h.bf16 %v3678_v48  ;;  %v3679_v50 = vunpack.i.l.bf16 %v3678_v48 }
 0x31b   :  { %v646_v51 = vsel %vm645_vm3, %v3674_v47, %v3679_v50  ;;  %v647_v52 = vsel %vm645_vm3, %v3675_v46, %v3680_v49  ;;  %v3759_v50 = vld [vmem:[#allocation25 + $0x18] sm:$0xff]  }
 0x31c   :  { %v656_v54 = vpack.c.bf16 %v647_v52, %v646_v51  ;;  %v3106_v52 = vld [vmem:[#allocation8] ss:$0 sm:$0xff] }
 0x31e   :  { %3378 = vmatmul.mubr.bf16.vlgmr.msra.gmra.mrb[4].mxu1 %v656_v54 }
 0x31f   :  { %3382 = vmatpush3.bf16.msra.mxu1 %v3716_v53  ;;  %3397 = vmatprep.mubr.msk.bf16.mxu1 %vm4685_vm2, %v4684_v20 }
 0x320   :  { %3383 = vmatprep.subr.bf16.mxu1 %v4684_v20 }
 0x323   :  { %3384 = vmatpush3.bf16.msra.mxu1 %v3719_v55 }
 0x324   :  { %3385 = vmatprep.subr.bf16.mxu1 %v4684_v20 }
 0x327   :  { %3386 = vmatpush3.bf16.msra.mxu1 %v3722_v56 }
 0x328   :  { %3387 = vmatprep.subr.bf16.mxu1 %v4684_v20 }
 0x32b   :  { %3388 = vmatpush3.bf16.msra.mxu1 %v3725_v57 }
 0x32c   :  { %3389 = vmatprep.subr.bf16.mxu1 %v4684_v20 }
 0x32e   :  { %v514_v62 = vpop.xlane.xlu0 %513 }
 0x32f   :  { %3390 = vmatpush3.bf16.msra.mxu1 %v3728_v58  ;;  %v518_v2 = vmax.f32 %v514_v62, 1.0 }
 0x330   :  { %3391 = vmatprep.subr.bf16.mxu1 %v4684_v20 }
 0x333   :  { %3392 = vmatpush3.bf16.msra.mxu1 %v3731_v59  ;;  %v517_v63 = vpop.xlane.xlu0 %516 }
 0x334   :  { %3393 = vmatprep.subr.bf16.mxu1 %v4684_v20  ;;  %v519_v1 = vmax.f32 %v517_v63, 1.0 }
 0x336   :  { %3796 = vrcp.f32 %v519_v1 }
 0x337   :  { %3394 = vmatpush3.bf16.msra.mxu1 %v3734_v60  ;;  %3798 = vrcp.f32 %v518_v2 }
 0x338   :  { %3395 = vmatprep.subr.bf16.mxu1 %v4684_v20 }
 0x33b   :  { %3396 = vmatpush3.bf16.msra.mxu1 %v3737_v61 }
 0x33c   :  { %3413 = vmatprep.subr.bf16.mxu1 %v4684_v20 }
 0x33e   :  { %3398 = vmatmul.mubr.bf16.vlgmr.msra.gmra.mrb[8].mxu1 %v656_v54 }
 0x33f   :  { %3415 = vmatprep.mubr.msk.bf16.mxu1 %vm4685_vm2, %v4684_v20 }
 0x340   :  { %v5056_v3 = vpop.eup %3796 }
 0x341   :  { %v5058_v4 = vpop.eup %3798 }
 0x378   :  { %v572_v5 = vpop.f32.mrb[0].mxu0  ;;  %v622_v7 = vpop.f32.mrb[0].mxu1 }
 0x379   :  { %v629_v6 = vmul.f32 %v5058_v4, %v572_v5  ;;  %v574_v8 = vpop.f32.mrb[1].mxu0  ;;  %v631_v9 = vmul.f32 %v5056_v3, %v622_v7  ;;  %v624_v11 = vpop.f32.mrb[1].mxu1 }
 0x37a   :  { %v630_v10 = vmul.f32 %v5058_v4, %v574_v8  ;;  %v576_v12 = vpop.f32.mrb[2].mxu0  ;;  %v632_v14 = vmul.f32 %v5056_v3, %v624_v11  ;;  %v626_v15 = vpop.f32.mrb[2].mxu1 }
 0x37b   :  { %v577_v17 = vpop.f32.mrb[3].mxu0  ;;  %v654_v18 = vpack.c.bf16 %v631_v9, %v629_v6  ;;  %v627_v19 = vpop.f32.mrb[3].mxu1 }
 0x37c   :  { %v652_v21 = vsel %vm645_vm3, %v630_v10, %v3674_v47  ;;  %v653_v22 = vsel %vm645_vm3, %v632_v14, %v3675_v46  ;;  %v3758_v47 = vld [vmem:[#allocation25 + $0x10] sm:$0xff]  }
 0x37d   :  { %v655_v23 = vpack.c.bf16 %v653_v22, %v652_v21 }
 0x37f   :  { %888 = vmatprep.mubr.bf16.mxu0 %v655_v23 }
 0x380   :  { %889 = vmatmul.mubr.bf16.vlgmr.msra.gmra.mrb[4].mxu0 %v654_v18 }
 0x381   :  { %3263 = vmatpush3.bf16.msra.mxu0 %v3741_v24  ;;  %1217 = vmatprep.mubr.bf16.mxu0 %v655_v23  ;;  %v3133_v23 = vld [vmem:[#allocation32] ss:$0 sm:$0xff] }
 0x382   :  { %3264 = vmatprep.subr.bf16.mxu0 %v3742_v25 }
 0x385   :  { %3265 = vmatpush3.bf16.msra.mxu0 %v3743_v26 }
 0x386   :  { %3266 = vmatprep.subr.bf16.mxu0 %v3744_v27 }
 0x389   :  { %3267 = vmatpush3.bf16.msra.mxu0 %v3745_v28 }
 0x38a   :  { %3268 = vmatprep.subr.bf16.mxu0 %v3746_v29 }
 0x38d   :  { %3269 = vmatpush3.bf16.msra.mxu0 %v3747_v30 }
 0x38e   :  { %3270 = vmatprep.subr.bf16.mxu0 %v3748_v31 }
 0x391   :  { %3271 = vmatpush3.bf16.msra.mxu0 %v3749_v32 }
 0x392   :  { %3272 = vmatprep.subr.bf16.mxu0 %v3750_v33 }
 0x395   :  { %3273 = vmatpush3.bf16.msra.mxu0 %v3751_v34 }
 0x396   :  { %3274 = vmatprep.subr.bf16.mxu0 %v3752_v35 }
 0x399   :  { %3275 = vmatpush3.bf16.msra.mxu0 %v3753_v36 }
 0x39a   :  { %3276 = vmatprep.subr.bf16.mxu0 %v3754_v37 }
 0x39d   :  { %3277 = vmatpush3.bf16.msra.mxu0 %v3755_v38 }
 0x39e   :  { %3401 = vmatprep.subr.bf16.mxu0 %v4684_v20 }
 0x3a0   :  { %1218 = vmatmul.mubr.bf16.vlgmr.msra.gmra.mrb[8].mxu0 %v654_v18 }
 0x3a1   :  { %3409 = vmatprep.mubr.msk.bf16.mxu0 %vm4685_vm2, %v4684_v20  ;;  %3402 = vmatpush3.bf16.msra.mxu0 %v3756_v43 }
 0x3a2   :  { %3403 = vmatprep.subr.bf16.mxu0 %v4684_v20 }
 0x3a5   :  { %3404 = vmatpush3.bf16.msra.mxu0 %v3757_v44 }
 0x3a6   :  { %3405 = vmatprep.subr.bf16.mxu0 %v4684_v20 }
 0x3a9   :  { %3406 = vmatpush3.bf16.msra.mxu0 %v3758_v47 }
 0x3aa   :  { %3407 = vmatprep.subr.bf16.mxu0 %v4684_v20 }
 0x3ad   :  { %3408 = vmatpush3.bf16.msra.mxu0 %v3759_v50 }
 0x3ae   :  { %3425 = vmatprep.subr.bf16.mxu0 %v4684_v20 }
 0x3f1   :  { %v931_v39 = vpop.f32.mrb[4].mxu1 }
 0x3f2   :  { %v3379_v40 = vpop.f32.mrb[5].mxu1 }
 0x3f3   :  { %v934_v41 = vpop.f32.mrb[6].mxu1 }
 0x3f4   :  { %v3380_v42 = vpop.f32.mrb[7].mxu1 }
 0x411   :  { %v1260_v45 = vpop.f32.mrb[8].mxu1 }
 0x412   :  { %v3399_v46 = vpop.f32.mrb[9].mxu1 }
 0x413   :  { %v1263_v48 = vpop.f32.mrb[10].mxu1 }
 0x414   :  { %v3400_v49 = vpop.f32.mrb[11].mxu1 }
 0x453   :  { %v3247_v51 = vpop.f32.mrb[4].mxu0 }
 0x454   :  { %v3248_v53 = vpop.f32.mrb[5].mxu0 }
 0x455   :  { %v3249_v54 = vadd.f32 %v3248_v53, %v3247_v51  ;;  %v3250_v55 = vpop.f32.mrb[6].mxu0 }
 0x456   :  { %v3251_v56 = vpop.f32.mrb[7].mxu0 }
 0x457   :  { %v891_v57 = vadd.f32 %v3249_v54, %v3106_v52  ;;  %v3252_v58 = vadd.f32 %v3251_v56, %v3250_v55 }
 0x459   :  { %v932_v59 = vadd.f32 %v931_v39, %v891_v57  ;;  %v894_v60 = vadd.f32 %v3252_v58, %v3106_v52  ;;  %v3131_v57 = vld [vmem:[#allocation10] ss:$0 sm:$0xff] }
 0x45b   :  { %v938_v61 = vmax.f32 %v932_v59, 0.0  ;;  %v935_v62 = vadd.f32 %v934_v41, %v894_v60 }
 0x45d   :  { %v939_v63 = vmax.f32 %v935_v62, 0.0  ;;  %v940_v1 = vsel %vm645_vm3, %v938_v61, 0.0  ;;  %v3132_v62 = vld [vmem:[#allocation11] ss:$0 sm:$0xff] }
 0x45f   :  { %v941_v2 = vsel %vm645_vm3, %v939_v63, 0.0 }
 0x460   :  { %v942_v5 = vadd.f32 %v941_v2, %v940_v1 }
 0x462   :  { %v943_v6 = vrot.slane %v942_v5, 4 }
 0x464   :  { %v944_v7 = vadd.f32 %v943_v6, %v942_v5 }
 0x466   :  { %v945_v8 = vrot.slane %v944_v7, 2 }
 0x468   :  { %v946_v9 = vadd.f32 %v945_v8, %v944_v7 }
 0x46a   :  { %v947_v10 = vrot.slane %v946_v9, 1 }
 0x46c   :  { %v948_v11 = vadd.f32 %v947_v10, %v946_v9 }
 0x46e   :  { %v949_v12 = vmul.f32 0.0625, %v948_v11 }
 0x470   :  { %v950_v14 = vsub.f32 %v938_v61, %v949_v12  ;;  %v951_v15 = vsub.f32 %v939_v63, %v949_v12 }
 0x472   :  { %v952_v17 = vmul.f32 %v950_v14, %v950_v14  ;;  %v953_v18 = vmul.f32 %v951_v15, %v951_v15 }
 0x473   :  { %v3278_v19 = vpop.f32.mrb[8].mxu0 }
 0x474   :  { %v954_v21 = vsel %vm645_vm3, %v952_v17, 0.0  ;;  %v955_v22 = vsel %vm645_vm3, %v953_v18, 0.0  ;;  %v3279_v24 = vpop.f32.mrb[9].mxu0 }
 0x475   :  { %v956_v25 = vadd.f32 %v955_v22, %v954_v21  ;;  %v3280_v26 = vadd.f32 %v3279_v24, %v3278_v19  ;;  %v3281_v27 = vpop.f32.mrb[10].mxu0  ;;  %v3158_v22 = vld [vmem:[#allocation34] ss:$0 sm:$0xff] }
 0x476   :  { %v3282_v28 = vpop.f32.mrb[11].mxu0 }
 0x477   :  { %v957_v29 = vrot.slane %v956_v25, 4  ;;  %v1220_v30 = vadd.f32 %v3280_v26, %v3133_v23  ;;  %v3283_v31 = vadd.f32 %v3282_v28, %v3281_v27 }
 0x479   :  { %v958_v32 = vadd.f32 %v957_v29, %v956_v25  ;;  %v1261_v33 = vadd.f32 %v1260_v45, %v1220_v30  ;;  %v1223_v34 = vadd.f32 %v3283_v31, %v3133_v23  ;;  %v3159_v25 = vld [vmem:[#allocation35] ss:$0 sm:$0xff] }
 0x47b   :  { %v959_v35 = vrot.slane %v958_v32, 2  ;;  %v1267_v36 = vmax.f32 %v1261_v33, 0.0  ;;  %v1264_v37 = vadd.f32 %v1263_v48, %v1223_v34 }
 0x47d   :  { %v960_v38 = vadd.f32 %v959_v35, %v958_v32  ;;  %v1268_v39 = vmax.f32 %v1264_v37, 0.0  ;;  %v1269_v41 = vsel %vm645_vm3, %v1267_v36, 0.0 }
 0x47f   :  { %v961_v40 = vrot.slane %v960_v38, 1  ;;  %v1270_v42 = vsel %vm645_vm3, %v1268_v39, 0.0 }
 0x480   :  { %v1271_v43 = vadd.f32 %v1270_v42, %v1269_v41  ;;  %v3763_v41 = vld [vmem:[#allocation13 + $0x8] sm:$0xff]  }
 0x481   :  { %v962_v44 = vadd.f32 %v961_v40, %v960_v38  ;;  %v3760_v38 = vld [vmem:[#allocation37] sm:$0xff]   ;;  %v3762_v40 = vld [vmem:[#allocation37 + $0x8] sm:$0xff]   ;;  %v3764_v42 = vld [vmem:[#allocation37 + $0x10] sm:$0xff]  }
 0x482   :  { %v1272_v46 = vrot.slane %v1271_v43, 4 }
 0x483   :  { %v963_v47 = vmul.f32 0.0625, %v962_v44  ;;  %v3766_v44 = vld [vmem:[#allocation37 + $0x18] sm:$0xff]  }
 0x484   :  { %v1273_v49 = vadd.f32 %v1272_v46, %v1271_v43  ;;  %v3765_v43 = vld [vmem:[#allocation13 + $0x10] sm:$0xff]   ;;  %v3767_v46 = vld [vmem:[#allocation13 + $0x18] sm:$0xff]  }
 0x485   :  { %v964_v50 = vadd.f32 1e-05, %v963_v47  ;;  %v3768_v47 = vld [vmem:[#allocation37 + $0x20] sm:$0xff]  }
 0x486   :  { %v1274_v51 = vrot.slane %v1273_v49, 2 }
 0x487   :  { %3800 = vrsqrt.f32 %v964_v50  ;;  %v3770_v50 = vld [vmem:[#allocation37 + $0x28] sm:$0xff]  }
 0x488   :  { %v1275_v45 = vadd.f32 %v1274_v51, %v1273_v49  ;;  %v3769_v49 = vld [vmem:[#allocation13 + $0x20] sm:$0xff]   ;;  %v3771_v51 = vld [vmem:[#allocation13 + $0x28] sm:$0xff]  }
 0x48a   :  { %v1276_v52 = vrot.slane %v1275_v45, 1 }
 0x48c   :  { %v1277_v53 = vadd.f32 %v1276_v52, %v1275_v45  ;;  %v3772_v45 = vld [vmem:[#allocation37 + $0x30] sm:$0xff]  }
 0x48e   :  { %v1278_v54 = vmul.f32 0.0625, %v1277_v53  ;;  %v3773_v53 = vld [vmem:[#allocation13 + $0x30] sm:$0xff]  }
 0x490   :  { %v1279_v48 = vsub.f32 %v1267_v36, %v1278_v54  ;;  %v1280_v55 = vsub.f32 %v1268_v39, %v1278_v54  ;;  %v3761_v39 = vld [vmem:[#allocation13] sm:$0xff]   ;;  %v3774_v54 = vld [vmem:[#allocation37 + $0x38] sm:$0xff]  }
 0x491   :  { %v3801_v56 = vpop.eup %3800 }
 0x492   :  { %v966_v58 = vmul.f32 %v3801_v56, %v950_v14  ;;  %v967_v59 = vmul.f32 %v3801_v56, %v951_v15  ;;  %v1281_v60 = vmul.f32 %v1279_v48, %v1279_v48  ;;  %v1282_v61 = vmul.f32 %v1280_v55, %v1280_v55 }
 0x494   :  { %v975_v63 = vmul.f32 %v3131_v57, %v966_v58  ;;  %v976_v1 = vmul.f32 %v3131_v57, %v967_v59  ;;  %v1283_v2 = vsel %vm645_vm3, %v1281_v60, 0.0  ;;  %v1284_v5 = vsel %vm645_vm3, %v1282_v61, 0.0  ;;  %v3775_v57 = vld [vmem:[#allocation13 + $0x38] sm:$0xff]  }
 0x495   :  { %v1285_v6 = vadd.f32 %v1284_v5, %v1283_v2 }
 0x496   :  { %v5081_v7 = vadd.f32 %v3132_v62, %v975_v63  ;;  %v5083_v8 = vadd.f32 %v3132_v62, %v976_v1 }
 0x497   :  { %v1286_v9 = vrot.slane %v1285_v6, 4 }
 0x498   :  { %v1316_v10 = vpack.c.bf16 %v5083_v8, %v5081_v7  ;;  %v3686_v2 = vpack.i.bf16 %v5083_v8, %v5081_v7 }
 0x499   :  { %v1287_v11 = vadd.f32 %v1286_v9, %v1285_v6 }
 0x49a   :  { %3410 = vmatmul.mubr.msk.bf16.vlgmr.msra.gmra.mrb[12].mxu0 %vm645_vm3, %v1316_v10 }
 0x49b   :  { %v1288_v12 = vrot.slane %v1287_v11, 2  ;;  %3441 = vmatprep.mubr.msk.bf16.mxu0 %vm4685_vm2, %v4684_v20  ;;  %3426 = vmatpush3.bf16.msra.mxu0 %v3761_v39 }
 0x49c   :  { %3427 = vmatprep.subr.bf16.mxu0 %v4684_v20 }
 0x49d   :  { %v1289_v14 = vadd.f32 %v1288_v12, %v1287_v11 }
 0x49f   :  { %v1290_v15 = vrot.slane %v1289_v14, 1  ;;  %3428 = vmatpush3.bf16.msra.mxu0 %v3763_v41 }
 0x4a0   :  { %3429 = vmatprep.subr.bf16.mxu0 %v4684_v20 }
 0x4a1   :  { %v1291_v17 = vadd.f32 %v1290_v15, %v1289_v14 }
 0x4a3   :  { %v1292_v18 = vmul.f32 0.0625, %v1291_v17  ;;  %3430 = vmatpush3.bf16.msra.mxu0 %v3765_v43 }
 0x4a4   :  { %3431 = vmatprep.subr.bf16.mxu0 %v4684_v20 }
 0x4a5   :  { %v1293_v19 = vadd.f32 1e-05, %v1292_v18 }
 0x4a7   :  { %3802 = vrsqrt.f32 %v1293_v19  ;;  %3432 = vmatpush3.bf16.msra.mxu0 %v3767_v46  ;;  %v3776_v19 = vld [vmem:[#allocation26] sm:$0xff]  }
 0x4a8   :  { %3433 = vmatprep.subr.bf16.mxu0 %v4684_v20 }
 0x4ab   :  { %3434 = vmatpush3.bf16.msra.mxu0 %v3769_v49 }
 0x4ac   :  { %3435 = vmatprep.subr.bf16.mxu0 %v4684_v20 }
 0x4af   :  { %3436 = vmatpush3.bf16.msra.mxu0 %v3771_v51 }
 0x4b0   :  { %3437 = vmatprep.subr.bf16.mxu0 %v4684_v20 }
 0x4b1   :  { %v3803_v21 = vpop.eup %3802 }
 0x4b2   :  { %v1296_v23 = vmul.f32 %v3803_v21, %v1280_v55  ;;  %v1295_v24 = vmul.f32 %v3803_v21, %v1279_v48  ;;  %v3777_v21 = vld [vmem:[#allocation26 + $0x8] sm:$0xff]  }
 0x4b3   :  { %3438 = vmatpush3.bf16.msra.mxu0 %v3773_v53 }
 0x4b4   :  { %v1305_v26 = vmul.f32 %v3158_v22, %v1296_v23  ;;  %v1304_v27 = vmul.f32 %v3158_v22, %v1295_v24  ;;  %3439 = vmatprep.subr.bf16.mxu0 %v4684_v20  ;;  %v3778_v22 = vld [vmem:[#allocation26 + $0x10] sm:$0xff]   ;;  %v3779_v23 = vld [vmem:[#allocation26 + $0x18] sm:$0xff]   ;;  %v3179_v24 = vld [vmem:[#allocation38] ss:$0 sm:$0xff] }
 0x4b6   :  { %v5090_v28 = vadd.f32 %v3159_v25, %v1305_v26  ;;  %v5092_v29 = vadd.f32 %v3159_v25, %v1304_v27 }
 0x4b7   :  { %3440 = vmatpush3.bf16.msra.mxu0 %v3775_v57 }
 0x4b8   :  { %1405 = vrot.lane.b32.xlu1 %v5090_v28, %s4658_s25  ;;  %1403 = vrot.lane.b32.xlu0 %v5092_v29, %s4658_s25 }
 0x4b9   :  { %3465 = vmatprep.subr.bf16.mxu0 %v4684_v20 }
 0x52a   :  { %v5098_v30 = vpop.permute.xlu1 %1405  ;;  %v5100_v31 = vpop.permute.xlu0 %1403 }
 0x52b   :  { %v1410_v32 = vsel %vm645_vm3, %v5083_v8, %v5098_v30  ;;  %v1409_v33 = vsel %vm645_vm3, %v5081_v7, %v5100_v31 }
 0x52c   :  { %v1411_v34 = vpack.c.bf16 %v1409_v33, %v1409_v33  ;;  %v1412_v35 = vpack.c.bf16 %v1410_v32, %v1410_v32 }
 0x52e   :  { %v1414_v36 = vsel %vm531_vm0, %v1411_v34, 0  ;;  %v1457_v37 = vsel %vm531_vm0, %v1412_v35, 0 }
 0x52f   :  { %3414 = vmatpush3.bf16.msra.mxu1 %v1414_v36 }
 0x530   :  { %3419 = vmatprep.subr.bf16.mxu1 %v4684_v20 }
 0x532   :  { %3416 = vmatmul.mubr.msk.bf16.vlgmr.msra.gmra.mrb[12].mxu1 %vm511_vm1, %v5019_v13 }
 0x533   :  { %3420 = vmatpush3.bf16.msra.mxu1 %v1457_v37  ;;  %3421 = vmatprep.mubr.msk.bf16.mxu1 %vm4685_vm2, %v4684_v20 }
 0x534   :  { %3445 = vmatprep.subr.bf16.mxu1 %v4684_v20 }
 0x53a   :  { %3422 = vmatmul.mubr.msk.bf16.vlgmr.msra.gmra.mrb[16].mxu1 %vm511_vm1, %v5022_v16 }
 0x53b   :  { %3461 = vmatprep.mubr.msk.bf16.mxu1 %vm4685_vm2, %v4684_v20  ;;  %3446 = vmatpush3.bf16.msra.mxu1 %v3760_v38 }
 0x53c   :  { %3447 = vmatprep.subr.bf16.mxu1 %v4684_v20 }
 0x53f   :  { %3448 = vmatpush3.bf16.msra.mxu1 %v3762_v40 }
 0x540   :  { %3449 = vmatprep.subr.bf16.mxu1 %v4684_v20 }
 0x543   :  { %3450 = vmatpush3.bf16.msra.mxu1 %v3764_v42 }
 0x544   :  { %3451 = vmatprep.subr.bf16.mxu1 %v4684_v20 }
 0x547   :  { %3452 = vmatpush3.bf16.msra.mxu1 %v3766_v44 }
 0x548   :  { %3453 = vmatprep.subr.bf16.mxu1 %v4684_v20 }
 0x54b   :  { %3454 = vmatpush3.bf16.msra.mxu1 %v3768_v47 }
 0x54c   :  { %3455 = vmatprep.subr.bf16.mxu1 %v4684_v20 }
 0x54f   :  { %3456 = vmatpush3.bf16.msra.mxu1 %v3770_v50 }
 0x550   :  { %3457 = vmatprep.subr.bf16.mxu1 %v4684_v20 }
 0x553   :  { %3458 = vmatpush3.bf16.msra.mxu1 %v3772_v45 }
 0x554   :  { %3459 = vmatprep.subr.bf16.mxu1 %v4684_v20 }
 0x557   :  { %3460 = vmatpush3.bf16.msra.mxu1 %v3774_v54 }
 0x558   :  { %3477 = vmatprep.subr.bf16.mxu1 %v4684_v20 }
 0x605   :  { %v1450_v52 = vpop.f32.mrb[12].mxu1 }
 0x606   :  { %v3417_v48 = vpop.f32.mrb[13].mxu1  ;;  %v1499_v59 = vmul.f32 %v5058_v4, %v1450_v52 }
 0x607   :  { %v1453_v55 = vpop.f32.mrb[14].mxu1 }
 0x608   :  { %v3418_v56 = vpop.f32.mrb[15].mxu1 }
 0x60d   :  { %v1493_v58 = vpop.f32.mrb[16].mxu1 }
 0x60e   :  { %v1500_v60 = vmul.f32 %v5056_v3, %v1493_v58  ;;  %v3423_v61 = vpop.f32.mrb[17].mxu1 }
 0x60f   :  { %v1496_v62 = vpop.f32.mrb[18].mxu1 }
 0x610   :  { %v3424_v63 = vpop.f32.mrb[19].mxu1  ;;  %v3681_v1 = vpack.i.bf16 %v1500_v60, %v1499_v59 }
 0x612   :  { %3682 = vrot.lane.b32.xlu1 %v3681_v1, %s4658_s25 }
 0x616   :  { %3687 = vrot.lane.b32.xlu1 %v3686_v2, %s4658_s25 }
 0x684   :  { %v3683_v5 = vpop.permute.xlu1 %3682 }
 0x685   :  { %v3685_v6 = vunpack.i.h.bf16 %v3683_v5  ;;  %v3684_v9 = vunpack.i.l.bf16 %v3683_v5 }
 0x687   :  { %v1681_v10 = vsel %vm645_vm3, %v3685_v6, %v5098_v30  ;;  %v1680_v11 = vsel %vm645_vm3, %v3684_v9, %v5100_v31  ;;  %v3168_v31 = vld [vmem:[#allocation14] ss:$0 sm:$0xff] }
 0x688   :  { %v1682_v12 = vpack.c.bf16 %v1681_v10, %v1680_v11  ;;  %v3688_v14 = vpop.permute.xlu1 %3687 }
 0x689   :  { %v3690_v15 = vunpack.i.h.bf16 %v3688_v14  ;;  %v3689_v17 = vunpack.i.l.bf16 %v3688_v14 }
 0x68a   :  { %3462 = vmatmul.mubr.bf16.vlgmr.msra.gmra.mrb[20].mxu1 %v1682_v12 }
 0x68b   :  { %v1510_v18 = vsel %vm645_vm3, %v1500_v60, %v3690_v15  ;;  %v1509_v7 = vsel %vm645_vm3, %v1499_v59, %v3689_v17  ;;  %3479 = vmatprep.mubr.msk.bf16.mxu1 %vm4685_vm2, %v4684_v20 }
 0x68c   :  { %v1511_v8 = vpack.c.bf16 %v1510_v18, %v1509_v7 }
 0x68e   :  { %3442 = vmatmul.mubr.bf16.vlgmr.msra.gmra.mrb[16].mxu0 %v1511_v8 }
 0x68f   :  { %3473 = vmatprep.mubr.msk.bf16.mxu0 %vm4685_vm2, %v4684_v20  ;;  %3466 = vmatpush3.bf16.msra.mxu0 %v3776_v19 }
 0x690   :  { %3467 = vmatprep.subr.bf16.mxu0 %v4684_v20 }
 0x693   :  { %3468 = vmatpush3.bf16.msra.mxu0 %v3777_v21 }
 0x694   :  { %3469 = vmatprep.subr.bf16.mxu0 %v4684_v20 }
 0x697   :  { %3470 = vmatpush3.bf16.msra.mxu0 %v3778_v22 }
 0x698   :  { %3471 = vmatprep.subr.bf16.mxu0 %v4684_v20 }
 0x69b   :  { %3472 = vmatpush3.bf16.msra.mxu0 %v3779_v23 }
 0x69c   :  { %3489 = vmatprep.subr.bf16.mxu0 %v4684_v20 }
 0x75d   :  { %v1788_v25 = vpop.f32.mrb[20].mxu1 }
 0x75e   :  { %v1789_v26 = vadd.f32 %v3179_v24, %v1788_v25  ;;  %v3463_v27 = vpop.f32.mrb[21].mxu1 }
 0x75f   :  { %v1791_v30 = vpop.f32.mrb[22].mxu1 }
 0x760   :  { %v1795_v32 = vmax.f32 %v1789_v26, 0.0  ;;  %v1792_v33 = vadd.f32 %v3179_v24, %v1791_v30  ;;  %v3464_v34 = vpop.f32.mrb[23].mxu1 }
 0x761   :  { %v1617_v35 = vpop.f32.mrb[16].mxu0 }
 0x762   :  { %v1796_v36 = vmax.f32 %v1792_v33, 0.0  ;;  %v1618_v37 = vadd.f32 %v3168_v31, %v1617_v35  ;;  %v3443_v38 = vpop.f32.mrb[17].mxu0  ;;  %v1797_v40 = vsel %vm645_vm3, %v1795_v32, 0.0 }
 0x763   :  { %v1620_v39 = vpop.f32.mrb[18].mxu0 }
 0x764   :  { %v1798_v41 = vsel %vm645_vm3, %v1796_v36, 0.0  ;;  %v1624_v42 = vmax.f32 %v1618_v37, 0.0  ;;  %v1621_v43 = vadd.f32 %v3168_v31, %v1620_v39  ;;  %v3444_v44 = vpop.f32.mrb[19].mxu0  ;;  %v3188_v39 = vld [vmem:[#allocation40] ss:$0 sm:$0xff] }
 0x765   :  { %v1799_v46 = vadd.f32 %v1798_v41, %v1797_v40 }
 0x766   :  { %v1625_v47 = vmax.f32 %v1621_v43, 0.0  ;;  %v1626_v50 = vsel %vm645_vm3, %v1624_v42, 0.0 }
 0x767   :  { %v1800_v49 = vrot.slane %v1799_v46, 4 }
 0x768   :  { %v1627_v51 = vsel %vm645_vm3, %v1625_v47, 0.0 }
 0x769   :  { %v1801_v45 = vadd.f32 %v1800_v49, %v1799_v46  ;;  %v1628_v52 = vadd.f32 %v1627_v51, %v1626_v50  ;;  %v3177_v46 = vld [vmem:[#allocation16] ss:$0 sm:$0xff] }
 0x76b   :  { %v1802_v53 = vrot.slane %v1801_v45, 2  ;;  %v1629_v54 = vrot.slane %v1628_v52, 4 }
 0x76d   :  { %v1803_v48 = vadd.f32 %v1802_v53, %v1801_v45  ;;  %v1630_v55 = vadd.f32 %v1629_v54, %v1628_v52  ;;  %v3178_v45 = vld [vmem:[#allocation17] ss:$0 sm:$0xff] }
 0x76f   :  { %v1804_v56 = vrot.slane %v1803_v48, 1  ;;  %v1631_v57 = vrot.slane %v1630_v55, 2 }
 0x771   :  { %v1805_v58 = vadd.f32 %v1804_v56, %v1803_v48  ;;  %v1632_v59 = vadd.f32 %v1631_v57, %v1630_v55  ;;  %v3780_v56 = vld [vmem:[#allocation19] sm:$0xff]  }
 0x773   :  { %v1806_v60 = vmul.f32 0.0625, %v1805_v58  ;;  %v1633_v61 = vrot.slane %v1632_v59, 1 }
 0x775   :  { %v1807_v62 = vsub.f32 %v1795_v32, %v1806_v60  ;;  %v1808_v63 = vsub.f32 %v1796_v36, %v1806_v60  ;;  %v1634_v1 = vadd.f32 %v1633_v61, %v1632_v59  ;;  %v3781_v59 = vld [vmem:[#allocation19 + $0x8] sm:$0xff]   ;;  %v3782_v60 = vld [vmem:[#allocation19 + $0x10] sm:$0xff]   ;;  %v3783_v61 = vld [vmem:[#allocation19 + $0x18] sm:$0xff]  }
 0x777   :  { %v1809_v2 = vmul.f32 %v1807_v62, %v1807_v62  ;;  %v1810_v5 = vmul.f32 %v1808_v63, %v1808_v63  ;;  %v1635_v6 = vmul.f32 0.0625, %v1634_v1 }
 0x779   :  { %v1811_v9 = vsel %vm645_vm3, %v1809_v2, 0.0  ;;  %v1812_v10 = vsel %vm645_vm3, %v1810_v5, 0.0  ;;  %v1636_v11 = vsub.f32 %v1624_v42, %v1635_v6  ;;  %v1637_v12 = vsub.f32 %v1625_v47, %v1635_v6  ;;  %v3189_v42 = vld [vmem:[#allocation41] ss:$0 sm:$0xff] }
 0x77a   :  { %v1813_v14 = vadd.f32 %v1812_v10, %v1811_v9 }
 0x77b   :  { %v1638_v15 = vmul.f32 %v1636_v11, %v1636_v11  ;;  %v1639_v17 = vmul.f32 %v1637_v12, %v1637_v12 }
 0x77c   :  { %v1814_v18 = vrot.slane %v1813_v14, 4 }
 0x77d   :  { %v1640_v7 = vsel %vm645_vm3, %v1638_v15, 0.0  ;;  %v1641_v8 = vsel %vm645_vm3, %v1639_v17, 0.0  ;;  %v3787_v15 = vld [vmem:[#allocation19 + $0x38] sm:$0xff]  }
 0x77e   :  { %v1815_v19 = vadd.f32 %v1814_v18, %v1813_v14  ;;  %v1642_v21 = vadd.f32 %v1641_v8, %v1640_v7  ;;  %v3786_v14 = vld [vmem:[#allocation19 + $0x30] sm:$0xff]   ;;  %v3789_v18 = vld [vmem:[#allocation43 + $0x8] sm:$0xff]   ;;  %v3790_v7 = vld [vmem:[#allocation43 + $0x10] sm:$0xff]  }
 0x77f   :  { %v3788_v17 = vld [vmem:[#allocation43] sm:$0xff]   ;;  %v3791_v8 = vld [vmem:[#allocation43 + $0x18] sm:$0xff]  }
 0x780   :  { %v1816_v22 = vrot.slane %v1815_v19, 2  ;;  %v1643_v23 = vrot.slane %v1642_v21, 4 }
 0x782   :  { %v1817_v24 = vadd.f32 %v1816_v22, %v1815_v19  ;;  %v1644_v25 = vadd.f32 %v1643_v23, %v1642_v21  ;;  %v3792_v19 = vld [vmem:[#allocation43 + $0x20] sm:$0xff]   ;;  %v3793_v21 = vld [vmem:[#allocation43 + $0x28] sm:$0xff]   ;;  %v3794_v22 = vld [vmem:[#allocation43 + $0x30] sm:$0xff]  }
 0x784   :  { %v1818_v26 = vrot.slane %v1817_v24, 1  ;;  %v1645_v27 = vrot.slane %v1644_v25, 2 }
 0x786   :  { %v1819_v30 = vadd.f32 %v1818_v26, %v1817_v24  ;;  %v1646_v31 = vadd.f32 %v1645_v27, %v1644_v25  ;;  %v3795_v24 = vld [vmem:[#allocation43 + $0x38] sm:$0xff]  }
 0x788   :  { %v1820_v32 = vmul.f32 0.0625, %v1819_v30  ;;  %v1647_v33 = vrot.slane %v1646_v31, 1 }
 0x78a   :  { %v1821_v34 = vadd.f32 1e-05, %v1820_v32  ;;  %v1648_v35 = vadd.f32 %v1647_v33, %v1646_v31 }
 0x78c   :  { %3804 = vrsqrt.f32 %v1821_v34  ;;  %v1649_v36 = vmul.f32 0.0625, %v1648_v35 }
 0x78e   :  { %v1650_v37 = vadd.f32 1e-05, %v1649_v36 }
 0x790   :  { %3806 = vrsqrt.f32 %v1650_v37 }
 0x796   :  { %v3805_v38 = vpop.eup %3804 }
 0x797   :  { %v1824_v40 = vmul.f32 %v3805_v38, %v1808_v63  ;;  %v1823_v41 = vmul.f32 %v3805_v38, %v1807_v62  ;;  %v3784_v62 = vld [vmem:[#allocation19 + $0x20] sm:$0xff]  }
 0x799   :  { %v1832_v43 = vmul.f32 %v3188_v39, %v1823_v41  ;;  %v1833_v51 = vmul.f32 %v3188_v39, %v1824_v40 }
 0x79a   :  { %v3807_v44 = vpop.eup %3806 }
 0x79b   :  { %v1652_v47 = vmul.f32 %v3807_v44, %v1636_v11  ;;  %v1653_v49 = vmul.f32 %v3807_v44, %v1637_v12  ;;  %v1841_v50 = vadd.f32 %v3189_v42, %v1832_v43  ;;  %v1842_v55 = vadd.f32 %v3189_v42, %v1833_v51  ;;  %v3785_v12 = vld [vmem:[#allocation19 + $0x28] sm:$0xff]   ;;  %v3197_v51 = vld [vmem:[#allocation20] ss:$0 sm:$0xff] }
 0x79d   :  { %v1661_v52 = vmul.f32 %v3177_v46, %v1652_v47  ;;  %v1662_v53 = vmul.f32 %v3177_v46, %v1653_v49  ;;  %1924 = vrot.lane.b32.xlu1 %v1841_v50, %s4658_s25  ;;  %v2366_v49 = vld [vmem:[#allocation28] sm:$0x1] }
 0x79e   :  { %v2372_v50 = vsel %vm2370_vm4, %v2366_v49, 0 }
 0x79f   :  { %v1670_v54 = vadd.f32 %v3178_v45, %v1661_v52  ;;  %v1671_v48 = vadd.f32 %v3178_v45, %v1662_v53 }
 0x7a1   :  { %1926 = vrot.lane.b32.xlu1 %v1842_v55, %s4658_s25  ;;  %v1843_v57 = vpack.c.bf16 %v1671_v48, %v1670_v54  ;;  %v3691_v58 = vpack.i.bf16 %v1671_v48, %v1670_v54 }
 0x7a3   :  { %3474 = vmatmul.mubr.msk.bf16.vlgmr.msra.gmra.mrb[12].mxu0 %vm645_vm3, %v1843_v57 }
 0x7a4   :  { %3490 = vmatpush3.bf16.msra.mxu0 %v3780_v56  ;;  %3505 = vmatprep.mubr.msk.bf16.mxu0 %vm4685_vm2, %v4684_v20 }
 0x7a5   :  { %3692 = vrot.lane.b32.xlu1 %v3691_v58, %s4658_s25  ;;  %3491 = vmatprep.subr.bf16.mxu0 %v4684_v20 }
 0x7a8   :  { %3492 = vmatpush3.bf16.msra.mxu0 %v3781_v59 }
 0x7a9   :  { %3493 = vmatprep.subr.bf16.mxu0 %v4684_v20 }
 0x7ac   :  { %3494 = vmatpush3.bf16.msra.mxu0 %v3782_v60 }
 0x7ad   :  { %3495 = vmatprep.subr.bf16.mxu0 %v4684_v20 }
 0x7b0   :  { %3496 = vmatpush3.bf16.msra.mxu0 %v3783_v61 }
 0x7b1   :  { %3497 = vmatprep.subr.bf16.mxu0 %v4684_v20 }
 0x7b4   :  { %3498 = vmatpush3.bf16.msra.mxu0 %v3784_v62 }
 0x7b5   :  { %3499 = vmatprep.subr.bf16.mxu0 %v4684_v20 }
 0x7b8   :  { %3500 = vmatpush3.bf16.msra.mxu0 %v3785_v12 }
 0x7b9   :  { %3501 = vmatprep.subr.bf16.mxu0 %v4684_v20 }
 0x7bc   :  { %3502 = vmatpush3.bf16.msra.mxu0 %v3786_v14 }
 0x7bd   :  { %3503 = vmatprep.subr.bf16.mxu0 %v4684_v20 }
 0x7c0   :  { %3504 = vmatpush3.bf16.msra.mxu0 %v3787_v15 }
 0x7c1   :  { %3529 = vmatprep.subr.bf16.mxu0 %v4684_v20 }
 0x80f   :  { %v5175_v63 = vpop.permute.xlu1 %1924 }
 0x810   :  { %v1930_v1 = vsel %vm645_vm3, %v1670_v54, %v5175_v63 }
 0x811   :  { %v1932_v2 = vpack.c.bf16 %v1930_v1, %v1930_v1 }
 0x813   :  { %v5179_v5 = vpop.permute.xlu1 %1926  ;;  %v1935_v6 = vsel %vm531_vm0, %v1932_v2, 0 }
 0x814   :  { %v1931_v9 = vsel %vm645_vm3, %v1671_v48, %v5179_v5  ;;  %3478 = vmatpush3.bf16.msra.mxu1 %v1935_v6 }
 0x815   :  { %v1933_v10 = vpack.c.bf16 %v1931_v9, %v1931_v9  ;;  %3483 = vmatprep.subr.bf16.mxu1 %v4684_v20 }
 0x817   :  { %3480 = vmatmul.mubr.msk.bf16.vlgmr.msra.gmra.mrb[24].mxu1 %vm511_vm1, %v5019_v13  ;;  %v1978_v11 = vsel %vm531_vm0, %v1933_v10, 0  ;;  %v3693_v30 = vpop.permute.xlu1 %3692 }
 0x818   :  { %3484 = vmatpush3.bf16.msra.mxu1 %v1978_v11  ;;  %3485 = vmatprep.mubr.msk.bf16.mxu1 %vm4685_vm2, %v4684_v20  ;;  %v3695_v33 = vunpack.i.h.bf16 %v3693_v30  ;;  %v3694_v34 = vunpack.i.l.bf16 %v3693_v30  ;;  %v3206_v30 = vld [vmem:[#allocation22] ss:$0 sm:$0xff] }
 0x819   :  { %3509 = vmatprep.subr.bf16.mxu1 %v4684_v20 }
 0x81f   :  { %3486 = vmatmul.mubr.msk.bf16.vlgmr.msra.gmra.mrb[28].mxu1 %vm511_vm1, %v5022_v16 }
 0x820   :  { %3525 = vmatprep.mubr.msk.bf16.mxu1 %vm4685_vm2, %v4684_v20  ;;  %3510 = vmatpush3.bf16.msra.mxu1 %v3788_v17 }
 0x821   :  { %3511 = vmatprep.subr.bf16.mxu1 %v4684_v20 }
 0x824   :  { %3512 = vmatpush3.bf16.msra.mxu1 %v3789_v18 }
 0x825   :  { %3513 = vmatprep.subr.bf16.mxu1 %v4684_v20 }
 0x828   :  { %3514 = vmatpush3.bf16.msra.mxu1 %v3790_v7 }
 0x829   :  { %3515 = vmatprep.subr.bf16.mxu1 %v4684_v20 }
 0x82c   :  { %3516 = vmatpush3.bf16.msra.mxu1 %v3791_v8 }
 0x82d   :  { %3517 = vmatprep.subr.bf16.mxu1 %v4684_v20 }
 0x830   :  { %3518 = vmatpush3.bf16.msra.mxu1 %v3792_v19 }
 0x831   :  { %3519 = vmatprep.subr.bf16.mxu1 %v4684_v20 }
 0x834   :  { %3520 = vmatpush3.bf16.msra.mxu1 %v3793_v21 }
 0x835   :  { %3521 = vmatprep.subr.bf16.mxu1 %v4684_v20 }
 0x838   :  { %3522 = vmatpush3.bf16.msra.mxu1 %v3794_v22 }
 0x839   :  { %3523 = vmatprep.subr.bf16.mxu1 %v4684_v20 }
 0x83c   :  { %3524 = vmatpush3.bf16.msra.mxu1 %v3795_v24 }
 0x8ea   :  { %v1971_v23 = vpop.f32.mrb[24].mxu1 }
 0x8eb   :  { %v3481_v25 = vpop.f32.mrb[25].mxu1  ;;  %v2020_v31 = vmul.f32 %v5058_v4, %v1971_v23 }
 0x8ec   :  { %v1974_v26 = vpop.f32.mrb[26].mxu1 }
 0x8ed   :  { %v3482_v27 = vpop.f32.mrb[27].mxu1  ;;  %v2030_v38 = vsel %vm645_vm3, %v2020_v31, %v3694_v34 }
 0x8f2   :  { %v2014_v32 = vpop.f32.mrb[28].mxu1 }
 0x8f3   :  { %v2021_v35 = vmul.f32 %v5056_v3, %v2014_v32  ;;  %v3487_v36 = vpop.f32.mrb[29].mxu1 }
 0x8f4   :  { %v2017_v37 = vpop.f32.mrb[30].mxu1 }
 0x8f5   :  { %v2031_v39 = vsel %vm645_vm3, %v2021_v35, %v3695_v33  ;;  %v3696_v40 = vpack.i.bf16 %v2021_v35, %v2020_v31  ;;  %v3488_v41 = vpop.f32.mrb[31].mxu1  ;;  %v3207_v33 = vld [vmem:[#allocation23] ss:$0 sm:$0xff] }
 0x8f6   :  { %v2032_v42 = vpack.c.bf16 %v2031_v39, %v2030_v38  ;;  %v3208_v39 = vld [vmem:[#allocation44] ss:$0 sm:$0xff] }
 0x8f7   :  { %3697 = vrot.lane.b32.xlu0 %v3696_v40, %s4658_s25 }
 0x8f8   :  { %3506 = vmatmul.mubr.bf16.vlgmr.msra.gmra.mrb[20].mxu0 %v2032_v42 }
 0x8f9   :  { %3531 = vmatprep.mubr.msk.bf16.mxu0 %vm4685_vm2, %v4684_v20  ;;  %3530 = vmatpush3.bf16.msra.mxu0 %v2372_v50 }
 0x969   :  { %v3698_v4 = vpop.permute.xlu0 %3697 }
 0x96a   :  { %v3700_v43 = vunpack.i.h.bf16 %v3698_v4  ;;  %v3699_v44 = vunpack.i.l.bf16 %v3698_v4 }
 0x96c   :  { %v2203_v3 = vsel %vm645_vm3, %v3700_v43, %v5179_v5  ;;  %v2202_v46 = vsel %vm645_vm3, %v3699_v44, %v5175_v63 }
 0x96d   :  { %v2204_v47 = vpack.c.bf16 %v2203_v3, %v2202_v46 }
 0x96f   :  { %3526 = vmatmul.mubr.bf16.vlgmr.msra.gmra.mrb[32].mxu1 %v2204_v47 }
 0x970   :  { %2556 = vmatprep.mubr.bf16.mxu1 %v4683_v0 }
 0x9cb   :  { %v2138_v45 = vpop.f32.mrb[20].mxu0 }
 0x9cc   :  { %v2139_v52 = vadd.f32 %v3197_v51, %v2138_v45  ;;  %v3507_v53 = vpop.f32.mrb[21].mxu0 }
 0x9cd   :  { %v2141_v54 = vpop.f32.mrb[22].mxu0 }
 0x9ce   :  { %v2145_v48 = vmax.f32 %v2139_v52, 0.0  ;;  %v2142_v55 = vadd.f32 %v3197_v51, %v2141_v54  ;;  %v3508_v56 = vpop.f32.mrb[23].mxu0 }
 0x9d0   :  { %v2146_v57 = vmax.f32 %v2142_v55, 0.0  ;;  %v2148_v58 = vsel %vm2147_vm5, %v2145_v48, 0.0 }
 0x9d2   :  { %v2149_v59 = vsel %vm2147_vm5, %v2146_v57, 0.0 }
 0x9d3   :  { %v2150_v60 = vadd.f32 %v2149_v59, %v2148_v58 }
 0x9d5   :  { %v2151_v61 = vrot.slane %v2150_v60, 4 }
 0x9d7   :  { %v2152_v62 = vadd.f32 %v2151_v61, %v2150_v60 }
 0x9d9   :  { %v2153_v1 = vrot.slane %v2152_v62, 2 }
 0x9db   :  { %v2154_v2 = vadd.f32 %v2153_v1, %v2152_v62 }
 0x9dd   :  { %v2155_v6 = vrot.slane %v2154_v2, 1 }
 0x9df   :  { %v2156_v9 = vadd.f32 %v2155_v6, %v2154_v2 }
 0x9e1   :  { %v2157_v10 = vmul.f32 0.0625, %v2156_v9 }
 0x9e3   :  { %v2158_v11 = vsub.f32 %v2145_v48, %v2157_v10  ;;  %v2159_v12 = vsub.f32 %v2146_v57, %v2157_v10 }
 0x9e5   :  { %v2160_v14 = vmul.f32 %v2158_v11, %v2158_v11  ;;  %v2161_v15 = vmul.f32 %v2159_v12, %v2159_v12 }
 0x9e7   :  { %v2162_v17 = vsel %vm2147_vm5, %v2160_v14, 0.0  ;;  %v2163_v18 = vsel %vm2147_vm5, %v2161_v15, 0.0  ;;  %v3217_v15 = vld [vmem:[#allocation46] ss:$0 sm:$0xff] }
 0x9e8   :  { %v2164_v7 = vadd.f32 %v2163_v18, %v2162_v17 }
 0x9ea   :  { %v2165_v8 = vrot.slane %v2164_v7, 4 }
 0x9ec   :  { %v2166_v19 = vadd.f32 %v2165_v8, %v2164_v7  ;;  %v2419_v7 = vsel %vm645_vm3, %v5092_v29, %v5175_v63  ;;  %v2420_v8 = vsel %vm645_vm3, %v5090_v28, %v5179_v5  ;;  %v3165_v28 = vld [vmem:[#allocation29] ss:$0 sm:$0xff] }
 0x9ee   :  { %v2167_v21 = vrot.slane %v2166_v19, 2 }
 0x9f0   :  { %v2168_v22 = vadd.f32 %v2167_v21, %v2166_v19  ;;  %v3218_v19 = vld [vmem:[#allocation47] ss:$0 sm:$0xff] }
 0x9f2   :  { %v2169_v23 = vrot.slane %v2168_v22, 1 }
 0x9f4   :  { %v2170_v24 = vadd.f32 %v2169_v23, %v2168_v22  ;;  %v2511_v23 = vpack.c.bf16 %v2419_v7, %v2419_v7 }
 0x9f6   :  { %v2171_v25 = vmul.f32 0.0625, %v2170_v24  ;;  %v2513_v24 = vpack.c.bf16 %v2420_v8, %v2420_v8 }
 0x9f8   :  { %v2172_v26 = vadd.f32 1e-05, %v2171_v25  ;;  %v2569_v29 = vsel %vm531_vm0, %v2513_v24, 0 }
 0x9fa   :  { %3808 = vrsqrt.f32 %v2172_v26 }
 0xa04   :  { %v3809_v27 = vpop.eup %3808 }
 0xa05   :  { %v2174_v31 = vmul.f32 %v3809_v27, %v2158_v11  ;;  %v2175_v32 = vmul.f32 %v3809_v27, %v2159_v12 }
 0xa07   :  { %v2183_v34 = vmul.f32 %v3206_v30, %v2174_v31  ;;  %v2184_v35 = vmul.f32 %v3206_v30, %v2175_v32  ;;  %v2519_v31 = vsel %vm531_vm0, %v2511_v23, 0 }
 0xa09   :  { %v2192_v36 = vadd.f32 %v3207_v33, %v2183_v34  ;;  %v2193_v37 = vadd.f32 %v3207_v33, %v2184_v35 }
 0xa0b   :  { %v2365_v38 = vpack.c.bf16 %v2193_v37, %v2192_v36 }
 0xa0d   :  { %3532 = vmatmul.mubr.msk.bf16.vlgmr.msra.gmra.mrb[12].mxu0 %vm2147_vm5, %v2365_v38 }
 0xa0e   :  { %2606 = vmatprep.mubr.bf16.mxu0 %v4683_v0 }
 0xa42   :  { %v2310_v40 = vpop.f32.mrb[32].mxu1 }
 0xa43   :  { %v2311_v41 = vadd.f32 %v3208_v39, %v2310_v40  ;;  %v3527_v42 = vpop.f32.mrb[33].mxu1 }
 0xa44   :  { %v2313_v4 = vpop.f32.mrb[34].mxu1 }
 0xa45   :  { %v2317_v43 = vmax.f32 %v2311_v41, 0.0  ;;  %v2314_v44 = vadd.f32 %v3208_v39, %v2313_v4  ;;  %v3528_v3 = vpop.f32.mrb[35].mxu1 }
 0xa47   :  { %v2318_v46 = vmax.f32 %v2314_v44, 0.0  ;;  %v2319_v47 = vsel %vm645_vm3, %v2317_v43, 0.0 }
 0xa49   :  { %v2320_v49 = vsel %vm645_vm3, %v2318_v46, 0.0 }
 0xa4a   :  { %v2321_v50 = vadd.f32 %v2320_v49, %v2319_v47 }
 0xa4c   :  { %v2322_v51 = vrot.slane %v2321_v50, 4 }
 0xa4e   :  { %v2323_v45 = vadd.f32 %v2322_v51, %v2321_v50 }
 0xa50   :  { %v2324_v52 = vrot.slane %v2323_v45, 2 }
 0xa52   :  { %v2325_v53 = vadd.f32 %v2324_v52, %v2323_v45 }
 0xa54   :  { %v2326_v54 = vrot.slane %v2325_v53, 1 }
 0xa56   :  { %v2327_v0 = vadd.f32 %v2326_v54, %v2325_v53 }
 0xa58   :  { %v2328_v48 = vmul.f32 0.0625, %v2327_v0 }
 0xa5a   :  { %v2329_v55 = vsub.f32 %v2317_v43, %v2328_v48  ;;  %v2330_v56 = vsub.f32 %v2318_v46, %v2328_v48 }
 0xa5c   :  { %v2331_v57 = vmul.f32 %v2329_v55, %v2329_v55  ;;  %v2332_v58 = vmul.f32 %v2330_v56, %v2330_v56 }
 0xa5e   :  { %v2333_v59 = vsel %vm645_vm3, %v2331_v57, 0.0  ;;  %v2334_v60 = vsel %vm645_vm3, %v2332_v58, 0.0 }
 0xa5f   :  { %v2335_v61 = vadd.f32 %v2334_v60, %v2333_v59 }
 0xa61   :  { %v2336_v62 = vrot.slane %v2335_v61, 4 }
 0xa63   :  { %v2337_v1 = vadd.f32 %v2336_v62, %v2335_v61 }
 0xa65   :  { %v2338_v2 = vrot.slane %v2337_v1, 2 }
 0xa67   :  { %v2339_v6 = vadd.f32 %v2338_v2, %v2337_v1 }
 0xa69   :  { %v2340_v9 = vrot.slane %v2339_v6, 1 }
 0xa6b   :  { %v2341_v10 = vadd.f32 %v2340_v9, %v2339_v6 }
 0xa6d   :  { %v2342_v11 = vmul.f32 0.0625, %v2341_v10 }
 0xa6f   :  { %v2343_v12 = vadd.f32 1e-05, %v2342_v11 }
 0xa71   :  { %3810 = vrsqrt.f32 %v2343_v12 }
 0xa7b   :  { %v3811_v14 = vpop.eup %3810 }
 0xa7c   :  { %v2345_v17 = vmul.f32 %v3811_v14, %v2329_v55  ;;  %v2346_v18 = vmul.f32 %v3811_v14, %v2330_v56 }
 0xa7e   :  { %v2354_v21 = vmul.f32 %v3217_v15, %v2345_v17  ;;  %v2355_v22 = vmul.f32 %v3217_v15, %v2346_v18  ;;  %v2615_v17 = vsel %vm531_vm0, %v5019_v13, 0  ;;  %v2657_v18 = vsel %vm531_vm0, %v5022_v16, 0 }
 0xa80   :  { %v2363_v25 = vadd.f32 %v3218_v19, %v2354_v21  ;;  %v2364_v26 = vadd.f32 %v3218_v19, %v2355_v22  ;;  %v2873_v19 = vlaneseq  ;;  %v4686_v21 = vmov 1983009808  }
 0xa81   :  { %v2966_v22 = vunpack.c.l.s4 %v4686_v21 }
 0xa82   :  { %v2512_v27 = vpack.c.bf16 %v2363_v25, %v2363_v25  ;;  %v2514_v30 = vpack.c.bf16 %v2364_v26, %v2364_v26  ;;  %v2874_v23 = vshrl.u32 %v2873_v19, 7 }
 0xa83   :  { %v2967_v24 = vunpack.c.0.s8 %v2966_v22 }
 0xa84   :  { %3220 = vmatprep.subr.msk.bf16.mxu1 %vm531_vm0, %v2512_v27  ;;  %3222 = vmatprep.subr.msk.bf16.mxu0 %vm531_vm0, %v2514_v30 }
 0xa85   :  { %2525 = vmatpush1.bf16.msra.mxu1 %v2519_v31  ;;  %2575 = vmatpush1.bf16.msra.mxu0 %v2569_v29  ;;  %v2970_v27 = vsub.s32 %v2967_v24, %v2874_v23 }
 0xa86   :  { %3535 = vmatprep.subr.bf16.mxu1 %v4684_v20  ;;  %3541 = vmatprep.subr.bf16.mxu0 %v4684_v20 }
 0xae0   :  { %v2408_v63 = vpop.f32.mrb[12].mxu0 }
 0xae1   :  { %v3571_v5 = vadd.f32 %v3165_v28, %v2408_v63  ;;  %v3533_v32 = vpop.f32.mrb[13].mxu0 }
 0xae2   :  { %v2411_v33 = vpop.f32.mrb[14].mxu0 }
 0xae3   :  { %v2417_v34 = vmax.f32 %v3571_v5, 0.0  ;;  %v3572_v35 = vadd.f32 %v3165_v28, %v2411_v33  ;;  %v3534_v36 = vpop.f32.mrb[15].mxu0 }
 0xae5   :  { %v2418_v37 = vmax.f32 %v3572_v35, 0.0  ;;  %v2421_v38 = vsel %vm2147_vm5, %v2417_v34, -inf }
 0xae6   :  { %2422 = vmax.xlane.f32.xlu1 %v2421_v38 }
 0xae7   :  { %v2424_v39 = vsel %vm2147_vm5, %v2418_v37, -inf }
 0xae8   :  { %2425 = vmax.xlane.f32.xlu0 %v2424_v39 }
 0xb73   :  { %v2423_v40 = vpop.xlane.xlu1 %2422 }
 0xb74   :  { %v2427_v41 = vsub.f32 %v2417_v34, %v2423_v40 }
 0xb75   :  { %v2426_v42 = vpop.xlane.xlu0 %2425 }
 0xb76   :  { %v2429_v4 = vmul.f32 1.442695, %v2427_v41  ;;  %v2428_v43 = vsub.f32 %v2418_v37, %v2426_v42 }
 0xb78   :  { %3812 = vpow2.f32 %v2429_v4  ;;  %v2431_v44 = vmul.f32 1.442695, %v2428_v43 }
 0xb7a   :  { %3814 = vpow2.f32 %v2431_v44 }
 0xb82   :  { %v3813_v3 = vpop.eup %3812 }
 0xb83   :  { %v2433_v46 = vsel %vm2147_vm5, %v3813_v3, 0.0 }
 0xb84   :  { %v3815_v47 = vpop.eup %3814  ;;  %2434 = vadd.xlane.f32.xlu0 %v2433_v46 }
 0xb85   :  { %v2436_v49 = vsel %vm2147_vm5, %v3815_v47, 0.0 }
 0xb86   :  { %2437 = vadd.xlane.f32.xlu1 %v2436_v49 }
 0xc11   :  { %v2435_v50 = vpop.xlane.xlu0 %2434 }
 0xc12   :  { %3816 = vrcp.f32 %v2435_v50 }
 0xc13   :  { %v2438_v51 = vpop.xlane.xlu1 %2437 }
 0xc14   :  { %3818 = vrcp.f32 %v2438_v51 }
 0xc1c   :  { %v3817_v45 = vpop.eup %3816 }
 0xc1d   :  { %v2440_v52 = vmul.f32 %v3817_v45, %v3813_v3  ;;  %v3826_v3 = vld [vmem:[#allocation5] sm:$0xff] }
 0xc1e   :  { %v3819_v53 = vpop.eup %3818  ;;  %v2880_v46 = vmul.f32 %v3826_v3, %v3826_v3 }
 0xc1f   :  { %v2442_v54 = vmul.f32 %v3819_v53, %v3815_v47  ;;  %v2939_v0 = vadd.f32 1e-15, %v2440_v52  ;;  %v2937_v57 = vsub.f32 0.0, %v2440_v52  ;;  %v2509_v13 = vpack.c.bf16 %v2440_v52, %v2440_v52  ;;  %v3827_v47 = vld [vmem:[#allocation5 + $0x8] sm:$0xff] }
 0xc20   :  { %v2881_v49 = vmul.f32 %v3827_v47, %v3827_v47  ;;  %v2882_v50 = vsel %vm511_vm1, %v2880_v46, 0.0 }
 0xc21   :  { %v3701_v48 = vpack.i.bf16 %v2442_v54, %v2440_v52  ;;  %v2940_v55 = vadd.f32 1e-15, %v2442_v54  ;;  %3820 = vlog2.f32 %v2939_v0  ;;  %v2938_v60 = vsub.f32 0.0, %v2442_v54 }
 0xc22   :  { %v2510_v7 = vpack.c.bf16 %v2442_v54, %v2442_v54  ;;  %v2705_v16 = vsel %vm531_vm0, %v2509_v13, 0  ;;  %v2883_v51 = vsel %vm511_vm1, %v2881_v49, 0.0  ;;  %v2876_v52 = vand.u32 127, %v2873_v19 }
 0xc23   :  { %3702 = vxpose.xlu0.b32.start.end [1/1] (short) (narrow) %v3701_v48, 8  ;;  %3822 = vlog2.f32 %v2940_v55  ;;  %v2884_v45 = vadd.f32 %v2883_v51, %v2882_v50 }
 0xc24   :  { %v2751_v8 = vsel %vm531_vm0, %v2510_v7, 0  ;;  %vm2877_vm9 = vcmp.eq.s32.totalorder %v2874_v23, %v2876_v52 }
 0xc25   :  { %2885 = vadd.xlane.f32.xlu1 %v2884_v45  ;;  %v3230_v53 = vsel %vm2877_vm9, 1.0, %v4684_v20 }
 0xc2b   :  { %v3821_v56 = vpop.eup %3820 }
 0xc2c   :  { %v2942_v58 = vmul.f32 0.6931472, %v3821_v56 }
 0xc2d   :  { %v3823_v59 = vpop.eup %3822 }
 0xc2e   :  { %v2944_v61 = vmul.f32 0.6931472, %v3823_v59  ;;  %v2945_v62 = vmul.f32 %v2942_v58, %v2937_v57 }
 0xc30   :  { %v2946_v1 = vmul.f32 %v2944_v61, %v2938_v60  ;;  %v2947_v2 = vsel %vm2147_vm5, %v2945_v62, 0.0 }
 0xc32   :  { %v2948_v6 = vsel %vm2147_vm5, %v2946_v1, 0.0 }
 0xc33   :  { %v5245_v9 = vadd.f32 %v2948_v6, %v2947_v2 }
 0xca3   :  { %v3703_v10 = vpop.trf.xlu0 }
 0xca4   :  { %v3707_v11 = vunpack.i.h.bf16 %v3703_v10  ;;  %v3704_v12 = vunpack.i.l.bf16 %v3703_v10 }
 0xca6   :  { %v5247_v14 = vpack.c.bf16 %v3707_v11, %v3707_v11  ;;  %v2507_v15 = vpack.c.bf16 %v3704_v12, %v3704_v12 }
 0xca8   :  { %3221 = vmatmul.mubr.msk.bf16.vlgmr.msra.gmra.mrb[36].mxu1 %vm511_vm1, %v2507_v15  ;;  %3223 = vmatmul.mubr.msk.bf16.vlgmr.msra.gmra.mrb[24].mxu0 %vm511_vm1, %v5247_v14 }
 0xca9   :  { %3536 = vmatpush3.bf16.msra.mxu1 %v2615_v17  ;;  %3542 = vmatpush3.bf16.msra.mxu0 %v2657_v18 }
 0xcaa   :  { %3537 = vmatprep.mubr.msk.bf16.mxu1 %vm4685_vm2, %v4684_v20  ;;  %3543 = vmatprep.mubr.msk.bf16.mxu0 %vm4685_vm2, %v4684_v20 }
 0xcab   :  { %3547 = vmatprep.subr.bf16.mxu1 %v4684_v20  ;;  %3553 = vmatprep.subr.bf16.mxu0 %v4684_v20 }
 0xcb0   :  { %3538 = vmatmul.mubr.msk.bf16.vlgmr.msra.gmra.mrb[40].mxu1 %vm511_vm1, %v2507_v15  ;;  %3544 = vmatmul.mubr.msk.bf16.vlgmr.msra.gmra.mrb[28].mxu0 %vm511_vm1, %v5247_v14 }
 0xcb1   :  { %3548 = vmatpush3.bf16.msra.mxu1 %v2705_v16  ;;  %3554 = vmatpush3.bf16.msra.mxu0 %v2751_v8 }
 0xcb2   :  { %3549 = vmatprep.mubr.msk.bf16.mxu1 %vm4685_vm2, %v4684_v20  ;;  %3555 = vmatprep.mubr.msk.bf16.mxu0 %vm4685_vm2, %v4684_v20  ;;  %v2886_v19 = vpop.xlane.xlu1 %2885 }
 0xcb3   :  { %3559 = vmatprep.subr.bf16.mxu1 %v4684_v20  ;;  %3565 = vmatprep.subr.bf16.mxu0 %v4684_v20  ;;  %v2887_v21 = vrot.slane %v2886_v19, 4 }
 0xcb5   :  { %v2888_v22 = vadd.f32 %v2887_v21, %v2886_v19 }
 0xcb7   :  { %v2889_v23 = vrot.slane %v2888_v22, 2 }
 0xcb9   :  { %v2890_v24 = vadd.f32 %v2889_v23, %v2888_v22 }
 0xd7b   :  { %v2558_v25 = vpop.f32.mrb[36].mxu1  ;;  %v2608_v26 = vpop.f32.mrb[24].mxu0 }
 0xd7c   :  { %v2560_v30 = vpop.f32.mrb[37].mxu1  ;;  %v2610_v31 = vpop.f32.mrb[25].mxu0 }
 0xd7d   :  { %v2964_v29 = vcombine.low %v2558_v25, %v2560_v30  ;;  %v2972_v28 = vcombine.low %v2608_v26, %v2610_v31  ;;  %v2562_v63 = vpop.f32.mrb[38].mxu1  ;;  %v2612_v5 = vpop.f32.mrb[26].mxu0  ;;  %v2891_v25 = vrot.slane %v2890_v24, 1 }
 0xd7e   :  { %v2563_v32 = vpop.f32.mrb[39].mxu1  ;;  %v2613_v33 = vpop.f32.mrb[27].mxu0 }
 0xd7f   :  { %v2971_v34 = vrot.slane %v2964_v29, %v2970_v27  ;;  %v2979_v35 = vrot.slane %v2972_v28, %v2970_v27  ;;  %v2892_v26 = vadd.f32 %v2891_v25, %v2890_v24 }
 0xd81   :  { %2985 = vst.msk [vmem:[#allocation49] sm:$0xf] %vm2984_vm8, %v2971_v34  ;;  %2986 = vst.msk [vmem:[#allocation49 + $0x4] sm:$0xf] %vm2984_vm8, %v2979_v35 }
 0xd82   :  { %3581 = vpush %v2892_v26 }
 0xd83   :  { %v2651_v36 = vpop.f32.mrb[40].mxu1  ;;  %v2693_v37 = vpop.f32.mrb[28].mxu0 }
 0xd84   :  { %v2699_v38 = vpack.c.bf16 %v2651_v36, %v2651_v36  ;;  %v2700_v39 = vpack.c.bf16 %v2693_v37, %v2693_v37  ;;  %v3539_v40 = vpop.f32.mrb[41].mxu1  ;;  %v3545_v41 = vpop.f32.mrb[29].mxu0 }
 0xd85   :  { %v2654_v42 = vpop.f32.mrb[42].mxu1  ;;  %v2696_v4 = vpop.f32.mrb[30].mxu0 }
 0xd86   :  { %v3540_v43 = vpop.f32.mrb[43].mxu1  ;;  %v3546_v44 = vpop.f32.mrb[31].mxu0  ;;  %3550 = vmatmul.mubr.msk.bf16.vlgmr.msra.gmra.mrb[44].mxu1 %vm511_vm1, %v2699_v38  ;;  %3556 = vmatmul.mubr.msk.bf16.vlgmr.msra.gmra.mrb[32].mxu0 %vm511_vm1, %v2700_v39 }
 0xd87   :  { %3560 = vmatpush3.bf16.msra.mxu1 %v2705_v16  ;;  %3566 = vmatpush3.bf16.msra.mxu0 %v2751_v8 }
 0xd88   :  { %3561 = vmatprep.mubr.msk.bf16.mxu1 %vm4685_vm2, %v4684_v20  ;;  %3567 = vmatprep.mubr.msk.bf16.mxu0 %vm4685_vm2, %v4684_v20 }
 0xd8e   :  { %3562 = vmatmul.mubr.msk.bf16.vlgmr.msra.gmra.mrb[48].mxu1 %vm511_vm1, %v2507_v15  ;;  %3568 = vmatmul.mubr.msk.bf16.vlgmr.msra.gmra.mrb[36].mxu0 %vm511_vm1, %v5247_v14 }
 0xe59   :  { %v2741_v54 = vpop.f32.mrb[44].mxu1  ;;  %v2787_v0 = vpop.f32.mrb[32].mxu0 }
 0xe5a   :  { %v2894_v48 = vmul.f32 %v3230_v53, %v2741_v54  ;;  %2987 = vst.msk [vmem:[#allocation50] sm:$0x3] %vm2896_vm10, %v2741_v54  ;;  %v2895_v55 = vmul.f32 %v3230_v53, %v2787_v0  ;;  %2988 = vst.msk [vmem:[#allocation50 + $0x2] sm:$0x3] %vm2896_vm10, %v2787_v0  ;;  %v3551_v56 = vpop.f32.mrb[45].mxu1  ;;  %v3557_v57 = vpop.f32.mrb[33].mxu0 }
 0xe5b   :  { %v2744_v58 = vpop.f32.mrb[46].mxu1  ;;  %v2790_v59 = vpop.f32.mrb[34].mxu0 }
 0xe5c   :  { %v3552_v60 = vpop.f32.mrb[47].mxu1  ;;  %v3558_v61 = vpop.f32.mrb[35].mxu0  ;;  %v2897_v62 = vsel %vm2896_vm10, %v2894_v48, 0.0  ;;  %v2898_v1 = vsel %vm2896_vm10, %v2895_v55, 0.0 }
 0xe5d   :  { %v2899_v20 = vadd.f32 %v2898_v1, %v2897_v62 }
 0xe5f   :  { %2900 = vadd.xlane.f32.xlu1 %v2899_v20 }
 0xe61   :  { %v2827_v2 = vpop.f32.mrb[48].mxu1  ;;  %v2867_v6 = vpop.f32.mrb[36].mxu0 }
 0xe62   :  { %v2911_v10 = vmul.f32 %v2827_v2, %v2827_v2  ;;  %v2912_v11 = vmul.f32 %v2867_v6, %v2867_v6  ;;  %v3563_v12 = vpop.f32.mrb[49].mxu1  ;;  %v3569_v14 = vpop.f32.mrb[37].mxu0 }
 0xe63   :  { %v2830_v15 = vpop.f32.mrb[50].mxu1  ;;  %v2870_v17 = vpop.f32.mrb[38].mxu0 }
 0xe64   :  { %v3564_v18 = vpop.f32.mrb[51].mxu1  ;;  %v3570_v13 = vpop.f32.mrb[39].mxu0  ;;  %v2913_v7 = vsel %vm2896_vm10, %v2911_v10, 0.0  ;;  %v2914_v16 = vsel %vm2896_vm10, %v2912_v11, 0.0 }
 0xe65   :  { %v2915_v8 = vadd.f32 %v2914_v16, %v2913_v7 }
 0xe67   :  { %2916 = vadd.xlane.f32.xlu1 %v2915_v8 }
 0xe6b   :  { %2950 = vadd.xlane.f32.xlu1 %v5245_v9 }
 0xeec   :  { %v2901_v27 = vpop.xlane.xlu1 %2900 }
 0xeed   :  { %v2902_v30 = vrot.slane %v2901_v27, 4 }
 0xeef   :  { %v2903_v31 = vadd.f32 %v2902_v30, %v2901_v27 }
 0xef1   :  { %v2904_v29 = vrot.slane %v2903_v31, 2 }
 0xef3   :  { %v2905_v28 = vadd.f32 %v2904_v29, %v2903_v31 }
 0xef4   :  { %v2917_v63 = vpop.xlane.xlu1 %2916 }
 0xef5   :  { %v2918_v5 = vrot.slane %v2917_v63, 4  ;;  %v2906_v32 = vrot.slane %v2905_v28, 1 }
 0xef7   :  { %v2919_v33 = vadd.f32 %v2918_v5, %v2917_v63  ;;  %v2907_v34 = vadd.f32 %v2906_v32, %v2905_v28 }
 0xef9   :  { %v2920_v35 = vrot.slane %v2919_v33, 2  ;;  %3583 = vpush %v2907_v34 }
 0xefb   :  { %v2921_v9 = vadd.f32 %v2920_v35, %v2919_v33 }
 0xefd   :  { %v2922_v36 = vrot.slane %v2921_v9, 1 }
 0xefe   :  { %4499 = shalt.err (!%p4496_p6)
}
 0xeff   :  { %s4500_s8 = scalar_lea.hbm %s4857_s5, 64 }
 0xf00   :  { %p4501_p7 = scmp.ne.s32.totalorder %s4857_s5, %s4500_s8  ;;  %p4504_p8 = scmp.lt.u32.totalorder %s4500_s8, %s4857_s5 }
 0xf02   :  { %p4506_p9 = pnand %p4504_p8, %p4501_p7 }
 0xf04   :  { %4509 = shalt.err (!%p4506_p9)
}
 0xf05   :  { %s4689_s26 = smov 32   ;;  %s4690_s3 = smov 2   ;;  %v2923_v37 = vadd.f32 %v2922_v36, %v2921_v9 }
 0xf06   :  { %3017 = dma.vmem_to_hbm [thread:$0]  %s3012_s18, 64, %s4857_s5, [#allocation51], %s4689_s26, %s4689_s26, %s4690_s3  }
 0xf07   :  { %s4510_s20 = scalar_lea.vmem %s3000_s22, 128  ;;  %p4515_p11 = scmp.lt.s32.totalorder %s3000_s22, %s3000_s22 }
 0xf08   :  { %p4511_p10 = scmp.ne.s32.totalorder %s3000_s22, %s4510_s20  ;;  %p4516_p12 = scmp.lt.s32.totalorder %s4510_s20, %s4510_s20 }
 0xf0a   :  { %p4517_p13 = por %p4516_p12, %p4515_p11 }
 0xf0c   :  { %p4518_p0 = pnand %p4517_p13, %p4511_p10 }
 0xf0e   :  { %4521 = shalt.err (!%p4518_p0)
}
 0xf0f   :  { %s4522_s28 = scalar_lea.hbm %s4852_s12, 128 }
 0xf10   :  { %p4523_p1 = scmp.ne.s32.totalorder %s4852_s12, %s4522_s28  ;;  %p4526_p2 = scmp.lt.u32.totalorder %s4522_s28, %s4852_s12 }
 0xf12   :  { %p4528_p3 = pnand %p4526_p2, %p4523_p1 }
 0xf14   :  { %4531 = shalt.err (!%p4528_p3)
}
 0xf15   :  { %3005 = dma.vmem_to_hbm [thread:$0]  %s3000_s22, 128, %s4852_s12, [#allocation4], %s4658_s25, %s4658_s25, %s4659_s6   ;;  %3585 = vpush %v2923_v37  ;;  %v2951_v38 = vpop.xlane.xlu1 %2950  ;;  %vm2990_vm13 = vcmask 0  }
 0xf16   :  { %s3582_s5 = spop %3581  ;;  %v2952_v39 = vrot.slane %v2951_v38, 4  ;;  %s4691_s7 = smov 0.0  }
 0xf17   :  { %s4692_s12 = smov [#allocation52]   ;;  %s4693_s14 = smov [#allocation53]  }
 0xf18   :  { %v2953_v40 = vadd.f32 %v2952_v39, %v2951_v38  ;;  %s3024_s25 = sshll.u32 %s4692_s12, 4  ;;  %s3034_s21 = sshll.u32 %s4693_s14, 4  ;;  %s3025_s25 = int_to_ptr.vmem [resolvable:$true] %s3024_s25  ;;  %s5303_s21 = int_to_ptr.vmem [resolvable:$true] %s3034_s21 }
 0xf19   :  { %s4532_s24 = scalar_lea.vmem %s3025_s25, 16  ;;  %s4536_s11 = scalar_lea.vmem %s3025_s25, 32 }
 0xf1a   :  { %v2954_v42 = vrot.slane %v2953_v40, 2  ;;  %p4533_p4 = scmp.ne.s32.totalorder %s3025_s25, %s4532_s24  ;;  %p4537_p5 = scmp.lt.s32.totalorder %s3025_s25, %s3025_s25 }
 0xf1b   :  { %p4538_p6 = scmp.lt.s32.totalorder %s4536_s11, %s4532_s24 }
 0xf1c   :  { %v2955_v4 = vadd.f32 %v2954_v42, %v2953_v40 }
 0xf1d   :  { %p4539_p7 = por %p4538_p6, %p4537_p5 }
 0xf1e   :  { %v2956_v44 = vrot.slane %v2955_v4, 1 }
 0xf1f   :  { %p4540_p8 = pnand %p4539_p7, %p4533_p4 }
 0xf20   :  { %v2957_v50 = vadd.f32 %v2956_v44, %v2955_v4 }
 0xf2a   :  { %s3584_s1 = spop %3583 }
 0xf2b   :  { %s2909_s2 = smul.f32 2.0, %s3584_s1 }
 0xf2d   :  { %s2910_s29 = ssub.f32 %s3582_s5, %s2909_s2 }
 0xf46   :  { %s3586_s9 = spop %3585 }
 0xf47   :  { %s2925_s0 = sadd.f32 %s3586_s9, %s2910_s29 }
 0xf49   :  { %s2926_s4 = smax.f32 %s4691_s7, %s2925_s0 }
 0xf4a   :  { %v2927_v41 = vstv %s2926_s4 }
 0xf4b   :  { %3824 = vrsqrt.f32 %v2927_v41  ;;  %vm2930_vm11 = vcmp.eq.f32.partialorder %v2927_v41, inf  ;;  %v2933_v46 = vand.u32 2147483648, %v2927_v41  ;;  %vm2932_vm12 = vcmp.eq.f32.partialorder %v2927_v41, 0.0 }
 0xf55   :  { %v3825_v43 = vpop.eup %3824 }
 0xf56   :  { %v2929_v3 = vmul.f32 %v3825_v43, %v2927_v41 }
 0xf58   :  { %v2931_v47 = vsel %vm2930_vm11, %v2927_v41, %v2929_v3 }
 0xf59   :  { %v2934_v49 = vsel %vm2932_vm12, %v2933_v46, %v2931_v47 }
 0xf5a   :  { %3587 = vpush %v2934_v49 }
 0xf5b   :  { %3589 = vpush %v2957_v50 }
 0xf8b   :  { %s3588_s6 = spop %3587 }
 0xf8c   :  { %s2936_s17 = smul.f32 0.0078125, %s3588_s6  ;;  %s3590_s30 = spop %3589 }
 0xf8d   :  { %s2959_s10 = smul.f32 0.0625, %s3590_s30 }
 0xf8e   :  { %v2989_v51 = vstv %s2936_s17 }
 0xf8f   :  { %2991 = vst.msk [vmem:[#allocation52] sm:$0x1] %vm2990_vm13, %v2989_v51  ;;  %v2992_v45 = vstv %s2959_s10 }
 0xf90   :  { %2993 = vst.msk [vmem:[#allocation53] sm:$0x1] %vm2990_vm13, %v2992_v45 }
 0xf91   :  { %4543 = shalt.err (!%p4540_p8)
}
 0xf92   :  { %s4544_s15 = scalar_lea.hbm %s4862_s27, 16 }
 0xf93   :  { %p4545_p9 = scmp.ne.s32.totalorder %s4862_s27, %s4544_s15  ;;  %p4548_p10 = scmp.lt.u32.totalorder %s4544_s15, %s4862_s27 }
 0xf95   :  { %p4550_p11 = pnand %p4548_p10, %p4545_p9 }
 0xf97   :  { %4553 = shalt.err (!%p4550_p11)
}
 0xf98   :  { %3027 = dma.vmem_to_hbm [thread:$0]  %s3025_s25, 16, %s4862_s27, [#allocation51]  }
 0xf99   :  { %s4554_s16 = scalar_lea.vmem %s5303_s21, 16  ;;  %s4558_s18 = scalar_lea.vmem %s5303_s21, 32 }
 0xf9a   :  { %p4555_p12 = scmp.ne.s32.totalorder %s5303_s21, %s4554_s16  ;;  %p4559_p13 = scmp.lt.s32.totalorder %s5303_s21, %s5303_s21 }
 0xf9b   :  { %p4560_p0 = scmp.lt.s32.totalorder %s4558_s18, %s4554_s16 }
 0xf9d   :  { %p4561_p1 = por %p4560_p0, %p4559_p13 }
 0xf9f   :  { %p4562_p2 = pnand %p4561_p1, %p4555_p12 }
 0xfa1   :  { %4565 = shalt.err (!%p4562_p2)
}
 0xfa2   :  { %s4566_s19 = scalar_lea.hbm %s4867_s13, 16 }
 0xfa3   :  { %p4567_p3 = scmp.ne.s32.totalorder %s4867_s13, %s4566_s19  ;;  %p4570_p4 = scmp.lt.u32.totalorder %s4566_s19, %s4867_s13 }
 0xfa5   :  { %p4572_p5 = pnand %p4570_p4, %p4567_p3 }
 0xfa7   :  { %4575 = shalt.err (!%p4572_p5)
}
 0xfa8   :  { %3037 = dma.vmem_to_hbm [thread:$0]  %s5303_s21, 16, %s4867_s13, [#allocation54]  }
 0xfa9   :  { %4608 = dma.done.wait [#allocation4], 128  }
 0xfaa   :  { %4609 = vsyncadd [#allocation4], 4294967168 }
 0xfab   :  { %4610 = dma.done.wait [#allocation51], 80  }
 0xfac   :  { %4611 = vsyncadd [#allocation51], 4294967216 }
 0xfad   :  { %4612 = dma.done.wait [#allocation54], 16  }
 0xfae   :  { %4613 = vsyncadd [#allocation54], 4294967280 }
 0xfaf   :  { %3050 = vsyncpa [#allocation3], 1 }
 0xfb0   :  { %3051 = vsyncpa [#allocation6], 1 }
 0xfb1   :  { %3052 = vsyncpa [#allocation9], 1 }
 0xfb2   :  { %3053 = vsyncpa [#allocation12], 1 }
 0xfb3   :  { %3054 = vsyncpa [#allocation15], 1 }
 0xfb4   :  { %3055 = vsyncpa [#allocation18], 1 }
 0xfb5   :  { %3056 = vsyncpa [#allocation21], 1 }
 0xfb6   :  { %3057 = vsyncpa [#allocation24], 1 }
 0xfb7   :  { %3058 = vsyncpa [#allocation27], 1 }
 0xfb8   :  { %3059 = vsyncpa [#allocation30], 1 }
 0xfb9   :  { %3060 = vsyncpa [#allocation33], 1 }
 0xfba   :  { %3061 = vsyncpa [#allocation36], 1 }
 0xfbb   :  { %3062 = vsyncpa [#allocation39], 1 }
 0xfbc   :  { %3063 = vsyncpa [#allocation42], 1 }
 0xfbd   :  { %3064 = vsyncpa [#allocation45], 1 }
 0xfbe   :  { %3065 = vsyncpa [#allocation48], 1 }
 0xfbf   :  { %3066 = vsyncpa [#allocation4], 1 }
 0xfc0   :  { %3067 = vsyncpa [#allocation51], 1 }
 0xfc1   :  { %3068 = vsyncpa [#allocation54], 1 }

// kernel: graphsage_diffpool_forward.3
= control target key start
LH: loop header
LB: loop body
LE: loop exit
PB: predicated region body
PF: predicated region fallthrough
CT: control target
= control target key end

     0   :  { %s5520_s6 = smov 1   ;;  %s5521_s10 = smov 2   ;;  %s7096_s0 = inlined_call_operand.smem [shape: u32[35], index: -1, kind: input, shape index: {}] }
   0x1   :  { %s5607_s5 = sld [smem:[%s7096_s0]]   ;;  %s5522_s14 = smov 3  }
   0x2   :  { %s5612_s9 = sld [smem:[%s7096_s0 + %s5520_s6]]   ;;  %s5523_s18 = smov 4  }
   0x3   :  { %s5617_s13 = sld [smem:[%s7096_s0 + %s5521_s10]]   ;;  %s5524_s22 = smov 5  }
   0x4   :  { %s5622_s17 = sld [smem:[%s7096_s0 + %s5522_s14]]   ;;  %s5525_s26 = smov 6  }
   0x5   :  { %s5627_s21 = sld [smem:[%s7096_s0 + %s5523_s18]]   ;;  %s5526_s30 = smov 7  }
   0x6   :  { %s5632_s25 = sld [smem:[%s7096_s0 + %s5524_s22]]   ;;  %s5527_s4 = smov 8  }
   0x7   :  { %7132 = sst [smem:[#allocation75_spill]] %s5607_s5  ;;  %s5528_s10 = smov 9  }
   0x8   :  { %s5637_s29 = sld [smem:[%s7096_s0 + %s5525_s26]]   ;;  %s5529_s15 = smov 10  }
   0x9   :  { %7133 = sst [smem:[#allocation76_spill]] %s5617_s13  ;;  %s5530_s20 = smov 11  }
   0xa   :  { %s5642_s3 = sld [smem:[%s7096_s0 + %s5526_s30]]   ;;  %s5531_s26 = smov 12  }
   0xb   :  { %7134 = sst [smem:[#allocation77_spill]] %s5627_s21  ;;  %s5532_s1 = smov 13  }
   0xc   :  { %s5647_s8 = sld [smem:[%s7096_s0 + %s5527_s4]]   ;;  %s5533_s7 = smov 14  }
   0xd   :  { %s5652_s14 = sld [smem:[%s7096_s0 + %s5528_s10]]   ;;  %s5535_s22 = smov 16  }
   0xe   :  { %7135 = sst [smem:[#allocation78_spill]] %s5637_s29  ;;  %s5536_s28 = smov 17  }
   0xf   :  { %s5657_s19 = sld [smem:[%s7096_s0 + %s5529_s15]]   ;;  %s5534_s15 = smov 15  }
  0x10   :  { %s5662_s24 = sld [smem:[%s7096_s0 + %s5530_s20]]  }
  0x11   :  { %s5667_s30 = sld [smem:[%s7096_s0 + %s5531_s26]]  }
  0x12   :  { %7136 = sst [smem:[#allocation79_spill]] %s5647_s8 }
  0x13   :  { %s5672_s6 = sld [smem:[%s7096_s0 + %s5532_s1]]  }
  0x14   :  { %s5677_s12 = sld [smem:[%s7096_s0 + %s5533_s7]]   ;;  %s5537_s7 = smov 18  }
  0x15   :  { %7137 = sst [smem:[#allocation80_spill]] %s5657_s19 }
  0x16   :  { %s5682_s20 = sld [smem:[%s7096_s0 + %s5534_s15]]   ;;  %s5538_s15 = smov 19  }
  0x17   :  { %7138 = sst [smem:[#allocation81_spill]] %s5667_s30 }
  0x18   :  { %s5687_s27 = sld [smem:[%s7096_s0 + %s5535_s22]]   ;;  %s5539_s22 = smov 20  }
  0x19   :  { %s5692_s4 = sld [smem:[%s7096_s0 + %s5536_s28]]   ;;  %s5540_s28 = smov 21  }
  0x1a   :  { %7139 = sst [smem:[#allocation82_spill]] %s5677_s12 }
  0x1b   :  { %s5697_s12 = sld [smem:[%s7096_s0 + %s5537_s7]]   ;;  %s5541_s7 = smov 22  }
  0x1c   :  { %s5702_s30 = sld [smem:[%s7096_s0 + %s5538_s15]]   ;;  %s5542_s15 = smov 23  }
  0x1d   :  { %s5712_s19 = sld [smem:[%s7096_s0 + %s5540_s28]]   ;;  %s5544_s28 = smov 25  }
  0x1e   :  { %7140 = sst [smem:[#allocation83_spill]] %s5687_s27 }
  0x1f   :  { %s5707_s27 = sld [smem:[%s7096_s0 + %s5539_s22]]   ;;  %s5543_s22 = smov 24  }
  0x20   :  { %s5722_s8 = sld [smem:[%s7096_s0 + %s5542_s15]]   ;;  %s5546_s15 = smov 27  }
  0x21   :  { %7141 = sst [smem:[#allocation84_spill]] %s5697_s12 }
  0x22   :  { %s5717_s12 = sld [smem:[%s7096_s0 + %s5541_s7]]   ;;  %s5545_s7 = smov 26  }
  0x23   :  { %s5732_s29 = sld [smem:[%s7096_s0 + %s5544_s28]]   ;;  %s5548_s28 = smov 29  }
  0x24   :  { %s5742_s21 = sld [smem:[%s7096_s0 + %s5546_s15]]   ;;  %s5550_s15 = smov 31  }
  0x25   :  { %7142 = sst [smem:[#allocation85_spill]] %s5707_s27 }
  0x26   :  { %s5727_s27 = sld [smem:[%s7096_s0 + %s5543_s22]]   ;;  %s5547_s22 = smov 28  }
  0x27   :  { %s5752_s13 = sld [smem:[%s7096_s0 + %s5548_s28]]   ;;  %s5552_s28 = smov 33  }
  0x28   :  { %7143 = sst [smem:[#allocation86_spill]] %s5717_s12 }
  0x29   :  { %s5737_s12 = sld [smem:[%s7096_s0 + %s5545_s7]]   ;;  %s5549_s7 = smov 30  }
  0x2a   :  { %s5762_s5 = sld [smem:[%s7096_s0 + %s5550_s15]]  }
  0x2c   :  { %7144 = sst [smem:[#allocation87_spill]] %s5727_s27 }
  0x2d   :  { %s5747_s27 = sld [smem:[%s7096_s0 + %s5547_s22]]   ;;  %s5551_s22 = smov 32  }
  0x2e   :  { %7147 = sst [smem:[#allocation90_spill]] %s5752_s13 }
  0x2f   :  { %7145 = sst [smem:[#allocation88_spill]] %s5737_s12 }
  0x30   :  { %s5757_s12 = sld [smem:[%s7096_s0 + %s5549_s7]]   ;;  %s5553_s7 = smov 34  }
  0x31   :  { %s5772_s13 = sld [smem:[%s7096_s0 + %s5552_s28]]  }
  0x33   :  { %7146 = sst [smem:[#allocation89_spill]] %s5747_s27 }
  0x34   :  { %s5767_s27 = sld [smem:[%s7096_s0 + %s5551_s22]]  }
  0x36   :  { %7148 = sst [smem:[#allocation91_spill]] %s5757_s12 }
  0x37   :  { %s5777_s12 = sld [smem:[%s7096_s0 + %s5553_s7]]  }
  0x38   :  { %75 = vsyncpa [#allocation3], 0 }
  0x39   :  { %76 = vsyncpa [#allocation6], 0 }
  0x3a   :  { %77 = vsyncpa [#allocation9], 0 }
  0x3b   :  { %78 = vsyncpa [#allocation12], 0 }
  0x3c   :  { %79 = vsyncpa [#allocation15], 0 }
  0x3d   :  { %80 = vsyncpa [#allocation18], 0 }
  0x3e   :  { %81 = vsyncpa [#allocation21], 0 }
  0x3f   :  { %82 = vsyncpa [#allocation24], 0 }
  0x40   :  { %83 = vsyncpa [#allocation27], 0 }
  0x41   :  { %84 = vsyncpa [#allocation30], 0 }
  0x42   :  { %85 = vsyncpa [#allocation33], 0 }
  0x43   :  { %86 = vsyncpa [#allocation36], 0 }
  0x44   :  { %87 = vsyncpa [#allocation39], 0 }
  0x45   :  { %88 = vsyncpa [#allocation42], 0 }
  0x46   :  { %89 = vsyncpa [#allocation45], 0 }
  0x47   :  { %90 = vsyncpa [#allocation48], 0 }
  0x48   :  { %91 = vsyncpa [#allocation4], 0 }
  0x49   :  { %92 = vsyncpa [#allocation52], 0 }
  0x4a   :  { %93 = vsyncpa [#allocation55], 0  ;;  %s5554_s0 = smov [#allocation5]   ;;  %s5555_s16 = smov [#allocation8]  }
  0x4b   :  { %s111_s15 = sshll.u32 %s5554_s0, 4  ;;  %s135_s18 = sshll.u32 %s5555_s16, 4  ;;  %s112_s15 = int_to_ptr.vmem [resolvable:$true] %s111_s15  ;;  %s5779_s18 = int_to_ptr.vmem [resolvable:$true] %s135_s18 }
  0x4c   :  { %s4712_s22 = scalar_lea.hbm %s5612_s9, 1024 }
  0x4d   :  { %p4713_p0 = scmp.ne.s32.totalorder %s5612_s9, %s4712_s22  ;;  %p4716_p1 = scmp.lt.u32.totalorder %s4712_s22, %s5612_s9 }
  0x4f   :  { %p4718_p2 = pnand %p4716_p1, %p4713_p0 }
  0x51   :  { %4721 = shalt.err (!%p4718_p2)
}
  0x52   :  { %s4722_s23 = scalar_lea.vmem %s112_s15, 1024  ;;  %p4727_p4 = scmp.lt.s32.totalorder %s112_s15, %s112_s15 }
  0x53   :  { %p4723_p3 = scmp.ne.s32.totalorder %s112_s15, %s4722_s23  ;;  %p4728_p5 = scmp.lt.s32.totalorder %s4722_s23, %s4722_s23 }
  0x55   :  { %p4729_p6 = por %p4728_p5, %p4727_p4 }
  0x57   :  { %p4730_p7 = pnand %p4729_p6, %p4723_p3 }
  0x59   :  { %4733 = shalt.err (!%p4730_p7)
}
  0x5a   :  { %s5556_s26 = smov 128   ;;  %s5557_s28 = smov 8  }
  0x5b   :  { %117 = dma.hbm_to_vmem [thread:$0]  %s5612_s9, 1024, %s112_s15, [#allocation6], %s5556_s26, %s5556_s26, %s5557_s28  }
  0x5c   :  { %s4734_s1 = scalar_lea.hbm %s5622_s17, 256 }
  0x5d   :  { %p4735_p8 = scmp.ne.s32.totalorder %s5622_s17, %s4734_s1  ;;  %p4738_p9 = scmp.lt.u32.totalorder %s4734_s1, %s5622_s17 }
  0x5f   :  { %p4740_p10 = pnand %p4738_p9, %p4735_p8 }
  0x61   :  { %4743 = shalt.err (!%p4740_p10)
}
  0x62   :  { %s4744_s2 = scalar_lea.vmem %s5779_s18, 256  ;;  %p4749_p12 = scmp.lt.s32.totalorder %s5779_s18, %s5779_s18 }
  0x63   :  { %p4745_p11 = scmp.ne.s32.totalorder %s5779_s18, %s4744_s2  ;;  %p4750_p13 = scmp.lt.s32.totalorder %s4744_s2, %s4744_s2 }
  0x65   :  { %p4751_p0 = por %p4750_p13, %p4749_p12 }
  0x67   :  { %p4752_p1 = pnand %p4751_p0, %p4745_p11 }
  0x69   :  { %4755 = shalt.err (!%p4752_p1)
}
  0x6a   :  { %s5558_s7 = smov 64   ;;  %s5559_s9 = smov 4  }
  0x6b   :  { %141 = dma.hbm_to_vmem [thread:$0]  %s5622_s17, 256, %s5779_s18, [#allocation9], %s5558_s7, %s5558_s7, %s5559_s9  }
  0x6c   :  { %s5560_s10 = smov [#allocation11]   ;;  %s5561_s0 = smov [#allocation14]  }
  0x6d   :  { %s158_s11 = sshll.u32 %s5560_s10, 4  ;;  %s177_s15 = sshll.u32 %s5561_s0, 4  ;;  %s159_s11 = int_to_ptr.vmem [resolvable:$true] %s158_s11  ;;  %s5800_s15 = int_to_ptr.vmem [resolvable:$true] %s177_s15 }
  0x6e   :  { %s4756_s16 = scalar_lea.hbm %s5632_s25, 16 }
  0x6f   :  { %p4757_p2 = scmp.ne.s32.totalorder %s5632_s25, %s4756_s16  ;;  %p4760_p3 = scmp.lt.u32.totalorder %s4756_s16, %s5632_s25 }
  0x71   :  { %p4762_p4 = pnand %p4760_p3, %p4757_p2 }
  0x73   :  { %4765 = shalt.err (!%p4762_p4)
}
  0x74   :  { %s4766_s22 = scalar_lea.vmem %s159_s11, 16  ;;  %s4770_s23 = scalar_lea.vmem %s159_s11, 32 }
  0x75   :  { %p4767_p5 = scmp.ne.s32.totalorder %s159_s11, %s4766_s22  ;;  %p4771_p6 = scmp.lt.s32.totalorder %s159_s11, %s159_s11 }
  0x76   :  { %p4772_p7 = scmp.lt.s32.totalorder %s4770_s23, %s4766_s22 }
  0x78   :  { %p4773_p8 = por %p4772_p7, %p4771_p6 }
  0x7a   :  { %p4774_p9 = pnand %p4773_p8, %p4767_p5 }
  0x7c   :  { %4777 = shalt.err (!%p4774_p9)
}
  0x7d   :  { %161 = dma.hbm_to_vmem [thread:$0]  %s5632_s25, 16, %s159_s11, [#allocation12]  }
  0x7e   :  { %s4778_s17 = scalar_lea.hbm %s5642_s3, 1024 }
  0x7f   :  { %p4779_p10 = scmp.ne.s32.totalorder %s5642_s3, %s4778_s17  ;;  %p4782_p11 = scmp.lt.u32.totalorder %s4778_s17, %s5642_s3 }
  0x81   :  { %p4784_p12 = pnand %p4782_p11, %p4779_p10 }
  0x83   :  { %4787 = shalt.err (!%p4784_p12)
}
  0x84   :  { %s4788_s18 = scalar_lea.vmem %s5800_s15, 1024  ;;  %p4793_p0 = scmp.lt.s32.totalorder %s5800_s15, %s5800_s15 }
  0x85   :  { %p4789_p13 = scmp.ne.s32.totalorder %s5800_s15, %s4788_s18  ;;  %p4794_p1 = scmp.lt.s32.totalorder %s4788_s18, %s4788_s18 }
  0x87   :  { %p4795_p2 = por %p4794_p1, %p4793_p0 }
  0x89   :  { %p4796_p3 = pnand %p4795_p2, %p4789_p13 }
  0x8b   :  { %4799 = shalt.err (!%p4796_p3)
}
  0x8c   :  { %183 = dma.hbm_to_vmem [thread:$0]  %s5642_s3, 1024, %s5800_s15, [#allocation15], %s5558_s7, %s5558_s7, %s5559_s9  }
  0x8d   :  { %s5562_s25 = smov [#allocation17]   ;;  %s5563_s2 = smov [#allocation20]  }
  0x8e   :  { %s200_s1 = sshll.u32 %s5562_s25, 4  ;;  %s219_s10 = sshll.u32 %s5563_s2, 4  ;;  %s201_s1 = int_to_ptr.vmem [resolvable:$true] %s200_s1  ;;  %s5818_s10 = int_to_ptr.vmem [resolvable:$true] %s219_s10 }
  0x8f   :  { %s4800_s11 = scalar_lea.hbm %s5652_s14, 16 }
  0x90   :  { %p4801_p4 = scmp.ne.s32.totalorder %s5652_s14, %s4800_s11  ;;  %p4804_p5 = scmp.lt.u32.totalorder %s4800_s11, %s5652_s14 }
  0x92   :  { %p4806_p6 = pnand %p4804_p5, %p4801_p4 }
  0x94   :  { %4809 = shalt.err (!%p4806_p6)
}
  0x95   :  { %s4810_s0 = scalar_lea.vmem %s201_s1, 16  ;;  %s4814_s16 = scalar_lea.vmem %s201_s1, 32 }
  0x96   :  { %p4811_p7 = scmp.ne.s32.totalorder %s201_s1, %s4810_s0  ;;  %p4815_p8 = scmp.lt.s32.totalorder %s201_s1, %s201_s1 }
  0x97   :  { %p4816_p9 = scmp.lt.s32.totalorder %s4814_s16, %s4810_s0 }
  0x99   :  { %p4817_p10 = por %p4816_p9, %p4815_p8 }
  0x9b   :  { %p4818_p11 = pnand %p4817_p10, %p4811_p7 }
  0x9d   :  { %4821 = shalt.err (!%p4818_p11)
}
  0x9e   :  { %203 = dma.hbm_to_vmem [thread:$0]  %s5652_s14, 16, %s201_s1, [#allocation18]  }
  0x9f   :  { %s4822_s3 = scalar_lea.hbm %s5662_s24, 1024 }
  0xa0   :  { %p4823_p12 = scmp.ne.s32.totalorder %s5662_s24, %s4822_s3  ;;  %p4826_p13 = scmp.lt.u32.totalorder %s4822_s3, %s5662_s24 }
  0xa2   :  { %p4828_p0 = pnand %p4826_p13, %p4823_p12 }
  0xa4   :  { %4831 = shalt.err (!%p4828_p0)
}
  0xa5   :  { %s4832_s15 = scalar_lea.vmem %s5818_s10, 1024  ;;  %p4837_p2 = scmp.lt.s32.totalorder %s5818_s10, %s5818_s10 }
  0xa6   :  { %p4833_p1 = scmp.ne.s32.totalorder %s5818_s10, %s4832_s15  ;;  %p4838_p3 = scmp.lt.s32.totalorder %s4832_s15, %s4832_s15 }
  0xa8   :  { %p4839_p4 = por %p4838_p3, %p4837_p2 }
  0xaa   :  { %p4840_p5 = pnand %p4839_p4, %p4833_p1 }
  0xac   :  { %4843 = shalt.err (!%p4840_p5)
}
  0xad   :  { %225 = dma.hbm_to_vmem [thread:$0]  %s5662_s24, 1024, %s5818_s10, [#allocation21], %s5558_s7, %s5558_s7, %s5559_s9  }
  0xae   :  { %s5564_s14 = smov [#allocation23]   ;;  %s5565_s23 = smov [#allocation26]  }
  0xaf   :  { %s242_s22 = sshll.u32 %s5564_s14, 4  ;;  %s261_s17 = sshll.u32 %s5565_s23, 4  ;;  %s243_s22 = int_to_ptr.vmem [resolvable:$true] %s242_s22  ;;  %s5836_s17 = int_to_ptr.vmem [resolvable:$true] %s261_s17 }
  0xb0   :  { %s4844_s18 = scalar_lea.hbm %s5672_s6, 16 }
  0xb1   :  { %p4845_p6 = scmp.ne.s32.totalorder %s5672_s6, %s4844_s18  ;;  %p4848_p7 = scmp.lt.u32.totalorder %s4844_s18, %s5672_s6 }
  0xb3   :  { %p4850_p8 = pnand %p4848_p7, %p4845_p6 }
  0xb5   :  { %4853 = shalt.err (!%p4850_p8)
}
  0xb6   :  { %s4854_s25 = scalar_lea.vmem %s243_s22, 16  ;;  %s4858_s1 = scalar_lea.vmem %s243_s22, 32 }
  0xb7   :  { %p4855_p9 = scmp.ne.s32.totalorder %s243_s22, %s4854_s25  ;;  %p4859_p10 = scmp.lt.s32.totalorder %s243_s22, %s243_s22 }
  0xb8   :  { %p4860_p11 = scmp.lt.s32.totalorder %s4858_s1, %s4854_s25 }
  0xba   :  { %p4861_p12 = por %p4860_p11, %p4859_p10 }
  0xbc   :  { %p4862_p13 = pnand %p4861_p12, %p4855_p9 }
  0xbe   :  { %4865 = shalt.err (!%p4862_p13)
}
  0xbf   :  { %245 = dma.hbm_to_vmem [thread:$0]  %s5672_s6, 16, %s243_s22, [#allocation24]  }
  0xc0   :  { %s4866_s24 = scalar_lea.hbm %s5682_s20, 512 }
  0xc1   :  { %p4867_p0 = scmp.ne.s32.totalorder %s5682_s20, %s4866_s24  ;;  %p4870_p1 = scmp.lt.u32.totalorder %s4866_s24, %s5682_s20 }
  0xc3   :  { %p4872_p2 = pnand %p4870_p1, %p4867_p0 }
  0xc5   :  { %4875 = shalt.err (!%p4872_p2)
}
  0xc6   :  { %s4876_s2 = scalar_lea.vmem %s5836_s17, 512  ;;  %p4881_p4 = scmp.lt.s32.totalorder %s5836_s17, %s5836_s17 }
  0xc7   :  { %p4877_p3 = scmp.ne.s32.totalorder %s5836_s17, %s4876_s2  ;;  %p4882_p5 = scmp.lt.s32.totalorder %s4876_s2, %s4876_s2 }
  0xc9   :  { %p4883_p6 = por %p4882_p5, %p4881_p4 }
  0xcb   :  { %p4884_p7 = pnand %p4883_p6, %p4877_p3 }
  0xcd   :  { %4887 = shalt.err (!%p4884_p7)
}
  0xce   :  { %267 = dma.hbm_to_vmem [thread:$0]  %s5682_s20, 512, %s5836_s17, [#allocation27], %s5558_s7, %s5558_s7, %s5559_s9  }
  0xcf   :  { %s5566_s6 = smov [#allocation29]   ;;  %s5567_s11 = smov [#allocation32]  }
  0xd0   :  { %s286_s10 = sshll.u32 %s5566_s6, 4  ;;  %s305_s0 = sshll.u32 %s5567_s11, 4  ;;  %s287_s10 = int_to_ptr.vmem [resolvable:$true] %s286_s10  ;;  %s5854_s0 = int_to_ptr.vmem [resolvable:$true] %s305_s0 }
  0xd1   :  { %s4888_s16 = scalar_lea.hbm %s5692_s4, 64 }
  0xd2   :  { %p4889_p8 = scmp.ne.s32.totalorder %s5692_s4, %s4888_s16  ;;  %p4892_p9 = scmp.lt.u32.totalorder %s4888_s16, %s5692_s4 }
  0xd4   :  { %p4894_p10 = pnand %p4892_p9, %p4889_p8 }
  0xd6   :  { %4897 = shalt.err (!%p4894_p10)
}
  0xd7   :  { %s4898_s3 = scalar_lea.vmem %s287_s10, 64  ;;  %p4903_p12 = scmp.lt.s32.totalorder %s287_s10, %s287_s10 }
  0xd8   :  { %p4899_p11 = scmp.ne.s32.totalorder %s287_s10, %s4898_s3  ;;  %p4904_p13 = scmp.lt.s32.totalorder %s4898_s3, %s4898_s3 }
  0xda   :  { %p4905_p0 = por %p4904_p13, %p4903_p12 }
  0xdc   :  { %p4906_p1 = pnand %p4905_p0, %p4899_p11 }
  0xde   :  { %4909 = shalt.err (!%p4906_p1)
}
  0xdf   :  { %289 = dma.hbm_to_vmem [thread:$0]  %s5692_s4, 64, %s287_s10, [#allocation30]  }
  0xe0   :  { %s4910_s20 = scalar_lea.hbm %s5702_s30, 256 }
  0xe1   :  { %p4911_p2 = scmp.ne.s32.totalorder %s5702_s30, %s4910_s20  ;;  %p4914_p3 = scmp.lt.u32.totalorder %s4910_s20, %s5702_s30 }
  0xe3   :  { %p4916_p4 = pnand %p4914_p3, %p4911_p2 }
  0xe5   :  { %4919 = shalt.err (!%p4916_p4)
}
  0xe6   :  { %s4920_s15 = scalar_lea.vmem %s5854_s0, 256  ;;  %p4925_p6 = scmp.lt.s32.totalorder %s5854_s0, %s5854_s0 }
  0xe7   :  { %p4921_p5 = scmp.ne.s32.totalorder %s5854_s0, %s4920_s15  ;;  %p4926_p7 = scmp.lt.s32.totalorder %s4920_s15, %s4920_s15 }
  0xe9   :  { %p4927_p8 = por %p4926_p7, %p4925_p6 }
  0xeb   :  { %p4928_p9 = pnand %p4927_p8, %p4921_p5 }
  0xed   :  { %4931 = shalt.err (!%p4928_p9)
}
  0xee   :  { %311 = dma.hbm_to_vmem [thread:$0]  %s5702_s30, 256, %s5854_s0, [#allocation33], %s5558_s7, %s5558_s7, %s5559_s9  }
  0xef   :  { %s5568_s4 = smov [#allocation35]   ;;  %s5569_s22 = smov [#allocation38]  }
  0xf0   :  { %s328_s14 = sshll.u32 %s5568_s4, 4  ;;  %s347_s23 = sshll.u32 %s5569_s22, 4  ;;  %s329_s14 = int_to_ptr.vmem [resolvable:$true] %s328_s14  ;;  %s5872_s23 = int_to_ptr.vmem [resolvable:$true] %s347_s23 }
  0xf1   :  { %s4932_s17 = scalar_lea.hbm %s5712_s19, 16 }
  0xf2   :  { %p4933_p10 = scmp.ne.s32.totalorder %s5712_s19, %s4932_s17  ;;  %p4936_p11 = scmp.lt.u32.totalorder %s4932_s17, %s5712_s19 }
  0xf4   :  { %p4938_p12 = pnand %p4936_p11, %p4933_p10 }
  0xf6   :  { %4941 = shalt.err (!%p4938_p12)
}
  0xf7   :  { %s4942_s18 = scalar_lea.vmem %s329_s14, 16  ;;  %s4946_s25 = scalar_lea.vmem %s329_s14, 32 }
  0xf8   :  { %p4943_p13 = scmp.ne.s32.totalorder %s329_s14, %s4942_s18  ;;  %p4947_p0 = scmp.lt.s32.totalorder %s329_s14, %s329_s14 }
  0xf9   :  { %p4948_p1 = scmp.lt.s32.totalorder %s4946_s25, %s4942_s18 }
  0xfb   :  { %p4949_p2 = por %p4948_p1, %p4947_p0 }
  0xfd   :  { %p4950_p3 = pnand %p4949_p2, %p4943_p13 }
  0xff   :  { %4953 = shalt.err (!%p4950_p3)
}
 0x100   :  { %331 = dma.hbm_to_vmem [thread:$0]  %s5712_s19, 16, %s329_s14, [#allocation36]  }
 0x101   :  { %s4954_s30 = scalar_lea.hbm %s5722_s8, 1024 }
 0x102   :  { %p4955_p4 = scmp.ne.s32.totalorder %s5722_s8, %s4954_s30  ;;  %p4958_p5 = scmp.lt.u32.totalorder %s4954_s30, %s5722_s8 }
 0x104   :  { %p4960_p6 = pnand %p4958_p5, %p4955_p4 }
 0x106   :  { %4963 = shalt.err (!%p4960_p6)
}
 0x107   :  { %s4964_s1 = scalar_lea.vmem %s5872_s23, 1024  ;;  %p4969_p8 = scmp.lt.s32.totalorder %s5872_s23, %s5872_s23 }
 0x108   :  { %p4965_p7 = scmp.ne.s32.totalorder %s5872_s23, %s4964_s1  ;;  %p4970_p9 = scmp.lt.s32.totalorder %s4964_s1, %s4964_s1 }
 0x10a   :  { %p4971_p10 = por %p4970_p9, %p4969_p8 }
 0x10c   :  { %p4972_p11 = pnand %p4971_p10, %p4965_p7 }
 0x10e   :  { %4975 = shalt.err (!%p4972_p11)
}
 0x10f   :  { %353 = dma.hbm_to_vmem [thread:$0]  %s5722_s8, 1024, %s5872_s23, [#allocation39], %s5558_s7, %s5558_s7, %s5559_s9  }
 0x110   :  { %s5570_s19 = smov [#allocation41]   ;;  %s5571_s2 = smov [#allocation44]  }
 0x111   :  { %s370_s24 = sshll.u32 %s5570_s19, 4  ;;  %s389_s6 = sshll.u32 %s5571_s2, 4  ;;  %s371_s24 = int_to_ptr.vmem [resolvable:$true] %s370_s24  ;;  %s5890_s6 = int_to_ptr.vmem [resolvable:$true] %s389_s6 }
 0x112   :  { %s4976_s10 = scalar_lea.hbm %s5732_s29, 16 }
 0x113   :  { %p4977_p12 = scmp.ne.s32.totalorder %s5732_s29, %s4976_s10  ;;  %p4980_p13 = scmp.lt.u32.totalorder %s4976_s10, %s5732_s29 }
 0x115   :  { %p4982_p0 = pnand %p4980_p13, %p4977_p12 }
 0x117   :  { %4985 = shalt.err (!%p4982_p0)
}
 0x118   :  { %s4986_s11 = scalar_lea.vmem %s371_s24, 16  ;;  %s4990_s0 = scalar_lea.vmem %s371_s24, 32 }
 0x119   :  { %p4987_p1 = scmp.ne.s32.totalorder %s371_s24, %s4986_s11  ;;  %p4991_p2 = scmp.lt.s32.totalorder %s371_s24, %s371_s24 }
 0x11a   :  { %p4992_p3 = scmp.lt.s32.totalorder %s4990_s0, %s4986_s11 }
 0x11c   :  { %p4993_p4 = por %p4992_p3, %p4991_p2 }
 0x11e   :  { %p4994_p5 = pnand %p4993_p4, %p4987_p1 }
 0x120   :  { %4997 = shalt.err (!%p4994_p5)
}
 0x121   :  { %373 = dma.hbm_to_vmem [thread:$0]  %s5732_s29, 16, %s371_s24, [#allocation42]  }
 0x122   :  { %s4998_s8 = scalar_lea.hbm %s5742_s21, 1024 }
 0x123   :  { %p4999_p6 = scmp.ne.s32.totalorder %s5742_s21, %s4998_s8  ;;  %p5002_p7 = scmp.lt.u32.totalorder %s4998_s8, %s5742_s21 }
 0x125   :  { %p5004_p8 = pnand %p5002_p7, %p4999_p6 }
 0x127   :  { %5007 = shalt.err (!%p5004_p8)
}
 0x128   :  { %s5008_s16 = scalar_lea.vmem %s5890_s6, 1024  ;;  %p5013_p10 = scmp.lt.s32.totalorder %s5890_s6, %s5890_s6 }
 0x129   :  { %p5009_p9 = scmp.ne.s32.totalorder %s5890_s6, %s5008_s16  ;;  %p5014_p11 = scmp.lt.s32.totalorder %s5008_s16, %s5008_s16 }
 0x12b   :  { %p5015_p12 = por %p5014_p11, %p5013_p10 }
 0x12d   :  { %p5016_p13 = pnand %p5015_p12, %p5009_p9 }
 0x12f   :  { %5019 = shalt.err (!%p5016_p13)
}
 0x130   :  { %s7149_s29 = sld [smem:[#allocation90_spill]]  ;;  %s5572_s3 = smov [#allocation47]  }
 0x131   :  { %395 = dma.hbm_to_vmem [thread:$0]  %s5742_s21, 1024, %s5890_s6, [#allocation45], %s5558_s7, %s5558_s7, %s5559_s9  }
 0x132   :  { %s412_s20 = sshll.u32 %s5572_s3, 4  ;;  %s5573_s15 = smov [#allocation2]   ;;  %s413_s20 = int_to_ptr.vmem [resolvable:$true] %s412_s20 }
 0x133   :  { %s99_s4 = sshll.u32 %s5573_s15, 4  ;;  %s5908_s4 = int_to_ptr.vmem [resolvable:$true] %s99_s4 }
 0x136   :  { %s5020_s14 = scalar_lea.hbm %s7149_s29, 16 }
 0x137   :  { %p5021_p0 = scmp.ne.s32.totalorder %s7149_s29, %s5020_s14  ;;  %p5024_p1 = scmp.lt.u32.totalorder %s5020_s14, %s7149_s29 }
 0x139   :  { %p5026_p2 = pnand %p5024_p1, %p5021_p0 }
 0x13b   :  { %5029 = shalt.err (!%p5026_p2)
}
 0x13c   :  { %s5030_s22 = scalar_lea.vmem %s413_s20, 16  ;;  %s5034_s23 = scalar_lea.vmem %s413_s20, 32 }
 0x13d   :  { %p5031_p3 = scmp.ne.s32.totalorder %s413_s20, %s5030_s22  ;;  %p5035_p4 = scmp.lt.s32.totalorder %s413_s20, %s413_s20 }
 0x13e   :  { %p5036_p5 = scmp.lt.s32.totalorder %s5034_s23, %s5030_s22 }
 0x140   :  { %p5037_p6 = por %p5036_p5, %p5035_p4 }
 0x142   :  { %p5038_p7 = pnand %p5037_p6, %p5031_p3 }
 0x144   :  { %5041 = shalt.err (!%p5038_p7)
}
 0x145   :  { %s7150_s21 = sld [smem:[#allocation75_spill]] }
 0x146   :  { %415 = dma.hbm_to_vmem [thread:$0]  %s7149_s29, 16, %s413_s20, [#allocation48]  }
 0x14b   :  { %s5042_s17 = scalar_lea.hbm %s7150_s21, 1024 }
 0x14c   :  { %p5043_p8 = scmp.ne.s32.totalorder %s7150_s21, %s5042_s17  ;;  %p5046_p9 = scmp.lt.u32.totalorder %s5042_s17, %s7150_s21 }
 0x14e   :  { %p5048_p10 = pnand %p5046_p9, %p5043_p8 }
 0x150   :  { %5051 = shalt.err (!%p5048_p10)
}
 0x151   :  { %s5052_s18 = scalar_lea.vmem %s5908_s4, 1024  ;;  %p5057_p12 = scmp.lt.s32.totalorder %s5908_s4, %s5908_s4 }
 0x152   :  { %p5053_p11 = scmp.ne.s32.totalorder %s5908_s4, %s5052_s18  ;;  %p5058_p13 = scmp.lt.s32.totalorder %s5052_s18, %s5052_s18 }
 0x154   :  { %p5059_p0 = por %p5058_p13, %p5057_p12 }
 0x156   :  { %p5060_p1 = pnand %p5059_p0, %p5053_p11 }
 0x158   :  { %5063 = shalt.err (!%p5060_p1)
}
 0x159   :  { %s7151_s25 = sld [smem:[#allocation76_spill]]  ;;  %s5574_s30 = smov [#allocation7]  }
 0x15a   :  { %105 = dma.hbm_to_vmem [thread:$0]  %s7150_s21, 1024, %s5908_s4, [#allocation3], %s5556_s26, %s5556_s26, %s5557_s28  }
 0x15b   :  { %s123_s1 = sshll.u32 %s5574_s30, 4  ;;  %s5575_s19 = smov [#allocation10]   ;;  %s124_s1 = int_to_ptr.vmem [resolvable:$true] %s123_s1 }
 0x15c   :  { %s148_s24 = sshll.u32 %s5575_s19, 4  ;;  %s149_s24 = int_to_ptr.vmem [resolvable:$true] %s148_s24 }
 0x15f   :  { %s5064_s2 = scalar_lea.hbm %s7151_s25, 1024 }
 0x160   :  { %p5065_p2 = scmp.ne.s32.totalorder %s7151_s25, %s5064_s2  ;;  %p5068_p3 = scmp.lt.u32.totalorder %s5064_s2, %s7151_s25 }
 0x162   :  { %p5070_p4 = pnand %p5068_p3, %p5065_p2 }
 0x164   :  { %5073 = shalt.err (!%p5070_p4)
}
 0x165   :  { %s5074_s6 = scalar_lea.vmem %s124_s1, 1024  ;;  %p5079_p6 = scmp.lt.s32.totalorder %s124_s1, %s124_s1 }
 0x166   :  { %p5075_p5 = scmp.ne.s32.totalorder %s124_s1, %s5074_s6  ;;  %p5080_p7 = scmp.lt.s32.totalorder %s5074_s6, %s5074_s6 }
 0x168   :  { %p5081_p8 = por %p5080_p7, %p5079_p6 }
 0x16a   :  { %p5082_p9 = pnand %p5081_p8, %p5075_p5 }
 0x16c   :  { %5085 = shalt.err (!%p5082_p9)
}
 0x16d   :  { %s7152_s10 = sld [smem:[#allocation77_spill]] }
 0x16e   :  { %129 = dma.hbm_to_vmem [thread:$0]  %s7151_s25, 1024, %s124_s1, [#allocation6], %s5556_s26, %s5556_s26, %s5557_s28  }
 0x173   :  { %s5086_s11 = scalar_lea.hbm %s7152_s10, 16 }
 0x174   :  { %p5087_p10 = scmp.ne.s32.totalorder %s7152_s10, %s5086_s11  ;;  %p5090_p11 = scmp.lt.u32.totalorder %s5086_s11, %s7152_s10 }
 0x176   :  { %p5092_p12 = pnand %p5090_p11, %p5087_p10 }
 0x178   :  { %5095 = shalt.err (!%p5092_p12)
}
 0x179   :  { %s5096_s0 = scalar_lea.vmem %s149_s24, 16  ;;  %s5100_s8 = scalar_lea.vmem %s149_s24, 32 }
 0x17a   :  { %p5097_p13 = scmp.ne.s32.totalorder %s149_s24, %s5096_s0  ;;  %p5101_p0 = scmp.lt.s32.totalorder %s149_s24, %s149_s24 }
 0x17b   :  { %p5102_p1 = scmp.lt.s32.totalorder %s5100_s8, %s5096_s0 }
 0x17d   :  { %p5103_p2 = por %p5102_p1, %p5101_p0 }
 0x17f   :  { %p5104_p3 = pnand %p5103_p2, %p5097_p13 }
 0x181   :  { %5107 = shalt.err (!%p5104_p3)
}
 0x182   :  { %s7153_s16 = sld [smem:[#allocation78_spill]]  ;;  %s5576_s29 = smov [#allocation13]  }
 0x183   :  { %151 = dma.hbm_to_vmem [thread:$0]  %s7152_s10, 16, %s149_s24, [#allocation9]  }
 0x184   :  { %s168_s3 = sshll.u32 %s5576_s29, 4  ;;  %s5577_s20 = smov [#allocation16]   ;;  %s169_s3 = int_to_ptr.vmem [resolvable:$true] %s168_s3 }
 0x185   :  { %s190_s15 = sshll.u32 %s5577_s20, 4  ;;  %s191_s15 = int_to_ptr.vmem [resolvable:$true] %s190_s15 }
 0x188   :  { %s5108_s4 = scalar_lea.hbm %s7153_s16, 16 }
 0x189   :  { %p5109_p4 = scmp.ne.s32.totalorder %s7153_s16, %s5108_s4  ;;  %p5112_p5 = scmp.lt.u32.totalorder %s5108_s4, %s7153_s16 }
 0x18b   :  { %p5114_p6 = pnand %p5112_p5, %p5109_p4 }
 0x18d   :  { %5117 = shalt.err (!%p5114_p6)
}
 0x18e   :  { %s5118_s14 = scalar_lea.vmem %s169_s3, 16  ;;  %s5122_s22 = scalar_lea.vmem %s169_s3, 32 }
 0x18f   :  { %p5119_p7 = scmp.ne.s32.totalorder %s169_s3, %s5118_s14  ;;  %p5123_p8 = scmp.lt.s32.totalorder %s169_s3, %s169_s3 }
 0x190   :  { %p5124_p9 = scmp.lt.s32.totalorder %s5122_s22, %s5118_s14 }
 0x192   :  { %p5125_p10 = por %p5124_p9, %p5123_p8 }
 0x194   :  { %p5126_p11 = pnand %p5125_p10, %p5119_p7 }
 0x196   :  { %5129 = shalt.err (!%p5126_p11)
}
 0x197   :  { %s7154_s23 = sld [smem:[#allocation79_spill]] }
 0x198   :  { %171 = dma.hbm_to_vmem [thread:$0]  %s7153_s16, 16, %s169_s3, [#allocation12]  }
 0x19d   :  { %s5130_s21 = scalar_lea.hbm %s7154_s23, 16 }
 0x19e   :  { %p5131_p12 = scmp.ne.s32.totalorder %s7154_s23, %s5130_s21  ;;  %p5134_p13 = scmp.lt.u32.totalorder %s5130_s21, %s7154_s23 }
 0x1a0   :  { %p5136_p0 = pnand %p5134_p13, %p5131_p12 }
 0x1a2   :  { %5139 = shalt.err (!%p5136_p0)
}
 0x1a3   :  { %s5140_s17 = scalar_lea.vmem %s191_s15, 16  ;;  %s5144_s18 = scalar_lea.vmem %s191_s15, 32 }
 0x1a4   :  { %p5141_p1 = scmp.ne.s32.totalorder %s191_s15, %s5140_s17  ;;  %p5145_p2 = scmp.lt.s32.totalorder %s191_s15, %s191_s15 }
 0x1a5   :  { %p5146_p3 = scmp.lt.s32.totalorder %s5144_s18, %s5140_s17 }
 0x1a7   :  { %p5147_p4 = por %p5146_p3, %p5145_p2 }
 0x1a9   :  { %p5148_p5 = pnand %p5147_p4, %p5141_p1 }
 0x1ab   :  { %5151 = shalt.err (!%p5148_p5)
}
 0x1ac   :  { %s7155_s25 = sld [smem:[#allocation80_spill]]  ;;  %s5578_s30 = smov [#allocation19]  }
 0x1ad   :  { %193 = dma.hbm_to_vmem [thread:$0]  %s7154_s23, 16, %s191_s15, [#allocation15]  }
 0x1ae   :  { %s210_s1 = sshll.u32 %s5578_s30, 4  ;;  %s5579_s19 = smov [#allocation22]   ;;  %s211_s1 = int_to_ptr.vmem [resolvable:$true] %s210_s1 }
 0x1af   :  { %s232_s24 = sshll.u32 %s5579_s19, 4  ;;  %s233_s24 = int_to_ptr.vmem [resolvable:$true] %s232_s24 }
 0x1b2   :  { %s5152_s2 = scalar_lea.hbm %s7155_s25, 16 }
 0x1b3   :  { %p5153_p6 = scmp.ne.s32.totalorder %s7155_s25, %s5152_s2  ;;  %p5156_p7 = scmp.lt.u32.totalorder %s5152_s2, %s7155_s25 }
 0x1b5   :  { %p5158_p8 = pnand %p5156_p7, %p5153_p6 }
 0x1b7   :  { %5161 = shalt.err (!%p5158_p8)
}
 0x1b8   :  { %s5162_s6 = scalar_lea.vmem %s211_s1, 16  ;;  %s5166_s10 = scalar_lea.vmem %s211_s1, 32 }
 0x1b9   :  { %p5163_p9 = scmp.ne.s32.totalorder %s211_s1, %s5162_s6  ;;  %p5167_p10 = scmp.lt.s32.totalorder %s211_s1, %s211_s1 }
 0x1ba   :  { %p5168_p11 = scmp.lt.s32.totalorder %s5166_s10, %s5162_s6 }
 0x1bc   :  { %p5169_p12 = por %p5168_p11, %p5167_p10 }
 0x1be   :  { %p5170_p13 = pnand %p5169_p12, %p5163_p9 }
 0x1c0   :  { %5173 = shalt.err (!%p5170_p13)
}
 0x1c1   :  { %s7156_s11 = sld [smem:[#allocation81_spill]] }
 0x1c2   :  { %213 = dma.hbm_to_vmem [thread:$0]  %s7155_s25, 16, %s211_s1, [#allocation18]  }
 0x1c7   :  { %s5174_s0 = scalar_lea.hbm %s7156_s11, 16 }
 0x1c8   :  { %p5175_p0 = scmp.ne.s32.totalorder %s7156_s11, %s5174_s0  ;;  %p5178_p1 = scmp.lt.u32.totalorder %s5174_s0, %s7156_s11 }
 0x1ca   :  { %p5180_p2 = pnand %p5178_p1, %p5175_p0 }
 0x1cc   :  { %5183 = shalt.err (!%p5180_p2)
}
 0x1cd   :  { %s5184_s8 = scalar_lea.vmem %s233_s24, 16  ;;  %s5188_s16 = scalar_lea.vmem %s233_s24, 32 }
 0x1ce   :  { %p5185_p3 = scmp.ne.s32.totalorder %s233_s24, %s5184_s8  ;;  %p5189_p4 = scmp.lt.s32.totalorder %s233_s24, %s233_s24 }
 0x1cf   :  { %p5190_p5 = scmp.lt.s32.totalorder %s5188_s16, %s5184_s8 }
 0x1d1   :  { %p5191_p6 = por %p5190_p5, %p5189_p4 }
 0x1d3   :  { %p5192_p7 = pnand %p5191_p6, %p5185_p3 }
 0x1d5   :  { %5195 = shalt.err (!%p5192_p7)
}
 0x1d6   :  { %s7157_s29 = sld [smem:[#allocation82_spill]]  ;;  %s5580_s3 = smov [#allocation25]  }
 0x1d7   :  { %235 = dma.hbm_to_vmem [thread:$0]  %s7156_s11, 16, %s233_s24, [#allocation21]  }
 0x1d8   :  { %s252_s20 = sshll.u32 %s5580_s3, 4  ;;  %s5581_s15 = smov [#allocation28]   ;;  %s253_s20 = int_to_ptr.vmem [resolvable:$true] %s252_s20 }
 0x1d9   :  { %s273_s4 = sshll.u32 %s5581_s15, 4  ;;  %s5953_s4 = int_to_ptr.vmem [resolvable:$true] %s273_s4 }
 0x1dc   :  { %s5196_s14 = scalar_lea.hbm %s7157_s29, 16 }
 0x1dd   :  { %p5197_p8 = scmp.ne.s32.totalorder %s7157_s29, %s5196_s14  ;;  %p5200_p9 = scmp.lt.u32.totalorder %s5196_s14, %s7157_s29 }
 0x1df   :  { %p5202_p10 = pnand %p5200_p9, %p5197_p8 }
 0x1e1   :  { %5205 = shalt.err (!%p5202_p10)
}
 0x1e2   :  { %s5206_s22 = scalar_lea.vmem %s253_s20, 16  ;;  %s5210_s23 = scalar_lea.vmem %s253_s20, 32 }
 0x1e3   :  { %p5207_p11 = scmp.ne.s32.totalorder %s253_s20, %s5206_s22  ;;  %p5211_p12 = scmp.lt.s32.totalorder %s253_s20, %s253_s20 }
 0x1e4   :  { %p5212_p13 = scmp.lt.s32.totalorder %s5210_s23, %s5206_s22 }
 0x1e6   :  { %p5213_p0 = por %p5212_p13, %p5211_p12 }
 0x1e8   :  { %p5214_p1 = pnand %p5213_p0, %p5207_p11 }
 0x1ea   :  { %5217 = shalt.err (!%p5214_p1)
}
 0x1eb   :  { %s7158_s21 = sld [smem:[#allocation83_spill]] }
 0x1ec   :  { %255 = dma.hbm_to_vmem [thread:$0]  %s7157_s29, 16, %s253_s20, [#allocation24]  }
 0x1f1   :  { %s5218_s17 = scalar_lea.hbm %s7158_s21, 512 }
 0x1f2   :  { %p5219_p2 = scmp.ne.s32.totalorder %s7158_s21, %s5218_s17  ;;  %p5222_p3 = scmp.lt.u32.totalorder %s5218_s17, %s7158_s21 }
 0x1f4   :  { %p5224_p4 = pnand %p5222_p3, %p5219_p2 }
 0x1f6   :  { %5227 = shalt.err (!%p5224_p4)
}
 0x1f7   :  { %s5228_s18 = scalar_lea.vmem %s5953_s4, 512  ;;  %p5233_p6 = scmp.lt.s32.totalorder %s5953_s4, %s5953_s4 }
 0x1f8   :  { %p5229_p5 = scmp.ne.s32.totalorder %s5953_s4, %s5228_s18  ;;  %p5234_p7 = scmp.lt.s32.totalorder %s5228_s18, %s5228_s18 }
 0x1fa   :  { %p5235_p8 = por %p5234_p7, %p5233_p6 }
 0x1fc   :  { %p5236_p9 = pnand %p5235_p8, %p5229_p5 }
 0x1fe   :  { %5239 = shalt.err (!%p5236_p9)
}
 0x1ff   :  { %s7159_s25 = sld [smem:[#allocation84_spill]]  ;;  %s5582_s30 = smov [#allocation31]  }
 0x200   :  { %279 = dma.hbm_to_vmem [thread:$0]  %s7158_s21, 512, %s5953_s4, [#allocation27], %s5558_s7, %s5558_s7, %s5559_s9  }
 0x201   :  { %s296_s1 = sshll.u32 %s5582_s30, 4  ;;  %s5583_s19 = smov [#allocation34]   ;;  %s297_s1 = int_to_ptr.vmem [resolvable:$true] %s296_s1 }
 0x202   :  { %s318_s24 = sshll.u32 %s5583_s19, 4  ;;  %s319_s24 = int_to_ptr.vmem [resolvable:$true] %s318_s24 }
 0x205   :  { %s5240_s2 = scalar_lea.hbm %s7159_s25, 16 }
 0x206   :  { %p5241_p10 = scmp.ne.s32.totalorder %s7159_s25, %s5240_s2  ;;  %p5244_p11 = scmp.lt.u32.totalorder %s5240_s2, %s7159_s25 }
 0x208   :  { %p5246_p12 = pnand %p5244_p11, %p5241_p10 }
 0x20a   :  { %5249 = shalt.err (!%p5246_p12)
}
 0x20b   :  { %s5250_s6 = scalar_lea.vmem %s297_s1, 16  ;;  %s5254_s10 = scalar_lea.vmem %s297_s1, 32 }
 0x20c   :  { %p5251_p13 = scmp.ne.s32.totalorder %s297_s1, %s5250_s6  ;;  %p5255_p0 = scmp.lt.s32.totalorder %s297_s1, %s297_s1 }
 0x20d   :  { %p5256_p1 = scmp.lt.s32.totalorder %s5254_s10, %s5250_s6 }
 0x20f   :  { %p5257_p2 = por %p5256_p1, %p5255_p0 }
 0x211   :  { %p5258_p3 = pnand %p5257_p2, %p5251_p13 }
 0x213   :  { %5261 = shalt.err (!%p5258_p3)
}
 0x214   :  { %s7160_s9 = sld [smem:[#allocation85_spill]] }
 0x215   :  { %299 = dma.hbm_to_vmem [thread:$0]  %s7159_s25, 16, %s297_s1, [#allocation30]  }
 0x21a   :  { %s5262_s11 = scalar_lea.hbm %s7160_s9, 16 }
 0x21b   :  { %p5263_p4 = scmp.ne.s32.totalorder %s7160_s9, %s5262_s11  ;;  %p5266_p5 = scmp.lt.u32.totalorder %s5262_s11, %s7160_s9 }
 0x21d   :  { %p5268_p6 = pnand %p5266_p5, %p5263_p4 }
 0x21f   :  { %5271 = shalt.err (!%p5268_p6)
}
 0x220   :  { %s5272_s0 = scalar_lea.vmem %s319_s24, 16  ;;  %s5276_s8 = scalar_lea.vmem %s319_s24, 32 }
 0x221   :  { %p5273_p7 = scmp.ne.s32.totalorder %s319_s24, %s5272_s0  ;;  %p5277_p8 = scmp.lt.s32.totalorder %s319_s24, %s319_s24 }
 0x222   :  { %p5278_p9 = scmp.lt.s32.totalorder %s5276_s8, %s5272_s0 }
 0x224   :  { %p5279_p10 = por %p5278_p9, %p5277_p8 }
 0x226   :  { %p5280_p11 = pnand %p5279_p10, %p5273_p7 }
 0x228   :  { %5283 = shalt.err (!%p5280_p11)
}
 0x229   :  { %s7161_s16 = sld [smem:[#allocation86_spill]]  ;;  %s5584_s29 = smov [#allocation37]  }
 0x22a   :  { %321 = dma.hbm_to_vmem [thread:$0]  %s7160_s9, 16, %s319_s24, [#allocation33]  }
 0x22b   :  { %s338_s3 = sshll.u32 %s5584_s29, 4  ;;  %s5585_s20 = smov [#allocation40]   ;;  %s339_s3 = int_to_ptr.vmem [resolvable:$true] %s338_s3 }
 0x22c   :  { %s360_s15 = sshll.u32 %s5585_s20, 4  ;;  %s361_s15 = int_to_ptr.vmem [resolvable:$true] %s360_s15 }
 0x22f   :  { %s5284_s4 = scalar_lea.hbm %s7161_s16, 16 }
 0x230   :  { %p5285_p12 = scmp.ne.s32.totalorder %s7161_s16, %s5284_s4  ;;  %p5288_p13 = scmp.lt.u32.totalorder %s5284_s4, %s7161_s16 }
 0x232   :  { %p5290_p0 = pnand %p5288_p13, %p5285_p12 }
 0x234   :  { %5293 = shalt.err (!%p5290_p0)
}
 0x235   :  { %s5294_s14 = scalar_lea.vmem %s339_s3, 16  ;;  %s5298_s22 = scalar_lea.vmem %s339_s3, 32 }
 0x236   :  { %p5295_p1 = scmp.ne.s32.totalorder %s339_s3, %s5294_s14  ;;  %p5299_p2 = scmp.lt.s32.totalorder %s339_s3, %s339_s3 }
 0x237   :  { %p5300_p3 = scmp.lt.s32.totalorder %s5298_s22, %s5294_s14 }
 0x239   :  { %p5301_p4 = por %p5300_p3, %p5299_p2 }
 0x23b   :  { %p5302_p5 = pnand %p5301_p4, %p5295_p1 }
 0x23d   :  { %5305 = shalt.err (!%p5302_p5)
}
 0x23e   :  { %s7162_s23 = sld [smem:[#allocation87_spill]] }
 0x23f   :  { %341 = dma.hbm_to_vmem [thread:$0]  %s7161_s16, 16, %s339_s3, [#allocation36]  }
 0x244   :  { %s5306_s21 = scalar_lea.hbm %s7162_s23, 16 }
 0x245   :  { %p5307_p6 = scmp.ne.s32.totalorder %s7162_s23, %s5306_s21  ;;  %p5310_p7 = scmp.lt.u32.totalorder %s5306_s21, %s7162_s23 }
 0x247   :  { %p5312_p8 = pnand %p5310_p7, %p5307_p6 }
 0x249   :  { %5315 = shalt.err (!%p5312_p8)
}
 0x24a   :  { %s5316_s17 = scalar_lea.vmem %s361_s15, 16  ;;  %s5320_s18 = scalar_lea.vmem %s361_s15, 32 }
 0x24b   :  { %p5317_p9 = scmp.ne.s32.totalorder %s361_s15, %s5316_s17  ;;  %p5321_p10 = scmp.lt.s32.totalorder %s361_s15, %s361_s15 }
 0x24c   :  { %p5322_p11 = scmp.lt.s32.totalorder %s5320_s18, %s5316_s17 }
 0x24e   :  { %p5323_p12 = por %p5322_p11, %p5321_p10 }
 0x250   :  { %p5324_p13 = pnand %p5323_p12, %p5317_p9 }
 0x252   :  { %5327 = shalt.err (!%p5324_p13)
}
 0x253   :  { %s7163_s25 = sld [smem:[#allocation88_spill]]  ;;  %s5586_s30 = smov [#allocation43]  }
 0x254   :  { %363 = dma.hbm_to_vmem [thread:$0]  %s7162_s23, 16, %s361_s15, [#allocation39]  }
 0x255   :  { %s380_s1 = sshll.u32 %s5586_s30, 4  ;;  %s5587_s19 = smov [#allocation46]   ;;  %s381_s1 = int_to_ptr.vmem [resolvable:$true] %s380_s1 }
 0x256   :  { %s402_s24 = sshll.u32 %s5587_s19, 4  ;;  %s403_s24 = int_to_ptr.vmem [resolvable:$true] %s402_s24 }
 0x259   :  { %s5328_s2 = scalar_lea.hbm %s7163_s25, 16 }
 0x25a   :  { %p5329_p0 = scmp.ne.s32.totalorder %s7163_s25, %s5328_s2  ;;  %p5332_p1 = scmp.lt.u32.totalorder %s5328_s2, %s7163_s25 }
 0x25c   :  { %p5334_p2 = pnand %p5332_p1, %p5329_p0 }
 0x25e   :  { %5337 = shalt.err (!%p5334_p2)
}
 0x25f   :  { %s5338_s6 = scalar_lea.vmem %s381_s1, 16  ;;  %s5342_s10 = scalar_lea.vmem %s381_s1, 32 }
 0x260   :  { %p5339_p3 = scmp.ne.s32.totalorder %s381_s1, %s5338_s6  ;;  %p5343_p4 = scmp.lt.s32.totalorder %s381_s1, %s381_s1 }
 0x261   :  { %p5344_p5 = scmp.lt.s32.totalorder %s5342_s10, %s5338_s6 }
 0x263   :  { %p5345_p6 = por %p5344_p5, %p5343_p4 }
 0x265   :  { %p5346_p7 = pnand %p5345_p6, %p5339_p3 }
 0x267   :  { %5349 = shalt.err (!%p5346_p7)
}
 0x268   :  { %s7164_s9 = sld [smem:[#allocation89_spill]] }
 0x269   :  { %383 = dma.hbm_to_vmem [thread:$0]  %s7163_s25, 16, %s381_s1, [#allocation42]  }
 0x26e   :  { %s5350_s11 = scalar_lea.hbm %s7164_s9, 16 }
 0x26f   :  { %p5351_p8 = scmp.ne.s32.totalorder %s7164_s9, %s5350_s11  ;;  %p5354_p9 = scmp.lt.u32.totalorder %s5350_s11, %s7164_s9 }
 0x271   :  { %p5356_p10 = pnand %p5354_p9, %p5351_p8 }
 0x273   :  { %5359 = shalt.err (!%p5356_p10)
}
 0x274   :  { %s5360_s0 = scalar_lea.vmem %s403_s24, 16  ;;  %s5364_s8 = scalar_lea.vmem %s403_s24, 32 }
 0x275   :  { %p5361_p11 = scmp.ne.s32.totalorder %s403_s24, %s5360_s0  ;;  %p5365_p12 = scmp.lt.s32.totalorder %s403_s24, %s403_s24 }
 0x276   :  { %p5366_p13 = scmp.lt.s32.totalorder %s5364_s8, %s5360_s0 }
 0x278   :  { %p5367_p0 = por %p5366_p13, %p5365_p12 }
 0x27a   :  { %p5368_p1 = pnand %p5367_p0, %p5361_p11 }
 0x27c   :  { %5371 = shalt.err (!%p5368_p1)
}
 0x27d   :  { %s7165_s16 = sld [smem:[#allocation91_spill]]  ;;  %s5588_s29 = smov [#allocation49]  }
 0x27e   :  { %405 = dma.hbm_to_vmem [thread:$0]  %s7164_s9, 16, %s403_s24, [#allocation45]  }
 0x27f   :  { %s422_s3 = sshll.u32 %s5588_s29, 4  ;;  %s423_s3 = int_to_ptr.vmem [resolvable:$true] %s422_s3 }
 0x283   :  { %s5372_s20 = scalar_lea.hbm %s7165_s16, 16 }
 0x284   :  { %p5373_p2 = scmp.ne.s32.totalorder %s7165_s16, %s5372_s20  ;;  %p5376_p3 = scmp.lt.u32.totalorder %s5372_s20, %s7165_s16 }
 0x286   :  { %p5378_p4 = pnand %p5376_p3, %p5373_p2 }
 0x288   :  { %5381 = shalt.err (!%p5378_p4)
}
 0x289   :  { %s5382_s15 = scalar_lea.vmem %s423_s3, 16  ;;  %s5386_s4 = scalar_lea.vmem %s423_s3, 32 }
 0x28a   :  { %p5383_p5 = scmp.ne.s32.totalorder %s423_s3, %s5382_s15  ;;  %p5387_p6 = scmp.lt.s32.totalorder %s423_s3, %s423_s3 }
 0x28b   :  { %p5388_p7 = scmp.lt.s32.totalorder %s5386_s4, %s5382_s15 }
 0x28d   :  { %p5389_p8 = por %p5388_p7, %p5387_p6 }
 0x28f   :  { %p5390_p9 = pnand %p5389_p8, %p5383_p5 }
 0x291   :  { %5393 = shalt.err (!%p5390_p9)
}
 0x292   :  { %425 = dma.hbm_to_vmem [thread:$0]  %s7165_s16, 16, %s423_s3, [#allocation48]  }
 0x293   :  { %5482 = dma.done.wait [#allocation3], 1024  }
 0x294   :  { %5483 = vsyncadd [#allocation3], 4294966272 }
 0x295   :  { %5484 = dma.done.wait [#allocation6], 2048  }
 0x296   :  { %5485 = vsyncadd [#allocation6], 4294965248 }
 0x297   :  { %5486 = dma.done.wait [#allocation9], 272  }
 0x298   :  { %5487 = vsyncadd [#allocation9], 4294967024 }
 0x299   :  { %5488 = dma.done.wait [#allocation12], 32  }
 0x29a   :  { %5489 = vsyncadd [#allocation12], 4294967264 }
 0x29b   :  { %5490 = dma.done.wait [#allocation15], 1040  }
 0x29c   :  { %5491 = vsyncadd [#allocation15], 4294966256 }
 0x29d   :  { %5492 = dma.done.wait [#allocation18], 32  }
 0x29e   :  { %5493 = vsyncadd [#allocation18], 4294967264 }
 0x29f   :  { %5494 = dma.done.wait [#allocation21], 1040  }
 0x2a0   :  { %5495 = vsyncadd [#allocation21], 4294966256 }
 0x2a1   :  { %5496 = dma.done.wait [#allocation24], 32  }
 0x2a2   :  { %5497 = vsyncadd [#allocation24], 4294967264 }
 0x2a3   :  { %5498 = dma.done.wait [#allocation27], 1024  }
 0x2a4   :  { %5499 = vsyncadd [#allocation27], 4294966272 }
 0x2a5   :  { %5500 = dma.done.wait [#allocation30], 80  }
 0x2a6   :  { %5501 = vsyncadd [#allocation30], 4294967216 }
 0x2a7   :  { %5502 = dma.done.wait [#allocation33], 272  }
 0x2a8   :  { %5503 = vsyncadd [#allocation33], 4294967024 }
 0x2a9   :  { %5504 = dma.done.wait [#allocation36], 32  }
 0x2aa   :  { %5505 = vsyncadd [#allocation36], 4294967264 }
 0x2ab   :  { %5506 = dma.done.wait [#allocation39], 1040  }
 0x2ac   :  { %5507 = vsyncadd [#allocation39], 4294966256 }
 0x2ad   :  { %5508 = dma.done.wait [#allocation42], 32  }
 0x2ae   :  { %5509 = vsyncadd [#allocation42], 4294967264 }
 0x2af   :  { %5510 = dma.done.wait [#allocation45], 1040  }
 0x2b0   :  { %5511 = vsyncadd [#allocation45], 4294966256 }
 0x2b1   :  { %5512 = dma.done.wait [#allocation48], 32  }
 0x2b2   :  { %5513 = vsyncadd [#allocation48], 4294967264  ;;  %v520_v0 = vld [vmem:[#allocation2] sm:$0xff]  ;;  %v521_v1 = vld [vmem:[#allocation2 + $0x8] sm:$0xff]  ;;  %vm548_vm0 = vcmask 261120   ;;  %s5589_s14 = smov 16  }
 0x2b3   :  { %v522_v2 = vld [vmem:[#allocation2 + $0x10] sm:$0xff]  ;;  %v597_v3 = vpack.c.bf16 %v521_v1, %v520_v0  ;;  %v523_v4 = vld [vmem:[#allocation2 + $0x18] sm:$0xff]  ;;  %v524_v5 = vld [vmem:[#allocation2 + $0x20] sm:$0xff]  ;;  %v4460_v34 = vpack.i.bf16 %v521_v1, %v520_v0  ;;  %v7114_v42 = vmov 0   ;;  %vm751_vm1 = vcmask 130048   ;;  %s5594_s23 = smov [#allocation50]  }
 0x2b4   :  { %v525_v6 = vld [vmem:[#allocation2 + $0x28] sm:$0xff]  ;;  %v598_v7 = vpack.c.bf16 %v523_v4, %v522_v2  ;;  %v528_v9 = vld [vmem:[#allocation5] sm:$0xff]  ;;  %v530_v11 = vld [vmem:[#allocation5 + $0x10] sm:$0xff]  ;;  %v4465_v32 = vpack.i.bf16 %v523_v4, %v522_v2  ;;  %4481 = vset.pattern.permute.xlu1 %v7114_v42  ;;  %4480 = vset.pattern.permute.xlu0 %v7114_v42  ;;  %vm920_vm2 = vcmask 523264   ;;  %vm2976_vm3 = vcmask 1043456   ;;  %s3757_s21 = sshll.u32 %s5594_s23, 4  ;;  %s3758_s21 = int_to_ptr.vmem [resolvable:$true] %s3757_s21 }
 0x2b5   :  { %v599_v8 = vpack.c.bf16 %v525_v6, %v524_v5  ;;  %v529_v10 = vld [vmem:[#allocation5 + $0x8] sm:$0xff]  ;;  %4088 = vmatprep.subr.bf16.mxu0 %v597_v3  ;;  %v531_v13 = vld [vmem:[#allocation5 + $0x18] sm:$0xff]  ;;  %v526_v14 = vld [vmem:[#allocation2 + $0x30] sm:$0xff]  ;;  %v555_v19 = vsel %vm548_vm0, %v530_v11, 0.0  ;;  %v549_v23 = vsel %vm548_vm0, %v528_v9, 0.0  ;;  %v4470_v33 = vpack.i.bf16 %v525_v6, %v524_v5 }
 0x2b6   :  { %v5999_v12 = vpack.c.bf16 %v529_v10, %v528_v9  ;;  %v527_v15 = vld [vmem:[#allocation2 + $0x38] sm:$0xff]  ;;  %4089 = vmatpush3.bf16.msra.mxu0 %v597_v3  ;;  %v532_v17 = vld [vmem:[#allocation5 + $0x20] sm:$0xff]  ;;  %v533_v18 = vld [vmem:[#allocation5 + $0x28] sm:$0xff]  ;;  %v6007_v24 = vpack.c.bf16 %v531_v13, %v530_v11  ;;  %v558_v25 = vsel %vm548_vm0, %v531_v13, 0.0  ;;  %v552_v26 = vsel %vm548_vm0, %v529_v10, 0.0  ;;  %556 = vadd.xlane.f32.xlu1 %v555_v19 }
 0x2b7   :  { %4096 = vmatprep.subr.bf16.mxu1 %v599_v8  ;;  %v600_v16 = vpack.c.bf16 %v527_v15, %v526_v14  ;;  %4090 = vmatprep.subr.bf16.mxu0 %v598_v7  ;;  %v6002_v20 = vpack.c.bf16 %v533_v18, %v532_v17  ;;  %v534_v21 = vld [vmem:[#allocation5 + $0x30] sm:$0xff]  ;;  %v535_v22 = vld [vmem:[#allocation5 + $0x38] sm:$0xff]  ;;  %v564_v27 = vsel %vm548_vm0, %v533_v18, 0.0  ;;  %v561_v28 = vsel %vm548_vm0, %v532_v17, 0.0  ;;  %v4582_v36 = vld [vmem:[#allocation8] sm:$0xff]  }
 0x2b8   :  { %7166 = vst [vmem:[#allocation92_spill] sm:$0xff] %v5999_v12  ;;  %4097 = vmatpush3.bf16.msra.mxu1 %v599_v8  ;;  %4092 = vmatprep.mubr.msk.bf16.mxu0 %vm548_vm0, %v5999_v12  ;;  %v570_v29 = vsel %vm548_vm0, %v535_v22, 0.0  ;;  %v567_v30 = vsel %vm548_vm0, %v534_v21, 0.0  ;;  %v6017_v31 = vpack.c.bf16 %v535_v22, %v534_v21  ;;  %v4475_v35 = vpack.i.bf16 %v527_v15, %v526_v14  ;;  %v4583_v37 = vld [vmem:[#allocation32] sm:$0xff]   ;;  %v4585_v39 = vld [vmem:[#allocation32 + $0x8] sm:$0xff]   ;;  %v540_v41 = vld [vmem:[#allocation7] sm:$0xff] }
 0x2b9   :  { %4098 = vmatprep.subr.bf16.mxu1 %v600_v16  ;;  %4100 = vmatprep.mubr.msk.bf16.mxu1 %vm548_vm0, %v6002_v20  ;;  %v4584_v38 = vld [vmem:[#allocation8 + $0x8] sm:$0xff]   ;;  %v542_v43 = vld [vmem:[#allocation7 + $0x10] sm:$0xff]  ;;  %v543_v44 = vld [vmem:[#allocation7 + $0x18] sm:$0xff]  ;;  %vm2562_vm4 = vcmask 64512   ;;  %vm5592_vm5 = vmmov 0  }
 0x2ba   :  { %4091 = vmatpush3.bf16.msra.mxu0 %v598_v7  ;;  %550 = vadd.xlane.f32.xlu0 %v549_v23  ;;  %v541_v40 = vld [vmem:[#allocation7 + $0x8] sm:$0xff]  ;;  %v544_v45 = vld [vmem:[#allocation7 + $0x20] sm:$0xff]  ;;  %v546_v47 = vld [vmem:[#allocation7 + $0x30] sm:$0xff] }
 0x2bb   :  { %559 = vadd.xlane.f32.xlu1 %v558_v25  ;;  %4104 = vmatprep.subr.bf16.mxu0 %v4582_v36  ;;  %v545_v46 = vld [vmem:[#allocation7 + $0x28] sm:$0xff]  ;;  %v547_v48 = vld [vmem:[#allocation7 + $0x38] sm:$0xff] }
 0x2bc   :  { %4099 = vmatpush3.bf16.msra.mxu1 %v600_v16 }
 0x2bd   :  { %4093 = vmatmul.mubr.msk.bf16.vlgmr.msra.gmra.mrb[0].mxu0 %vm548_vm0, %v6007_v24  ;;  %4116 = vmatprep.subr.bf16.mxu1 %v4583_v37 }
 0x2be   :  { %553 = vadd.xlane.f32.xlu0 %v552_v26  ;;  %4105 = vmatpush3.bf16.msra.mxu0 %v4582_v36 }
 0x2bf   :  { %4101 = vmatmul.mubr.msk.bf16.vlgmr.msra.gmra.mrb[0].mxu1 %vm548_vm0, %v6017_v31  ;;  %565 = vadd.xlane.f32.xlu1 %v564_v27 }
 0x2c0   :  { %4117 = vmatpush3.bf16.msra.mxu1 %v4583_v37  ;;  %4106 = vmatprep.subr.bf16.mxu0 %v4584_v38 }
 0x2c1   :  { %4118 = vmatprep.subr.bf16.mxu1 %v4585_v39 }
 0x2c2   :  { %562 = vadd.xlane.f32.xlu0 %v561_v28  ;;  %4107 = vmatpush3.bf16.msra.mxu0 %v4584_v38 }
 0x2c3   :  { %571 = vadd.xlane.f32.xlu1 %v570_v29 }
 0x2c4   :  { %4119 = vmatpush3.bf16.msra.mxu1 %v4585_v39 }
 0x2c6   :  { %568 = vadd.xlane.f32.xlu0 %v567_v30 }
 0x2d4   :  { %4466 = vrot.lane.b32.xlu1 %v4465_v32, %s5589_s14 }
 0x2d8   :  { %4471 = vrot.lane.b32.xlu1 %v4470_v33, %s5589_s14 }
 0x2dc   :  { %4461 = vrot.lane.b32.xlu0 %v4460_v34, %s5589_s14  ;;  %4476 = vrot.lane.b32.xlu1 %v4475_v35, %s5589_s14 }
 0x2e0   :  { %871 = vperm.xlu1 %4481, %v541_v40   ;;  %866 = vperm.xlu0 %4480, %v540_v41  }
 0x2e4   :  { %876 = vperm.xlu1 %4481, %v542_v43   ;;  %881 = vperm.xlu0 %4480, %v543_v44  }
 0x2e8   :  { %886 = vperm.xlu1 %4481, %v544_v45   ;;  %891 = vperm.xlu0 %4480, %v545_v46  }
 0x2ec   :  { %896 = vperm.xlu1 %4481, %v546_v47   ;;  %901 = vperm.xlu0 %4480, %v547_v48  }
 0x343   :  { %v557_v49 = vpop.xlane.xlu1 %556 }
 0x344   :  { %v575_v56 = vmax.f32 %v557_v49, 1.0 }
 0x346   :  { %4626 = vrcp.f32 %v575_v56  ;;  %v4588_v56 = vld [vmem:[#allocation26 + $0x10] sm:$0xff]  }
 0x347   :  { %v551_v50 = vpop.xlane.xlu0 %550 }
 0x348   :  { %v560_v51 = vpop.xlane.xlu1 %559  ;;  %v573_v57 = vmax.f32 %v551_v50, 1.0 }
 0x349   :  { %v576_v59 = vmax.f32 %v560_v51, 1.0 }
 0x34a   :  { %4628 = vrcp.f32 %v573_v57  ;;  %v4589_v57 = vld [vmem:[#allocation26 + $0x18] sm:$0xff]  }
 0x34b   :  { %v554_v52 = vpop.xlane.xlu0 %553  ;;  %4630 = vrcp.f32 %v576_v59 }
 0x34c   :  { %v566_v53 = vpop.xlane.xlu1 %565  ;;  %v574_v60 = vmax.f32 %v554_v52, 1.0 }
 0x34d   :  { %v578_v1 = vmax.f32 %v566_v53, 1.0 }
 0x34e   :  { %4632 = vrcp.f32 %v574_v60  ;;  %v6075_v60 = vld [vmem:[#allocation10] ss:$0 sm:$0xff] }
 0x34f   :  { %v563_v54 = vpop.xlane.xlu0 %562 }
 0x350   :  { %v572_v55 = vpop.xlane.xlu1 %571  ;;  %v577_v63 = vmax.f32 %v563_v54, 1.0  ;;  %v6029_v3 = vpop.eup %4626  ;;  %v4586_v54 = vld [vmem:[#allocation26] sm:$0xff]  }
 0x351   :  { %v580_v0 = vmax.f32 %v572_v55, 1.0  ;;  %4128 = vmatprep.subr.bf16.mxu0 %v4586_v54  ;;  %v4587_v55 = vld [vmem:[#allocation26 + $0x8] sm:$0xff]  }
 0x353   :  { %v569_v58 = vpop.xlane.xlu0 %568 }
 0x354   :  { %v579_v61 = vmax.f32 %v569_v58, 1.0  ;;  %v4467_v62 = vpop.permute.xlu1 %4466  ;;  %v6031_v4 = vpop.eup %4628 }
 0x355   :  { %v6033_v5 = vpop.eup %4630  ;;  %v4469_v11 = vunpack.i.h.bf16 %v4467_v62  ;;  %v4468_v16 = vunpack.i.l.bf16 %v4467_v62 }
 0x356   :  { %4634 = vrcp.f32 %v579_v61  ;;  %v6077_v61 = vld [vmem:[#allocation34] ss:$0 sm:$0xff] }
 0x357   :  { %4636 = vrcp.f32 %v577_v63  ;;  %v4462_v9 = vpop.permute.xlu0 %4461 }
 0x358   :  { %4638 = vrcp.f32 %v580_v0  ;;  %v4472_v2 = vpop.permute.xlu1 %4471  ;;  %v6035_v7 = vpop.eup %4632  ;;  %v4464_v18 = vunpack.i.h.bf16 %v4462_v9  ;;  %v4463_v25 = vunpack.i.l.bf16 %v4462_v9 }
 0x359   :  { %4640 = vrcp.f32 %v578_v1  ;;  %v4473_v21 = vunpack.i.l.bf16 %v4472_v2  ;;  %v4474_v34 = vunpack.i.h.bf16 %v4472_v2 }
 0x35c   :  { %v4477_v6 = vpop.permute.xlu1 %4476 }
 0x35d   :  { %v4478_v14 = vunpack.i.l.bf16 %v4477_v6  ;;  %v4479_v30 = vunpack.i.h.bf16 %v4477_v6 }
 0x35f   :  { %v6073_v59 = vpop.permute.xlu0 %866 }
 0x360   :  { %v6037_v8 = vpop.eup %4634  ;;  %v6071_v58 = vpop.permute.xlu1 %871 }
 0x361   :  { %v6039_v10 = vpop.eup %4636 }
 0x362   :  { %v6041_v15 = vpop.eup %4638 }
 0x363   :  { %v6044_v23 = vpop.eup %4640 }
 0x364   :  { %v6079_v62 = vpop.permute.xlu1 %876 }
 0x390   :  { %v4094_v13 = vpop.f32.mrb[0].mxu0 }
 0x391   :  { %v713_v17 = vmul.f32 %v6029_v3, %v4094_v13  ;;  %v641_v19 = vpop.f32.mrb[1].mxu0 }
 0x392   :  { %v4102_v22 = vpop.f32.mrb[0].mxu1  ;;  %v711_v26 = vmul.f32 %v6031_v4, %v641_v19  ;;  %v4095_v27 = vpop.f32.mrb[2].mxu0 }
 0x393   :  { %v717_v28 = vmul.f32 %v6037_v8, %v4102_v22  ;;  %v696_v29 = vpop.f32.mrb[1].mxu1  ;;  %v714_v32 = vmul.f32 %v6033_v5, %v4095_v27  ;;  %v644_v33 = vpop.f32.mrb[3].mxu0  ;;  %v754_v41 = vsel %vm751_vm1, %v713_v17, %v4468_v16 }
 0x394   :  { %v715_v35 = vmul.f32 %v6039_v10, %v696_v29  ;;  %v4103_v36 = vpop.f32.mrb[2].mxu1  ;;  %v712_v37 = vmul.f32 %v6035_v7, %v644_v33  ;;  %v752_v46 = vsel %vm751_vm1, %v711_v26, %v4463_v25  ;;  %v6093_v26 = vpop.permute.xlu0 %881 }
 0x395   :  { %v718_v38 = vmul.f32 %v6041_v15, %v4103_v36  ;;  %v699_v39 = vpop.f32.mrb[3].mxu1  ;;  %v758_v40 = vsel %vm751_vm1, %v717_v28, %v4478_v14  ;;  %v755_v43 = vsel %vm751_vm1, %v714_v32, %v4469_v11 }
 0x396   :  { %v756_v44 = vsel %vm751_vm1, %v715_v35, %v4473_v21  ;;  %v716_v45 = vmul.f32 %v6044_v23, %v699_v39  ;;  %v761_v47 = vpack.c.bf16 %v755_v43, %v754_v41  ;;  %v753_v48 = vsel %vm751_vm1, %v712_v37, %v4464_v18 }
 0x397   :  { %v759_v49 = vsel %vm751_vm1, %v718_v38, %v4479_v30  ;;  %v760_v50 = vpack.c.bf16 %v753_v48, %v752_v46  ;;  %v6117_v38 = vpop.permute.xlu1 %886 }
 0x398   :  { %v757_v51 = vsel %vm751_vm1, %v716_v45, %v4474_v34  ;;  %v763_v52 = vpack.c.bf16 %v759_v49, %v758_v40 }
 0x399   :  { %v762_v53 = vpack.c.bf16 %v757_v51, %v756_v44  ;;  %4108 = vmatprep.mubr.msk.bf16.mxu0 %vm548_vm0, %v760_v50  ;;  %4120 = vmatprep.mubr.msk.bf16.mxu1 %vm548_vm0, %v760_v50 }
 0x39a   :  { %4109 = vmatmul.mubr.msk.bf16.vlgmr.msra.gmra.mrb[4].mxu0 %vm548_vm0, %v761_v47  ;;  %4121 = vmatmul.mubr.msk.bf16.vlgmr.msra.gmra.mrb[4].mxu1 %vm548_vm0, %v761_v47 }
 0x39b   :  { %4112 = vmatprep.mubr.msk.bf16.mxu0 %vm548_vm0, %v762_v53  ;;  %4124 = vmatprep.mubr.msk.bf16.mxu1 %vm548_vm0, %v762_v53 }
 0x39c   :  { %4129 = vmatpush3.bf16.msra.mxu0 %v4586_v54 }
 0x39d   :  { %4130 = vmatprep.subr.bf16.mxu0 %v4587_v55 }
 0x3a0   :  { %4131 = vmatpush3.bf16.msra.mxu0 %v4587_v55 }
 0x3a1   :  { %4132 = vmatprep.subr.bf16.mxu0 %v4588_v56 }
 0x3a2   :  { %4113 = vmatmul.mubr.msk.bf16.gmra.mrb[8].mxu0 %vm548_vm0, %v763_v52  ;;  %4125 = vmatmul.mubr.msk.bf16.gmra.mrb[8].mxu1 %vm548_vm0, %v763_v52 }
 0x3a3   :  { %4148 = vmatprep.mubr.msk.bf16.mxu1 %vm548_vm0, %v5999_v12 }
 0x3a4   :  { %4133 = vmatpush3.bf16.msra.mxu0 %v4588_v56 }
 0x3a5   :  { %4134 = vmatprep.subr.bf16.mxu0 %v4589_v57 }
 0x3a8   :  { %4135 = vmatpush3.bf16.msra.mxu0 %v4589_v57 }
 0x46d   :  { %v4110_v63 = vpop.f32.mrb[4].mxu0  ;;  %v4122_v0 = vpop.f32.mrb[4].mxu1 }
 0x46e   :  { %v842_v1 = vadd.f32 %v4110_v63, %v6075_v60  ;;  %v1087_v2 = vadd.f32 %v4122_v0, %v6077_v61  ;;  %v833_v6 = vpop.f32.mrb[5].mxu0  ;;  %v1078_v9 = vpop.f32.mrb[5].mxu1 }
 0x46f   :  { %v834_v11 = vadd.f32 %v6075_v60, %v833_v6  ;;  %v1079_v13 = vadd.f32 %v6077_v61, %v1078_v9  ;;  %v4111_v14 = vpop.f32.mrb[6].mxu0  ;;  %v4123_v16 = vpop.f32.mrb[6].mxu1 }
 0x470   :  { %v6086_v17 = vmul.f32 %v6079_v62, %v842_v1  ;;  %v6089_v18 = vmul.f32 %v1087_v2, %v6079_v62  ;;  %v845_v19 = vadd.f32 %v4111_v14, %v6075_v60  ;;  %v1090_v21 = vadd.f32 %v4123_v16, %v6077_v61  ;;  %v836_v22 = vpop.f32.mrb[7].mxu0  ;;  %v1081_v25 = vpop.f32.mrb[7].mxu1 }
 0x471   :  { %v6096_v27 = vmul.f32 %v6073_v59, %v834_v11  ;;  %v6099_v28 = vmul.f32 %v1079_v13, %v6073_v59  ;;  %v837_v29 = vadd.f32 %v6075_v60, %v836_v22  ;;  %v1082_v30 = vadd.f32 %v6077_v61, %v1081_v25  ;;  %v6145_v11 = vpop.permute.xlu0 %891 }
 0x472   :  { %v6104_v32 = vmul.f32 %v6093_v26, %v845_v19  ;;  %v6107_v33 = vmul.f32 %v1090_v21, %v6093_v26  ;;  %v914_v39 = vmax.f32 %v6086_v17, 0.0  ;;  %v7118_v40 = vmax.f32 %v6089_v18, 0.0 }
 0x473   :  { %v912_v34 = vmax.f32 %v6096_v27, 0.0  ;;  %v1117_v35 = vmax.f32 %v6099_v28, 0.0  ;;  %v6112_v36 = vmul.f32 %v6071_v58, %v837_v29  ;;  %v6115_v37 = vmul.f32 %v1082_v30, %v6071_v58 }
 0x474   :  { %v915_v48 = vmax.f32 %v6104_v32, 0.0  ;;  %v7117_v49 = vmax.f32 %v6107_v33, 0.0  ;;  %v924_v63 = vsel %vm920_vm2, %v914_v39, 0.0  ;;  %v1128_v0 = vsel %vm920_vm2, %v7118_v40, 0.0 }
 0x475   :  { %v913_v41 = vmax.f32 %v6112_v36, 0.0  ;;  %v1118_v43 = vmax.f32 %v6115_v37, 0.0  ;;  %v4114_v44 = vpop.f32.mrb[8].mxu0  ;;  %v4126_v45 = vpop.f32.mrb[8].mxu1  ;;  %v921_v46 = vsel %vm920_vm2, %v912_v34, 0.0  ;;  %v1125_v47 = vsel %vm920_vm2, %v1117_v35, 0.0 }
 0x476   :  { %v849_v50 = vpop.f32.mrb[9].mxu0  ;;  %v1094_v51 = vpop.f32.mrb[9].mxu1  ;;  %v858_v13 = vadd.f32 %v4114_v44, %v6075_v60  ;;  %v1103_v14 = vadd.f32 %v4126_v45, %v6077_v61  ;;  %v926_v25 = vsel %vm920_vm2, %v915_v48, 0.0  ;;  %v1130_v29 = vsel %vm920_vm2, %v7117_v49, 0.0 }
 0x477   :  { %v922_v52 = vsel %vm920_vm2, %v913_v41, 0.0  ;;  %v1126_v53 = vsel %vm920_vm2, %v1118_v43, 0.0  ;;  %v850_v54 = vadd.f32 %v6075_v60, %v849_v50  ;;  %v1095_v55 = vadd.f32 %v6077_v61, %v1094_v51  ;;  %v4115_v56 = vpop.f32.mrb[10].mxu0  ;;  %v4127_v57 = vpop.f32.mrb[10].mxu1 }
 0x478   :  { %v923_v1 = vadd.f32 %v922_v52, %v921_v46  ;;  %v1127_v2 = vadd.f32 %v1126_v53, %v1125_v47  ;;  %v852_v6 = vpop.f32.mrb[11].mxu0  ;;  %v1097_v9 = vpop.f32.mrb[11].mxu1  ;;  %v861_v50 = vadd.f32 %v4115_v56, %v6075_v60  ;;  %v1106_v51 = vadd.f32 %v4127_v57, %v6077_v61 }
 0x479   :  { %v6150_v16 = vmul.f32 %v6117_v38, %v850_v54  ;;  %v6153_v19 = vmul.f32 %v1095_v55, %v6117_v38  ;;  %v6163_v45 = vpop.permute.xlu1 %896  ;;  %v6177_v56 = vpop.permute.xlu0 %901 }
 0x47a   :  { %v925_v21 = vadd.f32 %v924_v63, %v923_v1  ;;  %v1129_v22 = vadd.f32 %v1128_v0, %v1127_v2  ;;  %v910_v52 = vmul.f32 %v6163_v45, %v858_v13  ;;  %v6169_v53 = vmul.f32 %v1103_v14, %v6163_v45 }
 0x47b   :  { %v916_v30 = vmax.f32 %v6150_v16, 0.0  ;;  %v7116_v44 = vmax.f32 %v6153_v19, 0.0  ;;  %v853_v1 = vadd.f32 %v6075_v60, %v852_v6  ;;  %v1098_v2 = vadd.f32 %v6077_v61, %v1097_v9 }
 0x47c   :  { %v927_v46 = vadd.f32 %v926_v25, %v925_v21  ;;  %v1131_v47 = vadd.f32 %v1130_v29, %v1129_v22  ;;  %v911_v57 = vmul.f32 %v6177_v56, %v861_v50  ;;  %v6181_v13 = vmul.f32 %v1106_v51, %v6177_v56 }
 0x47d   :  { %v928_v54 = vsel %vm920_vm2, %v916_v30, 0.0  ;;  %v1132_v55 = vsel %vm920_vm2, %v7116_v44, 0.0  ;;  %v909_v14 = vmul.f32 %v6145_v11, %v853_v1  ;;  %v1114_v16 = vmul.f32 %v1098_v2, %v6145_v11 }
 0x47e   :  { %v929_v63 = vadd.f32 %v928_v54, %v927_v46  ;;  %v1133_v0 = vadd.f32 %v1132_v55, %v1131_v47  ;;  %v918_v21 = vmax.f32 %v910_v52, 0.0  ;;  %v1123_v22 = vmax.f32 %v6169_v53, 0.0 }
 0x47f   :  { %v917_v25 = vmax.f32 %v909_v14, 0.0  ;;  %v1122_v29 = vmax.f32 %v1114_v16, 0.0  ;;  %v919_v46 = vmax.f32 %v911_v57, 0.0  ;;  %v1124_v60 = vmax.f32 %v6181_v13, 0.0 }
 0x480   :  { %v932_v50 = vsel %vm920_vm2, %v918_v21, 0.0  ;;  %v1136_v51 = vsel %vm920_vm2, %v1123_v22, 0.0 }
 0x481   :  { %v930_v61 = vsel %vm920_vm2, %v917_v25, 0.0  ;;  %v1134_v6 = vsel %vm920_vm2, %v1122_v29, 0.0  ;;  %v934_v52 = vsel %vm920_vm2, %v919_v46, 0.0  ;;  %v1138_v53 = vsel %vm920_vm2, %v1124_v60, 0.0 }
 0x482   :  { %v931_v9 = vadd.f32 %v930_v61, %v929_v63  ;;  %v1135_v47 = vadd.f32 %v1134_v6, %v1133_v0 }
 0x484   :  { %v933_v54 = vadd.f32 %v932_v50, %v931_v9  ;;  %v1137_v55 = vadd.f32 %v1136_v51, %v1135_v47 }
 0x486   :  { %v935_v1 = vadd.f32 %v934_v52, %v933_v54  ;;  %v1139_v2 = vadd.f32 %v1138_v53, %v1137_v55  ;;  %v7167_v53 = vmax.f32 %v6089_v18, 0.0 }
 0x488   :  { %v936_v57 = vrot.slane %v935_v1, 4  ;;  %v1140_v13 = vrot.slane %v1139_v2, 4 }
 0x48a   :  { %v937_v14 = vadd.f32 %v936_v57, %v935_v1  ;;  %v1141_v16 = vadd.f32 %v1140_v13, %v1139_v2  ;;  %v7168_v57 = vmax.f32 %v6107_v33, 0.0 }
 0x48c   :  { %v938_v42 = vrot.slane %v937_v14, 2  ;;  %v1142_v44 = vrot.slane %v1141_v16, 2 }
 0x48e   :  { %v939_v63 = vadd.f32 %v938_v42, %v937_v14  ;;  %v1143_v0 = vadd.f32 %v1142_v44, %v1141_v16  ;;  %v7169_v14 = vmax.f32 %v6153_v19, 0.0 }
 0x490   :  { %v940_v61 = vrot.slane %v939_v63, 1  ;;  %v1144_v6 = vrot.slane %v1143_v0, 1 }
 0x492   :  { %v941_v49 = vadd.f32 %v940_v61, %v939_v63  ;;  %v1145_v40 = vadd.f32 %v1144_v6, %v1143_v0 }
 0x494   :  { %v942_v9 = vmul.f32 0.015625, %v941_v49  ;;  %v1146_v47 = vmul.f32 0.015625, %v1145_v40 }
 0x496   :  { %v6195_v50 = vsub.f32 %v912_v34, %v942_v9  ;;  %v6199_v51 = vsub.f32 %v913_v41, %v942_v9  ;;  %v6203_v54 = vsub.f32 %v914_v39, %v942_v9  ;;  %v6207_v42 = vsub.f32 %v915_v48, %v942_v9 }
 0x497   :  { %v6209_v44 = vsub.f32 %v916_v30, %v942_v9  ;;  %v6211_v49 = vsub.f32 %v917_v25, %v942_v9  ;;  %v6213_v40 = vsub.f32 %v918_v21, %v942_v9  ;;  %v6215_v27 = vsub.f32 %v919_v46, %v942_v9 }
 0x498   :  { %v951_v34 = vmul.f32 %v6195_v50, %v6195_v50  ;;  %v952_v17 = vmul.f32 %v6199_v51, %v6199_v51  ;;  %v953_v36 = vmul.f32 %v6203_v54, %v6203_v54  ;;  %v954_v32 = vmul.f32 %v6207_v42, %v6207_v42 }
 0x499   :  { %v955_v48 = vmul.f32 %v6209_v44, %v6209_v44  ;;  %v956_v30 = vmul.f32 %v6211_v49, %v6211_v49  ;;  %v6235_v55 = vsub.f32 %v1117_v35, %v1146_v47  ;;  %v6239_v52 = vsub.f32 %v1118_v43, %v1146_v47 }
 0x49a   :  { %v959_v39 = vsel %vm920_vm2, %v951_v34, 0.0  ;;  %v960_v41 = vsel %vm920_vm2, %v952_v17, 0.0  ;;  %v962_v25 = vsel %vm920_vm2, %v953_v36, 0.0  ;;  %v964_v46 = vsel %vm920_vm2, %v954_v32, 0.0 }
 0x49b   :  { %v961_v21 = vadd.f32 %v960_v41, %v959_v39  ;;  %v6243_v1 = vsub.f32 %v7167_v53, %v1146_v47  ;;  %v6247_v13 = vsub.f32 %v7168_v57, %v1146_v47  ;;  %v6251_v16 = vsub.f32 %v7169_v14, %v1146_v47 }
 0x49c   :  { %v6253_v28 = vsub.f32 %v1122_v29, %v1146_v47  ;;  %v6255_v35 = vsub.f32 %v1123_v22, %v1146_v47  ;;  %v6257_v37 = vsub.f32 %v1124_v60, %v1146_v47  ;;  %v1155_v18 = vmul.f32 %v6235_v55, %v6235_v55 }
 0x49d   :  { %v963_v2 = vadd.f32 %v962_v25, %v961_v21  ;;  %v1156_v43 = vmul.f32 %v6239_v52, %v6239_v52  ;;  %v1157_v33 = vmul.f32 %v6243_v1, %v6243_v1  ;;  %v957_v19 = vmul.f32 %v6213_v40, %v6213_v40 }
 0x49e   :  { %v966_v29 = vsel %vm920_vm2, %v955_v48, 0.0  ;;  %v1163_v22 = vsel %vm920_vm2, %v1155_v18, 0.0  ;;  %v1158_v60 = vmul.f32 %v6247_v13, %v6247_v13  ;;  %v958_v6 = vmul.f32 %v6215_v27, %v6215_v27 }
 0x49f   :  { %v965_v63 = vadd.f32 %v964_v46, %v963_v2  ;;  %v1164_v61 = vsel %vm920_vm2, %v1156_v43, 0.0  ;;  %v968_v9 = vsel %vm920_vm2, %v956_v30, 0.0  ;;  %v1159_v17 = vmul.f32 %v6251_v16, %v6251_v16 }
 0x4a0   :  { %v1165_v47 = vadd.f32 %v1164_v61, %v1163_v22  ;;  %v1166_v36 = vsel %vm920_vm2, %v1157_v33, 0.0  ;;  %v970_v32 = vsel %vm920_vm2, %v957_v19, 0.0  ;;  %v1160_v48 = vmul.f32 %v6253_v28, %v6253_v28 }
 0x4a1   :  { %v967_v0 = vadd.f32 %v966_v29, %v965_v63  ;;  %v1168_v21 = vsel %vm920_vm2, %v1158_v60, 0.0  ;;  %v972_v25 = vsel %vm920_vm2, %v958_v6, 0.0  ;;  %v1161_v53 = vmul.f32 %v6255_v35, %v6255_v35 }
 0x4a2   :  { %v1167_v39 = vadd.f32 %v1166_v36, %v1165_v47  ;;  %v1170_v2 = vsel %vm920_vm2, %v1159_v17, 0.0  ;;  %v1162_v18 = vmul.f32 %v6257_v37, %v6257_v37  ;;  %v1172_v43 = vsel %vm920_vm2, %v1160_v48, 0.0 }
 0x4a3   :  { %v969_v34 = vadd.f32 %v968_v9, %v967_v0  ;;  %v1174_v19 = vsel %vm920_vm2, %v1161_v53, 0.0 }
 0x4a4   :  { %v1169_v46 = vadd.f32 %v1168_v21, %v1167_v39  ;;  %v1176_v0 = vsel %vm920_vm2, %v1162_v18, 0.0  ;;  %v3873_v18 = vld [vmem:[#allocation13] ss:$0 sm:$0xff] }
 0x4a5   :  { %v971_v41 = vadd.f32 %v970_v32, %v969_v34 }
 0x4a6   :  { %v1171_v57 = vadd.f32 %v1170_v2, %v1169_v46 }
 0x4a7   :  { %v973_v30 = vadd.f32 %v972_v25, %v971_v41 }
 0x4a8   :  { %v1173_v63 = vadd.f32 %v1172_v43, %v1171_v57 }
 0x4a9   :  { %v974_v14 = vrot.slane %v973_v30, 4 }
 0x4aa   :  { %v1175_v29 = vadd.f32 %v1174_v19, %v1173_v63 }
 0x4ab   :  { %v975_v33 = vadd.f32 %v974_v14, %v973_v30  ;;  %v3872_v30 = vld [vmem:[#allocation11] ss:$0 sm:$0xff] }
 0x4ac   :  { %v1177_v60 = vadd.f32 %v1176_v0, %v1175_v29 }
 0x4ad   :  { %v976_v22 = vrot.slane %v975_v33, 2 }
 0x4ae   :  { %v1178_v6 = vrot.slane %v1177_v60, 4 }
 0x4af   :  { %v977_v61 = vadd.f32 %v976_v22, %v975_v33 }
 0x4b0   :  { %v1179_v47 = vadd.f32 %v1178_v6, %v1177_v60 }
 0x4b1   :  { %v978_v9 = vrot.slane %v977_v61, 1 }
 0x4b2   :  { %v1180_v17 = vrot.slane %v1179_v47, 2 }
 0x4b3   :  { %v979_v34 = vadd.f32 %v978_v9, %v977_v61 }
 0x4b4   :  { %v1181_v32 = vadd.f32 %v1180_v17, %v1179_v47 }
 0x4b5   :  { %v980_v36 = vmul.f32 0.015625, %v979_v34 }
 0x4b6   :  { %v1182_v41 = vrot.slane %v1181_v32, 1 }
 0x4b7   :  { %v981_v39 = vadd.f32 1e-05, %v980_v36 }
 0x4b8   :  { %v1183_v48 = vadd.f32 %v1182_v41, %v1181_v32  ;;  %v3882_v41 = vld [vmem:[#allocation37] ss:$0 sm:$0xff] }
 0x4b9   :  { %4642 = vrsqrt.f32 %v981_v39 }
 0x4ba   :  { %v1184_v21 = vmul.f32 0.015625, %v1183_v48 }
 0x4bc   :  { %v1185_v25 = vadd.f32 1e-05, %v1184_v21 }
 0x4be   :  { %4644 = vrsqrt.f32 %v1185_v25 }
 0x4c3   :  { %v4643_v46 = vpop.eup %4642 }
 0x4c4   :  { %v985_v53 = vmul.f32 %v4643_v46, %v6203_v54  ;;  %v986_v2 = vmul.f32 %v4643_v46, %v6207_v42  ;;  %v988_v57 = vmul.f32 %v4643_v46, %v6211_v49  ;;  %v983_v14 = vmul.f32 %v4643_v46, %v6195_v50 }
 0x4c5   :  { %v984_v43 = vmul.f32 %v4643_v46, %v6199_v51  ;;  %v987_v63 = vmul.f32 %v4643_v46, %v6209_v44  ;;  %v989_v33 = vmul.f32 %v4643_v46, %v6213_v40  ;;  %v990_v19 = vmul.f32 %v4643_v46, %v6215_v27  ;;  %v3881_v27 = vld [vmem:[#allocation35] ss:$0 sm:$0xff] }
 0x4c6   :  { %v1001_v29 = vmul.f32 %v3872_v30, %v986_v2  ;;  %v1003_v22 = vmul.f32 %v3872_v30, %v988_v57  ;;  %v998_v0 = vmul.f32 %v3872_v30, %v983_v14  ;;  %v1000_v60 = vmul.f32 %v3872_v30, %v985_v53 }
 0x4c7   :  { %v999_v54 = vmul.f32 %v3872_v30, %v984_v43  ;;  %v1002_v61 = vmul.f32 %v3872_v30, %v987_v63  ;;  %v1004_v47 = vmul.f32 %v3872_v30, %v989_v33  ;;  %v1005_v34 = vmul.f32 %v3872_v30, %v990_v19 }
 0x4c8   :  { %v6299_v42 = vadd.f32 %v3873_v18, %v1003_v22  ;;  %v6301_v49 = vadd.f32 %v3873_v18, %v998_v0  ;;  %v6303_v50 = vadd.f32 %v3873_v18, %v1000_v60  ;;  %v6305_v6 = vadd.f32 %v3873_v18, %v1001_v29  ;;  %v4645_v40 = vpop.eup %4644 }
 0x4c9   :  { %v6307_v51 = vadd.f32 %v3873_v18, %v999_v54  ;;  %v6309_v44 = vadd.f32 %v3873_v18, %v1002_v61  ;;  %v1192_v17 = vmul.f32 %v4645_v40, %v6253_v28  ;;  %v1189_v36 = vmul.f32 %v4645_v40, %v6243_v1 }
 0x4ca   :  { %v1227_v9 = vpack.c.bf16 %v6305_v6, %v6303_v50  ;;  %v1190_v32 = vmul.f32 %v4645_v40, %v6247_v13  ;;  %v1187_v39 = vmul.f32 %v4645_v40, %v6235_v55  ;;  %v1188_v48 = vmul.f32 %v4645_v40, %v6239_v52 }
 0x4cb   :  { %v1226_v21 = vpack.c.bf16 %v6307_v51, %v6301_v49  ;;  %v1228_v25 = vpack.c.bf16 %v6299_v42, %v6309_v44  ;;  %v1193_v46 = vmul.f32 %v4645_v40, %v6255_v35  ;;  %v1204_v30 = vmul.f32 %v3881_v27, %v1189_v36 }
 0x4cc   :  { %v1205_v53 = vmul.f32 %v3881_v27, %v1190_v32  ;;  %v1202_v28 = vmul.f32 %v3881_v27, %v1187_v39  ;;  %v1194_v1 = vmul.f32 %v4645_v40, %v6257_v37  ;;  %v1203_v2 = vmul.f32 %v3881_v27, %v1188_v48 }
 0x4cd   :  { %4136 = vmatprep.mubr.msk.bf16.mxu0 %vm920_vm2, %v1226_v21  ;;  %v1208_v55 = vmul.f32 %v3881_v27, %v1193_v46  ;;  %v1191_v13 = vmul.f32 %v4645_v40, %v6251_v16  ;;  %v1207_v52 = vmul.f32 %v3881_v27, %v1192_v17  ;;  %v6326_v57 = vadd.f32 %v3882_v41, %v1204_v30 }
 0x4ce   :  { %v6328_v14 = vadd.f32 %v3882_v41, %v1205_v53  ;;  %v6330_v43 = vadd.f32 %v3882_v41, %v1202_v28  ;;  %4137 = vmatmul.mubr.msk.bf16.vlgmr.msra.gmra.mrb[12].mxu0 %vm920_vm2, %v1227_v9  ;;  %v1209_v35 = vmul.f32 %v3881_v27, %v1194_v1  ;;  %v6333_v63 = vadd.f32 %v3882_v41, %v1203_v2 }
 0x4cf   :  { %4140 = vmatprep.mubr.msk.bf16.mxu0 %vm920_vm2, %v1228_v25  ;;  %v1206_v37 = vmul.f32 %v3881_v27, %v1191_v13  ;;  %v6336_v33 = vadd.f32 %v3873_v18, %v1004_v47  ;;  %v6340_v19 = vadd.f32 %v3882_v41, %v1208_v55  ;;  %v6344_v22 = vadd.f32 %v3873_v18, %v1005_v34 }
 0x4d0   :  { %v4487_v16 = vpack.i.bf16 %v6328_v14, %v6326_v57  ;;  %v6342_v29 = vadd.f32 %v3882_v41, %v1209_v35  ;;  %v4482_v0 = vpack.i.bf16 %v6333_v63, %v6330_v43  ;;  %v6350_v54 = vadd.f32 %v3882_v41, %v1207_v52 }
 0x4d1   :  { %7170 = vst [vmem:[#allocation93_spill] sm:$0xff] %v6340_v19  ;;  %v6348_v60 = vadd.f32 %v3882_v41, %v1206_v37  ;;  %v1229_v40 = vpack.c.bf16 %v6344_v22, %v6336_v33 }
 0x4d2   :  { %7171 = vst [vmem:[#allocation94_spill] sm:$0xff] %v6342_v29  ;;  %4488 = vrot.lane.b32.xlu0 %v4487_v16, %s5558_s7  ;;  %4483 = vrot.lane.b32.xlu1 %v4482_v0, %s5558_s7  ;;  %v4497_v61 = vpack.i.bf16 %v6342_v29, %v6340_v19  ;;  %v4590_v0 = vld [vmem:[#allocation38] sm:$0xff]  }
 0x4d3   :  { %v4492_v18 = vpack.i.bf16 %v6350_v54, %v6348_v60 }
 0x4d6   :  { %4498 = vrot.lane.b32.xlu0 %v4497_v61, %s5558_s7  ;;  %4141 = vmatmul.mubr.msk.bf16.gmra.mrb[16].mxu0 %vm920_vm2, %v1229_v40  ;;  %v4591_v61 = vld [vmem:[#allocation38 + $0x8] sm:$0xff]   ;;  %v4593_v40 = vld [vmem:[#allocation14] sm:$0xff]  }
 0x4d7   :  { %4493 = vrot.lane.b32.xlu1 %v4492_v18, %s5558_s7  ;;  %v4595_v18 = vld [vmem:[#allocation14 + $0x8] sm:$0xff]   ;;  %4160 = vmatprep.subr.bf16.mxu0 %v4593_v40 }
 0x4d8   :  { %4161 = vmatpush3.bf16.msra.mxu0 %v4593_v40 }
 0x4d9   :  { %4162 = vmatprep.subr.bf16.mxu0 %v4595_v18 }
 0x4dc   :  { %4163 = vmatpush3.bf16.msra.mxu0 %v4595_v18 }
 0x544   :  { %v6363_v27 = vpop.permute.xlu0 %4488  ;;  %v6367_v34 = vpop.permute.xlu1 %4483 }
 0x545   :  { %v4491_v9 = vunpack.i.h.bf16 %v6363_v27  ;;  %v4490_v47 = vunpack.i.l.bf16 %v6363_v27  ;;  %v4486_v17 = vunpack.i.h.bf16 %v6367_v34  ;;  %v4485_v36 = vunpack.i.l.bf16 %v6367_v34 }
 0x547   :  { %v1385_v32 = vsel %vm920_vm2, %v6301_v49, %v4485_v36  ;;  %v1386_v39 = vsel %vm920_vm2, %v6307_v51, %v4486_v17  ;;  %v1387_v41 = vsel %vm920_vm2, %v6303_v50, %v4490_v47  ;;  %v1388_v48 = vsel %vm920_vm2, %v6305_v6, %v4491_v9 }
 0x548   :  { %v6387_v21 = vpop.permute.xlu0 %4498  ;;  %v1393_v46 = vpack.c.bf16 %v1386_v39, %v1385_v32  ;;  %v1394_v28 = vpack.c.bf16 %v1388_v48, %v1387_v41  ;;  %v4592_v32 = vld [vmem:[#allocation38 + $0x10] sm:$0xff]   ;;  %v4597_v39 = vld [vmem:[#allocation14 + $0x10] sm:$0xff]   ;;  %v4594_v41 = vld [vmem:[#allocation38 + $0x18] sm:$0xff]  }
 0x549   :  { %v6389_v25 = vpop.permute.xlu1 %4493  ;;  %v4501_v1 = vunpack.i.h.bf16 %v6387_v21  ;;  %v4500_v2 = vunpack.i.l.bf16 %v6387_v21  ;;  %4164 = vmatprep.subr.bf16.mxu0 %v4597_v39  ;;  %v4596_v48 = vld [vmem:[#allocation38 + $0x20] sm:$0xff]  }
 0x54a   :  { %v4496_v30 = vunpack.i.h.bf16 %v6389_v25  ;;  %v4495_v53 = vunpack.i.l.bf16 %v6389_v25  ;;  %4144 = vmatprep.subr.bf16.mxu1 %v1393_v46  ;;  %4165 = vmatpush3.bf16.msra.mxu0 %v4597_v39 }
 0x54b   :  { %4145 = vmatpush3.bf16.msra.mxu1 %v1393_v46  ;;  %v1391_v35 = vsel %vm920_vm2, %v6336_v33, %v4500_v2  ;;  %v1392_v37 = vsel %vm920_vm2, %v6344_v22, %v4501_v1  ;;  %v4598_v46 = vld [vmem:[#allocation38 + $0x28] sm:$0xff]  }
 0x54c   :  { %v1389_v55 = vsel %vm920_vm2, %v6309_v44, %v4495_v53  ;;  %v1390_v13 = vsel %vm920_vm2, %v6299_v42, %v4496_v30  ;;  %4146 = vmatprep.subr.bf16.mxu1 %v1394_v28  ;;  %v1396_v16 = vpack.c.bf16 %v1392_v37, %v1391_v35 }
 0x54d   :  { %v1395_v52 = vpack.c.bf16 %v1390_v13, %v1389_v55  ;;  %v4600_v55 = vld [vmem:[#allocation14 + $0x18] sm:$0xff]   ;;  %v4601_v13 = vld [vmem:[#allocation14 + $0x20] sm:$0xff]  }
 0x54e   :  { %4166 = vmatprep.subr.bf16.mxu0 %v4600_v55 }
 0x54f   :  { %4147 = vmatpush3.bf16.msra.mxu1 %v1394_v28  ;;  %v4599_v28 = vld [vmem:[#allocation38 + $0x30] sm:$0xff]   ;;  %4167 = vmatpush3.bf16.msra.mxu0 %v4600_v55 }
 0x550   :  { %4152 = vmatprep.subr.bf16.mxu1 %v1395_v52  ;;  %4168 = vmatprep.subr.bf16.mxu0 %v4601_v13 }
 0x552   :  { %4149 = vmatmul.mubr.msk.bf16.vlgmr.msra.gmra.mrb[12].mxu1 %vm548_vm0, %v6007_v24 }
 0x553   :  { %4153 = vmatpush3.bf16.msra.mxu1 %v1395_v52  ;;  %4156 = vmatprep.mubr.msk.bf16.mxu1 %vm548_vm0, %v6002_v20  ;;  %v4602_v52 = vld [vmem:[#allocation38 + $0x38] sm:$0xff]  }
 0x554   :  { %4154 = vmatprep.subr.bf16.mxu1 %v1396_v16  ;;  %4169 = vmatpush3.bf16.msra.mxu0 %v4601_v13  ;;  %v4605_v13 = vld [vmem:[#allocation14 + $0x38] sm:$0xff]  }
 0x557   :  { %4155 = vmatpush3.bf16.msra.mxu1 %v1396_v16  ;;  %v4603_v16 = vld [vmem:[#allocation14 + $0x28] sm:$0xff]  }
 0x558   :  { %4184 = vmatprep.subr.bf16.mxu1 %v4590_v0  ;;  %4170 = vmatprep.subr.bf16.mxu0 %v4603_v16 }
 0x559   :  { %4171 = vmatpush3.bf16.msra.mxu0 %v4603_v16 }
 0x55a   :  { %4157 = vmatmul.mubr.msk.bf16.vlgmr.msra.gmra.mrb[16].mxu1 %vm548_vm0, %v6017_v31 }
 0x55b   :  { %4185 = vmatpush3.bf16.msra.mxu1 %v4590_v0 }
 0x55c   :  { %4186 = vmatprep.subr.bf16.mxu1 %v4591_v61 }
 0x55f   :  { %4187 = vmatpush3.bf16.msra.mxu1 %v4591_v61 }
 0x560   :  { %4188 = vmatprep.subr.bf16.mxu1 %v4592_v32 }
 0x563   :  { %4189 = vmatpush3.bf16.msra.mxu1 %v4592_v32 }
 0x564   :  { %4190 = vmatprep.subr.bf16.mxu1 %v4594_v41 }
 0x567   :  { %4191 = vmatpush3.bf16.msra.mxu1 %v4594_v41 }
 0x568   :  { %4192 = vmatprep.subr.bf16.mxu1 %v4596_v48 }
 0x56b   :  { %4193 = vmatpush3.bf16.msra.mxu1 %v4596_v48  ;;  %v4604_v48 = vld [vmem:[#allocation14 + $0x30] sm:$0xff]  }
 0x56c   :  { %4194 = vmatprep.subr.bf16.mxu1 %v4598_v46  ;;  %4172 = vmatprep.subr.bf16.mxu0 %v4604_v48 }
 0x56d   :  { %4173 = vmatpush3.bf16.msra.mxu0 %v4604_v48 }
 0x56e   :  { %4174 = vmatprep.subr.bf16.mxu0 %v4605_v13 }
 0x56f   :  { %4195 = vmatpush3.bf16.msra.mxu1 %v4598_v46 }
 0x570   :  { %4196 = vmatprep.subr.bf16.mxu1 %v4599_v28 }
 0x571   :  { %4175 = vmatpush3.bf16.msra.mxu0 %v4605_v13  ;;  %v4532_v13 = vpack.i.bf16 %v6299_v42, %v6309_v44 }
 0x573   :  { %4197 = vmatpush3.bf16.msra.mxu1 %v4599_v28 }
 0x574   :  { %4198 = vmatprep.subr.bf16.mxu1 %v4602_v52 }
 0x577   :  { %4199 = vmatpush3.bf16.msra.mxu1 %v4602_v52 }
 0x625   :  { %v4150_v35 = vpop.f32.mrb[12].mxu1 }
 0x626   :  { %v1431_v37 = vpop.f32.mrb[13].mxu1  ;;  %v6418_v61 = vmul.f32 %v6029_v3, %v4150_v35 }
 0x627   :  { %v4151_v0 = vpop.f32.mrb[14].mxu1  ;;  %v6424_v32 = vmul.f32 %v6031_v4, %v1431_v37 }
 0x628   :  { %v6421_v40 = vmul.f32 %v6033_v5, %v4151_v0  ;;  %v1434_v18 = vpop.f32.mrb[15].mxu1 }
 0x629   :  { %v6427_v39 = vmul.f32 %v6035_v7, %v1434_v18 }
 0x62a   :  { %v4507_v41 = vpack.i.bf16 %v6421_v40, %v6418_v61 }
 0x62b   :  { %v4502_v46 = vpack.i.bf16 %v6427_v39, %v6424_v32 }
 0x62c   :  { %4508 = vrot.lane.b32.xlu0 %v4507_v41, %s5558_s7 }
 0x62d   :  { %4503 = vrot.lane.b32.xlu1 %v4502_v46, %s5558_s7  ;;  %v4158_v28 = vpop.f32.mrb[16].mxu1  ;;  %v4527_v46 = vpack.i.bf16 %v6305_v6, %v6303_v50 }
 0x62e   :  { %v1480_v55 = vpop.f32.mrb[17].mxu1  ;;  %v6436_v35 = vmul.f32 %v6037_v8, %v4158_v28  ;;  %v4522_v28 = vpack.i.bf16 %v6307_v51, %v6301_v49 }
 0x62f   :  { %v4159_v52 = vpop.f32.mrb[18].mxu1  ;;  %v6442_v0 = vmul.f32 %v6039_v10, %v1480_v55  ;;  %v4537_v55 = vpack.i.bf16 %v6344_v22, %v6336_v33 }
 0x630   :  { %v6439_v37 = vmul.f32 %v6041_v15, %v4159_v52  ;;  %v1483_v16 = vpop.f32.mrb[19].mxu1 }
 0x631   :  { %v6445_v18 = vmul.f32 %v6044_v23, %v1483_v16 }
 0x632   :  { %v4517_v41 = vpack.i.bf16 %v6439_v37, %v6436_v35 }
 0x633   :  { %v4512_v48 = vpack.i.bf16 %v6445_v18, %v6442_v0 }
 0x634   :  { %4518 = vrot.lane.b32.xlu0 %v4517_v41, %s5558_s7 }
 0x635   :  { %4513 = vrot.lane.b32.xlu1 %v4512_v48, %s5558_s7 }
 0x638   :  { %4528 = vrot.lane.b32.xlu0 %v4527_v46, %s5558_s7 }
 0x639   :  { %4523 = vrot.lane.b32.xlu1 %v4522_v28, %s5558_s7 }
 0x63c   :  { %4538 = vrot.lane.b32.xlu0 %v4537_v55, %s5558_s7 }
 0x63d   :  { %4533 = vrot.lane.b32.xlu1 %v4532_v13, %s5558_s7 }
 0x69e   :  { %v4509_v52 = vpop.permute.xlu0 %4508 }
 0x69f   :  { %v4511_v16 = vunpack.i.h.bf16 %v4509_v52  ;;  %v4510_v50 = vunpack.i.l.bf16 %v4509_v52  ;;  %v4504_v6 = vpop.permute.xlu1 %4503 }
 0x6a0   :  { %v4506_v41 = vunpack.i.h.bf16 %v4504_v6  ;;  %v4505_v49 = vunpack.i.l.bf16 %v4504_v6 }
 0x6a1   :  { %v1834_v51 = vsel %vm920_vm2, %v4511_v16, %v4491_v9  ;;  %v1833_v33 = vsel %vm920_vm2, %v4510_v50, %v4490_v47 }
 0x6a2   :  { %v1831_v42 = vsel %vm920_vm2, %v4505_v49, %v4485_v36  ;;  %v1832_v44 = vsel %vm920_vm2, %v4506_v41, %v4486_v17  ;;  %v1840_v48 = vpack.c.bf16 %v1834_v51, %v1833_v33 }
 0x6a3   :  { %v1839_v22 = vpack.c.bf16 %v1832_v44, %v1831_v42 }
 0x6a5   :  { %4200 = vmatprep.mubr.bf16.mxu1 %v1839_v22 }
 0x6a6   :  { %4201 = vmatmul.mubr.bf16.vlgmr.msra.gmra.mrb[20].mxu1 %v1840_v48  ;;  %v4519_v46 = vpop.permute.xlu0 %4518 }
 0x6a7   :  { %v4521_v28 = vunpack.i.h.bf16 %v4519_v46  ;;  %v4520_v55 = vunpack.i.l.bf16 %v4519_v46  ;;  %v4514_v9 = vpop.permute.xlu1 %4513 }
 0x6a8   :  { %v4516_v13 = vunpack.i.h.bf16 %v4514_v9  ;;  %v4515_v27 = vunpack.i.l.bf16 %v4514_v9 }
 0x6a9   :  { %v1837_v47 = vsel %vm920_vm2, %v4520_v55, %v4500_v2  ;;  %v1838_v34 = vsel %vm920_vm2, %v4521_v28, %v4501_v1 }
 0x6aa   :  { %v4529_v36 = vpop.permute.xlu0 %4528  ;;  %v1835_v17 = vsel %vm920_vm2, %v4515_v27, %v4495_v53  ;;  %v1836_v52 = vsel %vm920_vm2, %v4516_v13, %v4496_v30  ;;  %v1842_v2 = vpack.c.bf16 %v1838_v34, %v1837_v47  ;;  %v4606_v13 = vld [vmem:[#allocation28] sm:$0xff]   ;;  %v4607_v27 = vld [vmem:[#allocation28 + $0x8] sm:$0xff]   ;;  %v3907_v47 = vld [vmem:[#allocation40] ss:$0 sm:$0xff] }
 0x6ab   :  { %v4531_v16 = vunpack.i.h.bf16 %v4529_v36  ;;  %v4530_v50 = vunpack.i.l.bf16 %v4529_v36  ;;  %v4524_v6 = vpop.permute.xlu1 %4523  ;;  %v1841_v41 = vpack.c.bf16 %v1836_v52, %v1835_v17  ;;  %4208 = vmatprep.subr.bf16.mxu0 %v4606_v13 }
 0x6ac   :  { %v4526_v49 = vunpack.i.h.bf16 %v4524_v6  ;;  %v4525_v51 = vunpack.i.l.bf16 %v4524_v6 }
 0x6ad   :  { %v1538_v21 = vsel %vm920_vm2, %v6421_v40, %v4531_v16  ;;  %v1537_v1 = vsel %vm920_vm2, %v6418_v61, %v4530_v50  ;;  %4204 = vmatprep.mubr.bf16.mxu1 %v1841_v41 }
 0x6ae   :  { %v4539_v33 = vpop.permute.xlu0 %4538  ;;  %4205 = vmatmul.mubr.bf16.gmra.mrb[24].mxu1 %v1842_v2  ;;  %v1535_v25 = vsel %vm920_vm2, %v6424_v32, %v4525_v51  ;;  %v1536_v30 = vsel %vm920_vm2, %v6427_v39, %v4526_v49  ;;  %v1544_v44 = vpack.c.bf16 %v1538_v21, %v1537_v1 }
 0x6af   :  { %v4534_v53 = vpop.permute.xlu1 %4533  ;;  %v1543_v42 = vpack.c.bf16 %v1536_v30, %v1535_v25  ;;  %4228 = vmatprep.mubr.msk.bf16.mxu1 %vm548_vm0, %v5999_v12  ;;  %v4541_v48 = vunpack.i.h.bf16 %v4539_v33  ;;  %v4540_v46 = vunpack.i.l.bf16 %v4539_v33 }
 0x6b0   :  { %v4536_v22 = vunpack.i.h.bf16 %v4534_v53  ;;  %v4535_v40 = vunpack.i.l.bf16 %v4534_v53 }
 0x6b1   :  { %4176 = vmatprep.mubr.bf16.mxu0 %v1543_v42  ;;  %v1541_v39 = vsel %vm920_vm2, %v6436_v35, %v4540_v46  ;;  %v1542_v55 = vsel %vm920_vm2, %v6439_v37, %v4541_v48  ;;  %v3896_v48 = vld [vmem:[#allocation16] ss:$0 sm:$0xff] }
 0x6b2   :  { %4177 = vmatmul.mubr.bf16.vlgmr.msra.gmra.mrb[20].mxu0 %v1544_v44  ;;  %v1539_v61 = vsel %vm920_vm2, %v6442_v0, %v4535_v40  ;;  %v1540_v32 = vsel %vm920_vm2, %v6445_v18, %v4536_v22  ;;  %v1546_v9 = vpack.c.bf16 %v1542_v55, %v1541_v39  ;;  %v4608_v0 = vld [vmem:[#allocation28 + $0x10] sm:$0xff]   ;;  %v4609_v18 = vld [vmem:[#allocation28 + $0x18] sm:$0xff]  }
 0x6b3   :  { %v1545_v28 = vpack.c.bf16 %v1540_v32, %v1539_v61  ;;  %4209 = vmatpush3.bf16.msra.mxu0 %v4606_v13 }
 0x6b4   :  { %4210 = vmatprep.subr.bf16.mxu0 %v4607_v27 }
 0x6b5   :  { %4180 = vmatprep.mubr.bf16.mxu0 %v1545_v28 }
 0x6b7   :  { %4211 = vmatpush3.bf16.msra.mxu0 %v4607_v27 }
 0x6b8   :  { %4212 = vmatprep.subr.bf16.mxu0 %v4608_v0 }
 0x6ba   :  { %4181 = vmatmul.mubr.bf16.gmra.mrb[24].mxu0 %v1546_v9 }
 0x6bb   :  { %4213 = vmatpush3.bf16.msra.mxu0 %v4608_v0 }
 0x6bc   :  { %4214 = vmatprep.subr.bf16.mxu0 %v4609_v18 }
 0x6bf   :  { %4215 = vmatpush3.bf16.msra.mxu0 %v4609_v18 }
 0x779   :  { %v4202_v34 = vpop.f32.mrb[20].mxu1 }
 0x77a   :  { %v1957_v35 = vadd.f32 %v4202_v34, %v3907_v47  ;;  %v1948_v36 = vpop.f32.mrb[21].mxu1 }
 0x77b   :  { %v1949_v17 = vadd.f32 %v3907_v47, %v1948_v36  ;;  %v4203_v37 = vpop.f32.mrb[22].mxu1 }
 0x77c   :  { %v1960_v52 = vadd.f32 %v4203_v37, %v3907_v47  ;;  %v1951_v16 = vpop.f32.mrb[23].mxu1  ;;  %v6508_v50 = vmul.f32 %v1957_v35, %v6079_v62 }
 0x77d   :  { %v6511_v6 = vmul.f32 %v1949_v17, %v6073_v59  ;;  %v1952_v41 = vadd.f32 %v3907_v47, %v1951_v16 }
 0x77e   :  { %v6514_v49 = vmul.f32 %v1960_v52, %v6093_v26  ;;  %v7125_v21 = vmax.f32 %v6508_v50, 0.0 }
 0x77f   :  { %v7128_v51 = vmax.f32 %v6511_v6, 0.0  ;;  %v6518_v2 = vmul.f32 %v1952_v41, %v6071_v58 }
 0x780   :  { %v7122_v25 = vmax.f32 %v6514_v49, 0.0  ;;  %v1998_v39 = vsel %vm920_vm2, %v7125_v21, 0.0 }
 0x781   :  { %v7126_v1 = vmax.f32 %v6518_v2, 0.0  ;;  %v4206_v33 = vpop.f32.mrb[24].mxu1  ;;  %v1995_v42 = vsel %vm920_vm2, %v7128_v51, 0.0 }
 0x782   :  { %v1973_v30 = vadd.f32 %v4206_v33, %v3907_v47  ;;  %v1964_v53 = vpop.f32.mrb[25].mxu1  ;;  %v2000_v27 = vsel %vm920_vm2, %v7122_v25, 0.0 }
 0x783   :  { %v1996_v44 = vsel %vm920_vm2, %v7126_v1, 0.0  ;;  %v1965_v22 = vadd.f32 %v3907_v47, %v1964_v53  ;;  %v4207_v40 = vpop.f32.mrb[26].mxu1 }
 0x784   :  { %v1997_v46 = vadd.f32 %v1996_v44, %v1995_v42  ;;  %v6530_v61 = vmul.f32 %v1973_v30, %v6163_v45  ;;  %v1976_v32 = vadd.f32 %v4207_v40, %v3907_v47  ;;  %v1967_v28 = vpop.f32.mrb[27].mxu1 }
 0x785   :  { %v6536_v55 = vmul.f32 %v1965_v22, %v6117_v38  ;;  %v1968_v9 = vadd.f32 %v3907_v47, %v1967_v28  ;;  %v4178_v13 = vpop.f32.mrb[20].mxu0 }
 0x786   :  { %v1999_v0 = vadd.f32 %v1998_v39, %v1997_v46  ;;  %v1661_v18 = vadd.f32 %v4178_v13, %v3896_v48  ;;  %v1652_v34 = vpop.f32.mrb[21].mxu0  ;;  %v6543_v36 = vmul.f32 %v1976_v32, %v6177_v56  ;;  %v7119_v47 = vmax.f32 %v6530_v61, 0.0 }
 0x787   :  { %v7120_v35 = vmax.f32 %v6536_v55, 0.0  ;;  %v6546_v17 = vmul.f32 %v1968_v9, %v6145_v11  ;;  %v1653_v37 = vadd.f32 %v3896_v48, %v1652_v34  ;;  %v4179_v52 = vpop.f32.mrb[22].mxu0 }
 0x788   :  { %v2001_v16 = vadd.f32 %v2000_v27, %v1999_v0  ;;  %v1655_v41 = vpop.f32.mrb[23].mxu0  ;;  %v1664_v42 = vadd.f32 %v4179_v52, %v3896_v48  ;;  %v6557_v22 = vmul.f32 %v1661_v18, %v6079_v62  ;;  %v1994_v46 = vmax.f32 %v6543_v36, 0.0 }
 0x789   :  { %v2002_v33 = vsel %vm920_vm2, %v7120_v35, 0.0  ;;  %v1992_v30 = vmax.f32 %v6546_v17, 0.0  ;;  %v6554_v53 = vmul.f32 %v1653_v37, %v6073_v59  ;;  %v1656_v40 = vadd.f32 %v3896_v48, %v1655_v41 }
 0x78a   :  { %v2003_v44 = vadd.f32 %v2002_v33, %v2001_v16  ;;  %v6563_v9 = vmul.f32 %v1664_v42, %v6093_v26  ;;  %v2006_v27 = vsel %vm920_vm2, %v7119_v47, 0.0  ;;  %v7124_v34 = vmax.f32 %v6557_v22, 0.0 }
 0x78b   :  { %v2004_v32 = vsel %vm920_vm2, %v1992_v30, 0.0  ;;  %v7121_v28 = vmax.f32 %v6554_v53, 0.0  ;;  %v6566_v13 = vmul.f32 %v1656_v40, %v6071_v58  ;;  %v2008_v52 = vsel %vm920_vm2, %v1994_v46, 0.0 }
 0x78c   :  { %v2005_v39 = vadd.f32 %v2004_v32, %v2003_v44  ;;  %v7127_v44 = vmax.f32 %v6563_v9, 0.0 }
 0x78d   :  { %v4182_v0 = vpop.f32.mrb[24].mxu0  ;;  %v7123_v36 = vmax.f32 %v6566_v13, 0.0  ;;  %v1699_v16 = vsel %vm920_vm2, %v7121_v28, 0.0 }
 0x78e   :  { %v2007_v18 = vadd.f32 %v2006_v27, %v2005_v39  ;;  %v1677_v17 = vadd.f32 %v4182_v0, %v3896_v48  ;;  %v1668_v37 = vpop.f32.mrb[25].mxu0 }
 0x78f   :  { %v1669_v41 = vadd.f32 %v3896_v48, %v1668_v37  ;;  %v4183_v33 = vpop.f32.mrb[26].mxu0  ;;  %v1700_v40 = vsel %vm920_vm2, %v7123_v36, 0.0  ;;  %v1702_v37 = vsel %vm920_vm2, %v7124_v34, 0.0 }
 0x790   :  { %v2009_v42 = vadd.f32 %v2008_v52, %v2007_v18  ;;  %v1680_v32 = vadd.f32 %v4183_v33, %v3896_v48  ;;  %v1671_v39 = vpop.f32.mrb[27].mxu0  ;;  %v1701_v27 = vadd.f32 %v1700_v40, %v1699_v16  ;;  %v1689_v18 = vmul.f32 %v1677_v17, %v6163_v45 }
 0x791   :  { %v6582_v0 = vmul.f32 %v1669_v41, %v6117_v38  ;;  %v1672_v47 = vadd.f32 %v3896_v48, %v1671_v39  ;;  %v1704_v16 = vsel %vm920_vm2, %v7127_v44, 0.0 }
 0x792   :  { %v2010_v35 = vrot.slane %v2009_v42, 4  ;;  %v1703_v52 = vadd.f32 %v1702_v37, %v1701_v27  ;;  %v1690_v41 = vmul.f32 %v1680_v32, %v6177_v56  ;;  %v1697_v34 = vmax.f32 %v1689_v18, 0.0 }
 0x793   :  { %v1695_v28 = vmax.f32 %v6582_v0, 0.0  ;;  %v1688_v25 = vmul.f32 %v1672_v47, %v6145_v11 }
 0x794   :  { %v2011_v36 = vadd.f32 %v2010_v35, %v2009_v42  ;;  %v1705_v48 = vadd.f32 %v1704_v16, %v1703_v52  ;;  %v1698_v0 = vmax.f32 %v1690_v41, 0.0  ;;  %v1710_v35 = vsel %vm920_vm2, %v1697_v34, 0.0 }
 0x795   :  { %v1706_v33 = vsel %vm920_vm2, %v1695_v28, 0.0  ;;  %v1696_v40 = vmax.f32 %v1688_v25, 0.0  ;;  %v7172_v25 = vmax.f32 %v6511_v6, 0.0  ;;  %v7177_v6 = vmax.f32 %v6530_v61, 0.0 }
 0x796   :  { %v2012_v39 = vrot.slane %v2011_v36, 2  ;;  %v1707_v21 = vadd.f32 %v1706_v33, %v1705_v48  ;;  %v1712_v44 = vsel %vm920_vm2, %v1698_v0, 0.0 }
 0x797   :  { %v1708_v17 = vsel %vm920_vm2, %v1696_v40, 0.0 }
 0x798   :  { %v2013_v27 = vadd.f32 %v2012_v39, %v2011_v36  ;;  %v1709_v37 = vadd.f32 %v1708_v17, %v1707_v21  ;;  %v7173_v36 = vmax.f32 %v6518_v2, 0.0  ;;  %v7174_v21 = vmax.f32 %v6508_v50, 0.0 }
 0x799   :  { %v7175_v39 = vmax.f32 %v6514_v49, 0.0 }
 0x79a   :  { %v2014_v47 = vrot.slane %v2013_v27, 1  ;;  %v1711_v42 = vadd.f32 %v1710_v35, %v1709_v37 }
 0x79c   :  { %v2015_v1 = vadd.f32 %v2014_v47, %v2013_v27  ;;  %v1713_v32 = vadd.f32 %v1712_v44, %v1711_v42 }
 0x79e   :  { %v2016_v52 = vmul.f32 0.015625, %v2015_v1  ;;  %v1714_v16 = vrot.slane %v1713_v32, 4  ;;  %v7176_v1 = vmax.f32 %v6536_v55, 0.0 }
 0x7a0   :  { %v6598_v51 = vsub.f32 %v1992_v30, %v2016_v52  ;;  %v6602_v18 = vsub.f32 %v7172_v25, %v2016_v52  ;;  %v6606_v41 = vsub.f32 %v7173_v36, %v2016_v52  ;;  %v6610_v48 = vsub.f32 %v7174_v21, %v2016_v52 }
 0x7a1   :  { %v1715_v33 = vadd.f32 %v1714_v16, %v1713_v32  ;;  %v6614_v44 = vsub.f32 %v7175_v39, %v2016_v52  ;;  %v6618_v30 = vsub.f32 %v7176_v1, %v2016_v52  ;;  %v6622_v17 = vsub.f32 %v7177_v6, %v2016_v52 }
 0x7a2   :  { %v6624_v2 = vsub.f32 %v1994_v46, %v2016_v52  ;;  %v2025_v50 = vmul.f32 %v6602_v18, %v6602_v18  ;;  %v2026_v27 = vmul.f32 %v6606_v41, %v6606_v41  ;;  %v2027_v49 = vmul.f32 %v6610_v48, %v6610_v48 }
 0x7a3   :  { %v1716_v37 = vrot.slane %v1715_v33, 2  ;;  %v2028_v61 = vmul.f32 %v6614_v44, %v6614_v44  ;;  %v2029_v32 = vmul.f32 %v6618_v30, %v6618_v30  ;;  %v2030_v1 = vmul.f32 %v6598_v51, %v6598_v51 }
 0x7a4   :  { %v2033_v55 = vsel %vm920_vm2, %v2025_v50, 0.0  ;;  %v2034_v35 = vsel %vm920_vm2, %v2026_v27, 0.0  ;;  %v2036_v52 = vsel %vm920_vm2, %v2027_v49, 0.0  ;;  %v7178_v50 = vmax.f32 %v6554_v53, 0.0 }
 0x7a5   :  { %v1717_v47 = vadd.f32 %v1716_v37, %v1715_v33  ;;  %v2035_v46 = vadd.f32 %v2034_v35, %v2033_v55  ;;  %v2038_v36 = vsel %vm920_vm2, %v2028_v61, 0.0  ;;  %v2040_v33 = vsel %vm920_vm2, %v2029_v32, 0.0 }
 0x7a6   :  { %v7179_v37 = vmax.f32 %v6566_v13, 0.0  ;;  %v7180_v49 = vmax.f32 %v6557_v22, 0.0  ;;  %v7181_v61 = vmax.f32 %v6563_v9, 0.0  ;;  %v2031_v9 = vmul.f32 %v6622_v17, %v6622_v17 }
 0x7a7   :  { %v1718_v42 = vrot.slane %v1717_v47, 1  ;;  %v2037_v16 = vadd.f32 %v2036_v52, %v2035_v46 }
 0x7a9   :  { %v1719_v25 = vadd.f32 %v1718_v42, %v1717_v47  ;;  %v2039_v21 = vadd.f32 %v2038_v36, %v2037_v16 }
 0x7ab   :  { %v1720_v39 = vmul.f32 0.015625, %v1719_v25  ;;  %v2041_v6 = vadd.f32 %v2040_v33, %v2039_v21  ;;  %v2032_v25 = vmul.f32 %v6624_v2, %v6624_v2 }
 0x7ad   :  { %v6645_v27 = vsub.f32 %v7178_v50, %v1720_v39  ;;  %v6649_v55 = vsub.f32 %v7179_v37, %v1720_v39  ;;  %v6653_v47 = vsub.f32 %v7180_v49, %v1720_v39  ;;  %v6657_v35 = vsub.f32 %v7181_v61, %v1720_v39 }
 0x7ae   :  { %v6659_v46 = vsub.f32 %v1695_v28, %v1720_v39  ;;  %v6661_v42 = vsub.f32 %v1696_v40, %v1720_v39  ;;  %v6663_v32 = vsub.f32 %v1697_v34, %v1720_v39  ;;  %v6665_v53 = vsub.f32 %v1698_v0, %v1720_v39 }
 0x7af   :  { %v1729_v13 = vmul.f32 %v6645_v27, %v6645_v27  ;;  %v1730_v22 = vmul.f32 %v6649_v55, %v6649_v55  ;;  %v1731_v52 = vmul.f32 %v6653_v47, %v6653_v47  ;;  %v1732_v28 = vmul.f32 %v6657_v35, %v6657_v35 }
 0x7b0   :  { %v2042_v0 = vsel %vm920_vm2, %v2030_v1, 0.0  ;;  %v1733_v36 = vmul.f32 %v6659_v46, %v6659_v46  ;;  %v2044_v50 = vsel %vm920_vm2, %v2031_v9, 0.0  ;;  %v1734_v37 = vmul.f32 %v6661_v42, %v6661_v42 }
 0x7b1   :  { %v1737_v34 = vsel %vm920_vm2, %v1729_v13, 0.0  ;;  %v1738_v40 = vsel %vm920_vm2, %v1730_v22, 0.0  ;;  %v1740_v21 = vsel %vm920_vm2, %v1731_v52, 0.0  ;;  %v2043_v39 = vadd.f32 %v2042_v0, %v2041_v6 }
 0x7b2   :  { %v1739_v16 = vadd.f32 %v1738_v40, %v1737_v34  ;;  %v1742_v49 = vsel %vm920_vm2, %v1732_v28, 0.0  ;;  %v2046_v13 = vsel %vm920_vm2, %v2032_v25, 0.0  ;;  %v1735_v22 = vmul.f32 %v6663_v32, %v6663_v32 }
 0x7b3   :  { %v2045_v61 = vadd.f32 %v2044_v50, %v2043_v39  ;;  %v1744_v34 = vsel %vm920_vm2, %v1733_v36, 0.0  ;;  %v1736_v6 = vmul.f32 %v6665_v53, %v6665_v53  ;;  %v1746_v9 = vsel %vm920_vm2, %v1734_v37, 0.0 }
 0x7b4   :  { %v1741_v33 = vadd.f32 %v1740_v21, %v1739_v16  ;;  %v1748_v28 = vsel %vm920_vm2, %v1735_v22, 0.0 }
 0x7b5   :  { %v2047_v40 = vadd.f32 %v2046_v13, %v2045_v61  ;;  %v1750_v25 = vsel %vm920_vm2, %v1736_v6, 0.0 }
 0x7b6   :  { %v1743_v1 = vadd.f32 %v1742_v49, %v1741_v33 }
 0x7b7   :  { %v2048_v0 = vrot.slane %v2047_v40, 4 }
 0x7b8   :  { %v1745_v52 = vadd.f32 %v1744_v34, %v1743_v1 }
 0x7b9   :  { %v2049_v21 = vadd.f32 %v2048_v0, %v2047_v40  ;;  %v3916_v0 = vld [vmem:[#allocation41] ss:$0 sm:$0xff] }
 0x7ba   :  { %v1747_v16 = vadd.f32 %v1746_v9, %v1745_v52 }
 0x7bb   :  { %v2050_v33 = vrot.slane %v2049_v21, 2 }
 0x7bc   :  { %v1749_v39 = vadd.f32 %v1748_v28, %v1747_v16 }
 0x7bd   :  { %v2051_v49 = vadd.f32 %v2050_v33, %v2049_v21  ;;  %v3917_v21 = vld [vmem:[#allocation43] ss:$0 sm:$0xff] }
 0x7be   :  { %v1751_v50 = vadd.f32 %v1750_v25, %v1749_v39 }
 0x7bf   :  { %v2052_v36 = vrot.slane %v2051_v49, 1 }
 0x7c0   :  { %v1752_v12 = vrot.slane %v1751_v50, 4 }
 0x7c1   :  { %v2053_v1 = vadd.f32 %v2052_v36, %v2051_v49 }
 0x7c2   :  { %v1753_v61 = vadd.f32 %v1752_v12, %v1751_v50 }
 0x7c3   :  { %v2054_v34 = vmul.f32 0.015625, %v2053_v1 }
 0x7c4   :  { %v1754_v13 = vrot.slane %v1753_v61, 2 }
 0x7c5   :  { %v2055_v29 = vadd.f32 1e-05, %v2054_v34 }
 0x7c6   :  { %v1755_v19 = vadd.f32 %v1754_v13, %v1753_v61 }
 0x7c7   :  { %4646 = vrsqrt.f32 %v2055_v29 }
 0x7c8   :  { %v1756_v37 = vrot.slane %v1755_v19, 1 }
 0x7ca   :  { %v1757_v52 = vadd.f32 %v1756_v37, %v1755_v19  ;;  %v3906_v37 = vld [vmem:[#allocation19] ss:$0 sm:$0xff] }
 0x7cc   :  { %v1758_v9 = vmul.f32 0.015625, %v1757_v52 }
 0x7ce   :  { %v1759_v22 = vadd.f32 1e-05, %v1758_v9 }
 0x7d0   :  { %4648 = vrsqrt.f32 %v1759_v22 }
 0x7d1   :  { %v4647_v40 = vpop.eup %4646 }
 0x7d2   :  { %v2058_v6 = vmul.f32 %v4647_v40, %v6606_v41  ;;  %v2057_v16 = vmul.f32 %v4647_v40, %v6602_v18  ;;  %v2060_v28 = vmul.f32 %v4647_v40, %v6614_v44  ;;  %v2059_v12 = vmul.f32 %v4647_v40, %v6610_v48  ;;  %v3905_v44 = vld [vmem:[#allocation17] ss:$0 sm:$0xff] }
 0x7d3   :  { %v2062_v39 = vmul.f32 %v4647_v40, %v6598_v51  ;;  %v2061_v25 = vmul.f32 %v4647_v40, %v6618_v30  ;;  %v2064_v19 = vmul.f32 %v4647_v40, %v6624_v2  ;;  %v2063_v29 = vmul.f32 %v4647_v40, %v6622_v17 }
 0x7d4   :  { %v2073_v33 = vmul.f32 %v3916_v0, %v2058_v6  ;;  %v2072_v50 = vmul.f32 %v3916_v0, %v2057_v16  ;;  %v2075_v49 = vmul.f32 %v3916_v0, %v2060_v28  ;;  %v2074_v36 = vmul.f32 %v3916_v0, %v2059_v12 }
 0x7d5   :  { %v2077_v18 = vmul.f32 %v3916_v0, %v2062_v39  ;;  %v2076_v30 = vmul.f32 %v3916_v0, %v2061_v25 }
 0x7d6   :  { %v2088_v41 = vadd.f32 %v3917_v21, %v2073_v33  ;;  %v2087_v61 = vadd.f32 %v3917_v21, %v2072_v50  ;;  %v2090_v51 = vadd.f32 %v3917_v21, %v2075_v49  ;;  %v2089_v48 = vadd.f32 %v3917_v21, %v2074_v36 }
 0x7d7   :  { %v2092_v25 = vadd.f32 %v3917_v21, %v2077_v18  ;;  %v2078_v33 = vmul.f32 %v3916_v0, %v2063_v29 }
 0x7d8   :  { %2226 = vrot.lane.b32.xlu0 %v2088_v41, %s5558_s7  ;;  %2224 = vrot.lane.b32.xlu1 %v2087_v61, %s5558_s7 }
 0x7da   :  { %v4649_v1 = vpop.eup %4648 }
 0x7db   :  { %v1763_v2 = vmul.f32 %v4649_v1, %v6653_v47  ;;  %v1764_v17 = vmul.f32 %v4649_v1, %v6657_v35  ;;  %v1766_v13 = vmul.f32 %v4649_v1, %v6661_v42  ;;  %v1761_v34 = vmul.f32 %v4649_v1, %v6645_v27 }
 0x7dc   :  { %v1762_v52 = vmul.f32 %v4649_v1, %v6649_v55  ;;  %v1765_v9 = vmul.f32 %v4649_v1, %v6659_v46  ;;  %v1767_v22 = vmul.f32 %v4649_v1, %v6663_v32  ;;  %v1768_v40 = vmul.f32 %v4649_v1, %v6665_v53  ;;  %2230 = vrot.lane.b32.xlu0 %v2090_v51, %s5558_s7 }
 0x7dd   :  { %v1779_v6 = vmul.f32 %v3905_v44, %v1764_v17  ;;  %v1781_v16 = vmul.f32 %v3905_v44, %v1766_v13  ;;  %v1776_v28 = vmul.f32 %v3905_v44, %v1761_v34  ;;  %v1778_v12 = vmul.f32 %v3905_v44, %v1763_v2  ;;  %2228 = vrot.lane.b32.xlu1 %v2089_v48, %s5558_s7 }
 0x7de   :  { %v1777_v47 = vmul.f32 %v3905_v44, %v1762_v52  ;;  %v1780_v35 = vmul.f32 %v3905_v44, %v1765_v9  ;;  %v2079_v27 = vmul.f32 %v3916_v0, %v2064_v19  ;;  %v2091_v46 = vadd.f32 %v3917_v21, %v2076_v30 }
 0x7df   :  { %v1791_v42 = vadd.f32 %v3906_v37, %v1776_v28  ;;  %v1793_v39 = vadd.f32 %v3906_v37, %v1778_v12  ;;  %v1794_v55 = vadd.f32 %v3906_v37, %v1779_v6  ;;  %v1796_v50 = vadd.f32 %v3906_v37, %v1781_v16  ;;  %v4610_v16 = vld [vmem:[#allocation20] sm:$0xff]  }
 0x7e0   :  { %v1792_v32 = vadd.f32 %v3906_v37, %v1777_v47  ;;  %v1795_v49 = vadd.f32 %v3906_v37, %v1780_v35  ;;  %2234 = vrot.lane.b32.xlu0 %v2092_v25, %s5558_s7  ;;  %v1782_v41 = vmul.f32 %v3905_v44, %v1767_v22  ;;  %v1783_v61 = vmul.f32 %v3905_v44, %v1768_v40 }
 0x7e1   :  { %v2096_v53 = vpack.c.bf16 %v1794_v55, %v1793_v39  ;;  %2232 = vrot.lane.b32.xlu1 %v2091_v46, %s5558_s7  ;;  %v2094_v1 = vadd.f32 %v3917_v21, %v2079_v27  ;;  %v2093_v51 = vadd.f32 %v3917_v21, %v2078_v33  ;;  %v4547_v18 = vpack.i.bf16 %v1794_v55, %v1793_v39 }
 0x7e2   :  { %v2095_v36 = vpack.c.bf16 %v1792_v32, %v1791_v42  ;;  %v2097_v19 = vpack.c.bf16 %v1796_v50, %v1795_v49  ;;  %v1797_v0 = vadd.f32 %v3906_v37, %v1782_v41  ;;  %v1798_v29 = vadd.f32 %v3906_v37, %v1783_v61  ;;  %v4617_v41 = vld [vmem:[#allocation20 + $0x38] sm:$0xff]   ;;  %v4618_v61 = vld [vmem:[#allocation44] sm:$0xff]  }
 0x7e3   :  { %v4542_v48 = vpack.i.bf16 %v1792_v32, %v1791_v42  ;;  %v4552_v30 = vpack.i.bf16 %v1796_v50, %v1795_v49 }
 0x7e4   :  { %4216 = vmatprep.mubr.msk.bf16.mxu0 %vm920_vm2, %v2095_v36  ;;  %2238 = vrot.lane.b32.xlu0 %v2094_v1, %s5558_s7  ;;  %v2098_v21 = vpack.c.bf16 %v1798_v29, %v1797_v0  ;;  %v4557_v44 = vpack.i.bf16 %v1798_v29, %v1797_v0  ;;  %v4616_v36 = vld [vmem:[#allocation20 + $0x30] sm:$0xff]  }
 0x7e5   :  { %4217 = vmatmul.mubr.msk.bf16.vlgmr.msra.gmra.mrb[12].mxu0 %vm920_vm2, %v2096_v53  ;;  %2236 = vrot.lane.b32.xlu1 %v2093_v51, %s5558_s7  ;;  %v4614_v53 = vld [vmem:[#allocation20 + $0x20] sm:$0xff]   ;;  %v4619_v1 = vld [vmem:[#allocation44 + $0x8] sm:$0xff]   ;;  %v4620_v51 = vld [vmem:[#allocation44 + $0x10] sm:$0xff]  }
 0x7e6   :  { %4220 = vmatprep.mubr.msk.bf16.mxu0 %vm920_vm2, %v2097_v19  ;;  %v4621_v19 = vld [vmem:[#allocation44 + $0x18] sm:$0xff]  }
 0x7e8   :  { %4548 = vrot.lane.b32.xlu0 %v4547_v18, %s5558_s7  ;;  %v4624_v18 = vld [vmem:[#allocation44 + $0x30] sm:$0xff]  }
 0x7e9   :  { %4543 = vrot.lane.b32.xlu1 %v4542_v48, %s5558_s7  ;;  %v4625_v48 = vld [vmem:[#allocation44 + $0x38] sm:$0xff]  }
 0x7ec   :  { %4558 = vrot.lane.b32.xlu0 %v4557_v44, %s5558_s7 }
 0x7ed   :  { %4221 = vmatmul.mubr.msk.bf16.gmra.mrb[16].mxu0 %vm920_vm2, %v2098_v21  ;;  %4553 = vrot.lane.b32.xlu1 %v4552_v30, %s5558_s7 }
 0x7ee   :  { %4236 = vmatprep.mubr.msk.bf16.mxu0 %vm548_vm0, %v6002_v20 }
 0x84a   :  { %v6732_v2 = vpop.permute.xlu0 %2226  ;;  %v6734_v17 = vpop.permute.xlu1 %2224 }
 0x84b   :  { %v2249_v13 = vsel %vm920_vm2, %v1792_v32, %v6732_v2  ;;  %v2248_v34 = vsel %vm920_vm2, %v1791_v42, %v6734_v17  ;;  %v4611_v42 = vld [vmem:[#allocation20 + $0x8] sm:$0xff]   ;;  %v4612_v32 = vld [vmem:[#allocation20 + $0x10] sm:$0xff]  }
 0x84c   :  { %v2256_v37 = vpack.c.bf16 %v2249_v13, %v2248_v34 }
 0x84e   :  { %v6740_v52 = vpop.permute.xlu0 %2230  ;;  %4224 = vmatprep.subr.bf16.mxu1 %v2256_v37 }
 0x84f   :  { %v6742_v9 = vpop.permute.xlu1 %2228  ;;  %v2251_v22 = vsel %vm920_vm2, %v1794_v55, %v6740_v52  ;;  %4225 = vmatpush3.bf16.msra.mxu1 %v2256_v37 }
 0x850   :  { %v2250_v40 = vsel %vm920_vm2, %v1793_v39, %v6742_v9 }
 0x851   :  { %v2257_v6 = vpack.c.bf16 %v2251_v22, %v2250_v40 }
 0x852   :  { %v6748_v28 = vpop.permute.xlu0 %2234 }
 0x853   :  { %v6750_v12 = vpop.permute.xlu1 %2232  ;;  %4226 = vmatprep.subr.bf16.mxu1 %v2257_v6  ;;  %v2253_v47 = vsel %vm920_vm2, %v1796_v50, %v6748_v28  ;;  %v4613_v50 = vld [vmem:[#allocation20 + $0x18] sm:$0xff]  }
 0x854   :  { %v2252_v35 = vsel %vm920_vm2, %v1795_v49, %v6750_v12  ;;  %4227 = vmatpush3.bf16.msra.mxu1 %v2257_v6  ;;  %v4615_v49 = vld [vmem:[#allocation20 + $0x28] sm:$0xff]  }
 0x855   :  { %v2258_v27 = vpack.c.bf16 %v2253_v47, %v2252_v35  ;;  %4240 = vmatprep.subr.bf16.mxu1 %v4610_v16 }
 0x856   :  { %v6756_v55 = vpop.permute.xlu0 %2238 }
 0x857   :  { %v6758_v39 = vpop.permute.xlu1 %2236  ;;  %4229 = vmatmul.mubr.msk.bf16.vlgmr.msra.gmra.mrb[28].mxu1 %vm548_vm0, %v6007_v24  ;;  %4232 = vmatprep.subr.bf16.mxu0 %v2258_v27  ;;  %v2255_v25 = vsel %vm920_vm2, %v1798_v29, %v6756_v55  ;;  %v4623_v29 = vld [vmem:[#allocation44 + $0x28] sm:$0xff]  }
 0x858   :  { %v2254_v46 = vsel %vm920_vm2, %v1797_v0, %v6758_v39  ;;  %4233 = vmatpush3.bf16.msra.mxu0 %v2258_v27  ;;  %4241 = vmatpush3.bf16.msra.mxu1 %v4610_v16  ;;  %v4622_v0 = vld [vmem:[#allocation44 + $0x20] sm:$0xff]  }
 0x859   :  { %v2259_v33 = vpack.c.bf16 %v2255_v25, %v2254_v46  ;;  %4242 = vmatprep.subr.bf16.mxu1 %v4611_v42 }
 0x85a   :  { %v4549_v21 = vpop.permute.xlu0 %4548 }
 0x85b   :  { %4234 = vmatprep.subr.bf16.mxu0 %v2259_v33  ;;  %v4544_v30 = vpop.permute.xlu1 %4543  ;;  %v4551_v40 = vunpack.i.h.bf16 %v4549_v21  ;;  %v4550_v6 = vunpack.i.l.bf16 %v4549_v21 }
 0x85c   :  { %4235 = vmatpush3.bf16.msra.mxu0 %v2259_v33  ;;  %4243 = vmatpush3.bf16.msra.mxu1 %v4611_v42  ;;  %v4546_v35 = vunpack.i.h.bf16 %v4544_v30  ;;  %v4545_v27 = vunpack.i.l.bf16 %v4544_v30 }
 0x85d   :  { %4244 = vmatprep.subr.bf16.mxu1 %v4612_v32  ;;  %4264 = vmatprep.subr.bf16.mxu0 %v4618_v61 }
 0x85f   :  { %4237 = vmatmul.mubr.msk.bf16.vlgmr.msra.gmra.mrb[28].mxu0 %vm548_vm0, %v6017_v31 }
 0x860   :  { %4245 = vmatpush3.bf16.msra.mxu1 %v4612_v32  ;;  %4265 = vmatpush3.bf16.msra.mxu0 %v4618_v61 }
 0x861   :  { %4246 = vmatprep.subr.bf16.mxu1 %v4613_v50  ;;  %4266 = vmatprep.subr.bf16.mxu0 %v4619_v1 }
 0x864   :  { %4247 = vmatpush3.bf16.msra.mxu1 %v4613_v50  ;;  %4267 = vmatpush3.bf16.msra.mxu0 %v4619_v1 }
 0x865   :  { %4248 = vmatprep.subr.bf16.mxu1 %v4614_v53  ;;  %4268 = vmatprep.subr.bf16.mxu0 %v4620_v51 }
 0x868   :  { %4249 = vmatpush3.bf16.msra.mxu1 %v4614_v53  ;;  %4269 = vmatpush3.bf16.msra.mxu0 %v4620_v51 }
 0x869   :  { %4250 = vmatprep.subr.bf16.mxu1 %v4615_v49  ;;  %4270 = vmatprep.subr.bf16.mxu0 %v4621_v19 }
 0x86c   :  { %4251 = vmatpush3.bf16.msra.mxu1 %v4615_v49  ;;  %4271 = vmatpush3.bf16.msra.mxu0 %v4621_v19 }
 0x86d   :  { %4252 = vmatprep.subr.bf16.mxu1 %v4616_v36  ;;  %4272 = vmatprep.subr.bf16.mxu0 %v4622_v0 }
 0x870   :  { %4253 = vmatpush3.bf16.msra.mxu1 %v4616_v36  ;;  %4273 = vmatpush3.bf16.msra.mxu0 %v4622_v0  ;;  %v4554_v36 = vpop.permute.xlu1 %4553 }
 0x871   :  { %4254 = vmatprep.subr.bf16.mxu1 %v4617_v41  ;;  %4274 = vmatprep.subr.bf16.mxu0 %v4623_v29 }
 0x874   :  { %4255 = vmatpush3.bf16.msra.mxu1 %v4617_v41  ;;  %4275 = vmatpush3.bf16.msra.mxu0 %v4623_v29 }
 0x875   :  { %4276 = vmatprep.subr.bf16.mxu0 %v4624_v18 }
 0x878   :  { %4277 = vmatpush3.bf16.msra.mxu0 %v4624_v18  ;;  %v4556_v18 = vunpack.i.h.bf16 %v4554_v36 }
 0x879   :  { %4278 = vmatprep.subr.bf16.mxu0 %v4625_v48 }
 0x87c   :  { %4279 = vmatpush3.bf16.msra.mxu0 %v4625_v48  ;;  %v4555_v48 = vunpack.i.l.bf16 %v4554_v36 }
 0x92a   :  { %v4230_v44 = vpop.f32.mrb[28].mxu1 }
 0x92b   :  { %v2360_v13 = vmul.f32 %v6029_v3, %v4230_v44  ;;  %v2294_v34 = vpop.f32.mrb[29].mxu1 }
 0x92c   :  { %v2358_v37 = vmul.f32 %v6031_v4, %v2294_v34  ;;  %v4231_v22 = vpop.f32.mrb[30].mxu1 }
 0x92d   :  { %v2361_v16 = vmul.f32 %v6033_v5, %v4231_v22  ;;  %v2297_v47 = vpop.f32.mrb[31].mxu1  ;;  %v2400_v25 = vsel %vm920_vm2, %v2360_v13, %v4550_v6  ;;  %v4559_v5 = vpop.permute.xlu0 %4558 }
 0x92e   :  { %v2359_v42 = vmul.f32 %v6035_v7, %v2297_v47  ;;  %v2398_v50 = vsel %vm920_vm2, %v2358_v37, %v4545_v27  ;;  %v4561_v51 = vunpack.i.h.bf16 %v4559_v5  ;;  %v4560_v19 = vunpack.i.l.bf16 %v4559_v5 }
 0x92f   :  { %v2401_v46 = vsel %vm920_vm2, %v2361_v16, %v4551_v40  ;;  %v4567_v33 = vpack.i.bf16 %v2361_v16, %v2360_v13 }
 0x930   :  { %v2407_v32 = vpack.c.bf16 %v2401_v46, %v2400_v25  ;;  %v4562_v3 = vpack.i.bf16 %v2359_v42, %v2358_v37  ;;  %v2399_v4 = vsel %vm920_vm2, %v2359_v42, %v4546_v35 }
 0x931   :  { %4568 = vrot.lane.b32.xlu0 %v4567_v33, %s5558_s7  ;;  %v2406_v53 = vpack.c.bf16 %v2399_v4, %v2398_v50 }
 0x932   :  { %4563 = vrot.lane.b32.xlu1 %v4562_v3, %s5558_s7  ;;  %v4238_v49 = vpop.f32.mrb[28].mxu0 }
 0x933   :  { %v2364_v7 = vmul.f32 %v6037_v8, %v4238_v49  ;;  %v2343_v41 = vpop.f32.mrb[29].mxu0  ;;  %4256 = vmatprep.mubr.bf16.mxu1 %v2406_v53 }
 0x934   :  { %v2362_v61 = vmul.f32 %v6039_v10, %v2343_v41  ;;  %v4239_v1 = vpop.f32.mrb[30].mxu0  ;;  %4257 = vmatmul.mubr.bf16.vlgmr.msra.gmra.mrb[32].mxu1 %v2407_v32 }
 0x935   :  { %v2365_v0 = vmul.f32 %v6041_v15, %v4239_v1  ;;  %v2346_v29 = vpop.f32.mrb[31].mxu0  ;;  %v2404_v30 = vsel %vm920_vm2, %v2364_v7, %v4560_v19  ;;  %v7182_v15 = vmov 0   ;;  %v2963_v19 = vld [vmem:[#allocation29] sm:$0xf] }
 0x936   :  { %v2363_v21 = vmul.f32 %v6044_v23, %v2346_v29  ;;  %v2402_v34 = vsel %vm920_vm2, %v2362_v61, %v4555_v48  ;;  %4370 = vmatprep.subr.msk.bf16.mxu0 %vm2976_vm3, %v2963_v19  ;;  %v3930_v29 = vld [vmem:[#allocation22] ss:$0 sm:$0xff] }
 0x937   :  { %v4577_v44 = vpack.i.bf16 %v2365_v0, %v2364_v7  ;;  %v2405_v8 = vsel %vm920_vm2, %v2365_v0, %v4561_v51  ;;  %v2978_v0 = vsel %vm2976_vm3, %v2963_v19, 0 }
 0x938   :  { %v4572_v13 = vpack.i.bf16 %v2363_v21, %v2362_v61  ;;  %v2403_v10 = vsel %vm920_vm2, %v2363_v21, %v4556_v18  ;;  %v2409_v37 = vpack.c.bf16 %v2405_v8, %v2404_v30 }
 0x939   :  { %4578 = vrot.lane.b32.xlu0 %v4577_v44, %s5558_s7  ;;  %v2408_v22 = vpack.c.bf16 %v2403_v10, %v2402_v34 }
 0x93a   :  { %4573 = vrot.lane.b32.xlu1 %v4572_v13, %s5558_s7  ;;  %s5593_s7 = smov [#allocation51]  }
 0x93b   :  { %4260 = vmatprep.mubr.bf16.mxu1 %v2408_v22  ;;  %s3769_s22 = sshll.u32 %s5593_s7, 4  ;;  %s3770_s22 = int_to_ptr.vmem [resolvable:$true] %s3769_s22 }
 0x93c   :  { %4261 = vmatmul.mubr.bf16.gmra.mrb[36].mxu1 %v2409_v37  ;;  %s5394_s17 = scalar_lea.vmem %s3770_s22, 256  ;;  %p5399_p11 = scmp.lt.s32.totalorder %s3770_s22, %s3770_s22 }
 0x93d   :  { %3294 = vmatprep.mubr.bf16.mxu1 %v7182_v15  ;;  %p5395_p10 = scmp.ne.s32.totalorder %s3770_s22, %s5394_s17  ;;  %p5400_p12 = scmp.lt.s32.totalorder %s5394_s17, %s5394_s17 }
 0x93f   :  { %p5401_p13 = por %p5400_p12, %p5399_p11 }
 0x941   :  { %p5402_p0 = pnand %p5401_p13, %p5395_p10 }
 0x9a3   :  { %v4569_v23 = vpop.permute.xlu0 %4568 }
 0x9a4   :  { %v4571_v40 = vunpack.i.h.bf16 %v4569_v23  ;;  %v4570_v6 = vunpack.i.l.bf16 %v4569_v23  ;;  %v4564_v16 = vpop.permute.xlu1 %4563 }
 0x9a5   :  { %v4566_v47 = vunpack.i.h.bf16 %v4564_v16  ;;  %v4565_v35 = vunpack.i.l.bf16 %v4564_v16 }
 0x9a6   :  { %v2698_v27 = vsel %vm920_vm2, %v4571_v40, %v6740_v52  ;;  %v2697_v42 = vsel %vm920_vm2, %v4570_v6, %v6742_v9 }
 0x9a7   :  { %v2695_v25 = vsel %vm920_vm2, %v4565_v35, %v6734_v17  ;;  %v2696_v46 = vsel %vm920_vm2, %v4566_v47, %v6732_v2  ;;  %v2704_v32 = vpack.c.bf16 %v2698_v27, %v2697_v42 }
 0x9a8   :  { %v2703_v33 = vpack.c.bf16 %v2696_v46, %v2695_v25 }
 0x9aa   :  { %4280 = vmatprep.mubr.bf16.mxu0 %v2703_v33 }
 0x9ab   :  { %4281 = vmatmul.mubr.bf16.vlgmr.msra.gmra.mrb[32].mxu0 %v2704_v32  ;;  %v4579_v3 = vpop.permute.xlu0 %4578 }
 0x9ac   :  { %v4581_v50 = vunpack.i.h.bf16 %v4579_v3  ;;  %v4580_v4 = vunpack.i.l.bf16 %v4579_v3  ;;  %v4574_v53 = vpop.permute.xlu1 %4573  ;;  %4289 = vmatpush3.bf16.msra.mxu0 %v2978_v0 }
 0x9ad   :  { %v4576_v5 = vunpack.i.h.bf16 %v4574_v53  ;;  %v4575_v49 = vunpack.i.l.bf16 %v4574_v53 }
 0x9ae   :  { %v2701_v36 = vsel %vm920_vm2, %v4580_v4, %v6758_v39  ;;  %v2702_v7 = vsel %vm920_vm2, %v4581_v50, %v6756_v55 }
 0x9af   :  { %v2699_v41 = vsel %vm920_vm2, %v4575_v49, %v6750_v12  ;;  %v2700_v61 = vsel %vm920_vm2, %v4576_v5, %v6748_v28  ;;  %v2706_v51 = vpack.c.bf16 %v2702_v7, %v2701_v36 }
 0x9b0   :  { %v2705_v1 = vpack.c.bf16 %v2700_v61, %v2699_v41 }
 0x9b2   :  { %4284 = vmatprep.mubr.bf16.mxu0 %v2705_v1 }
 0x9b3   :  { %4285 = vmatmul.mubr.bf16.gmra.mrb[36].mxu0 %v2706_v51 }
 0xa07   :  { %v4258_v18 = vpop.f32.mrb[32].mxu1 }
 0xa08   :  { %v2524_v48 = vadd.f32 %v4258_v18, %v3930_v29  ;;  %v2515_v21 = vpop.f32.mrb[33].mxu1 }
 0xa09   :  { %v2516_v44 = vadd.f32 %v3930_v29, %v2515_v21  ;;  %v4259_v30 = vpop.f32.mrb[34].mxu1 }
 0xa0a   :  { %v2527_v8 = vadd.f32 %v4259_v30, %v3930_v29  ;;  %v2518_v13 = vpop.f32.mrb[35].mxu1  ;;  %v2548_v34 = vmul.f32 %v2524_v48, %v6079_v62 }
 0xa0b   :  { %v2546_v10 = vmul.f32 %v2516_v44, %v6073_v59  ;;  %v2519_v37 = vadd.f32 %v3930_v29, %v2518_v13 }
 0xa0c   :  { %v2549_v23 = vmul.f32 %v2527_v8, %v6093_v26  ;;  %v2556_v6 = vmax.f32 %v2548_v34, 0.0 }
 0xa0d   :  { %v2554_v22 = vmax.f32 %v2546_v10, 0.0  ;;  %v2547_v40 = vmul.f32 %v2519_v37, %v6071_v58 }
 0xa0e   :  { %v2557_v25 = vmax.f32 %v2549_v23, 0.0  ;;  %v2566_v53 = vsel %vm2562_vm4, %v2556_v6, 0.0 }
 0xa0f   :  { %v2555_v16 = vmax.f32 %v2547_v40, 0.0  ;;  %v4262_v47 = vpop.f32.mrb[36].mxu1  ;;  %v2563_v42 = vsel %vm2562_vm4, %v2554_v22, 0.0 }
 0xa10   :  { %v2540_v35 = vadd.f32 %v4262_v47, %v3930_v29  ;;  %v2531_v27 = vpop.f32.mrb[37].mxu1  ;;  %v2568_v41 = vsel %vm2562_vm4, %v2557_v25, 0.0 }
 0xa11   :  { %v2564_v46 = vsel %vm2562_vm4, %v2555_v16, 0.0  ;;  %v2532_v33 = vadd.f32 %v3930_v29, %v2531_v27  ;;  %v4263_v32 = vpop.f32.mrb[38].mxu1 }
 0xa12   :  { %v2565_v3 = vadd.f32 %v2564_v46, %v2563_v42  ;;  %v2543_v50 = vadd.f32 %v4263_v32, %v3930_v29  ;;  %v2534_v4 = vpop.f32.mrb[39].mxu1  ;;  %v2552_v5 = vmul.f32 %v2540_v35, %v6163_v45 }
 0xa13   :  { %v2550_v49 = vmul.f32 %v2532_v33, %v6117_v38  ;;  %v2535_v36 = vadd.f32 %v3930_v29, %v2534_v4 }
 0xa14   :  { %v2567_v7 = vadd.f32 %v2566_v53, %v2565_v3  ;;  %v2553_v1 = vmul.f32 %v2543_v50, %v6177_v56  ;;  %v2560_v0 = vmax.f32 %v2552_v5, 0.0 }
 0xa15   :  { %v2558_v61 = vmax.f32 %v2550_v49, 0.0  ;;  %v2551_v51 = vmul.f32 %v2535_v36, %v6145_v11 }
 0xa16   :  { %v2569_v19 = vadd.f32 %v2568_v41, %v2567_v7  ;;  %v2561_v44 = vmax.f32 %v2553_v1, 0.0  ;;  %v2574_v29 = vsel %vm2562_vm4, %v2560_v0, 0.0 }
 0xa17   :  { %v2570_v18 = vsel %vm2562_vm4, %v2558_v61, 0.0  ;;  %v2559_v48 = vmax.f32 %v2551_v51, 0.0 }
 0xa18   :  { %v2571_v21 = vadd.f32 %v2570_v18, %v2569_v19  ;;  %v2576_v34 = vsel %vm2562_vm4, %v2561_v44, 0.0 }
 0xa19   :  { %v2572_v30 = vsel %vm2562_vm4, %v2559_v48, 0.0 }
 0xa1a   :  { %v2573_v8 = vadd.f32 %v2572_v30, %v2571_v21 }
 0xa1c   :  { %v2575_v13 = vadd.f32 %v2574_v29, %v2573_v8 }
 0xa1e   :  { %v2577_v10 = vadd.f32 %v2576_v34, %v2575_v13 }
 0xa20   :  { %v2578_v37 = vrot.slane %v2577_v10, 4 }
 0xa22   :  { %v2579_v23 = vadd.f32 %v2578_v37, %v2577_v10 }
 0xa24   :  { %v2580_v40 = vrot.slane %v2579_v23, 2 }
 0xa26   :  { %v2581_v47 = vadd.f32 %v2580_v40, %v2579_v23 }
 0xa28   :  { %v2582_v35 = vrot.slane %v2581_v47, 1 }
 0xa2a   :  { %v2583_v27 = vadd.f32 %v2582_v35, %v2581_v47 }
 0xa2c   :  { %v2584_v42 = vmul.f32 0.015625, %v2583_v27 }
 0xa2e   :  { %v2585_v46 = vsub.f32 %v2554_v22, %v2584_v42  ;;  %v2586_v33 = vsub.f32 %v2555_v16, %v2584_v42  ;;  %v2587_v32 = vsub.f32 %v2556_v6, %v2584_v42  ;;  %v2588_v3 = vsub.f32 %v2557_v25, %v2584_v42 }
 0xa2f   :  { %v2589_v50 = vsub.f32 %v2558_v61, %v2584_v42  ;;  %v2590_v4 = vsub.f32 %v2559_v48, %v2584_v42  ;;  %v2591_v53 = vsub.f32 %v2560_v0, %v2584_v42  ;;  %v2592_v5 = vsub.f32 %v2561_v44, %v2584_v42 }
 0xa30   :  { %v2593_v49 = vmul.f32 %v2585_v46, %v2585_v46  ;;  %v2594_v36 = vmul.f32 %v2586_v33, %v2586_v33  ;;  %v2595_v7 = vmul.f32 %v2587_v32, %v2587_v32  ;;  %v2596_v41 = vmul.f32 %v2588_v3, %v2588_v3 }
 0xa31   :  { %v2597_v18 = vmul.f32 %v2589_v50, %v2589_v50  ;;  %v2598_v16 = vmul.f32 %v2590_v4, %v2590_v4  ;;  %v2599_v61 = vmul.f32 %v2591_v53, %v2591_v53  ;;  %v2600_v44 = vmul.f32 %v2592_v5, %v2592_v5 }
 0xa32   :  { %v2601_v1 = vsel %vm2562_vm4, %v2593_v49, 0.0  ;;  %v2602_v51 = vsel %vm2562_vm4, %v2594_v36, 0.0  ;;  %v2604_v21 = vsel %vm2562_vm4, %v2595_v7, 0.0  ;;  %v2606_v6 = vsel %vm2562_vm4, %v2596_v41, 0.0  ;;  %v3939_v7 = vld [vmem:[#allocation23] ss:$0 sm:$0xff] }
 0xa33   :  { %v2603_v19 = vadd.f32 %v2602_v51, %v2601_v1  ;;  %v2608_v0 = vsel %vm2562_vm4, %v2597_v18, 0.0  ;;  %v2610_v30 = vsel %vm2562_vm4, %v2598_v16, 0.0  ;;  %v2612_v29 = vsel %vm2562_vm4, %v2599_v61, 0.0 }
 0xa34   :  { %v2614_v34 = vsel %vm2562_vm4, %v2600_v44, 0.0 }
 0xa35   :  { %v2605_v22 = vadd.f32 %v2604_v21, %v2603_v19  ;;  %v3940_v21 = vld [vmem:[#allocation25] ss:$0 sm:$0xff] }
 0xa37   :  { %v2607_v25 = vadd.f32 %v2606_v6, %v2605_v22 }
 0xa39   :  { %v2609_v48 = vadd.f32 %v2608_v0, %v2607_v25 }
 0xa3b   :  { %v2611_v8 = vadd.f32 %v2610_v30, %v2609_v48 }
 0xa3d   :  { %v2613_v13 = vadd.f32 %v2612_v29, %v2611_v8 }
 0xa3f   :  { %v2615_v10 = vadd.f32 %v2614_v34, %v2613_v13 }
 0xa41   :  { %v2616_v37 = vrot.slane %v2615_v10, 4 }
 0xa43   :  { %v2617_v23 = vadd.f32 %v2616_v37, %v2615_v10 }
 0xa45   :  { %v2618_v40 = vrot.slane %v2617_v23, 2 }
 0xa47   :  { %v2619_v47 = vadd.f32 %v2618_v40, %v2617_v23  ;;  %v3941_v23 = vld [vmem:[#allocation46] ss:$0 sm:$0xff] }
 0xa49   :  { %v2620_v35 = vrot.slane %v2619_v47, 1 }
 0xa4b   :  { %v2621_v27 = vadd.f32 %v2620_v35, %v2619_v47 }
 0xa4d   :  { %v2622_v42 = vmul.f32 0.015625, %v2621_v27 }
 0xa4f   :  { %v2623_v49 = vadd.f32 1e-05, %v2622_v42 }
 0xa51   :  { %4650 = vrsqrt.f32 %v2623_v49 }
 0xa5b   :  { %v4651_v36 = vpop.eup %4650 }
 0xa5c   :  { %v2627_v41 = vmul.f32 %v4651_v36, %v2587_v32  ;;  %v2628_v1 = vmul.f32 %v4651_v36, %v2588_v3  ;;  %v2630_v51 = vmul.f32 %v4651_v36, %v2590_v4  ;;  %v2625_v19 = vmul.f32 %v4651_v36, %v2585_v46 }
 0xa5d   :  { %v2626_v18 = vmul.f32 %v4651_v36, %v2586_v33  ;;  %v2629_v22 = vmul.f32 %v4651_v36, %v2589_v50  ;;  %v2631_v16 = vmul.f32 %v4651_v36, %v2591_v53  ;;  %v2632_v6 = vmul.f32 %v4651_v36, %v2592_v5 }
 0xa5e   :  { %v2645_v25 = vmul.f32 %v3939_v7, %v2630_v51  ;;  %v2640_v61 = vmul.f32 %v3939_v7, %v2625_v19  ;;  %v2642_v0 = vmul.f32 %v3939_v7, %v2627_v41  ;;  %v2643_v48 = vmul.f32 %v3939_v7, %v2628_v1 }
 0xa5f   :  { %v2641_v44 = vmul.f32 %v3939_v7, %v2626_v18  ;;  %v2644_v30 = vmul.f32 %v3939_v7, %v2629_v22  ;;  %v2646_v8 = vmul.f32 %v3939_v7, %v2631_v16  ;;  %v2647_v29 = vmul.f32 %v3939_v7, %v2632_v6 }
 0xa60   :  { %v2655_v13 = vadd.f32 %v3940_v21, %v2640_v61  ;;  %v2657_v34 = vadd.f32 %v3940_v21, %v2642_v0  ;;  %v2658_v10 = vadd.f32 %v3940_v21, %v2643_v48  ;;  %v2660_v32 = vadd.f32 %v3940_v21, %v2645_v25 }
 0xa61   :  { %v2656_v3 = vadd.f32 %v3940_v21, %v2641_v44  ;;  %v2659_v4 = vadd.f32 %v3940_v21, %v2644_v30  ;;  %v2661_v46 = vadd.f32 %v3940_v21, %v2646_v8  ;;  %v2662_v33 = vadd.f32 %v3940_v21, %v2647_v29 }
 0xa62   :  { %v2960_v37 = vpack.c.bf16 %v2658_v10, %v2657_v34 }
 0xa63   :  { %v2959_v50 = vpack.c.bf16 %v2656_v3, %v2655_v13  ;;  %v2961_v53 = vpack.c.bf16 %v2660_v32, %v2659_v4  ;;  %v2962_v5 = vpack.c.bf16 %v2662_v33, %v2661_v46 }
 0xa65   :  { %4290 = vmatprep.mubr.msk.bf16.mxu0 %vm2562_vm4, %v2959_v50 }
 0xa66   :  { %4291 = vmatmul.mubr.msk.bf16.vlgmr.msra.gmra.mrb[12].mxu0 %vm2562_vm4, %v2960_v37 }
 0xa67   :  { %4294 = vmatprep.mubr.msk.bf16.mxu0 %vm2562_vm4, %v2961_v53 }
 0xa6e   :  { %4295 = vmatmul.mubr.msk.bf16.gmra.mrb[16].mxu0 %vm2562_vm4, %v2962_v5 }
 0xa7e   :  { %v4282_v40 = vpop.f32.mrb[32].mxu0 }
 0xa7f   :  { %v2821_v47 = vadd.f32 %v4282_v40, %v3941_v23  ;;  %v2812_v35 = vpop.f32.mrb[33].mxu0 }
 0xa80   :  { %v2813_v27 = vadd.f32 %v3941_v23, %v2812_v35  ;;  %v4283_v42 = vpop.f32.mrb[34].mxu0 }
 0xa81   :  { %v2824_v49 = vadd.f32 %v4283_v42, %v3941_v23  ;;  %v2815_v36 = vpop.f32.mrb[35].mxu0  ;;  %v2845_v7 = vmul.f32 %v2821_v47, %v6079_v62 }
 0xa82   :  { %v2843_v41 = vmul.f32 %v2813_v27, %v6073_v59  ;;  %v2816_v1 = vadd.f32 %v3941_v23, %v2815_v36 }
 0xa83   :  { %v2846_v19 = vmul.f32 %v2824_v49, %v6093_v26  ;;  %v2853_v21 = vmax.f32 %v2845_v7, 0.0 }
 0xa84   :  { %v2851_v51 = vmax.f32 %v2843_v41, 0.0  ;;  %v2844_v18 = vmul.f32 %v2816_v1, %v6071_v58 }
 0xa85   :  { %v2854_v0 = vmax.f32 %v2846_v19, 0.0  ;;  %v2862_v34 = vsel %vm920_vm2, %v2853_v21, 0.0 }
 0xa86   :  { %v2852_v22 = vmax.f32 %v2844_v18, 0.0  ;;  %v4286_v16 = vpop.f32.mrb[36].mxu0  ;;  %v2859_v61 = vsel %vm920_vm2, %v2851_v51, 0.0 }
 0xa87   :  { %v2837_v6 = vadd.f32 %v4286_v16, %v3941_v23  ;;  %v2828_v25 = vpop.f32.mrb[37].mxu0  ;;  %v2864_v46 = vsel %vm920_vm2, %v2854_v0, 0.0 }
 0xa88   :  { %v2860_v48 = vsel %vm920_vm2, %v2852_v22, 0.0  ;;  %v2829_v44 = vadd.f32 %v3941_v23, %v2828_v25  ;;  %v4287_v30 = vpop.f32.mrb[38].mxu0 }
 0xa89   :  { %v2861_v8 = vadd.f32 %v2860_v48, %v2859_v61  ;;  %v2840_v29 = vadd.f32 %v4287_v30, %v3941_v23  ;;  %v2831_v13 = vpop.f32.mrb[39].mxu0  ;;  %v2849_v10 = vmul.f32 %v2837_v6, %v6163_v45 }
 0xa8a   :  { %v2847_v32 = vmul.f32 %v2829_v44, %v6117_v38  ;;  %v2832_v3 = vadd.f32 %v3941_v23, %v2831_v13 }
 0xa8b   :  { %v2863_v4 = vadd.f32 %v2862_v34, %v2861_v8  ;;  %v2850_v37 = vmul.f32 %v2840_v29, %v6177_v56  ;;  %v2857_v5 = vmax.f32 %v2849_v10, 0.0 }
 0xa8c   :  { %v2855_v33 = vmax.f32 %v2847_v32, 0.0  ;;  %v2848_v50 = vmul.f32 %v2832_v3, %v6145_v11 }
 0xa8d   :  { %v2865_v53 = vadd.f32 %v2864_v46, %v2863_v4  ;;  %v2858_v27 = vmax.f32 %v2850_v37, 0.0  ;;  %v2870_v23 = vsel %vm920_vm2, %v2857_v5, 0.0 }
 0xa8e   :  { %v2866_v40 = vsel %vm920_vm2, %v2855_v33, 0.0  ;;  %v2856_v47 = vmax.f32 %v2848_v50, 0.0 }
 0xa8f   :  { %v2867_v35 = vadd.f32 %v2866_v40, %v2865_v53  ;;  %v2872_v7 = vsel %vm920_vm2, %v2858_v27, 0.0 }
 0xa90   :  { %v2868_v42 = vsel %vm920_vm2, %v2856_v47, 0.0 }
 0xa91   :  { %v2869_v49 = vadd.f32 %v2868_v42, %v2867_v35 }
 0xa93   :  { %v2871_v36 = vadd.f32 %v2870_v23, %v2869_v49 }
 0xa95   :  { %v2873_v41 = vadd.f32 %v2872_v7, %v2871_v36 }
 0xa97   :  { %v2874_v1 = vrot.slane %v2873_v41, 4 }
 0xa99   :  { %v2875_v19 = vadd.f32 %v2874_v1, %v2873_v41 }
 0xa9b   :  { %v2876_v18 = vrot.slane %v2875_v19, 2 }
 0xa9d   :  { %v2877_v16 = vadd.f32 %v2876_v18, %v2875_v19 }
 0xa9f   :  { %v2878_v6 = vrot.slane %v2877_v16, 1 }
 0xaa1   :  { %v2879_v25 = vadd.f32 %v2878_v6, %v2877_v16 }
 0xaa3   :  { %v2880_v61 = vmul.f32 0.015625, %v2879_v25 }
 0xaa5   :  { %v2881_v48 = vsub.f32 %v2851_v51, %v2880_v61  ;;  %v2882_v44 = vsub.f32 %v2852_v22, %v2880_v61  ;;  %v2883_v30 = vsub.f32 %v2853_v21, %v2880_v61  ;;  %v2884_v8 = vsub.f32 %v2854_v0, %v2880_v61 }
 0xaa6   :  { %v2885_v29 = vsub.f32 %v2855_v33, %v2880_v61  ;;  %v2886_v13 = vsub.f32 %v2856_v47, %v2880_v61  ;;  %v2887_v34 = vsub.f32 %v2857_v5, %v2880_v61  ;;  %v2888_v10 = vsub.f32 %v2858_v27, %v2880_v61 }
 0xaa7   :  { %v2889_v32 = vmul.f32 %v2881_v48, %v2881_v48  ;;  %v2890_v3 = vmul.f32 %v2882_v44, %v2882_v44  ;;  %v2891_v4 = vmul.f32 %v2883_v30, %v2883_v30  ;;  %v2892_v46 = vmul.f32 %v2884_v8, %v2884_v8 }
 0xaa8   :  { %v2893_v40 = vmul.f32 %v2885_v29, %v2885_v29  ;;  %v2894_v22 = vmul.f32 %v2886_v13, %v2886_v13  ;;  %v2895_v33 = vmul.f32 %v2887_v34, %v2887_v34  ;;  %v2896_v27 = vmul.f32 %v2888_v10, %v2888_v10 }
 0xaa9   :  { %v2897_v37 = vsel %vm920_vm2, %v2889_v32, 0.0  ;;  %v2898_v50 = vsel %vm920_vm2, %v2890_v3, 0.0  ;;  %v2900_v35 = vsel %vm920_vm2, %v2891_v4, 0.0  ;;  %v2902_v21 = vsel %vm920_vm2, %v2892_v46, 0.0 }
 0xaaa   :  { %v2899_v53 = vadd.f32 %v2898_v50, %v2897_v37  ;;  %v2904_v5 = vsel %vm920_vm2, %v2893_v40, 0.0  ;;  %v2906_v42 = vsel %vm920_vm2, %v2894_v22, 0.0  ;;  %v2908_v23 = vsel %vm920_vm2, %v2895_v33, 0.0 }
 0xaab   :  { %v2910_v7 = vsel %vm920_vm2, %v2896_v27, 0.0  ;;  %v3062_v3 = vsel %vm920_vm2, %v6333_v63, %v6732_v2  ;;  %v3061_v4 = vsel %vm920_vm2, %v6330_v43, %v6734_v17  ;;  %v3063_v40 = vsel %vm920_vm2, %v6326_v57, %v6742_v9 }
 0xaac   :  { %v2901_v51 = vadd.f32 %v2900_v35, %v2899_v53  ;;  %v3167_v37 = vmul.f32 %v3062_v3, %v6071_v58  ;;  %v3165_v50 = vmul.f32 %v3061_v4, %v6073_v59  ;;  %v3064_v53 = vsel %vm920_vm2, %v6328_v14, %v6740_v52  ;;  %v3950_v35 = vld [vmem:[#allocation47] ss:$0 sm:$0xff] }
 0xaae   :  { %v2903_v0 = vadd.f32 %v2902_v21, %v2901_v51  ;;  %v3951_v21 = vld [vmem:[#allocation49] ss:$0 sm:$0xff] }
 0xab0   :  { %v2905_v47 = vadd.f32 %v2904_v5, %v2903_v0 }
 0xab2   :  { %v2907_v49 = vadd.f32 %v2906_v42, %v2905_v47 }
 0xab4   :  { %v2909_v36 = vadd.f32 %v2908_v23, %v2907_v49 }
 0xab6   :  { %v2911_v41 = vadd.f32 %v2910_v7, %v2909_v36 }
 0xab8   :  { %v2912_v1 = vrot.slane %v2911_v41, 4 }
 0xaba   :  { %v2913_v19 = vadd.f32 %v2912_v1, %v2911_v41 }
 0xabc   :  { %v2914_v18 = vrot.slane %v2913_v19, 2 }
 0xabe   :  { %v2915_v16 = vadd.f32 %v2914_v18, %v2913_v19 }
 0xac0   :  { %v2916_v6 = vrot.slane %v2915_v16, 1 }
 0xac2   :  { %v2917_v25 = vadd.f32 %v2916_v6, %v2915_v16  ;;  %v3251_v16 = vpack.c.bf16 %v3167_v37, %v3165_v50  ;;  %v3171_v6 = vmul.f32 %v3064_v53, %v6093_v26 }
 0xac4   :  { %v2918_v61 = vmul.f32 0.015625, %v2917_v25 }
 0xac6   :  { %v2919_v32 = vadd.f32 1e-05, %v2918_v61  ;;  %v3169_v61 = vmul.f32 %v3063_v40, %v6079_v62 }
 0xac8   :  { %4652 = vrsqrt.f32 %v2919_v32 }
 0xad2   :  { %v4653_v46 = vpop.eup %4652 }
 0xad3   :  { %v2926_v51 = vmul.f32 %v4653_v46, %v2886_v13  ;;  %v2921_v63 = vmul.f32 %v4653_v46, %v2881_v48  ;;  %v2922_v2 = vmul.f32 %v4653_v46, %v2882_v44  ;;  %v2923_v22 = vmul.f32 %v4653_v46, %v2883_v30 }
 0xad4   :  { %v2924_v43 = vmul.f32 %v4653_v46, %v2884_v8  ;;  %v2925_v17 = vmul.f32 %v4653_v46, %v2885_v29  ;;  %v2927_v0 = vmul.f32 %v4653_v46, %v2887_v34  ;;  %v2928_v33 = vmul.f32 %v4653_v46, %v2888_v10 }
 0xad5   :  { %v2941_v5 = vmul.f32 %v3950_v35, %v2926_v51  ;;  %v2936_v47 = vmul.f32 %v3950_v35, %v2921_v63  ;;  %v2937_v27 = vmul.f32 %v3950_v35, %v2922_v2  ;;  %v2938_v42 = vmul.f32 %v3950_v35, %v2923_v22 }
 0xad6   :  { %v2939_v49 = vmul.f32 %v3950_v35, %v2924_v43  ;;  %v2940_v14 = vmul.f32 %v3950_v35, %v2925_v17  ;;  %v2942_v52 = vmul.f32 %v3950_v35, %v2927_v0  ;;  %v2943_v23 = vmul.f32 %v3950_v35, %v2928_v33  ;;  %v3891_v35 = vld [vmem:[#allocation31] ss:$0 sm:$0xff] }
 0xad7   :  { %v2951_v36 = vadd.f32 %v3951_v21, %v2936_v47  ;;  %v2952_v57 = vadd.f32 %v3951_v21, %v2937_v27  ;;  %v2953_v9 = vadd.f32 %v3951_v21, %v2938_v42  ;;  %v2956_v13 = vadd.f32 %v3951_v21, %v2941_v5 }
 0xad8   :  { %v2954_v48 = vadd.f32 %v3951_v21, %v2939_v49  ;;  %v2955_v44 = vadd.f32 %v3951_v21, %v2940_v14  ;;  %v2957_v30 = vadd.f32 %v3951_v21, %v2942_v52  ;;  %v2958_v7 = vadd.f32 %v3951_v21, %v2943_v23 }
 0xad9   :  { %v3166_v8 = vmul.f32 %v2951_v36, %v6073_v59  ;;  %v3168_v29 = vmul.f32 %v2952_v57, %v6071_v58  ;;  %v3170_v34 = vmul.f32 %v2953_v9, %v6079_v62  ;;  %v3176_v10 = vmul.f32 %v2956_v13, %v6145_v11 }
 0xada   :  { %v3172_v41 = vmul.f32 %v2954_v48, %v6093_v26  ;;  %v3174_v1 = vmul.f32 %v2955_v44, %v6117_v38  ;;  %v6878_v19 = vmul.f32 %v2957_v30, %v6163_v45  ;;  %v6881_v18 = vmul.f32 %v2958_v7, %v6177_v56 }
 0xadb   :  { %v3252_v25 = vpack.c.bf16 %v3168_v29, %v3166_v8  ;;  %v3253_v46 = vpack.c.bf16 %v3171_v6, %v3169_v61 }
 0xadc   :  { %v3254_v32 = vpack.c.bf16 %v3172_v41, %v3170_v34  ;;  %v3256_v3 = vpack.c.bf16 %v3176_v10, %v3174_v1  ;;  %v3258_v4 = vpack.c.bf16 %v6881_v18, %v6878_v19 }
 0xadd   :  { %3262 = vmatprep.subr.bf16.mxu1 %v3252_v25 }
 0xade   :  { %3263 = vmatpush1.bf16.msra.mxu1 %v3251_v16 }
 0xadf   :  { %3264 = vmatprep.subr.bf16.mxu1 %v3254_v32 }
 0xae2   :  { %3265 = vmatpush1.bf16.msra.mxu1 %v3253_v46 }
 0xae3   :  { %3306 = vmatprep.subr.bf16.mxu1 %v3256_v3 }
 0xb39   :  { %v4292_v51 = vpop.f32.mrb[12].mxu0 }
 0xb3a   :  { %v4346_v63 = vadd.f32 %v4292_v51, %v3891_v35  ;;  %v3014_v37 = vpop.f32.mrb[13].mxu0 }
 0xb3b   :  { %v4347_v50 = vadd.f32 %v3891_v35, %v3014_v37  ;;  %v4293_v53 = vpop.f32.mrb[14].mxu0 }
 0xb3c   :  { %v3055_v2 = vmax.f32 %v4346_v63, 0.0  ;;  %v3017_v22 = vpop.f32.mrb[15].mxu0  ;;  %v4348_v43 = vadd.f32 %v4293_v53, %v3891_v35 }
 0xb3d   :  { %v3053_v40 = vmax.f32 %v4347_v50, 0.0  ;;  %v4349_v21 = vadd.f32 %v3891_v35, %v3017_v22 }
 0xb3e   :  { %v3075_v17 = vsel %vm2562_vm4, %v3055_v2, -inf  ;;  %v3056_v27 = vmax.f32 %v4348_v43, 0.0 }
 0xb3f   :  { %v3054_v0 = vmax.f32 %v4349_v21, 0.0  ;;  %3076 = vmax.xlane.f32.xlu0 %v3075_v17  ;;  %v3069_v33 = vsel %vm2562_vm4, %v3053_v40, -inf }
 0xb40   :  { %3070 = vmax.xlane.f32.xlu1 %v3069_v33  ;;  %v3078_v13 = vsel %vm2562_vm4, %v3056_v27, -inf }
 0xb41   :  { %v4296_v5 = vpop.f32.mrb[16].mxu0  ;;  %v3072_v47 = vsel %vm2562_vm4, %v3054_v0, -inf }
 0xb42   :  { %v3030_v42 = vpop.f32.mrb[17].mxu0  ;;  %v4350_v49 = vadd.f32 %v4296_v5, %v3891_v35 }
 0xb43   :  { %v4351_v14 = vadd.f32 %v3891_v35, %v3030_v42  ;;  %3073 = vmax.xlane.f32.xlu0 %v3072_v47  ;;  %v4297_v52 = vpop.f32.mrb[18].mxu0 }
 0xb44   :  { %v3033_v23 = vpop.f32.mrb[19].mxu0  ;;  %v4352_v9 = vadd.f32 %v4297_v52, %v3891_v35  ;;  %v3059_v48 = vmax.f32 %v4350_v49, 0.0 }
 0xb45   :  { %v3057_v36 = vmax.f32 %v4351_v14, 0.0  ;;  %v4353_v57 = vadd.f32 %v3891_v35, %v3033_v23 }
 0xb46   :  { %v3060_v8 = vmax.f32 %v4352_v9, 0.0  ;;  %v3087_v29 = vsel %vm2562_vm4, %v3059_v48, -inf }
 0xb47   :  { %v3058_v44 = vmax.f32 %v4353_v57, 0.0  ;;  %3079 = vmax.xlane.f32.xlu0 %v3078_v13  ;;  %v3081_v30 = vsel %vm2562_vm4, %v3057_v36, -inf }
 0xb48   :  { %3082 = vmax.xlane.f32.xlu1 %v3081_v30  ;;  %v3090_v34 = vsel %vm2562_vm4, %v3060_v8, -inf }
 0xb49   :  { %v3084_v7 = vsel %vm2562_vm4, %v3058_v44, -inf }
 0xb4b   :  { %3085 = vmax.xlane.f32.xlu0 %v3084_v7 }
 0xb4c   :  { %3088 = vmax.xlane.f32.xlu1 %v3087_v29 }
 0xb4f   :  { %3091 = vmax.xlane.f32.xlu0 %v3090_v34  ;;  %v4705_v34 = vld [vmem:[#allocation5 + $0x8] sm:$0xff] }
 0xbcc   :  { %v3077_v10 = vpop.xlane.xlu0 %3076 }
 0xbcd   :  { %v3095_v41 = vsub.f32 %v3055_v2, %v3077_v10  ;;  %v3071_v1 = vpop.xlane.xlu1 %3070  ;;  %v3603_v10 = vmul.f32 %v4705_v34, %v4705_v34 }
 0xbce   :  { %v3093_v16 = vsub.f32 %v3053_v40, %v3071_v1 }
 0xbcf   :  { %v3105_v6 = vmul.f32 1.442695, %v3095_v41  ;;  %v4706_v41 = vld [vmem:[#allocation5 + $0x10] sm:$0xff] }
 0xbd0   :  { %v3101_v25 = vmul.f32 1.442695, %v3093_v16  ;;  %v3074_v61 = vpop.xlane.xlu0 %3073  ;;  %v3604_v1 = vmul.f32 %v4706_v41, %v4706_v41 }
 0xbd1   :  { %v3094_v32 = vsub.f32 %v3054_v0, %v3074_v61 }
 0xbd2   :  { %4654 = vpow2.f32 %v3101_v25  ;;  %v4707_v25 = vld [vmem:[#allocation5 + $0x18] sm:$0xff] }
 0xbd3   :  { %v3103_v3 = vmul.f32 1.442695, %v3094_v32  ;;  %4656 = vpow2.f32 %v3105_v6  ;;  %v3611_v6 = vsel %vm548_vm0, %v3603_v10, 0.0  ;;  %v3605_v61 = vmul.f32 %v4707_v25, %v4707_v25 }
 0xbd4   :  { %v3080_v46 = vpop.xlane.xlu0 %3079 }
 0xbd5   :  { %4658 = vpow2.f32 %v3103_v3  ;;  %v3096_v35 = vsub.f32 %v3056_v27, %v3080_v46  ;;  %v3083_v51 = vpop.xlane.xlu1 %3082  ;;  %v3613_v3 = vsel %vm548_vm0, %v3604_v1, 0.0  ;;  %v3615_v46 = vsel %vm548_vm0, %v3605_v61, 0.0 }
 0xbd6   :  { %v3097_v63 = vsub.f32 %v3057_v36, %v3083_v51 }
 0xbd7   :  { %v3107_v37 = vmul.f32 1.442695, %v3096_v35 }
 0xbd8   :  { %v3109_v50 = vmul.f32 1.442695, %v3097_v63  ;;  %v3086_v53 = vpop.xlane.xlu0 %3085 }
 0xbd9   :  { %4660 = vpow2.f32 %v3107_v37  ;;  %v3098_v22 = vsub.f32 %v3058_v44, %v3086_v53  ;;  %v3089_v2 = vpop.xlane.xlu1 %3088 }
 0xbda   :  { %4662 = vpow2.f32 %v3109_v50  ;;  %v3099_v40 = vsub.f32 %v3059_v48, %v3089_v2 }
 0xbdb   :  { %v3111_v21 = vmul.f32 1.442695, %v3098_v22 }
 0xbdc   :  { %v4655_v43 = vpop.eup %4654  ;;  %v3113_v17 = vmul.f32 1.442695, %v3099_v40  ;;  %v3092_v0 = vpop.xlane.xlu0 %3091 }
 0xbdd   :  { %4664 = vpow2.f32 %v3111_v21  ;;  %v3100_v33 = vsub.f32 %v3060_v8, %v3092_v0  ;;  %v3117_v5 = vsel %vm2562_vm4, %v4655_v43, 0.0  ;;  %v6896_v47 = vpop.eup %4656  ;;  %v4704_v8 = vld [vmem:[#allocation5] sm:$0xff] }
 0xbde   :  { %4666 = vpow2.f32 %v3113_v17  ;;  %3118 = vadd.xlane.f32.xlu1 %v3117_v5  ;;  %v3123_v14 = vsel %vm2562_vm4, %v6896_v47, 0.0  ;;  %v3602_v29 = vmul.f32 %v4704_v8, %v4704_v8 }
 0xbdf   :  { %v4659_v27 = vpop.eup %4658  ;;  %v3115_v42 = vmul.f32 1.442695, %v3100_v33 }
 0xbe0   :  { %v3120_v49 = vsel %vm2562_vm4, %v4659_v27, 0.0  ;;  %v3610_v16 = vsel %vm548_vm0, %v3602_v29, 0.0 }
 0xbe1   :  { %4668 = vpow2.f32 %v3115_v42  ;;  %3121 = vadd.xlane.f32.xlu0 %v3120_v49  ;;  %v3612_v32 = vadd.f32 %v3611_v6, %v3610_v16 }
 0xbe2   :  { %3124 = vadd.xlane.f32.xlu1 %v3123_v14 }
 0xbe3   :  { %v4661_v52 = vpop.eup %4660  ;;  %v3614_v35 = vadd.f32 %v3613_v3, %v3612_v32 }
 0xbe4   :  { %v4663_v23 = vpop.eup %4662  ;;  %v3126_v36 = vsel %vm2562_vm4, %v4661_v52, 0.0 }
 0xbe5   :  { %3127 = vadd.xlane.f32.xlu0 %v3126_v36  ;;  %v3129_v57 = vsel %vm2562_vm4, %v4663_v23, 0.0  ;;  %v6919_v51 = vadd.f32 %v3615_v46, %v3614_v35 }
 0xbe6   :  { %3130 = vadd.xlane.f32.xlu1 %v3129_v57 }
 0xbe7   :  { %v6903_v9 = vpop.eup %4664 }
 0xbe8   :  { %v6905_v13 = vpop.eup %4666  ;;  %v3132_v48 = vsel %vm2562_vm4, %v6903_v9, 0.0 }
 0xbe9   :  { %3133 = vadd.xlane.f32.xlu0 %v3132_v48  ;;  %v3135_v44 = vsel %vm2562_vm4, %v6905_v13, 0.0  ;;  %v5591_v48 = vmov 0.0  }
 0xbea   :  { %3136 = vadd.xlane.f32.xlu1 %v3135_v44  ;;  %4306 = vmatprep.subr.bf16.mxu0 %v5591_v48 }
 0xbeb   :  { %v6911_v30 = vpop.eup %4668  ;;  %4307 = vmatpush3.bf16.msra.mxu0 %v6002_v20  ;;  %4310 = vmatprep.mubr.msk.bf16.mxu0 %vm5592_vm5, %v5591_v48 }
 0xbec   :  { %v3138_v7 = vsel %vm2562_vm4, %v6911_v30, 0.0  ;;  %4308 = vmatprep.subr.bf16.mxu0 %v5591_v48 }
 0xbed   :  { %3139 = vadd.xlane.f32.xlu0 %v3138_v7 }
 0xbef   :  { %4309 = vmatpush3.bf16.msra.mxu0 %v6017_v31 }
 0xbf0   :  { %4322 = vmatprep.subr.bf16.mxu0 %v5591_v48 }
 0xc6b   :  { %v3119_v63 = vpop.xlane.xlu1 %3118 }
 0xc6c   :  { %4670 = vrcp.f32 %v3119_v63 }
 0xc6e   :  { %v3122_v37 = vpop.xlane.xlu0 %3121 }
 0xc6f   :  { %4672 = vrcp.f32 %v3122_v37  ;;  %v3125_v50 = vpop.xlane.xlu1 %3124 }
 0xc70   :  { %4674 = vrcp.f32 %v3125_v50 }
 0xc72   :  { %v3128_v53 = vpop.xlane.xlu0 %3127 }
 0xc73   :  { %4676 = vrcp.f32 %v3128_v53  ;;  %v3131_v22 = vpop.xlane.xlu1 %3130 }
 0xc74   :  { %4678 = vrcp.f32 %v3131_v22 }
 0xc76   :  { %v4671_v2 = vpop.eup %4670  ;;  %v3134_v40 = vpop.xlane.xlu0 %3133 }
 0xc77   :  { %4680 = vrcp.f32 %v3134_v40  ;;  %v3137_v21 = vpop.xlane.xlu1 %3136  ;;  %v3142_v17 = vmul.f32 %v4671_v2, %v4655_v43 }
 0xc78   :  { %4682 = vrcp.f32 %v3137_v21 }
 0xc79   :  { %v4673_v0 = vpop.eup %4672  ;;  %v6922_v33 = vmul.f32 %v3142_v17, %v6073_v59 }
 0xc7a   :  { %v4675_v5 = vpop.eup %4674  ;;  %v3140_v42 = vpop.xlane.xlu0 %3139  ;;  %v3144_v49 = vmul.f32 %v4673_v0, %v4659_v27 }
 0xc7b   :  { %4684 = vrcp.f32 %v3140_v42  ;;  %3181 = vxpose.xlu1.b32.start [1/4] (short) (narrow) %v6922_v33, 8  ;;  %v3146_v36 = vmul.f32 %v4675_v5, %v6896_v47  ;;  %v3676_v50 = vsub.f32 0.0, %v6922_v33 }
 0xc7c   :  { %v3158_v14 = vmul.f32 %v3144_v49, %v6071_v58 }
 0xc7d   :  { %v4677_v57 = vpop.eup %4676  ;;  %v3159_v7 = vmul.f32 %v3146_v36, %v6079_v62 }
 0xc7e   :  { %v4679_v43 = vpop.eup %4678  ;;  %v3148_v44 = vmul.f32 %v4677_v57, %v4661_v52  ;;  %v6930_v59 = vpack.c.bf16 %v3158_v14, %v6922_v33  ;;  %v3685_v10 = vadd.f32 1e-15, %v3158_v14  ;;  %v3677_v35 = vsub.f32 0.0, %v3158_v14 }
 0xc7f   :  { %3182 = vxpose.xlu1.b32.cont [2/4] (short) (narrow) %v3158_v14, 8  ;;  %v3150_v27 = vmul.f32 %v4679_v43, %v4663_v23  ;;  %v3686_v1 = vadd.f32 1e-15, %v3159_v7  ;;  %v3678_v40 = vsub.f32 0.0, %v3159_v7  ;;  %v4708_v14 = vld [vmem:[#allocation5 + $0x20] sm:$0xff] }
 0xc80   :  { %v6935_v58 = vmul.f32 %v3148_v44, %v6093_v26  ;;  %4686 = vlog2.f32 %v3685_v10  ;;  %v3606_v36 = vmul.f32 %v4708_v14, %v4708_v14 }
 0xc81   :  { %v4681_v47 = vpop.eup %4680  ;;  %v6938_v8 = vmul.f32 %v3150_v27, %v6117_v38 }
 0xc82   :  { %v4683_v29 = vpop.eup %4682  ;;  %v3152_v52 = vmul.f32 %v4681_v47, %v6903_v9  ;;  %v6943_v20 = vpack.c.bf16 %v6935_v58, %v3159_v7  ;;  %v3687_v16 = vadd.f32 1e-15, %v6935_v58  ;;  %v3679_v57 = vsub.f32 0.0, %v6935_v58 }
 0xc83   :  { %3213 = vxpose.xlu0.b32.start [1/4] (short) (narrow) %v6938_v8, 8  ;;  %3183 = vxpose.xlu1.b32.cont [3/4] (short) (narrow) %v3159_v7, 8  ;;  %v3154_v26 = vmul.f32 %v4683_v29, %v6905_v13  ;;  %v3688_v6 = vadd.f32 1e-15, %v6938_v8  ;;  %v4709_v29 = vld [vmem:[#allocation5 + $0x28] sm:$0xff] }
 0xc84   :  { %v6947_v62 = vmul.f32 %v3152_v52, %v6145_v11  ;;  %v3607_v52 = vmul.f32 %v4709_v29, %v4709_v29  ;;  %v7184_v29 = vld [vmem:[#allocation93_spill] sm:$0xff] }
 0xc85   :  { %v4685_v23 = vpop.eup %4684  ;;  %v6961_v34 = vmul.f32 %v3154_v26, %v6163_v45  ;;  %v3617_v26 = vsel %vm548_vm0, %v3606_v36, 0.0 }
 0xc86   :  { %v3156_v31 = vmul.f32 %v4685_v23, %v6911_v30  ;;  %v6956_v9 = vpack.c.bf16 %v6947_v62, %v6938_v8  ;;  %v3684_v30 = vadd.f32 1e-15, %v6922_v33  ;;  %v3689_v32 = vadd.f32 1e-15, %v6947_v62 }
 0xc87   :  { %3184 = vxpose.xlu1.b32.end [4/4] (short) (narrow) %v6935_v58, 8  ;;  %3214 = vxpose.xlu0.b32.cont [2/4] (short) (narrow) %v6947_v62, 8  ;;  %v3690_v37 = vadd.f32 1e-15, %v6961_v34  ;;  %v3680_v23 = vsub.f32 0.0, %v6938_v8 }
 0xc88   :  { %v6964_v13 = vmul.f32 %v3156_v31, %v6177_v56  ;;  %4688 = vlog2.f32 %v3684_v30 }
 0xc89   :  { %4690 = vlog2.f32 %v3686_v1 }
 0xc8a   :  { %v6968_v41 = vpack.c.bf16 %v6964_v13, %v6961_v34  ;;  %4692 = vlog2.f32 %v3687_v16  ;;  %v4687_v25 = vpop.eup %4686  ;;  %v3691_v17 = vadd.f32 1e-15, %v6964_v13  ;;  %v3618_v16 = vadd.f32 %v3617_v26, %v6919_v51 }
 0xc8b   :  { %3215 = vxpose.xlu0.b32.cont [3/4] (short) (narrow) %v6961_v34, 8  ;;  %4694 = vlog2.f32 %v3688_v6  ;;  %v3695_v3 = vmul.f32 0.6931472, %v4687_v25  ;;  %v4710_v6 = vld [vmem:[#allocation5 + $0x30] sm:$0xff] }
 0xc8c   :  { %4696 = vlog2.f32 %v3689_v32  ;;  %v3608_v25 = vmul.f32 %v4710_v6, %v4710_v6  ;;  %v3681_v32 = vsub.f32 0.0, %v6947_v62 }
 0xc8d   :  { %v3709_v22 = vmul.f32 %v3695_v3, %v3677_v35  ;;  %4698 = vlog2.f32 %v3690_v37 }
 0xc8e   :  { %4700 = vlog2.f32 %v3691_v17 }
 0xc8f   :  { %3216 = vxpose.xlu0.b32.end [4/4] (short) (narrow) %v6964_v13, 8  ;;  %v3717_v42 = vsel %vm2562_vm4, %v3709_v22, 0.0  ;;  %v3621_v22 = vsel %vm548_vm0, %v3608_v25, 0.0 }
 0xc92   :  { %v4689_v61 = vpop.eup %4688 }
 0xc93   :  { %v4691_v46 = vpop.eup %4690  ;;  %v3693_v63 = vmul.f32 0.6931472, %v4689_v61  ;;  %v3619_v61 = vsel %vm548_vm0, %v3607_v52, 0.0  ;;  %v3067_v52 = vsel %vm920_vm2, %v7184_v29, %v6758_v39 }
 0xc94   :  { %v3697_v53 = vmul.f32 0.6931472, %v4691_v46  ;;  %v4693_v2 = vpop.eup %4692  ;;  %v3620_v37 = vadd.f32 %v3619_v61, %v3618_v16 }
 0xc95   :  { %v3708_v21 = vmul.f32 %v3693_v63, %v3676_v50  ;;  %v3699_v0 = vmul.f32 0.6931472, %v4693_v2  ;;  %v4695_v49 = vpop.eup %4694  ;;  %v4711_v50 = vld [vmem:[#allocation5 + $0x38] sm:$0xff]  ;;  %v3682_v2 = vsub.f32 0.0, %v6961_v34 }
 0xc96   :  { %v3710_v5 = vmul.f32 %v3697_v53, %v3678_v40  ;;  %v3701_v44 = vmul.f32 0.6931472, %v4695_v49  ;;  %v4697_v47 = vpop.eup %4696  ;;  %v3609_v53 = vmul.f32 %v4711_v50, %v4711_v50 }
 0xc97   :  { %v3716_v43 = vsel %vm2562_vm4, %v3708_v21, 0.0  ;;  %v3711_v27 = vmul.f32 %v3699_v0, %v3679_v57  ;;  %v3703_v10 = vmul.f32 0.6931472, %v4697_v47  ;;  %v4699_v1 = vpop.eup %4698  ;;  %v3622_v0 = vadd.f32 %v3621_v22, %v3620_v37 }
 0xc98   :  { %v3718_v33 = vadd.f32 %v3717_v42, %v3716_v43  ;;  %v3719_v7 = vsel %vm2562_vm4, %v3710_v5, 0.0  ;;  %v3712_v30 = vmul.f32 %v3701_v44, %v3680_v23  ;;  %v3705_v46 = vmul.f32 0.6931472, %v4699_v1  ;;  %v4701_v8 = vpop.eup %4700 }
 0xc99   :  { %v3721_v58 = vsel %vm2562_vm4, %v3711_v27, 0.0  ;;  %v3713_v35 = vmul.f32 %v3703_v10, %v3681_v32  ;;  %v3707_v40 = vmul.f32 0.6931472, %v4701_v8  ;;  %v3623_v62 = vsel %vm548_vm0, %v3609_v53, 0.0 }
 0xc9a   :  { %v3720_v31 = vadd.f32 %v3719_v7, %v3718_v33  ;;  %v3723_v63 = vsel %vm2562_vm4, %v3712_v30, 0.0  ;;  %v3714_v21 = vmul.f32 %v3705_v46, %v3682_v2  ;;  %v3683_v5 = vsub.f32 0.0, %v6964_v13  ;;  %v7183_v7 = vld [vmem:[#allocation94_spill] sm:$0xff] }
 0xc9b   :  { %v3725_v17 = vsel %vm2562_vm4, %v3713_v35, 0.0  ;;  %v3624_v36 = vadd.f32 %v3623_v62, %v3622_v0  ;;  %v3066_v33 = vsel %vm920_vm2, %v6350_v54, %v6748_v28  ;;  %v3065_v44 = vsel %vm920_vm2, %v6348_v60, %v6750_v12 }
 0xc9c   :  { %v3722_v3 = vadd.f32 %v3721_v58, %v3720_v31  ;;  %v3715_v49 = vmul.f32 %v3707_v40, %v3683_v5  ;;  %v3727_v14 = vsel %vm2562_vm4, %v3714_v21, 0.0  ;;  %v3175_v13 = vmul.f32 %v3066_v33, %v6145_v11 }
 0xc9d   :  { %v3173_v27 = vmul.f32 %v3065_v44, %v6117_v38  ;;  %v3068_v47 = vsel %vm920_vm2, %v7183_v7, %v6756_v55  ;;  %v3177_v60 = vmul.f32 %v3067_v52, %v6163_v45  ;;  %v7185_v45 = vld [vmem:[#allocation92_spill] sm:$0xff] }
 0xc9e   :  { %v3724_v51 = vadd.f32 %v3723_v63, %v3722_v3  ;;  %v3729_v43 = vsel %vm2562_vm4, %v3715_v49, 0.0  ;;  %v3179_v28 = vmul.f32 %v3068_v47, %v6177_v56 }
 0xc9f   :  { %v3255_v54 = vpack.c.bf16 %v3175_v13, %v3173_v27 }
 0xca0   :  { %v3726_v42 = vadd.f32 %v3725_v17, %v3724_v51  ;;  %v3257_v38 = vpack.c.bf16 %v3179_v28, %v3177_v60 }
 0xca2   :  { %v3728_v57 = vadd.f32 %v3727_v14, %v3726_v42 }
 0xca4   :  { %v3730_v34 = vadd.f32 %v3729_v43, %v3728_v57 }
 0xcbc   :  { %3625 = vadd.xlane.f32.xlu0 %v3624_v36 }
 0xcc0   :  { %3731 = vadd.xlane.f32.xlu0 %v3730_v34 }
 0xcfb   :  { %v3197_v26 = vpop.trf.xlu1 }
 0xcfc   :  { %v7011_v23 = vpack.c.bf16 %v3197_v26, %v3197_v26 }
 0xcfe   :  { %3956 = vmatmul.mubr.msk.bf16.vlgmr.msra.gmra.mrb[40].mxu1 %vm548_vm0, %v7011_v23 }
 0xcff   :  { %3307 = vmatpush1.bf16.msra.mxu1 %v3255_v54  ;;  %3338 = vmatprep.mubr.bf16.mxu1 %v7182_v15 }
 0xd00   :  { %3308 = vmatprep.subr.bf16.mxu1 %v3258_v4 }
 0xd03   :  { %3309 = vmatpush1.bf16.msra.mxu1 %v3257_v38  ;;  %v3229_v11 = vpop.trf.xlu0 }
 0xd04   :  { %v3246_v12 = vpack.c.bf16 %v3229_v11, %v3229_v11  ;;  %4298 = vmatprep.subr.bf16.mxu1 %v5591_v48 }
 0xd06   :  { %3957 = vmatmul.mubr.msk.bf16.vlgmr.msra.gmra.mrb[44].mxu1 %vm548_vm0, %v3246_v12  ;;  %4311 = vmatmul.mubr.msk.bf16.vlgmr.msra.gmra.mrb[40].mxu0 %vm548_vm0, %v3246_v12 }
 0xd07   :  { %4299 = vmatpush3.bf16.msra.mxu1 %v7185_v45  ;;  %4323 = vmatpush3.bf16.msra.mxu0 %v6956_v9 }
 0xd08   :  { %4300 = vmatprep.subr.bf16.mxu1 %v5591_v48  ;;  %4324 = vmatprep.subr.bf16.mxu0 %v5591_v48 }
 0xd09   :  { %4302 = vmatprep.mubr.msk.bf16.mxu1 %vm5592_vm5, %v5591_v48  ;;  %4326 = vmatprep.mubr.msk.bf16.mxu0 %vm5592_vm5, %v5591_v48 }
 0xd0b   :  { %4301 = vmatpush3.bf16.msra.mxu1 %v6007_v24  ;;  %4325 = vmatpush3.bf16.msra.mxu0 %v6968_v41 }
 0xd0c   :  { %4314 = vmatprep.subr.bf16.mxu1 %v5591_v48  ;;  %4338 = vmatprep.subr.bf16.mxu0 %v5591_v48 }
 0xd0e   :  { %4303 = vmatmul.mubr.msk.bf16.vlgmr.msra.gmra.mrb[48].mxu1 %vm548_vm0, %v7011_v23 }
 0xd0f   :  { %4315 = vmatpush3.bf16.msra.mxu1 %v6930_v59  ;;  %4318 = vmatprep.mubr.msk.bf16.mxu1 %vm5592_vm5, %v5591_v48 }
 0xd10   :  { %4316 = vmatprep.subr.bf16.mxu1 %v5591_v48 }
 0xd13   :  { %4317 = vmatpush3.bf16.msra.mxu1 %v6943_v20 }
 0xd14   :  { %4330 = vmatprep.subr.bf16.mxu1 %v5591_v48 }
 0xd49   :  { %v3626_v33 = vpop.xlane.xlu0 %3625 }
 0xd4a   :  { %v3627_v13 = vrot.slane %v3626_v33, 4 }
 0xd4c   :  { %v3628_v27 = vadd.f32 %v3627_v13, %v3626_v33 }
 0xd4e   :  { %v3629_v7 = vrot.slane %v3628_v27, 2 }
 0xd50   :  { %v3630_v47 = vadd.f32 %v3629_v7, %v3628_v27 }
 0xd52   :  { %v3631_v29 = vrot.slane %v3630_v47, 1 }
 0xd54   :  { %v3632_v52 = vadd.f32 %v3631_v29, %v3630_v47 }
 0xd56   :  { %4371 = vpush %v3632_v52 }
 0xdd1   :  { %v3296_v24 = vpop.f32.mrb[40].mxu1 }
 0xdd2   :  { %3741 = vst [vmem:[#allocation50] sm:$0xff] %v3296_v24  ;;  %v3298_v56 = vpop.f32.mrb[41].mxu1 }
 0xdd3   :  { %3742 = vst.msk [vmem:[#allocation50 + $0x8] sm:$0xff] %vm920_vm2, %v3298_v56  ;;  %v3300_v55 = vpop.f32.mrb[42].mxu1 }
 0xdd4   :  { %v3301_v39 = vpop.f32.mrb[43].mxu1 }
 0xdd9   :  { %v3421_v15 = vpop.f32.mrb[40].mxu0  ;;  %v3340_v19 = vpop.f32.mrb[44].mxu1 }
 0xdda   :  { %v3428_v18 = vpack.c.bf16 %v3421_v15, %v3421_v15  ;;  %3743 = vst [vmem:[#allocation50 + $0x10] sm:$0xff] %v3340_v19  ;;  %v3342_v4 = vpop.f32.mrb[45].mxu1  ;;  %v4312_v31 = vpop.f32.mrb[41].mxu0 }
 0xddb   :  { %3744 = vst.msk [vmem:[#allocation50 + $0x18] sm:$0xff] %vm920_vm2, %v3342_v4  ;;  %v3344_v10 = vpop.f32.mrb[46].mxu1  ;;  %v3424_v30 = vpop.f32.mrb[42].mxu0 }
 0xddc   :  { %4327 = vmatmul.mubr.msk.bf16.vlgmr.msra.gmra.mrb[44].mxu0 %vm548_vm0, %v3428_v18  ;;  %v3345_v58 = vpop.f32.mrb[47].mxu1  ;;  %v4313_v1 = vpop.f32.mrb[43].mxu0 }
 0xddd   :  { %4339 = vmatpush3.bf16.msra.mxu0 %v6956_v9  ;;  %4342 = vmatprep.mubr.msk.bf16.mxu0 %vm5592_vm5, %v5591_v48  ;;  %v3595_v9 = vlaneseq }
 0xdde   :  { %4340 = vmatprep.subr.bf16.mxu0 %v5591_v48 }
 0xddf   :  { %v3598_v3 = vand.u32 127, %v3595_v9 }
 0xde1   :  { %4341 = vmatpush3.bf16.msra.mxu0 %v6968_v41  ;;  %v3381_v16 = vpop.f32.mrb[48].mxu1  ;;  %v3596_v41 = vshrl.u32 %v3595_v9, 7 }
 0xde2   :  { %v3427_v6 = vpack.c.bf16 %v3381_v16, %v3381_v16  ;;  %v4304_v25 = vpop.f32.mrb[49].mxu1 }
 0xde3   :  { %v3384_v61 = vpop.f32.mrb[50].mxu1  ;;  %vm3599_vm6 = vcmp.eq.s32.totalorder %v3596_v41, %v3598_v3 }
 0xde4   :  { %v4305_v32 = vpop.f32.mrb[51].mxu1  ;;  %4319 = vmatmul.mubr.msk.bf16.vlgmr.msra.gmra.mrb[52].mxu1 %vm548_vm0, %v3427_v6  ;;  %4343 = vmatmul.mubr.msk.bf16.vlgmr.msra.gmra.mrb[48].mxu0 %vm548_vm0, %v3246_v12  ;;  %v3964_v8 = vsel %vm3599_vm6, 1.0, %v5591_v48 }
 0xde5   :  { %4331 = vmatpush3.bf16.msra.mxu1 %v6930_v59  ;;  %4334 = vmatprep.mubr.msk.bf16.mxu1 %vm5592_vm5, %v5591_v48 }
 0xde6   :  { %4332 = vmatprep.subr.bf16.mxu1 %v5591_v48 }
 0xde9   :  { %4333 = vmatpush3.bf16.msra.mxu1 %v6943_v20 }
 0xdec   :  { %4335 = vmatmul.mubr.msk.bf16.vlgmr.msra.gmra.mrb[56].mxu1 %vm548_vm0, %v7011_v23 }
 0xeaf   :  { %v3509_v46 = vpop.f32.mrb[44].mxu0 }
 0xeb0   :  { %3746 = vst.msk [vmem:[#allocation51 + $0x8] sm:$0xff] %vm2562_vm4, %v3509_v46  ;;  %v4328_v35 = vpop.f32.mrb[45].mxu0  ;;  %v3635_v37 = vmul.f32 %v3964_v8, %v3509_v46 }
 0xeb1   :  { %v3512_v63 = vpop.f32.mrb[46].mxu0 }
 0xeb2   :  { %v4329_v59 = vpop.f32.mrb[47].mxu0  ;;  %v3637_v62 = vsel %vm2562_vm4, %v3635_v37, 0.0 }
 0xeb7   :  { %v3466_v50 = vpop.f32.mrb[52].mxu1  ;;  %v3589_v53 = vpop.f32.mrb[48].mxu0 }
 0xeb8   :  { %v3634_v22 = vmul.f32 %v3964_v8, %v3466_v50  ;;  %3745 = vst.msk [vmem:[#allocation51] sm:$0xff] %vm2562_vm4, %v3466_v50  ;;  %v4320_v20 = vpop.f32.mrb[53].mxu1  ;;  %v4344_v2 = vpop.f32.mrb[49].mxu0  ;;  %v3651_v42 = vmul.f32 %v3589_v53, %v3589_v53 }
 0xeb9   :  { %v3469_v51 = vpop.f32.mrb[54].mxu1  ;;  %v3592_v40 = vpop.f32.mrb[50].mxu0 }
 0xeba   :  { %v4321_v21 = vpop.f32.mrb[55].mxu1  ;;  %v4345_v17 = vpop.f32.mrb[51].mxu0  ;;  %v3636_v0 = vsel %vm2562_vm4, %v3634_v22, 0.0  ;;  %v3653_v34 = vsel %vm2562_vm4, %v3651_v42, 0.0 }
 0xebb   :  { %v3638_v5 = vadd.f32 %v3637_v62, %v3636_v0 }
 0xebd   :  { %3639 = vadd.xlane.f32.xlu1 %v3638_v5 }
 0xebf   :  { %v3549_v48 = vpop.f32.mrb[56].mxu1 }
 0xec0   :  { %v3650_v49 = vmul.f32 %v3549_v48, %v3549_v48  ;;  %v4336_v14 = vpop.f32.mrb[57].mxu1 }
 0xec1   :  { %v3552_v36 = vpop.f32.mrb[58].mxu1 }
 0xec2   :  { %v4337_v57 = vpop.f32.mrb[59].mxu1  ;;  %v3652_v43 = vsel %vm2562_vm4, %v3650_v49, 0.0 }
 0xec3   :  { %v3654_v44 = vadd.f32 %v3653_v34, %v3652_v43 }
 0xec5   :  { %3655 = vadd.xlane.f32.xlu1 %v3654_v44 }
 0xf4a   :  { %v3640_v26 = vpop.xlane.xlu1 %3639 }
 0xf4b   :  { %v3641_v23 = vrot.slane %v3640_v26, 4 }
 0xf4d   :  { %v3642_v54 = vadd.f32 %v3641_v23, %v3640_v26 }
 0xf4f   :  { %v3643_v28 = vrot.slane %v3642_v54, 2 }
 0xf51   :  { %v3644_v60 = vadd.f32 %v3643_v28, %v3642_v54 }
 0xf52   :  { %v3656_v38 = vpop.xlane.xlu1 %3655 }
 0xf53   :  { %v3657_v11 = vrot.slane %v3656_v38, 4  ;;  %v3645_v12 = vrot.slane %v3644_v60, 1 }
 0xf55   :  { %v3658_v45 = vadd.f32 %v3657_v11, %v3656_v38  ;;  %v3646_v24 = vadd.f32 %v3645_v12, %v3644_v60 }
 0xf57   :  { %v3659_v56 = vrot.slane %v3658_v45, 2  ;;  %4373 = vpush %v3646_v24 }
 0xf59   :  { %v3660_v55 = vadd.f32 %v3659_v56, %v3658_v45 }
 0xf5a   :  { %5405 = shalt.err (!%p5402_p0)
}
 0xf5b   :  { %s5406_s18 = scalar_lea.hbm %s5767_s27, 256 }
 0xf5c   :  { %p5407_p1 = scmp.ne.s32.totalorder %s5767_s27, %s5406_s18  ;;  %p5410_p2 = scmp.lt.u32.totalorder %s5406_s18, %s5767_s27 }
 0xf5e   :  { %p5412_p3 = pnand %p5410_p2, %p5407_p1 }
 0xf60   :  { %5415 = shalt.err (!%p5412_p3)
}
 0xf61   :  { %3775 = dma.vmem_to_hbm [thread:$0]  %s3770_s22, 256, %s5767_s27, [#allocation52], %s5556_s26, %s5556_s26, %s5557_s28   ;;  %v3661_v39 = vrot.slane %v3660_v55, 1 }
 0xf62   :  { %s5416_s25 = scalar_lea.vmem %s3758_s21, 512  ;;  %p5421_p5 = scmp.lt.s32.totalorder %s3758_s21, %s3758_s21 }
 0xf63   :  { %p5417_p4 = scmp.ne.s32.totalorder %s3758_s21, %s5416_s25  ;;  %p5422_p6 = scmp.lt.s32.totalorder %s5416_s25, %s5416_s25 }
 0xf65   :  { %p5423_p7 = por %p5422_p6, %p5421_p5 }
 0xf67   :  { %p5424_p8 = pnand %p5423_p7, %p5417_p4 }
 0xf69   :  { %5427 = shalt.err (!%p5424_p8)
}
 0xf6a   :  { %s5428_s30 = scalar_lea.hbm %s5762_s5, 512 }
 0xf6b   :  { %p5429_p9 = scmp.ne.s32.totalorder %s5762_s5, %s5428_s30  ;;  %p5432_p10 = scmp.lt.u32.totalorder %s5428_s30, %s5762_s5 }
 0xf6d   :  { %p5434_p11 = pnand %p5432_p10, %p5429_p9 }
 0xf6f   :  { %5437 = shalt.err (!%p5434_p11)
}
 0xf70   :  { %s5595_s1 = smov 256   ;;  %v3662_v15 = vadd.f32 %v3661_v39, %v3660_v55  ;;  %s4372_s27 = spop %4371  ;;  %v3732_v19 = vpop.xlane.xlu0 %3731  ;;  %vm3748_vm9 = vcmask 0  }
 0xf71   :  { %3763 = dma.vmem_to_hbm [thread:$0]  %s3758_s21, 512, %s5762_s5, [#allocation4], %s5595_s1, %s5595_s1, %s5589_s14   ;;  %v3733_v18 = vrot.slane %v3732_v19, 4 }
 0xf72   :  { %4375 = vpush %v3662_v15  ;;  %s5596_s6 = smov 0.0   ;;  %s5597_s5 = smov [#allocation53]  }
 0xf73   :  { %v3734_v4 = vadd.f32 %v3733_v18, %v3732_v19  ;;  %s3782_s9 = sshll.u32 %s5597_s5, 4  ;;  %s5598_s0 = smov [#allocation54]   ;;  %s3783_s9 = int_to_ptr.vmem [resolvable:$true] %s3782_s9 }
 0xf74   :  { %s3792_s8 = sshll.u32 %s5598_s0, 4  ;;  %s5438_s20 = scalar_lea.vmem %s3783_s9, 16  ;;  %s7080_s8 = int_to_ptr.vmem [resolvable:$true] %s3792_s8 }
 0xf75   :  { %v3735_v10 = vrot.slane %v3734_v4, 2  ;;  %p5439_p12 = scmp.ne.s32.totalorder %s3783_s9, %s5438_s20  ;;  %s5442_s15 = scalar_lea.vmem %s3783_s9, 32 }
 0xf76   :  { %p5443_p13 = scmp.lt.s32.totalorder %s3783_s9, %s3783_s9  ;;  %p5444_p0 = scmp.lt.s32.totalorder %s5442_s15, %s5438_s20 }
 0xf77   :  { %v3736_v30 = vadd.f32 %v3735_v10, %v3734_v4 }
 0xf78   :  { %p5445_p1 = por %p5444_p0, %p5443_p13 }
 0xf79   :  { %v3737_v1 = vrot.slane %v3736_v30, 1 }
 0xf7a   :  { %p5446_p2 = pnand %p5445_p1, %p5439_p12 }
 0xf7b   :  { %v3738_v32 = vadd.f32 %v3737_v1, %v3736_v30 }
 0xf88   :  { %s4374_s26 = spop %4373 }
 0xf89   :  { %s3648_s28 = smul.f32 2.0, %s4374_s26 }
 0xf8b   :  { %s3649_s19 = ssub.f32 %s4372_s27, %s3648_s28 }
 0xfa3   :  { %s4376_s24 = spop %4375 }
 0xfa4   :  { %s3664_s2 = sadd.f32 %s4376_s24, %s3649_s19 }
 0xfa6   :  { %s3665_s10 = smax.f32 %s5596_s6, %s3664_s2 }
 0xfa7   :  { %v3666_v31 = vstv %s3665_s10 }
 0xfa8   :  { %4702 = vrsqrt.f32 %v3666_v31  ;;  %vm3669_vm7 = vcmp.eq.f32.partialorder %v3666_v31, inf  ;;  %v3672_v6 = vand.u32 2147483648, %v3666_v31  ;;  %vm3671_vm8 = vcmp.eq.f32.partialorder %v3666_v31, 0.0 }
 0xfb2   :  { %v4703_v58 = vpop.eup %4702 }
 0xfb3   :  { %v3668_v16 = vmul.f32 %v4703_v58, %v3666_v31 }
 0xfb5   :  { %v3670_v25 = vsel %vm3669_vm7, %v3666_v31, %v3668_v16 }
 0xfb6   :  { %v3673_v61 = vsel %vm3671_vm8, %v3672_v6, %v3670_v25 }
 0xfb7   :  { %4377 = vpush %v3673_v61 }
 0xfb8   :  { %4379 = vpush %v3738_v32 }
 0xfe8   :  { %s4378_s11 = spop %4377 }
 0xfe9   :  { %s3675_s16 = smul.f32 0.00048828125, %s4378_s11  ;;  %s4380_s29 = spop %4379 }
 0xfea   :  { %s3740_s3 = smul.f32 0.015625, %s4380_s29 }
 0xfeb   :  { %v3747_v9 = vstv %s3675_s16 }
 0xfec   :  { %3749 = vst.msk [vmem:[#allocation53] sm:$0x1] %vm3748_vm9, %v3747_v9  ;;  %v3750_v41 = vstv %s3740_s3 }
 0xfed   :  { %3751 = vst.msk [vmem:[#allocation54] sm:$0x1] %vm3748_vm9, %v3750_v41 }
 0xfee   :  { %5449 = shalt.err (!%p5446_p2)
}
 0xfef   :  { %s5450_s4 = scalar_lea.hbm %s5772_s13, 16 }
 0xff0   :  { %p5451_p3 = scmp.ne.s32.totalorder %s5772_s13, %s5450_s4  ;;  %p5454_p4 = scmp.lt.u32.totalorder %s5450_s4, %s5772_s13 }
 0xff2   :  { %p5456_p5 = pnand %p5454_p4, %p5451_p3 }
 0xff4   :  { %5459 = shalt.err (!%p5456_p5)
}
 0xff5   :  { %3785 = dma.vmem_to_hbm [thread:$0]  %s3783_s9, 16, %s5772_s13, [#allocation52]  }
 0xff6   :  { %s5460_s14 = scalar_lea.vmem %s7080_s8, 16  ;;  %s5464_s7 = scalar_lea.vmem %s7080_s8, 32 }
 0xff7   :  { %p5461_p6 = scmp.ne.s32.totalorder %s7080_s8, %s5460_s14  ;;  %p5465_p7 = scmp.lt.s32.totalorder %s7080_s8, %s7080_s8 }
 0xff8   :  { %p5466_p8 = scmp.lt.s32.totalorder %s5464_s7, %s5460_s14 }
 0xffa   :  { %p5467_p9 = por %p5466_p8, %p5465_p7 }
 0xffc   :  { %p5468_p10 = pnand %p5467_p9, %p5461_p6 }
 0xffe   :  { %5471 = shalt.err (!%p5468_p10)
}
 0xfff   :  { %s5472_s22 = scalar_lea.hbm %s5777_s12, 16 }
0x1000   :  { %p5473_p11 = scmp.ne.s32.totalorder %s5777_s12, %s5472_s22  ;;  %p5476_p12 = scmp.lt.u32.totalorder %s5472_s22, %s5777_s12 }
0x1002   :  { %p5478_p13 = pnand %p5476_p12, %p5473_p11 }
0x1004   :  { %5481 = shalt.err (!%p5478_p13)
}
0x1005   :  { %3795 = dma.vmem_to_hbm [thread:$0]  %s7080_s8, 16, %s5777_s12, [#allocation55]  }
0x1006   :  { %5514 = dma.done.wait [#allocation4], 512  }
0x1007   :  { %5515 = vsyncadd [#allocation4], 4294966784 }
0x1008   :  { %5516 = dma.done.wait [#allocation52], 272  }
0x1009   :  { %5517 = vsyncadd [#allocation52], 4294967024 }
0x100a   :  { %5518 = dma.done.wait [#allocation55], 16  }
0x100b   :  { %5519 = vsyncadd [#allocation55], 4294967280 }
0x100c   :  { %3808 = vsyncpa [#allocation3], 1 }
0x100d   :  { %3809 = vsyncpa [#allocation6], 1 }
0x100e   :  { %3810 = vsyncpa [#allocation9], 1 }
0x100f   :  { %3811 = vsyncpa [#allocation12], 1 }
0x1010   :  { %3812 = vsyncpa [#allocation15], 1 }
0x1011   :  { %3813 = vsyncpa [#allocation18], 1 }
0x1012   :  { %3814 = vsyncpa [#allocation21], 1 }
0x1013   :  { %3815 = vsyncpa [#allocation24], 1 }
0x1014   :  { %3816 = vsyncpa [#allocation27], 1 }
0x1015   :  { %3817 = vsyncpa [#allocation30], 1 }
0x1016   :  { %3818 = vsyncpa [#allocation33], 1 }
0x1017   :  { %3819 = vsyncpa [#allocation36], 1 }
0x1018   :  { %3820 = vsyncpa [#allocation39], 1 }
0x1019   :  { %3821 = vsyncpa [#allocation42], 1 }
0x101a   :  { %3822 = vsyncpa [#allocation45], 1 }
0x101b   :  { %3823 = vsyncpa [#allocation48], 1 }
0x101c   :  { %3824 = vsyncpa [#allocation4], 1 }
0x101d   :  { %3825 = vsyncpa [#allocation52], 1 }
0x101e   :  { %3826 = vsyncpa [#allocation55], 1 }

</bundles_post_ra>
